<compile_context>
chip_gen: v7x
topology: tpu7x:2x2x1
jax: 0.10.0
libtpu: 0.0.40
codegen_flags: <defaults>
</compile_context>

<pallas_src>
import jax
import jax.numpy as jnp
from jax.experimental import pallas as pl
from jax.experimental.pallas import tpu as pltpu

EPS = 1e-5


# --------------------------- Pallas kernels ---------------------------------

def _make_conv_stats_kernel(H, W, Cp, apply_bn_relu):
    """3x3 conv (stride 1, pad 1) on one image + per-image BN partial stats.

    Refs (in order):
      x_ref : (1, H*W, Cp)   input rows; bf16 (conv1) or raw f32 conv1 output
      [a_ref, b_ref : (1, Cp) f32 -- BN1 scale/shift, only if apply_bn_relu]
      w_ref : (3, 3, Cp, Cp) bf16 conv taps
      y_ref : (1, H*W, Cp) f32    raw conv output (pre-BN)
      s_ref : (1, 2, Cp)  f32     per-image [sum, sum_of_squares] over rows
      hp_ref: (H+2, W+2, Cp) bf16 VMEM scratch (spatially zero-padded input)
    """
    HW = H * W

    def kernel(*refs):
        if apply_bn_relu:
            x_ref, a_ref, b_ref, w_ref, y_ref, s_ref, hp_ref = refs
            # Fused BN1 + ReLU (f32), applied on the fly to the raw conv1 output.
            h = jnp.maximum(x_ref[0] * a_ref[...] + b_ref[...], 0.0)
        else:
            x_ref, w_ref, y_ref, s_ref, hp_ref = refs
            h = x_ref[0]

        # Spatially zero-padded input tile in VMEM; borders implement pad=1.
        hp_ref[...] = jnp.zeros_like(hp_ref)
        hp_ref[1:H + 1, 1:W + 1, :] = h.reshape(H, W, Cp).astype(hp_ref.dtype)

        # conv3x3 = 9 shifted bf16 matmuls, f32-accumulated in the VMEM block.
        first = True
        for ky in range(3):
            for kx in range(3):
                xs = hp_ref[ky:ky + H, kx:kx + W, :].reshape(HW, Cp)
                t = jnp.dot(xs, w_ref[ky, kx],
                            preferred_element_type=jnp.float32)
                if first:
                    y_ref[0] = t
                    first = False
                else:
                    y_ref[0] += t

        # Per-image partial BN statistics (batch reduction happens outside).
        y = y_ref[0]
        s_ref[0] = jnp.concatenate(
            [jnp.sum(y, axis=0, keepdims=True),
             jnp.sum(y * y, axis=0, keepdims=True)], axis=0)

    return kernel


def _bn_add_relu_kernel(y_ref, a_ref, b_ref, r_ref, o_ref):
    """Final stage: bn2 (precomputed scale/shift) + residual + ReLU."""
    o_ref[...] = jnp.maximum(
        y_ref[...] * a_ref[...] + b_ref[...] + r_ref[...], 0.0)


# --------------------------- pallas_call wrappers ----------------------------

def _conv3x3_stats(x_flat, w, *, N, H, W, Cp, scale=None, shift=None):
    HW = H * W
    apply_bn_relu = scale is not None
    kernel = _make_conv_stats_kernel(H, W, Cp, apply_bn_relu)

    row_spec = pl.BlockSpec((1, HW, Cp), lambda n: (n, 0, 0))
    vec_spec = pl.BlockSpec((1, Cp), lambda n: (0, 0))
    w_spec = pl.BlockSpec((3, 3, Cp, Cp), lambda n: (0, 0, 0, 0))

    if apply_bn_relu:
        in_specs = [row_spec, vec_spec, vec_spec, w_spec]
        args = (x_flat, scale, shift, w)
    else:
        in_specs = [row_spec, w_spec]
        args = (x_flat, w)

    return pl.pallas_call(
        kernel,
        out_shape=(jax.ShapeDtypeStruct((N, HW, Cp), jnp.float32),
                   jax.ShapeDtypeStruct((N, 2, Cp), jnp.float32)),
        grid=(N,),
        in_specs=in_specs,
        out_specs=(row_spec, pl.BlockSpec((1, 2, Cp), lambda n: (n, 0, 0))),
        scratch_shapes=[pltpu.VMEM((H + 2, W + 2, Cp), jnp.bfloat16)],
        compiler_params=pltpu.CompilerParams(
            dimension_semantics=("parallel",)),
    )(*args)


def _bn_add_relu(y, scale, shift, res, *, N, H, W, Cp):
    HW = H * W
    row_spec = pl.BlockSpec((1, HW, Cp), lambda n: (n, 0, 0))
    vec_spec = pl.BlockSpec((1, Cp), lambda n: (0, 0))
    return pl.pallas_call(
        _bn_add_relu_kernel,
        out_shape=jax.ShapeDtypeStruct((N, HW, Cp), jnp.float32),
        grid=(N,),
        in_specs=[row_spec, vec_spec, vec_spec, row_spec],
        out_specs=row_spec,
        compiler_params=pltpu.CompilerParams(
            dimension_semantics=("parallel",)),
    )(y, scale, shift, res)


# --------------------------- layout / stats glue -----------------------------

def _round_up(v, m):
    return ((v + m - 1) // m) * m


def _nhwc_flat(x_nchw, Cp):
    N, C, H, W = x_nchw.shape
    x = jnp.transpose(x_nchw, (0, 2, 3, 1))                      # NHWC
    x = jnp.pad(x, ((0, 0), (0, 0), (0, 0), (0, Cp - C)))
    return x.reshape(N, H * W, Cp)


def _prep_weight(w_oihw, Cp):
    Cout, Cin, _, _ = w_oihw.shape
    w = jnp.transpose(w_oihw, (2, 3, 1, 0))                      # (3,3,Cin,Cout)
    w = jnp.pad(w, ((0, 0), (0, 0), (0, Cp - Cin), (0, Cp - Cout)))
    return w.astype(jnp.bfloat16)


def _prep_gamma_beta(g, b, Cp):
    C = g.shape[0]
    gp = jnp.pad(g.astype(jnp.float32), (0, Cp - C), constant_values=1.0)
    bp = jnp.pad(b.astype(jnp.float32), (0, Cp - C))
    return gp, bp


def _bn_scale_shift(partial_stats, gamma_p, beta_p, count):
    """Finalize training-mode BN from per-image [sum, sum_sq] partials."""
    tot = jnp.sum(partial_stats, axis=0)                         # (2, Cp)
    mean = tot[0] / count
    var = jnp.maximum(tot[1] / count - mean * mean, 0.0)
    scale = gamma_p * jax.lax.rsqrt(var + EPS)
    shift = beta_p - mean * scale
    return scale[None, :], shift[None, :]                        # (1, Cp)


@jax.jit
def basic_block_forward(x_nchw, w1, g1, b1, w2, g2, b2):
    N, C, H, W = x_nchw.shape
    Cp = _round_up(C, 128)
    count = float(N * H * W)

    x_res = _nhwc_flat(x_nchw, Cp)                 # (N, HW, Cp) f32 (residual)
    x_bf16 = x_res.astype(jnp.bfloat16)            # conv1 input (half the HBM read)
    w1p, w2p = _prep_weight(w1, Cp), _prep_weight(w2, Cp)
    g1p, b1p = _prep_gamma_beta(g1, b1, Cp)
    g2p, b2p = _prep_gamma_beta(g2, b2, Cp)

    # conv1 (raw output) + per-image BN1 partial stats
    y1, s1 = _conv3x3_stats(x_bf16, w1p, N=N, H=H, W=W, Cp=Cp)
    sc1, sh1 = _bn_scale_shift(s1, g1p, b1p, count)

    # bn1 + relu fused into conv2 + per-image BN2 partial stats
    y2, s2 = _conv3x3_stats(y1, w2p, N=N, H=H, W=W, Cp=Cp, scale=sc1, shift=sh1)
    sc2, sh2 = _bn_scale_shift(s2, g2p, b2p, count)

    # bn2 + identity + relu
    out = _bn_add_relu(y2, sc2, sh2, x_res, N=N, H=H, W=W, Cp=Cp)

    out = out.reshape(N, H, W, Cp)[..., :C]
    return jnp.transpose(out, (0, 3, 1, 2))                      # NHWC -> NCHW


# ---------------- pure-JAX f32 reference (correctness check only) ------------

def ref_forward(x, w1, g1, b1, w2, g2, b2):
    def conv(x, w):
        return jax.lax.conv_general_dilated(
            x, w, window_strides=(1, 1), padding=[(1, 1), (1, 1)],
            dimension_numbers=("NCHW", "OIHW", "NCHW"))

    def bn(x, g, b):
        mean = jnp.mean(x, axis=(0, 2, 3), keepdims=True)
        var = jnp.mean((x - mean) ** 2, axis=(0, 2, 3), keepdims=True)
        return (x - mean) * (g.reshape(1, -1, 1, 1) * jax.lax.rsqrt(var + EPS)) \
            + b.reshape(1, -1, 1, 1)

    identity = x
    h = jax.nn.relu(bn(conv(x, w1), g1, b1))
    y = bn(conv(h, w2), g2, b2) + identity
    return jax.nn.relu(y)


if __name__ == "__main__":
    N, C, H, W = 2, 8, 16, 16  # in_ch == out_ch == 8, stride=1, dilation=1, pad=1

    key = jax.random.PRNGKey(0)
    ks = jax.random.split(key, 7)
    x = jax.random.normal(ks[0], (N, C, H, W), jnp.float32)
    w1 = jax.random.normal(ks[1], (C, C, 3, 3), jnp.float32) * 0.1
    w2 = jax.random.normal(ks[2], (C, C, 3, 3), jnp.float32) * 0.1
    g1 = 1.0 + 0.1 * jax.random.normal(ks[3], (C,), jnp.float32)
    b1 = 0.1 * jax.random.normal(ks[4], (C,), jnp.float32)
    g2 = 1.0 + 0.1 * jax.random.normal(ks[5], (C,), jnp.float32)
    b2 = 0.1 * jax.random.normal(ks[6], (C,), jnp.float32)

    out = jax.block_until_ready(basic_block_forward(x, w1, g1, b1, w2, g2, b2))
    ref = jax.block_until_ready(ref_forward(x, w1, g1, b1, w2, g2, b2))

    assert out.shape == x.shape and out.dtype == jnp.float32
    err = float(jnp.max(jnp.abs(out - ref)))
    # Tolerance accounts for bf16 matmul operands (f32 accumulation) vs the f32
    # reference; observed error is ~1e-2 worst case at these scales.
    if err < 5e-2:
        print("KERNEL_OK")
    else:
        print(f"MISMATCH max_abs_err={err}")
</pallas_src>

<mosaic_0001>
module attributes {stable_mosaic.version = 11 : i64} {
  func.func @kernel(%arg0: i32, %arg1: memref<1x256x128xbf16, #tpu.memory_space<vmem>>, %arg2: memref<3x3x128x128xbf16, #tpu.memory_space<vmem>>, %arg3: memref<1x256x128xf32, #tpu.memory_space<vmem>>, %arg4: memref<1x2x128xf32, #tpu.memory_space<vmem>>, %arg5: memref<18x18x128xbf16, #tpu.memory_space<vmem>>) attributes {dimension_semantics = [#tpu.dimension_semantics<parallel>], iteration_bounds = array<i64: 2>, scalar_prefetch = 0 : i64, scratch_operands = 1 : i64, tpu.core_type = #tpu.core_type<tc>, window_params = [{transform_indices = @transform_0, window_bounds = array<i64: 1, 256, 128>}, {pipeline_mode = #tpu.pipeline_mode<synchronous>, transform_indices = @transform_1, window_bounds = array<i64: 3, 3, 128, 128>}, {transform_indices = @transform_2, window_bounds = array<i64: 1, 256, 128>}, {transform_indices = @transform_3, window_bounds = array<i64: 1, 2, 128>}]} {
    %c0 = arith.constant 0 : index
    %c0_0 = arith.constant 0 : index
    %c0_1 = arith.constant 0 : index
    %0 = vector.load %arg1[%c0, %c0_0, %c0_1] : memref<1x256x128xbf16, #tpu.memory_space<vmem>>, vector<1x256x128xbf16>
    %1 = vector.shape_cast %0 : vector<1x256x128xbf16> to vector<256x128xbf16>
    %cst = arith.constant 0.000000e+00 : bf16
    %2 = vector.broadcast %cst : bf16 to vector<18x18x128xbf16>
    %c0_2 = arith.constant 0 : index
    %c0_3 = arith.constant 0 : index
    %c0_4 = arith.constant 0 : index
    %3 = vector.load %arg5[%c0_2, %c0_3, %c0_4] : memref<18x18x128xbf16, #tpu.memory_space<vmem>>, vector<18x18x128xbf16>
    tpu.vector_store %arg5[%c0_2, %c0_3, %c0_4], %2 {strides = array<i32>} : memref<18x18x128xbf16, #tpu.memory_space<vmem>>, vector<18x18x128xbf16>,
    %4 = vector.shape_cast %1 : vector<256x128xbf16> to vector<16x16x128xbf16>
    %c1 = arith.constant 1 : index
    %c1_5 = arith.constant 1 : index
    %c0_6 = arith.constant 0 : index
    %5 = vector.load %arg5[%c1, %c1_5, %c0_6] : memref<18x18x128xbf16, #tpu.memory_space<vmem>>, vector<16x16x128xbf16>
    tpu.vector_store %arg5[%c1, %c1_5, %c0_6], %4 {strides = array<i32>} : memref<18x18x128xbf16, #tpu.memory_space<vmem>>, vector<16x16x128xbf16>,
    %c0_7 = arith.constant 0 : index
    %c0_8 = arith.constant 0 : index
    %c0_9 = arith.constant 0 : index
    %6 = vector.load %arg5[%c0_7, %c0_8, %c0_9] : memref<18x18x128xbf16, #tpu.memory_space<vmem>>, vector<16x16x128xbf16>
    %7 = vector.shape_cast %6 : vector<16x16x128xbf16> to vector<256x128xbf16>
    %c0_10 = arith.constant 0 : index
    %c0_11 = arith.constant 0 : index
    %c0_12 = arith.constant 0 : index
    %c0_13 = arith.constant 0 : index
    %8 = vector.load %arg2[%c0_10, %c0_11, %c0_12, %c0_13] : memref<3x3x128x128xbf16, #tpu.memory_space<vmem>>, vector<1x1x128x128xbf16>
    %9 = vector.shape_cast %8 : vector<1x1x128x128xbf16> to vector<128x128xbf16>
    %cst_14 = arith.constant dense<0.000000e+00> : vector<256x128xf32>
    %10 = tpu.matmul %7, %9, %cst_14 {dimension_numbers = #tpu.dot_dimension_numbers<[1], [0], [0], [1], [0, 0, 1, 1], [], []>} : vector<256x128xbf16>, vector<128x128xbf16>, vector<256x128xf32> -> vector<256x128xf32>
    %c0_15 = arith.constant 0 : index
    %c0_16 = arith.constant 0 : index
    %c0_17 = arith.constant 0 : index
    %11 = vector.load %arg3[%c0_15, %c0_16, %c0_17] : memref<1x256x128xf32, #tpu.memory_space<vmem>>, vector<1x256x128xf32>
    %12 = vector.shape_cast %11 : vector<1x256x128xf32> to vector<256x128xf32>
    %13 = vector.shape_cast %10 : vector<256x128xf32> to vector<1x256x128xf32>
    tpu.vector_store %arg3[%c0_15, %c0_16, %c0_17], %13 {strides = array<i32>} : memref<1x256x128xf32, #tpu.memory_space<vmem>>, vector<1x256x128xf32>,
    %c0_18 = arith.constant 0 : index
    %c1_19 = arith.constant 1 : index
    %c0_20 = arith.constant 0 : index
    %14 = vector.load %arg5[%c0_18, %c1_19, %c0_20] : memref<18x18x128xbf16, #tpu.memory_space<vmem>>, vector<16x16x128xbf16>
    %15 = vector.shape_cast %14 : vector<16x16x128xbf16> to vector<256x128xbf16>
    %c0_21 = arith.constant 0 : index
    %c1_22 = arith.constant 1 : index
    %c0_23 = arith.constant 0 : index
    %c0_24 = arith.constant 0 : index
    %16 = vector.load %arg2[%c0_21, %c1_22, %c0_23, %c0_24] : memref<3x3x128x128xbf16, #tpu.memory_space<vmem>>, vector<1x1x128x128xbf16>
    %17 = vector.shape_cast %16 : vector<1x1x128x128xbf16> to vector<128x128xbf16>
    %cst_25 = arith.constant dense<0.000000e+00> : vector<256x128xf32>
    %18 = tpu.matmul %15, %17, %cst_25 {dimension_numbers = #tpu.dot_dimension_numbers<[1], [0], [0], [1], [0, 0, 1, 1], [], []>} : vector<256x128xbf16>, vector<128x128xbf16>, vector<256x128xf32> -> vector<256x128xf32>
    %c0_26 = arith.constant 0 : index
    %c0_27 = arith.constant 0 : index
    %c0_28 = arith.constant 0 : index
    %19 = vector.load %arg3[%c0_26, %c0_27, %c0_28] : memref<1x256x128xf32, #tpu.memory_space<vmem>>, vector<1x256x128xf32>
    %20 = vector.shape_cast %19 : vector<1x256x128xf32> to vector<256x128xf32>
    %21 = arith.addf %20, %18 : vector<256x128xf32>
    %c0_29 = arith.constant 0 : index
    %c0_30 = arith.constant 0 : index
    %c0_31 = arith.constant 0 : index
    %22 = vector.load %arg3[%c0_29, %c0_30, %c0_31] : memref<1x256x128xf32, #tpu.memory_space<vmem>>, vector<1x256x128xf32>
    %23 = vector.shape_cast %22 : vector<1x256x128xf32> to vector<256x128xf32>
    %24 = vector.shape_cast %21 : vector<256x128xf32> to vector<1x256x128xf32>
    tpu.vector_store %arg3[%c0_29, %c0_30, %c0_31], %24 {strides = array<i32>} : memref<1x256x128xf32, #tpu.memory_space<vmem>>, vector<1x256x128xf32>,
    %c0_32 = arith.constant 0 : index
    %c2 = arith.constant 2 : index
    %c0_33 = arith.constant 0 : index
    %25 = vector.load %arg5[%c0_32, %c2, %c0_33] : memref<18x18x128xbf16, #tpu.memory_space<vmem>>, vector<16x16x128xbf16>
    %26 = vector.shape_cast %25 : vector<16x16x128xbf16> to vector<256x128xbf16>
    %c0_34 = arith.constant 0 : index
    %c2_35 = arith.constant 2 : index
    %c0_36 = arith.constant 0 : index
    %c0_37 = arith.constant 0 : index
    %27 = vector.load %arg2[%c0_34, %c2_35, %c0_36, %c0_37] : memref<3x3x128x128xbf16, #tpu.memory_space<vmem>>, vector<1x1x128x128xbf16>
    %28 = vector.shape_cast %27 : vector<1x1x128x128xbf16> to vector<128x128xbf16>
    %cst_38 = arith.constant dense<0.000000e+00> : vector<256x128xf32>
    %29 = tpu.matmul %26, %28, %cst_38 {dimension_numbers = #tpu.dot_dimension_numbers<[1], [0], [0], [1], [0, 0, 1, 1], [], []>} : vector<256x128xbf16>, vector<128x128xbf16>, vector<256x128xf32> -> vector<256x128xf32>
    %c0_39 = arith.constant 0 : index
    %c0_40 = arith.constant 0 : index
    %c0_41 = arith.constant 0 : index
    %30 = vector.load %arg3[%c0_39, %c0_40, %c0_41] : memref<1x256x128xf32, #tpu.memory_space<vmem>>, vector<1x256x128xf32>
    %31 = vector.shape_cast %30 : vector<1x256x128xf32> to vector<256x128xf32>
    %32 = arith.addf %31, %29 : vector<256x128xf32>
    %c0_42 = arith.constant 0 : index
    %c0_43 = arith.constant 0 : index
    %c0_44 = arith.constant 0 : index
    %33 = vector.load %arg3[%c0_42, %c0_43, %c0_44] : memref<1x256x128xf32, #tpu.memory_space<vmem>>, vector<1x256x128xf32>
    %34 = vector.shape_cast %33 : vector<1x256x128xf32> to vector<256x128xf32>
    %35 = vector.shape_cast %32 : vector<256x128xf32> to vector<1x256x128xf32>
    tpu.vector_store %arg3[%c0_42, %c0_43, %c0_44], %35 {strides = array<i32>} : memref<1x256x128xf32, #tpu.memory_space<vmem>>, vector<1x256x128xf32>,
    %c1_45 = arith.constant 1 : index
    %c0_46 = arith.constant 0 : index
    %c0_47 = arith.constant 0 : index
    %36 = vector.load %arg5[%c1_45, %c0_46, %c0_47] : memref<18x18x128xbf16, #tpu.memory_space<vmem>>, vector<16x16x128xbf16>
    %37 = vector.shape_cast %36 : vector<16x16x128xbf16> to vector<256x128xbf16>
    %c1_48 = arith.constant 1 : index
    %c0_49 = arith.constant 0 : index
    %c0_50 = arith.constant 0 : index
    %c0_51 = arith.constant 0 : index
    %38 = vector.load %arg2[%c1_48, %c0_49, %c0_50, %c0_51] : memref<3x3x128x128xbf16, #tpu.memory_space<vmem>>, vector<1x1x128x128xbf16>
    %39 = vector.shape_cast %38 : vector<1x1x128x128xbf16> to vector<128x128xbf16>
    %cst_52 = arith.constant dense<0.000000e+00> : vector<256x128xf32>
    %40 = tpu.matmul %37, %39, %cst_52 {dimension_numbers = #tpu.dot_dimension_numbers<[1], [0], [0], [1], [0, 0, 1, 1], [], []>} : vector<256x128xbf16>, vector<128x128xbf16>, vector<256x128xf32> -> vector<256x128xf32>
    %c0_53 = arith.constant 0 : index
    %c0_54 = arith.constant 0 : index
    %c0_55 = arith.constant 0 : index
    %41 = vector.load %arg3[%c0_53, %c0_54, %c0_55] : memref<1x256x128xf32, #tpu.memory_space<vmem>>, vector<1x256x128xf32>
    %42 = vector.shape_cast %41 : vector<1x256x128xf32> to vector<256x128xf32>
    %43 = arith.addf %42, %40 : vector<256x128xf32>
    %c0_56 = arith.constant 0 : index
    %c0_57 = arith.constant 0 : index
    %c0_58 = arith.constant 0 : index
    %44 = vector.load %arg3[%c0_56, %c0_57, %c0_58] : memref<1x256x128xf32, #tpu.memory_space<vmem>>, vector<1x256x128xf32>
    %45 = vector.shape_cast %44 : vector<1x256x128xf32> to vector<256x128xf32>
    %46 = vector.shape_cast %43 : vector<256x128xf32> to vector<1x256x128xf32>
    tpu.vector_store %arg3[%c0_56, %c0_57, %c0_58], %46 {strides = array<i32>} : memref<1x256x128xf32, #tpu.memory_space<vmem>>, vector<1x256x128xf32>,
    %c1_59 = arith.constant 1 : index
    %c1_60 = arith.constant 1 : index
    %c0_61 = arith.constant 0 : index
    %47 = vector.load %arg5[%c1_59, %c1_60, %c0_61] : memref<18x18x128xbf16, #tpu.memory_space<vmem>>, vector<16x16x128xbf16>
    %48 = vector.shape_cast %47 : vector<16x16x128xbf16> to vector<256x128xbf16>
    %c1_62 = arith.constant 1 : index
    %c1_63 = arith.constant 1 : index
    %c0_64 = arith.constant 0 : index
    %c0_65 = arith.constant 0 : index
    %49 = vector.load %arg2[%c1_62, %c1_63, %c0_64, %c0_65] : memref<3x3x128x128xbf16, #tpu.memory_space<vmem>>, vector<1x1x128x128xbf16>
    %50 = vector.shape_cast %49 : vector<1x1x128x128xbf16> to vector<128x128xbf16>
    %cst_66 = arith.constant dense<0.000000e+00> : vector<256x128xf32>
    %51 = tpu.matmul %48, %50, %cst_66 {dimension_numbers = #tpu.dot_dimension_numbers<[1], [0], [0], [1], [0, 0, 1, 1], [], []>} : vector<256x128xbf16>, vector<128x128xbf16>, vector<256x128xf32> -> vector<256x128xf32>
    %c0_67 = arith.constant 0 : index
    %c0_68 = arith.constant 0 : index
    %c0_69 = arith.constant 0 : index
    %52 = vector.load %arg3[%c0_67, %c0_68, %c0_69] : memref<1x256x128xf32, #tpu.memory_space<vmem>>, vector<1x256x128xf32>
    %53 = vector.shape_cast %52 : vector<1x256x128xf32> to vector<256x128xf32>
    %54 = arith.addf %53, %51 : vector<256x128xf32>
    %c0_70 = arith.constant 0 : index
    %c0_71 = arith.constant 0 : index
    %c0_72 = arith.constant 0 : index
    %55 = vector.load %arg3[%c0_70, %c0_71, %c0_72] : memref<1x256x128xf32, #tpu.memory_space<vmem>>, vector<1x256x128xf32>
    %56 = vector.shape_cast %55 : vector<1x256x128xf32> to vector<256x128xf32>
    %57 = vector.shape_cast %54 : vector<256x128xf32> to vector<1x256x128xf32>
    tpu.vector_store %arg3[%c0_70, %c0_71, %c0_72], %57 {strides = array<i32>} : memref<1x256x128xf32, #tpu.memory_space<vmem>>, vector<1x256x128xf32>,
    %c1_73 = arith.constant 1 : index
    %c2_74 = arith.constant 2 : index
    %c0_75 = arith.constant 0 : index
    %58 = vector.load %arg5[%c1_73, %c2_74, %c0_75] : memref<18x18x128xbf16, #tpu.memory_space<vmem>>, vector<16x16x128xbf16>
    %59 = vector.shape_cast %58 : vector<16x16x128xbf16> to vector<256x128xbf16>
    %c1_76 = arith.constant 1 : index
    %c2_77 = arith.constant 2 : index
    %c0_78 = arith.constant 0 : index
    %c0_79 = arith.constant 0 : index
    %60 = vector.load %arg2[%c1_76, %c2_77, %c0_78, %c0_79] : memref<3x3x128x128xbf16, #tpu.memory_space<vmem>>, vector<1x1x128x128xbf16>
    %61 = vector.shape_cast %60 : vector<1x1x128x128xbf16> to vector<128x128xbf16>
    %cst_80 = arith.constant dense<0.000000e+00> : vector<256x128xf32>
    %62 = tpu.matmul %59, %61, %cst_80 {dimension_numbers = #tpu.dot_dimension_numbers<[1], [0], [0], [1], [0, 0, 1, 1], [], []>} : vector<256x128xbf16>, vector<128x128xbf16>, vector<256x128xf32> -> vector<256x128xf32>
    %c0_81 = arith.constant 0 : index
    %c0_82 = arith.constant 0 : index
    %c0_83 = arith.constant 0 : index
    %63 = vector.load %arg3[%c0_81, %c0_82, %c0_83] : memref<1x256x128xf32, #tpu.memory_space<vmem>>, vector<1x256x128xf32>
    %64 = vector.shape_cast %63 : vector<1x256x128xf32> to vector<256x128xf32>
    %65 = arith.addf %64, %62 : vector<256x128xf32>
    %c0_84 = arith.constant 0 : index
    %c0_85 = arith.constant 0 : index
    %c0_86 = arith.constant 0 : index
    %66 = vector.load %arg3[%c0_84, %c0_85, %c0_86] : memref<1x256x128xf32, #tpu.memory_space<vmem>>, vector<1x256x128xf32>
    %67 = vector.shape_cast %66 : vector<1x256x128xf32> to vector<256x128xf32>
    %68 = vector.shape_cast %65 : vector<256x128xf32> to vector<1x256x128xf32>
    tpu.vector_store %arg3[%c0_84, %c0_85, %c0_86], %68 {strides = array<i32>} : memref<1x256x128xf32, #tpu.memory_space<vmem>>, vector<1x256x128xf32>,
    %c2_87 = arith.constant 2 : index
    %c0_88 = arith.constant 0 : index
    %c0_89 = arith.constant 0 : index
    %69 = vector.load %arg5[%c2_87, %c0_88, %c0_89] : memref<18x18x128xbf16, #tpu.memory_space<vmem>>, vector<16x16x128xbf16>
    %70 = vector.shape_cast %69 : vector<16x16x128xbf16> to vector<256x128xbf16>
    %c2_90 = arith.constant 2 : index
    %c0_91 = arith.constant 0 : index
    %c0_92 = arith.constant 0 : index
    %c0_93 = arith.constant 0 : index
    %71 = vector.load %arg2[%c2_90, %c0_91, %c0_92, %c0_93] : memref<3x3x128x128xbf16, #tpu.memory_space<vmem>>, vector<1x1x128x128xbf16>
    %72 = vector.shape_cast %71 : vector<1x1x128x128xbf16> to vector<128x128xbf16>
    %cst_94 = arith.constant dense<0.000000e+00> : vector<256x128xf32>
    %73 = tpu.matmul %70, %72, %cst_94 {dimension_numbers = #tpu.dot_dimension_numbers<[1], [0], [0], [1], [0, 0, 1, 1], [], []>} : vector<256x128xbf16>, vector<128x128xbf16>, vector<256x128xf32> -> vector<256x128xf32>
    %c0_95 = arith.constant 0 : index
    %c0_96 = arith.constant 0 : index
    %c0_97 = arith.constant 0 : index
    %74 = vector.load %arg3[%c0_95, %c0_96, %c0_97] : memref<1x256x128xf32, #tpu.memory_space<vmem>>, vector<1x256x128xf32>
    %75 = vector.shape_cast %74 : vector<1x256x128xf32> to vector<256x128xf32>
    %76 = arith.addf %75, %73 : vector<256x128xf32>
    %c0_98 = arith.constant 0 : index
    %c0_99 = arith.constant 0 : index
    %c0_100 = arith.constant 0 : index
    %77 = vector.load %arg3[%c0_98, %c0_99, %c0_100] : memref<1x256x128xf32, #tpu.memory_space<vmem>>, vector<1x256x128xf32>
    %78 = vector.shape_cast %77 : vector<1x256x128xf32> to vector<256x128xf32>
    %79 = vector.shape_cast %76 : vector<256x128xf32> to vector<1x256x128xf32>
    tpu.vector_store %arg3[%c0_98, %c0_99, %c0_100], %79 {strides = array<i32>} : memref<1x256x128xf32, #tpu.memory_space<vmem>>, vector<1x256x128xf32>,
    %c2_101 = arith.constant 2 : index
    %c1_102 = arith.constant 1 : index
    %c0_103 = arith.constant 0 : index
    %80 = vector.load %arg5[%c2_101, %c1_102, %c0_103] : memref<18x18x128xbf16, #tpu.memory_space<vmem>>, vector<16x16x128xbf16>
    %81 = vector.shape_cast %80 : vector<16x16x128xbf16> to vector<256x128xbf16>
    %c2_104 = arith.constant 2 : index
    %c1_105 = arith.constant 1 : index
    %c0_106 = arith.constant 0 : index
    %c0_107 = arith.constant 0 : index
    %82 = vector.load %arg2[%c2_104, %c1_105, %c0_106, %c0_107] : memref<3x3x128x128xbf16, #tpu.memory_space<vmem>>, vector<1x1x128x128xbf16>
    %83 = vector.shape_cast %82 : vector<1x1x128x128xbf16> to vector<128x128xbf16>
    %cst_108 = arith.constant dense<0.000000e+00> : vector<256x128xf32>
    %84 = tpu.matmul %81, %83, %cst_108 {dimension_numbers = #tpu.dot_dimension_numbers<[1], [0], [0], [1], [0, 0, 1, 1], [], []>} : vector<256x128xbf16>, vector<128x128xbf16>, vector<256x128xf32> -> vector<256x128xf32>
    %c0_109 = arith.constant 0 : index
    %c0_110 = arith.constant 0 : index
    %c0_111 = arith.constant 0 : index
    %85 = vector.load %arg3[%c0_109, %c0_110, %c0_111] : memref<1x256x128xf32, #tpu.memory_space<vmem>>, vector<1x256x128xf32>
    %86 = vector.shape_cast %85 : vector<1x256x128xf32> to vector<256x128xf32>
    %87 = arith.addf %86, %84 : vector<256x128xf32>
    %c0_112 = arith.constant 0 : index
    %c0_113 = arith.constant 0 : index
    %c0_114 = arith.constant 0 : index
    %88 = vector.load %arg3[%c0_112, %c0_113, %c0_114] : memref<1x256x128xf32, #tpu.memory_space<vmem>>, vector<1x256x128xf32>
    %89 = vector.shape_cast %88 : vector<1x256x128xf32> to vector<256x128xf32>
    %90 = vector.shape_cast %87 : vector<256x128xf32> to vector<1x256x128xf32>
    tpu.vector_store %arg3[%c0_112, %c0_113, %c0_114], %90 {strides = array<i32>} : memref<1x256x128xf32, #tpu.memory_space<vmem>>, vector<1x256x128xf32>,
    %c2_115 = arith.constant 2 : index
    %c2_116 = arith.constant 2 : index
    %c0_117 = arith.constant 0 : index
    %91 = vector.load %arg5[%c2_115, %c2_116, %c0_117] : memref<18x18x128xbf16, #tpu.memory_space<vmem>>, vector<16x16x128xbf16>
    %92 = vector.shape_cast %91 : vector<16x16x128xbf16> to vector<256x128xbf16>
    %c2_118 = arith.constant 2 : index
    %c2_119 = arith.constant 2 : index
    %c0_120 = arith.constant 0 : index
    %c0_121 = arith.constant 0 : index
    %93 = vector.load %arg2[%c2_118, %c2_119, %c0_120, %c0_121] : memref<3x3x128x128xbf16, #tpu.memory_space<vmem>>, vector<1x1x128x128xbf16>
    %94 = vector.shape_cast %93 : vector<1x1x128x128xbf16> to vector<128x128xbf16>
    %cst_122 = arith.constant dense<0.000000e+00> : vector<256x128xf32>
    %95 = tpu.matmul %92, %94, %cst_122 {dimension_numbers = #tpu.dot_dimension_numbers<[1], [0], [0], [1], [0, 0, 1, 1], [], []>} : vector<256x128xbf16>, vector<128x128xbf16>, vector<256x128xf32> -> vector<256x128xf32>
    %c0_123 = arith.constant 0 : index
    %c0_124 = arith.constant 0 : index
    %c0_125 = arith.constant 0 : index
    %96 = vector.load %arg3[%c0_123, %c0_124, %c0_125] : memref<1x256x128xf32, #tpu.memory_space<vmem>>, vector<1x256x128xf32>
    %97 = vector.shape_cast %96 : vector<1x256x128xf32> to vector<256x128xf32>
    %98 = arith.addf %97, %95 : vector<256x128xf32>
    %c0_126 = arith.constant 0 : index
    %c0_127 = arith.constant 0 : index
    %c0_128 = arith.constant 0 : index
    %99 = vector.load %arg3[%c0_126, %c0_127, %c0_128] : memref<1x256x128xf32, #tpu.memory_space<vmem>>, vector<1x256x128xf32>
    %100 = vector.shape_cast %99 : vector<1x256x128xf32> to vector<256x128xf32>
    %101 = vector.shape_cast %98 : vector<256x128xf32> to vector<1x256x128xf32>
    tpu.vector_store %arg3[%c0_126, %c0_127, %c0_128], %101 {strides = array<i32>} : memref<1x256x128xf32, #tpu.memory_space<vmem>>, vector<1x256x128xf32>,
    %c0_129 = arith.constant 0 : index
    %c0_130 = arith.constant 0 : index
    %c0_131 = arith.constant 0 : index
    %102 = vector.load %arg3[%c0_129, %c0_130, %c0_131] : memref<1x256x128xf32, #tpu.memory_space<vmem>>, vector<1x256x128xf32>
    %103 = vector.shape_cast %102 : vector<1x256x128xf32> to vector<256x128xf32>
    %cst_132 = arith.constant dense<0.000000e+00> : vector<128xf32>
    %104 = vector.multi_reduction <add>, %103, %cst_132 [0] : vector<256x128xf32> to vector<128xf32>
    %105 = vector.shape_cast %104 : vector<128xf32> to vector<1x128xf32>
    %106 = arith.mulf %103, %103 : vector<256x128xf32>
    %cst_133 = arith.constant dense<0.000000e+00> : vector<128xf32>
    %107 = vector.multi_reduction <add>, %106, %cst_133 [0] : vector<256x128xf32> to vector<128xf32>
    %108 = vector.shape_cast %107 : vector<128xf32> to vector<1x128xf32>
    %109 = tpu.concatenate %105, %108 in 0 : vector<1x128xf32>, vector<1x128xf32> -> vector<2x128xf32>
    %c0_134 = arith.constant 0 : index
    %c0_135 = arith.constant 0 : index
    %c0_136 = arith.constant 0 : index
    %110 = vector.load %arg4[%c0_134, %c0_135, %c0_136] : memref<1x2x128xf32, #tpu.memory_space<vmem>>, vector<1x2x128xf32>
    %111 = vector.shape_cast %110 : vector<1x2x128xf32> to vector<2x128xf32>
    %112 = vector.shape_cast %109 : vector<2x128xf32> to vector<1x2x128xf32>
    tpu.vector_store %arg4[%c0_134, %c0_135, %c0_136], %112 {strides = array<i32>} : memref<1x2x128xf32, #tpu.memory_space<vmem>>, vector<1x2x128xf32>,
    return
  }
  func.func @transform_0(%arg0: i32) -> (i32, i32, i32) {
    %c0_i32 = arith.constant 0 : i32
    %c0_i32_0 = arith.constant 0 : i32
    %c0_i32_1 = arith.constant 0 : i32
    return %arg0, %c0_i32, %c0_i32_0 : i32, i32, i32
  }
  func.func @transform_1(%arg0: i32) -> (i32, i32, i32, i32) {
    %c0_i32 = arith.constant 0 : i32
    %c0_i32_0 = arith.constant 0 : i32
    %c0_i32_1 = arith.constant 0 : i32
    %c0_i32_2 = arith.constant 0 : i32
    %c0_i32_3 = arith.constant 0 : i32
    return %c0_i32, %c0_i32_0, %c0_i32_1, %c0_i32_2 : i32, i32, i32, i32
  }
  func.func @transform_2(%arg0: i32) -> (i32, i32, i32) {
    %c0_i32 = arith.constant 0 : i32
    %c0_i32_0 = arith.constant 0 : i32
    %c0_i32_1 = arith.constant 0 : i32
    return %arg0, %c0_i32, %c0_i32_0 : i32, i32, i32
  }
  func.func @transform_3(%arg0: i32) -> (i32, i32, i32) {
    %c0_i32 = arith.constant 0 : i32
    %c0_i32_0 = arith.constant 0 : i32
    %c0_i32_1 = arith.constant 0 : i32
    return %arg0, %c0_i32, %c0_i32_0 : i32, i32, i32
  }
}

module attributes {stable_mosaic.version = 11 : i64} {
  func.func @_bn_add_relu_kernel(%arg0: i32, %arg1: memref<1x256x128xf32, #tpu.memory_space<vmem>>, %arg2: memref<1x128xf32, #tpu.memory_space<vmem>>, %arg3: memref<1x128xf32, #tpu.memory_space<vmem>>, %arg4: memref<1x256x128xf32, #tpu.memory_space<vmem>>, %arg5: memref<1x256x128xf32, #tpu.memory_space<vmem>>) attributes {dimension_semantics = [#tpu.dimension_semantics<parallel>], iteration_bounds = array<i64: 2>, scalar_prefetch = 0 : i64, scratch_operands = 0 : i64, tpu.core_type = #tpu.core_type<tc>, window_params = [{transform_indices = @transform_0, window_bounds = array<i64: 1, 256, 128>}, {pipeline_mode = #tpu.pipeline_mode<synchronous>, transform_indices = @transform_1, window_bounds = array<i64: 1, 128>}, {pipeline_mode = #tpu.pipeline_mode<synchronous>, transform_indices = @transform_2, window_bounds = array<i64: 1, 128>}, {transform_indices = @transform_3, window_bounds = array<i64: 1, 256, 128>}, {transform_indices = @transform_4, window_bounds = array<i64: 1, 256, 128>}]} {
    %c0 = arith.constant 0 : index
    %c0_0 = arith.constant 0 : index
    %c0_1 = arith.constant 0 : index
    %0 = vector.load %arg1[%c0, %c0_0, %c0_1] : memref<1x256x128xf32, #tpu.memory_space<vmem>>, vector<1x256x128xf32>
    %c0_2 = arith.constant 0 : index
    %c0_3 = arith.constant 0 : index
    %1 = vector.load %arg2[%c0_2, %c0_3] : memref<1x128xf32, #tpu.memory_space<vmem>>, vector<1x128xf32>
    %2 = vector.shape_cast %1 : vector<1x128xf32> to vector<1x1x128xf32>
    %3 = vector.broadcast %2 : vector<1x1x128xf32> to vector<1x256x128xf32>
    %4 = arith.mulf %0, %3 : vector<1x256x128xf32>
    %c0_4 = arith.constant 0 : index
    %c0_5 = arith.constant 0 : index
    %5 = vector.load %arg3[%c0_4, %c0_5] : memref<1x128xf32, #tpu.memory_space<vmem>>, vector<1x128xf32>
    %6 = vector.shape_cast %5 : vector<1x128xf32> to vector<1x1x128xf32>
    %7 = vector.broadcast %6 : vector<1x1x128xf32> to vector<1x256x128xf32>
    %8 = arith.addf %4, %7 : vector<1x256x128xf32>
    %c0_6 = arith.constant 0 : index
    %c0_7 = arith.constant 0 : index
    %c0_8 = arith.constant 0 : index
    %9 = vector.load %arg4[%c0_6, %c0_7, %c0_8] : memref<1x256x128xf32, #tpu.memory_space<vmem>>, vector<1x256x128xf32>
    %10 = arith.addf %8, %9 : vector<1x256x128xf32>
    %cst = arith.constant 0.000000e+00 : f32
    %11 = vector.broadcast %cst : f32 to vector<1x256x128xf32>
    %12 = arith.maximumf %10, %11 : vector<1x256x128xf32>
    %c0_9 = arith.constant 0 : index
    %c0_10 = arith.constant 0 : index
    %c0_11 = arith.constant 0 : index
    %13 = vector.load %arg5[%c0_9, %c0_10, %c0_11] : memref<1x256x128xf32, #tpu.memory_space<vmem>>, vector<1x256x128xf32>
    tpu.vector_store %arg5[%c0_9, %c0_10, %c0_11], %12 {strides = array<i32>} : memref<1x256x128xf32, #tpu.memory_space<vmem>>, vector<1x256x128xf32>,
    return
  }
  func.func @transform_0(%arg0: i32) -> (i32, i32, i32) {
    %c0_i32 = arith.constant 0 : i32
    %c0_i32_0 = arith.constant 0 : i32
    %c0_i32_1 = arith.constant 0 : i32
    return %arg0, %c0_i32, %c0_i32_0 : i32, i32, i32
  }
  func.func @transform_1(%arg0: i32) -> (i32, i32) {
    %c0_i32 = arith.constant 0 : i32
    %c0_i32_0 = arith.constant 0 : i32
    %c0_i32_1 = arith.constant 0 : i32
    return %c0_i32, %c0_i32_0 : i32, i32
  }
  func.func @transform_2(%arg0: i32) -> (i32, i32) {
    %c0_i32 = arith.constant 0 : i32
    %c0_i32_0 = arith.constant 0 : i32
    %c0_i32_1 = arith.constant 0 : i32
    return %c0_i32, %c0_i32_0 : i32, i32
  }
  func.func @transform_3(%arg0: i32) -> (i32, i32, i32) {
    %c0_i32 = arith.constant 0 : i32
    %c0_i32_0 = arith.constant 0 : i32
    %c0_i32_1 = arith.constant 0 : i32
    return %arg0, %c0_i32, %c0_i32_0 : i32, i32, i32
  }
  func.func @transform_4(%arg0: i32) -> (i32, i32, i32) {
    %c0_i32 = arith.constant 0 : i32
    %c0_i32_0 = arith.constant 0 : i32
    %c0_i32_1 = arith.constant 0 : i32
    return %arg0, %c0_i32, %c0_i32_0 : i32, i32, i32
  }
}

module attributes {stable_mosaic.version = 11 : i64} {
  func.func @kernel(%arg0: i32, %arg1: memref<1x256x128xf32, #tpu.memory_space<vmem>>, %arg2: memref<1x128xf32, #tpu.memory_space<vmem>>, %arg3: memref<1x128xf32, #tpu.memory_space<vmem>>, %arg4: memref<3x3x128x128xbf16, #tpu.memory_space<vmem>>, %arg5: memref<1x256x128xf32, #tpu.memory_space<vmem>>, %arg6: memref<1x2x128xf32, #tpu.memory_space<vmem>>, %arg7: memref<18x18x128xbf16, #tpu.memory_space<vmem>>) attributes {dimension_semantics = [#tpu.dimension_semantics<parallel>], iteration_bounds = array<i64: 2>, scalar_prefetch = 0 : i64, scratch_operands = 1 : i64, tpu.core_type = #tpu.core_type<tc>, window_params = [{transform_indices = @transform_0, window_bounds = array<i64: 1, 256, 128>}, {pipeline_mode = #tpu.pipeline_mode<synchronous>, transform_indices = @transform_1, window_bounds = array<i64: 1, 128>}, {pipeline_mode = #tpu.pipeline_mode<synchronous>, transform_indices = @transform_2, window_bounds = array<i64: 1, 128>}, {pipeline_mode = #tpu.pipeline_mode<synchronous>, transform_indices = @transform_3, window_bounds = array<i64: 3, 3, 128, 128>}, {transform_indices = @transform_4, window_bounds = array<i64: 1, 256, 128>}, {transform_indices = @transform_5, window_bounds = array<i64: 1, 2, 128>}]} {
    %c0 = arith.constant 0 : index
    %c0_0 = arith.constant 0 : index
    %c0_1 = arith.constant 0 : index
    %0 = vector.load %arg1[%c0, %c0_0, %c0_1] : memref<1x256x128xf32, #tpu.memory_space<vmem>>, vector<1x256x128xf32>
    %1 = vector.shape_cast %0 : vector<1x256x128xf32> to vector<256x128xf32>
    %c0_2 = arith.constant 0 : index
    %c0_3 = arith.constant 0 : index
    %2 = vector.load %arg2[%c0_2, %c0_3] : memref<1x128xf32, #tpu.memory_space<vmem>>, vector<1x128xf32>
    %3 = vector.broadcast %2 : vector<1x128xf32> to vector<256x128xf32>
    %4 = arith.mulf %1, %3 : vector<256x128xf32>
    %c0_4 = arith.constant 0 : index
    %c0_5 = arith.constant 0 : index
    %5 = vector.load %arg3[%c0_4, %c0_5] : memref<1x128xf32, #tpu.memory_space<vmem>>, vector<1x128xf32>
    %6 = vector.broadcast %5 : vector<1x128xf32> to vector<256x128xf32>
    %7 = arith.addf %4, %6 : vector<256x128xf32>
    %cst = arith.constant 0.000000e+00 : f32
    %8 = vector.broadcast %cst : f32 to vector<256x128xf32>
    %9 = arith.maximumf %7, %8 : vector<256x128xf32>
    %cst_6 = arith.constant 0.000000e+00 : bf16
    %10 = vector.broadcast %cst_6 : bf16 to vector<18x18x128xbf16>
    %c0_7 = arith.constant 0 : index
    %c0_8 = arith.constant 0 : index
    %c0_9 = arith.constant 0 : index
    %11 = vector.load %arg7[%c0_7, %c0_8, %c0_9] : memref<18x18x128xbf16, #tpu.memory_space<vmem>>, vector<18x18x128xbf16>
    tpu.vector_store %arg7[%c0_7, %c0_8, %c0_9], %10 {strides = array<i32>} : memref<18x18x128xbf16, #tpu.memory_space<vmem>>, vector<18x18x128xbf16>,
    %12 = vector.shape_cast %9 : vector<256x128xf32> to vector<16x16x128xf32>
    %13 = arith.truncf %12 : vector<16x16x128xf32> to vector<16x16x128xbf16>
    %c1 = arith.constant 1 : index
    %c1_10 = arith.constant 1 : index
    %c0_11 = arith.constant 0 : index
    %14 = vector.load %arg7[%c1, %c1_10, %c0_11] : memref<18x18x128xbf16, #tpu.memory_space<vmem>>, vector<16x16x128xbf16>
    tpu.vector_store %arg7[%c1, %c1_10, %c0_11], %13 {strides = array<i32>} : memref<18x18x128xbf16, #tpu.memory_space<vmem>>, vector<16x16x128xbf16>,
    %c0_12 = arith.constant 0 : index
    %c0_13 = arith.constant 0 : index
    %c0_14 = arith.constant 0 : index
    %15 = vector.load %arg7[%c0_12, %c0_13, %c0_14] : memref<18x18x128xbf16, #tpu.memory_space<vmem>>, vector<16x16x128xbf16>
    %16 = vector.shape_cast %15 : vector<16x16x128xbf16> to vector<256x128xbf16>
    %c0_15 = arith.constant 0 : index
    %c0_16 = arith.constant 0 : index
    %c0_17 = arith.constant 0 : index
    %c0_18 = arith.constant 0 : index
    %17 = vector.load %arg4[%c0_15, %c0_16, %c0_17, %c0_18] : memref<3x3x128x128xbf16, #tpu.memory_space<vmem>>, vector<1x1x128x128xbf16>
    %18 = vector.shape_cast %17 : vector<1x1x128x128xbf16> to vector<128x128xbf16>
    %cst_19 = arith.constant dense<0.000000e+00> : vector<256x128xf32>
    %19 = tpu.matmul %16, %18, %cst_19 {dimension_numbers = #tpu.dot_dimension_numbers<[1], [0], [0], [1], [0, 0, 1, 1], [], []>} : vector<256x128xbf16>, vector<128x128xbf16>, vector<256x128xf32> -> vector<256x128xf32>
    %c0_20 = arith.constant 0 : index
    %c0_21 = arith.constant 0 : index
    %c0_22 = arith.constant 0 : index
    %20 = vector.load %arg5[%c0_20, %c0_21, %c0_22] : memref<1x256x128xf32, #tpu.memory_space<vmem>>, vector<1x256x128xf32>
    %21 = vector.shape_cast %20 : vector<1x256x128xf32> to vector<256x128xf32>
    %22 = vector.shape_cast %19 : vector<256x128xf32> to vector<1x256x128xf32>
    tpu.vector_store %arg5[%c0_20, %c0_21, %c0_22], %22 {strides = array<i32>} : memref<1x256x128xf32, #tpu.memory_space<vmem>>, vector<1x256x128xf32>,
    %c0_23 = arith.constant 0 : index
    %c1_24 = arith.constant 1 : index
    %c0_25 = arith.constant 0 : index
    %23 = vector.load %arg7[%c0_23, %c1_24, %c0_25] : memref<18x18x128xbf16, #tpu.memory_space<vmem>>, vector<16x16x128xbf16>
    %24 = vector.shape_cast %23 : vector<16x16x128xbf16> to vector<256x128xbf16>
    %c0_26 = arith.constant 0 : index
    %c1_27 = arith.constant 1 : index
    %c0_28 = arith.constant 0 : index
    %c0_29 = arith.constant 0 : index
    %25 = vector.load %arg4[%c0_26, %c1_27, %c0_28, %c0_29] : memref<3x3x128x128xbf16, #tpu.memory_space<vmem>>, vector<1x1x128x128xbf16>
    %26 = vector.shape_cast %25 : vector<1x1x128x128xbf16> to vector<128x128xbf16>
    %cst_30 = arith.constant dense<0.000000e+00> : vector<256x128xf32>
    %27 = tpu.matmul %24, %26, %cst_30 {dimension_numbers = #tpu.dot_dimension_numbers<[1], [0], [0], [1], [0, 0, 1, 1], [], []>} : vector<256x128xbf16>, vector<128x128xbf16>, vector<256x128xf32> -> vector<256x128xf32>
    %c0_31 = arith.constant 0 : index
    %c0_32 = arith.constant 0 : index
    %c0_33 = arith.constant 0 : index
    %28 = vector.load %arg5[%c0_31, %c0_32, %c0_33] : memref<1x256x128xf32, #tpu.memory_space<vmem>>, vector<1x256x128xf32>
    %29 = vector.shape_cast %28 : vector<1x256x128xf32> to vector<256x128xf32>
    %30 = arith.addf %29, %27 : vector<256x128xf32>
    %c0_34 = arith.constant 0 : index
    %c0_35 = arith.constant 0 : index
    %c0_36 = arith.constant 0 : index
    %31 = vector.load %arg5[%c0_34, %c0_35, %c0_36] : memref<1x256x128xf32, #tpu.memory_space<vmem>>, vector<1x256x128xf32>
    %32 = vector.shape_cast %31 : vector<1x256x128xf32> to vector<256x128xf32>
    %33 = vector.shape_cast %30 : vector<256x128xf32> to vector<1x256x128xf32>
    tpu.vector_store %arg5[%c0_34, %c0_35, %c0_36], %33 {strides = array<i32>} : memref<1x256x128xf32, #tpu.memory_space<vmem>>, vector<1x256x128xf32>,
    %c0_37 = arith.constant 0 : index
    %c2 = arith.constant 2 : index
    %c0_38 = arith.constant 0 : index
    %34 = vector.load %arg7[%c0_37, %c2, %c0_38] : memref<18x18x128xbf16, #tpu.memory_space<vmem>>, vector<16x16x128xbf16>
    %35 = vector.shape_cast %34 : vector<16x16x128xbf16> to vector<256x128xbf16>
    %c0_39 = arith.constant 0 : index
    %c2_40 = arith.constant 2 : index
    %c0_41 = arith.constant 0 : index
    %c0_42 = arith.constant 0 : index
    %36 = vector.load %arg4[%c0_39, %c2_40, %c0_41, %c0_42] : memref<3x3x128x128xbf16, #tpu.memory_space<vmem>>, vector<1x1x128x128xbf16>
    %37 = vector.shape_cast %36 : vector<1x1x128x128xbf16> to vector<128x128xbf16>
    %cst_43 = arith.constant dense<0.000000e+00> : vector<256x128xf32>
    %38 = tpu.matmul %35, %37, %cst_43 {dimension_numbers = #tpu.dot_dimension_numbers<[1], [0], [0], [1], [0, 0, 1, 1], [], []>} : vector<256x128xbf16>, vector<128x128xbf16>, vector<256x128xf32> -> vector<256x128xf32>
    %c0_44 = arith.constant 0 : index
    %c0_45 = arith.constant 0 : index
    %c0_46 = arith.constant 0 : index
    %39 = vector.load %arg5[%c0_44, %c0_45, %c0_46] : memref<1x256x128xf32, #tpu.memory_space<vmem>>, vector<1x256x128xf32>
    %40 = vector.shape_cast %39 : vector<1x256x128xf32> to vector<256x128xf32>
    %41 = arith.addf %40, %38 : vector<256x128xf32>
    %c0_47 = arith.constant 0 : index
    %c0_48 = arith.constant 0 : index
    %c0_49 = arith.constant 0 : index
    %42 = vector.load %arg5[%c0_47, %c0_48, %c0_49] : memref<1x256x128xf32, #tpu.memory_space<vmem>>, vector<1x256x128xf32>
    %43 = vector.shape_cast %42 : vector<1x256x128xf32> to vector<256x128xf32>
    %44 = vector.shape_cast %41 : vector<256x128xf32> to vector<1x256x128xf32>
    tpu.vector_store %arg5[%c0_47, %c0_48, %c0_49], %44 {strides = array<i32>} : memref<1x256x128xf32, #tpu.memory_space<vmem>>, vector<1x256x128xf32>,
    %c1_50 = arith.constant 1 : index
    %c0_51 = arith.constant 0 : index
    %c0_52 = arith.constant 0 : index
    %45 = vector.load %arg7[%c1_50, %c0_51, %c0_52] : memref<18x18x128xbf16, #tpu.memory_space<vmem>>, vector<16x16x128xbf16>
    %46 = vector.shape_cast %45 : vector<16x16x128xbf16> to vector<256x128xbf16>
    %c1_53 = arith.constant 1 : index
    %c0_54 = arith.constant 0 : index
    %c0_55 = arith.constant 0 : index
    %c0_56 = arith.constant 0 : index
    %47 = vector.load %arg4[%c1_53, %c0_54, %c0_55, %c0_56] : memref<3x3x128x128xbf16, #tpu.memory_space<vmem>>, vector<1x1x128x128xbf16>
    %48 = vector.shape_cast %47 : vector<1x1x128x128xbf16> to vector<128x128xbf16>
    %cst_57 = arith.constant dense<0.000000e+00> : vector<256x128xf32>
    %49 = tpu.matmul %46, %48, %cst_57 {dimension_numbers = #tpu.dot_dimension_numbers<[1], [0], [0], [1], [0, 0, 1, 1], [], []>} : vector<256x128xbf16>, vector<128x128xbf16>, vector<256x128xf32> -> vector<256x128xf32>
    %c0_58 = arith.constant 0 : index
    %c0_59 = arith.constant 0 : index
    %c0_60 = arith.constant 0 : index
    %50 = vector.load %arg5[%c0_58, %c0_59, %c0_60] : memref<1x256x128xf32, #tpu.memory_space<vmem>>, vector<1x256x128xf32>
    %51 = vector.shape_cast %50 : vector<1x256x128xf32> to vector<256x128xf32>
    %52 = arith.addf %51, %49 : vector<256x128xf32>
    %c0_61 = arith.constant 0 : index
    %c0_62 = arith.constant 0 : index
    %c0_63 = arith.constant 0 : index
    %53 = vector.load %arg5[%c0_61, %c0_62, %c0_63] : memref<1x256x128xf32, #tpu.memory_space<vmem>>, vector<1x256x128xf32>
    %54 = vector.shape_cast %53 : vector<1x256x128xf32> to vector<256x128xf32>
    %55 = vector.shape_cast %52 : vector<256x128xf32> to vector<1x256x128xf32>
    tpu.vector_store %arg5[%c0_61, %c0_62, %c0_63], %55 {strides = array<i32>} : memref<1x256x128xf32, #tpu.memory_space<vmem>>, vector<1x256x128xf32>,
    %c1_64 = arith.constant 1 : index
    %c1_65 = arith.constant 1 : index
    %c0_66 = arith.constant 0 : index
    %56 = vector.load %arg7[%c1_64, %c1_65, %c0_66] : memref<18x18x128xbf16, #tpu.memory_space<vmem>>, vector<16x16x128xbf16>
    %57 = vector.shape_cast %56 : vector<16x16x128xbf16> to vector<256x128xbf16>
    %c1_67 = arith.constant 1 : index
    %c1_68 = arith.constant 1 : index
    %c0_69 = arith.constant 0 : index
    %c0_70 = arith.constant 0 : index
    %58 = vector.load %arg4[%c1_67, %c1_68, %c0_69, %c0_70] : memref<3x3x128x128xbf16, #tpu.memory_space<vmem>>, vector<1x1x128x128xbf16>
    %59 = vector.shape_cast %58 : vector<1x1x128x128xbf16> to vector<128x128xbf16>
    %cst_71 = arith.constant dense<0.000000e+00> : vector<256x128xf32>
    %60 = tpu.matmul %57, %59, %cst_71 {dimension_numbers = #tpu.dot_dimension_numbers<[1], [0], [0], [1], [0, 0, 1, 1], [], []>} : vector<256x128xbf16>, vector<128x128xbf16>, vector<256x128xf32> -> vector<256x128xf32>
    %c0_72 = arith.constant 0 : index
    %c0_73 = arith.constant 0 : index
    %c0_74 = arith.constant 0 : index
    %61 = vector.load %arg5[%c0_72, %c0_73, %c0_74] : memref<1x256x128xf32, #tpu.memory_space<vmem>>, vector<1x256x128xf32>
    %62 = vector.shape_cast %61 : vector<1x256x128xf32> to vector<256x128xf32>
    %63 = arith.addf %62, %60 : vector<256x128xf32>
    %c0_75 = arith.constant 0 : index
    %c0_76 = arith.constant 0 : index
    %c0_77 = arith.constant 0 : index
    %64 = vector.load %arg5[%c0_75, %c0_76, %c0_77] : memref<1x256x128xf32, #tpu.memory_space<vmem>>, vector<1x256x128xf32>
    %65 = vector.shape_cast %64 : vector<1x256x128xf32> to vector<256x128xf32>
    %66 = vector.shape_cast %63 : vector<256x128xf32> to vector<1x256x128xf32>
    tpu.vector_store %arg5[%c0_75, %c0_76, %c0_77], %66 {strides = array<i32>} : memref<1x256x128xf32, #tpu.memory_space<vmem>>, vector<1x256x128xf32>,
    %c1_78 = arith.constant 1 : index
    %c2_79 = arith.constant 2 : index
    %c0_80 = arith.constant 0 : index
    %67 = vector.load %arg7[%c1_78, %c2_79, %c0_80] : memref<18x18x128xbf16, #tpu.memory_space<vmem>>, vector<16x16x128xbf16>
    %68 = vector.shape_cast %67 : vector<16x16x128xbf16> to vector<256x128xbf16>
    %c1_81 = arith.constant 1 : index
    %c2_82 = arith.constant 2 : index
    %c0_83 = arith.constant 0 : index
    %c0_84 = arith.constant 0 : index
    %69 = vector.load %arg4[%c1_81, %c2_82, %c0_83, %c0_84] : memref<3x3x128x128xbf16, #tpu.memory_space<vmem>>, vector<1x1x128x128xbf16>
    %70 = vector.shape_cast %69 : vector<1x1x128x128xbf16> to vector<128x128xbf16>
    %cst_85 = arith.constant dense<0.000000e+00> : vector<256x128xf32>
    %71 = tpu.matmul %68, %70, %cst_85 {dimension_numbers = #tpu.dot_dimension_numbers<[1], [0], [0], [1], [0, 0, 1, 1], [], []>} : vector<256x128xbf16>, vector<128x128xbf16>, vector<256x128xf32> -> vector<256x128xf32>
    %c0_86 = arith.constant 0 : index
    %c0_87 = arith.constant 0 : index
    %c0_88 = arith.constant 0 : index
    %72 = vector.load %arg5[%c0_86, %c0_87, %c0_88] : memref<1x256x128xf32, #tpu.memory_space<vmem>>, vector<1x256x128xf32>
    %73 = vector.shape_cast %72 : vector<1x256x128xf32> to vector<256x128xf32>
    %74 = arith.addf %73, %71 : vector<256x128xf32>
    %c0_89 = arith.constant 0 : index
    %c0_90 = arith.constant 0 : index
    %c0_91 = arith.constant 0 : index
    %75 = vector.load %arg5[%c0_89, %c0_90, %c0_91] : memref<1x256x128xf32, #tpu.memory_space<vmem>>, vector<1x256x128xf32>
    %76 = vector.shape_cast %75 : vector<1x256x128xf32> to vector<256x128xf32>
    %77 = vector.shape_cast %74 : vector<256x128xf32> to vector<1x256x128xf32>
    tpu.vector_store %arg5[%c0_89, %c0_90, %c0_91], %77 {strides = array<i32>} : memref<1x256x128xf32, #tpu.memory_space<vmem>>, vector<1x256x128xf32>,
    %c2_92 = arith.constant 2 : index
    %c0_93 = arith.constant 0 : index
    %c0_94 = arith.constant 0 : index
    %78 = vector.load %arg7[%c2_92, %c0_93, %c0_94] : memref<18x18x128xbf16, #tpu.memory_space<vmem>>, vector<16x16x128xbf16>
    %79 = vector.shape_cast %78 : vector<16x16x128xbf16> to vector<256x128xbf16>
    %c2_95 = arith.constant 2 : index
    %c0_96 = arith.constant 0 : index
    %c0_97 = arith.constant 0 : index
    %c0_98 = arith.constant 0 : index
    %80 = vector.load %arg4[%c2_95, %c0_96, %c0_97, %c0_98] : memref<3x3x128x128xbf16, #tpu.memory_space<vmem>>, vector<1x1x128x128xbf16>
    %81 = vector.shape_cast %80 : vector<1x1x128x128xbf16> to vector<128x128xbf16>
    %cst_99 = arith.constant dense<0.000000e+00> : vector<256x128xf32>
    %82 = tpu.matmul %79, %81, %cst_99 {dimension_numbers = #tpu.dot_dimension_numbers<[1], [0], [0], [1], [0, 0, 1, 1], [], []>} : vector<256x128xbf16>, vector<128x128xbf16>, vector<256x128xf32> -> vector<256x128xf32>
    %c0_100 = arith.constant 0 : index
    %c0_101 = arith.constant 0 : index
    %c0_102 = arith.constant 0 : index
    %83 = vector.load %arg5[%c0_100, %c0_101, %c0_102] : memref<1x256x128xf32, #tpu.memory_space<vmem>>, vector<1x256x128xf32>
    %84 = vector.shape_cast %83 : vector<1x256x128xf32> to vector<256x128xf32>
    %85 = arith.addf %84, %82 : vector<256x128xf32>
    %c0_103 = arith.constant 0 : index
    %c0_104 = arith.constant 0 : index
    %c0_105 = arith.constant 0 : index
    %86 = vector.load %arg5[%c0_103, %c0_104, %c0_105] : memref<1x256x128xf32, #tpu.memory_space<vmem>>, vector<1x256x128xf32>
    %87 = vector.shape_cast %86 : vector<1x256x128xf32> to vector<256x128xf32>
    %88 = vector.shape_cast %85 : vector<256x128xf32> to vector<1x256x128xf32>
    tpu.vector_store %arg5[%c0_103, %c0_104, %c0_105], %88 {strides = array<i32>} : memref<1x256x128xf32, #tpu.memory_space<vmem>>, vector<1x256x128xf32>,
    %c2_106 = arith.constant 2 : index
    %c1_107 = arith.constant 1 : index
    %c0_108 = arith.constant 0 : index
    %89 = vector.load %arg7[%c2_106, %c1_107, %c0_108] : memref<18x18x128xbf16, #tpu.memory_space<vmem>>, vector<16x16x128xbf16>
    %90 = vector.shape_cast %89 : vector<16x16x128xbf16> to vector<256x128xbf16>
    %c2_109 = arith.constant 2 : index
    %c1_110 = arith.constant 1 : index
    %c0_111 = arith.constant 0 : index
    %c0_112 = arith.constant 0 : index
    %91 = vector.load %arg4[%c2_109, %c1_110, %c0_111, %c0_112] : memref<3x3x128x128xbf16, #tpu.memory_space<vmem>>, vector<1x1x128x128xbf16>
    %92 = vector.shape_cast %91 : vector<1x1x128x128xbf16> to vector<128x128xbf16>
    %cst_113 = arith.constant dense<0.000000e+00> : vector<256x128xf32>
    %93 = tpu.matmul %90, %92, %cst_113 {dimension_numbers = #tpu.dot_dimension_numbers<[1], [0], [0], [1], [0, 0, 1, 1], [], []>} : vector<256x128xbf16>, vector<128x128xbf16>, vector<256x128xf32> -> vector<256x128xf32>
    %c0_114 = arith.constant 0 : index
    %c0_115 = arith.constant 0 : index
    %c0_116 = arith.constant 0 : index
    %94 = vector.load %arg5[%c0_114, %c0_115, %c0_116] : memref<1x256x128xf32, #tpu.memory_space<vmem>>, vector<1x256x128xf32>
    %95 = vector.shape_cast %94 : vector<1x256x128xf32> to vector<256x128xf32>
    %96 = arith.addf %95, %93 : vector<256x128xf32>
    %c0_117 = arith.constant 0 : index
    %c0_118 = arith.constant 0 : index
    %c0_119 = arith.constant 0 : index
    %97 = vector.load %arg5[%c0_117, %c0_118, %c0_119] : memref<1x256x128xf32, #tpu.memory_space<vmem>>, vector<1x256x128xf32>
    %98 = vector.shape_cast %97 : vector<1x256x128xf32> to vector<256x128xf32>
    %99 = vector.shape_cast %96 : vector<256x128xf32> to vector<1x256x128xf32>
    tpu.vector_store %arg5[%c0_117, %c0_118, %c0_119], %99 {strides = array<i32>} : memref<1x256x128xf32, #tpu.memory_space<vmem>>, vector<1x256x128xf32>,
    %c2_120 = arith.constant 2 : index
    %c2_121 = arith.constant 2 : index
    %c0_122 = arith.constant 0 : index
    %100 = vector.load %arg7[%c2_120, %c2_121, %c0_122] : memref<18x18x128xbf16, #tpu.memory_space<vmem>>, vector<16x16x128xbf16>
    %101 = vector.shape_cast %100 : vector<16x16x128xbf16> to vector<256x128xbf16>
    %c2_123 = arith.constant 2 : index
    %c2_124 = arith.constant 2 : index
    %c0_125 = arith.constant 0 : index
    %c0_126 = arith.constant 0 : index
    %102 = vector.load %arg4[%c2_123, %c2_124, %c0_125, %c0_126] : memref<3x3x128x128xbf16, #tpu.memory_space<vmem>>, vector<1x1x128x128xbf16>
    %103 = vector.shape_cast %102 : vector<1x1x128x128xbf16> to vector<128x128xbf16>
    %cst_127 = arith.constant dense<0.000000e+00> : vector<256x128xf32>
    %104 = tpu.matmul %101, %103, %cst_127 {dimension_numbers = #tpu.dot_dimension_numbers<[1], [0], [0], [1], [0, 0, 1, 1], [], []>} : vector<256x128xbf16>, vector<128x128xbf16>, vector<256x128xf32> -> vector<256x128xf32>
    %c0_128 = arith.constant 0 : index
    %c0_129 = arith.constant 0 : index
    %c0_130 = arith.constant 0 : index
    %105 = vector.load %arg5[%c0_128, %c0_129, %c0_130] : memref<1x256x128xf32, #tpu.memory_space<vmem>>, vector<1x256x128xf32>
    %106 = vector.shape_cast %105 : vector<1x256x128xf32> to vector<256x128xf32>
    %107 = arith.addf %106, %104 : vector<256x128xf32>
    %c0_131 = arith.constant 0 : index
    %c0_132 = arith.constant 0 : index
    %c0_133 = arith.constant 0 : index
    %108 = vector.load %arg5[%c0_131, %c0_132, %c0_133] : memref<1x256x128xf32, #tpu.memory_space<vmem>>, vector<1x256x128xf32>
    %109 = vector.shape_cast %108 : vector<1x256x128xf32> to vector<256x128xf32>
    %110 = vector.shape_cast %107 : vector<256x128xf32> to vector<1x256x128xf32>
    tpu.vector_store %arg5[%c0_131, %c0_132, %c0_133], %110 {strides = array<i32>} : memref<1x256x128xf32, #tpu.memory_space<vmem>>, vector<1x256x128xf32>,
    %c0_134 = arith.constant 0 : index
    %c0_135 = arith.constant 0 : index
    %c0_136 = arith.constant 0 : index
    %111 = vector.load %arg5[%c0_134, %c0_135, %c0_136] : memref<1x256x128xf32, #tpu.memory_space<vmem>>, vector<1x256x128xf32>
    %112 = vector.shape_cast %111 : vector<1x256x128xf32> to vector<256x128xf32>
    %cst_137 = arith.constant dense<0.000000e+00> : vector<128xf32>
    %113 = vector.multi_reduction <add>, %112, %cst_137 [0] : vector<256x128xf32> to vector<128xf32>
    %114 = vector.shape_cast %113 : vector<128xf32> to vector<1x128xf32>
    %115 = arith.mulf %112, %112 : vector<256x128xf32>
    %cst_138 = arith.constant dense<0.000000e+00> : vector<128xf32>
    %116 = vector.multi_reduction <add>, %115, %cst_138 [0] : vector<256x128xf32> to vector<128xf32>
    %117 = vector.shape_cast %116 : vector<128xf32> to vector<1x128xf32>
    %118 = tpu.concatenate %114, %117 in 0 : vector<1x128xf32>, vector<1x128xf32> -> vector<2x128xf32>
    %c0_139 = arith.constant 0 : index
    %c0_140 = arith.constant 0 : index
    %c0_141 = arith.constant 0 : index
    %119 = vector.load %arg6[%c0_139, %c0_140, %c0_141] : memref<1x2x128xf32, #tpu.memory_space<vmem>>, vector<1x2x128xf32>
    %120 = vector.shape_cast %119 : vector<1x2x128xf32> to vector<2x128xf32>
    %121 = vector.shape_cast %118 : vector<2x128xf32> to vector<1x2x128xf32>
    tpu.vector_store %arg6[%c0_139, %c0_140, %c0_141], %121 {strides = array<i32>} : memref<1x2x128xf32, #tpu.memory_space<vmem>>, vector<1x2x128xf32>,
    return
  }
  func.func @transform_0(%arg0: i32) -> (i32, i32, i32) {
    %c0_i32 = arith.constant 0 : i32
    %c0_i32_0 = arith.constant 0 : i32
    %c0_i32_1 = arith.constant 0 : i32
    return %arg0, %c0_i32, %c0_i32_0 : i32, i32, i32
  }
  func.func @transform_1(%arg0: i32) -> (i32, i32) {
    %c0_i32 = arith.constant 0 : i32
    %c0_i32_0 = arith.constant 0 : i32
    %c0_i32_1 = arith.constant 0 : i32
    return %c0_i32, %c0_i32_0 : i32, i32
  }
  func.func @transform_2(%arg0: i32) -> (i32, i32) {
    %c0_i32 = arith.constant 0 : i32
    %c0_i32_0 = arith.constant 0 : i32
    %c0_i32_1 = arith.constant 0 : i32
    return %c0_i32, %c0_i32_0 : i32, i32
  }
  func.func @transform_3(%arg0: i32) -> (i32, i32, i32, i32) {
    %c0_i32 = arith.constant 0 : i32
    %c0_i32_0 = arith.constant 0 : i32
    %c0_i32_1 = arith.constant 0 : i32
    %c0_i32_2 = arith.constant 0 : i32
    %c0_i32_3 = arith.constant 0 : i32
    return %c0_i32, %c0_i32_0, %c0_i32_1, %c0_i32_2 : i32, i32, i32, i32
  }
  func.func @transform_4(%arg0: i32) -> (i32, i32, i32) {
    %c0_i32 = arith.constant 0 : i32
    %c0_i32_0 = arith.constant 0 : i32
    %c0_i32_1 = arith.constant 0 : i32
    return %arg0, %c0_i32, %c0_i32_0 : i32, i32, i32
  }
  func.func @transform_5(%arg0: i32) -> (i32, i32, i32) {
    %c0_i32 = arith.constant 0 : i32
    %c0_i32_0 = arith.constant 0 : i32
    %c0_i32_1 = arith.constant 0 : i32
    return %arg0, %c0_i32, %c0_i32_0 : i32, i32, i32
  }
}

</mosaic_0001>

<bundles_post_ra>
// kernel: basic_block_forward.5
= control target key start
LH: loop header
LB: loop body
LE: loop exit
PB: predicated region body
PF: predicated region fallthrough
CT: control target
= control target key end

     0   :  { %s582_s15 = smov 0   ;;  %s783_s0 = inlined_call_operand.vmem [shape: f32[2,256,128], index: 0, kind: input, shape index: {}]   ;;  %s784_s1 = inlined_call_operand.vmem [shape: f32[1,128], index: 1, kind: input, shape index: {}]   ;;  %s785_s2 = inlined_call_operand.vmem [shape: f32[1,128], index: 2, kind: input, shape index: {}]   ;;  %s786_s3 = inlined_call_operand.vmem [shape: f32[2,256,128], index: 3, kind: input, shape index: {}]   ;;  %s787_s4 = inlined_call_operand.vmem [shape: f32[2,256,128], index: 4, kind: output, shape index: {}]  }
   0x1 LB: > { %s523_s16 = sadd.s32 4294967295, %s555_s15   ;;  %p527_p0 = scmp.ge.s32.totalorder %s555_s15, 1  ;;  %s555_s15 = sphi %s582_s15, %s14_s15  }
   0x2   : > { %p172_p1 = scmp.lt.s32.totalorder %s555_s15, 3 }
   0x4   : > { %p173_p2 = pnand %p527_p0, %p172_p1 }
   0x5   : > { %p203_p3 = scmp.lt.s32.totalorder (!%p173_p2), %s523_s16, 1  ;;  %v595_v0 = vld [vmem:[%s784_s1] ss:$0 sm:$0xff] (!%p173_p2) }
   0x6   : > { %176 = sbr.rel (%p173_p2) target bundleno = 55 (0x37), region = 36  ;;  %v613_v2 = vld [vmem:[%s785_s2] ss:$0 sm:$0xff] (!%p173_p2) }
   0xd   : > { %s789_s16 = smov (!%p203_p3, %s523_s16), 1 }
   0xe   : > { %s590_s17 = sshll.u32 %s789_s16, 8 }
   0xf   : > { %s601_s22 = scalar_lea.vmem %s783_s0, %s590_s17  ;;  %s607_s25 = scalar_lea.vmem %s786_s3, %s590_s17 }
  0x10   : > { %v218_v1 = vld [vmem:[%s601_s22] sm:$0xff]  ;;  %v219_v3 = vld [vmem:[%s601_s22 + $0x8] sm:$0xff]  ;;  %v220_v7 = vld [vmem:[%s601_s22 + $0x10] sm:$0xff]  ;;  %s643_s30 = scalar_lea.vmem %s787_s4, %s590_s17 }
  0x11   : > { %v257_v4 = vmul.f32 %v595_v0, %v218_v1  ;;  %v328_v5 = vld [vmem:[%s607_s25] sm:$0xff]  ;;  %v258_v6 = vmul.f32 %v595_v0, %v219_v3  ;;  %v329_v8 = vld [vmem:[%s607_s25 + $0x8] sm:$0xff]  ;;  %v259_v9 = vmul.f32 %v595_v0, %v220_v7  ;;  %v221_v10 = vld [vmem:[%s601_s22 + $0x18] sm:$0xff] }
  0x12   : > { %v222_v11 = vld [vmem:[%s601_s22 + $0x20] sm:$0xff]  ;;  %v330_v14 = vld [vmem:[%s607_s25 + $0x10] sm:$0xff]  ;;  %v260_v15 = vmul.f32 %v595_v0, %v221_v10  ;;  %v331_v16 = vld [vmem:[%s607_s25 + $0x18] sm:$0xff] }
  0x13   : > { %v296_v12 = vadd.f32 %v613_v2, %v257_v4  ;;  %v297_v13 = vadd.f32 %v613_v2, %v258_v6  ;;  %v261_v17 = vmul.f32 %v595_v0, %v222_v11  ;;  %v223_v18 = vld [vmem:[%s601_s22 + $0x28] sm:$0xff]  ;;  %v298_v19 = vadd.f32 %v613_v2, %v259_v9  ;;  %v332_v20 = vld [vmem:[%s607_s25 + $0x20] sm:$0xff]  ;;  %v224_v22 = vld [vmem:[%s601_s22 + $0x30] sm:$0xff] }
  0x14   : > { %v262_v21 = vmul.f32 %v595_v0, %v223_v18  ;;  %v225_v23 = vld [vmem:[%s601_s22 + $0x38] sm:$0xff]  ;;  %v299_v26 = vadd.f32 %v613_v2, %v260_v15  ;;  %v333_v28 = vld [vmem:[%s607_s25 + $0x28] sm:$0xff]  ;;  %v263_v31 = vmul.f32 %v595_v0, %v224_v22  ;;  %v226_v33 = vld [vmem:[%s601_s22 + $0x40] sm:$0xff] }
  0x15   : > { %v360_v24 = vadd.f32 %v328_v5, %v296_v12  ;;  %v361_v25 = vadd.f32 %v329_v8, %v297_v13  ;;  %v300_v27 = vadd.f32 %v613_v2, %v261_v17  ;;  %v362_v29 = vadd.f32 %v330_v14, %v298_v19  ;;  %v227_v34 = vld [vmem:[%s601_s22 + $0x48] sm:$0xff]  ;;  %v334_v39 = vld [vmem:[%s607_s25 + $0x30] sm:$0xff]  ;;  %v335_v40 = vld [vmem:[%s607_s25 + $0x38] sm:$0xff] }
  0x16   : > { %v301_v30 = vadd.f32 %v613_v2, %v262_v21  ;;  %v264_v32 = vmul.f32 %v595_v0, %v225_v23  ;;  %v363_v37 = vadd.f32 %v331_v16, %v299_v26  ;;  %v228_v41 = vld [vmem:[%s601_s22 + $0x50] sm:$0xff]  ;;  %v302_v44 = vadd.f32 %v613_v2, %v263_v31  ;;  %v229_v46 = vld [vmem:[%s601_s22 + $0x58] sm:$0xff]  ;;  %v230_v47 = vld [vmem:[%s601_s22 + $0x60] sm:$0xff] }
  0x17   : > { %v392_v35 = vmax.f32 %v360_v24, 0.0  ;;  %v393_v36 = vmax.f32 %v361_v25, 0.0  ;;  %v364_v38 = vadd.f32 %v332_v20, %v300_v27  ;;  %v394_v42 = vmax.f32 %v362_v29, 0.0  ;;  %v231_v52 = vld [vmem:[%s601_s22 + $0x68] sm:$0xff]  ;;  %v336_v56 = vld [vmem:[%s607_s25 + $0x40] sm:$0xff]  ;;  %v338_v61 = vld [vmem:[%s607_s25 + $0x50] sm:$0xff] }
  0x18   : > { %v365_v43 = vadd.f32 %v333_v28, %v301_v30  ;;  %v303_v45 = vadd.f32 %v613_v2, %v264_v32  ;;  %v395_v48 = vmax.f32 %v363_v37, 0.0  ;;  %v265_v50 = vmul.f32 %v595_v0, %v226_v33  ;;  %v337_v57 = vld [vmem:[%s607_s25 + $0x48] sm:$0xff]  ;;  %v232_v1 = vld [vmem:[%s601_s22 + $0x70] sm:$0xff]  ;;  %v233_v3 = vld [vmem:[%s601_s22 + $0x78] sm:$0xff] }
  0x19   : > { %424 = vst [vmem:[%s643_s30] sm:$0xff] %v392_v35  ;;  %425 = vst [vmem:[%s643_s30 + $0x8] sm:$0xff] %v393_v36  ;;  %v396_v49 = vmax.f32 %v364_v38, 0.0  ;;  %v266_v51 = vmul.f32 %v595_v0, %v227_v34  ;;  %v366_v54 = vadd.f32 %v334_v39, %v302_v44  ;;  %v267_v58 = vmul.f32 %v595_v0, %v228_v41  ;;  %v339_v7 = vld [vmem:[%s607_s25 + $0x58] sm:$0xff]  ;;  %v340_v8 = vld [vmem:[%s607_s25 + $0x60] sm:$0xff] }
  0x1a   : > { %426 = vst [vmem:[%s643_s30 + $0x10] sm:$0xff] %v394_v42  ;;  %v397_v53 = vmax.f32 %v365_v43, 0.0  ;;  %v367_v55 = vadd.f32 %v335_v40, %v303_v45  ;;  %427 = vst [vmem:[%s643_s30 + $0x18] sm:$0xff] %v395_v48  ;;  %v304_v59 = vadd.f32 %v613_v2, %v265_v50  ;;  %v268_v62 = vmul.f32 %v595_v0, %v229_v46  ;;  %v341_v14 = vld [vmem:[%s607_s25 + $0x68] sm:$0xff]  ;;  %v234_v19 = vld [vmem:[%s601_s22 + $0x80] sm:$0xff] }
  0x1b   : > { %428 = vst [vmem:[%s643_s30 + $0x20] sm:$0xff] %v396_v49  ;;  %v305_v60 = vadd.f32 %v613_v2, %v266_v51  ;;  %v269_v63 = vmul.f32 %v595_v0, %v230_v47  ;;  %v398_v4 = vmax.f32 %v366_v54, 0.0  ;;  %v306_v6 = vadd.f32 %v613_v2, %v267_v58  ;;  %v235_v20 = vld [vmem:[%s601_s22 + $0x88] sm:$0xff]  ;;  %v342_v25 = vld [vmem:[%s607_s25 + $0x70] sm:$0xff]  ;;  %v343_v26 = vld [vmem:[%s607_s25 + $0x78] sm:$0xff] }
  0x1c   : > { %429 = vst [vmem:[%s643_s30 + $0x28] sm:$0xff] %v397_v53  ;;  %v399_v5 = vmax.f32 %v367_v55, 0.0  ;;  %v270_v9 = vmul.f32 %v595_v0, %v231_v52  ;;  %v368_v10 = vadd.f32 %v336_v56, %v304_v59  ;;  %v307_v12 = vadd.f32 %v613_v2, %v268_v62  ;;  %v236_v27 = vld [vmem:[%s601_s22 + $0x90] sm:$0xff]  ;;  %v237_v32 = vld [vmem:[%s601_s22 + $0x98] sm:$0xff]  ;;  %v238_v33 = vld [vmem:[%s601_s22 + $0xa0] sm:$0xff] }
  0x1d   : > { %v369_v11 = vadd.f32 %v337_v57, %v305_v60  ;;  %v308_v13 = vadd.f32 %v613_v2, %v269_v63  ;;  %430 = vst [vmem:[%s643_s30 + $0x30] sm:$0xff] %v398_v4  ;;  %v370_v15 = vadd.f32 %v338_v61, %v306_v6  ;;  %v271_v17 = vmul.f32 %v595_v0, %v232_v1  ;;  %v239_v38 = vld [vmem:[%s601_s22 + $0xa8] sm:$0xff]  ;;  %v344_v42 = vld [vmem:[%s607_s25 + $0x80] sm:$0xff]  ;;  %v346_v47 = vld [vmem:[%s607_s25 + $0x90] sm:$0xff] }
  0x1e   : > { %431 = vst [vmem:[%s643_s30 + $0x38] sm:$0xff] %v399_v5  ;;  %v309_v16 = vadd.f32 %v613_v2, %v270_v9  ;;  %v272_v18 = vmul.f32 %v595_v0, %v233_v3  ;;  %v400_v21 = vmax.f32 %v368_v10, 0.0  ;;  %v371_v23 = vadd.f32 %v339_v7, %v307_v12  ;;  %v345_v43 = vld [vmem:[%s607_s25 + $0x88] sm:$0xff]  ;;  %v240_v50 = vld [vmem:[%s601_s22 + $0xb0] sm:$0xff]  ;;  %v241_v51 = vld [vmem:[%s601_s22 + $0xb8] sm:$0xff] }
  0x1f   : > { %v401_v22 = vmax.f32 %v369_v11, 0.0  ;;  %v372_v24 = vadd.f32 %v340_v8, %v308_v13  ;;  %v402_v28 = vmax.f32 %v370_v15, 0.0  ;;  %v310_v30 = vadd.f32 %v613_v2, %v271_v17  ;;  %v347_v55 = vld [vmem:[%s607_s25 + $0x98] sm:$0xff]  ;;  %v348_v56 = vld [vmem:[%s607_s25 + $0xa0] sm:$0xff]  ;;  %v349_v62 = vld [vmem:[%s607_s25 + $0xa8] sm:$0xff] }
  0x20   : > { %v373_v29 = vadd.f32 %v341_v14, %v309_v16  ;;  %v311_v31 = vadd.f32 %v613_v2, %v272_v18  ;;  %432 = vst [vmem:[%s643_s30 + $0x40] sm:$0xff] %v400_v21  ;;  %v403_v34 = vmax.f32 %v371_v23, 0.0  ;;  %v273_v36 = vmul.f32 %v595_v0, %v234_v19  ;;  %v242_v5 = vld [vmem:[%s601_s22 + $0xc0] sm:$0xff]  ;;  %v243_v6 = vld [vmem:[%s601_s22 + $0xc8] sm:$0xff]  ;;  %v350_v11 = vld [vmem:[%s607_s25 + $0xb0] sm:$0xff] }
  0x21   : > { %433 = vst [vmem:[%s643_s30 + $0x48] sm:$0xff] %v401_v22  ;;  %v404_v35 = vmax.f32 %v372_v24, 0.0  ;;  %v274_v37 = vmul.f32 %v595_v0, %v235_v20  ;;  %434 = vst [vmem:[%s643_s30 + $0x50] sm:$0xff] %v402_v28  ;;  %v374_v40 = vadd.f32 %v342_v25, %v310_v30  ;;  %v275_v44 = vmul.f32 %v595_v0, %v236_v27  ;;  %v351_v12 = vld [vmem:[%s607_s25 + $0xb8] sm:$0xff]  ;;  %v244_v13 = vld [vmem:[%s601_s22 + $0xd0] sm:$0xff] }
  0x22   : > { %v405_v39 = vmax.f32 %v373_v29, 0.0  ;;  %v375_v41 = vadd.f32 %v343_v26, %v311_v31  ;;  %435 = vst [vmem:[%s643_s30 + $0x58] sm:$0xff] %v403_v34  ;;  %v312_v45 = vadd.f32 %v613_v2, %v273_v36  ;;  %v276_v48 = vmul.f32 %v595_v0, %v237_v32  ;;  %v245_v18 = vld [vmem:[%s601_s22 + $0xd8] sm:$0xff]  ;;  %v246_v19 = vld [vmem:[%s601_s22 + $0xe0] sm:$0xff]  ;;  %v247_v24 = vld [vmem:[%s601_s22 + $0xe8] sm:$0xff] }
  0x23   : > { %436 = vst [vmem:[%s643_s30 + $0x60] sm:$0xff] %v404_v35  ;;  %v313_v46 = vadd.f32 %v613_v2, %v274_v37  ;;  %v277_v49 = vmul.f32 %v595_v0, %v238_v33  ;;  %v406_v52 = vmax.f32 %v374_v40, 0.0  ;;  %v314_v54 = vadd.f32 %v613_v2, %v275_v44  ;;  %v352_v28 = vld [vmem:[%s607_s25 + $0xc0] sm:$0xff]  ;;  %v353_v29 = vld [vmem:[%s607_s25 + $0xc8] sm:$0xff]  ;;  %v354_v33 = vld [vmem:[%s607_s25 + $0xd0] sm:$0xff] }
  0x24   : > { %437 = vst [vmem:[%s643_s30 + $0x68] sm:$0xff] %v405_v39  ;;  %v407_v53 = vmax.f32 %v375_v41, 0.0  ;;  %v278_v57 = vmul.f32 %v595_v0, %v239_v38  ;;  %v376_v58 = vadd.f32 %v344_v42, %v312_v45  ;;  %v315_v60 = vadd.f32 %v613_v2, %v276_v48  ;;  %v248_v36 = vld [vmem:[%s601_s22 + $0xf0] sm:$0xff]  ;;  %v249_v37 = vld [vmem:[%s601_s22 + $0xf8] sm:$0xff]  ;;  %v356_v42 = vld [vmem:[%s607_s25 + $0xe0] sm:$0xff] }
  0x25   : > { %v377_v59 = vadd.f32 %v345_v43, %v313_v46  ;;  %v316_v61 = vadd.f32 %v613_v2, %v277_v49  ;;  %438 = vst [vmem:[%s643_s30 + $0x70] sm:$0xff] %v406_v52  ;;  %v378_v63 = vadd.f32 %v346_v47, %v314_v54  ;;  %v279_v3 = vmul.f32 %v595_v0, %v240_v50  ;;  %v355_v41 = vld [vmem:[%s607_s25 + $0xd8] sm:$0xff]  ;;  %v357_v48 = vld [vmem:[%s607_s25 + $0xe8] sm:$0xff] }
  0x26   : > { %439 = vst [vmem:[%s643_s30 + $0x78] sm:$0xff] %v407_v53  ;;  %v317_v1 = vadd.f32 %v613_v2, %v278_v57  ;;  %v280_v4 = vmul.f32 %v595_v0, %v241_v51  ;;  %v408_v7 = vmax.f32 %v376_v58, 0.0  ;;  %v379_v9 = vadd.f32 %v347_v55, %v315_v60  ;;  %v358_v57 = vld [vmem:[%s607_s25 + $0xf0] sm:$0xff]  ;;  %v359_v58 = vld [vmem:[%s607_s25 + $0xf8] sm:$0xff] }
  0x27   : > { %v409_v8 = vmax.f32 %v377_v59, 0.0  ;;  %v380_v10 = vadd.f32 %v348_v56, %v316_v61  ;;  %v410_v14 = vmax.f32 %v378_v63, 0.0  ;;  %v318_v16 = vadd.f32 %v613_v2, %v279_v3 }
  0x28   : > { %v381_v15 = vadd.f32 %v349_v62, %v317_v1  ;;  %v319_v17 = vadd.f32 %v613_v2, %v280_v4  ;;  %440 = vst [vmem:[%s643_s30 + $0x80] sm:$0xff] %v408_v7  ;;  %v411_v20 = vmax.f32 %v379_v9, 0.0  ;;  %v281_v22 = vmul.f32 %v595_v0, %v242_v5 }
  0x29   : > { %441 = vst [vmem:[%s643_s30 + $0x88] sm:$0xff] %v409_v8  ;;  %v412_v21 = vmax.f32 %v380_v10, 0.0  ;;  %v282_v23 = vmul.f32 %v595_v0, %v243_v6  ;;  %442 = vst [vmem:[%s643_s30 + $0x90] sm:$0xff] %v410_v14  ;;  %v382_v26 = vadd.f32 %v350_v11, %v318_v16  ;;  %v283_v30 = vmul.f32 %v595_v0, %v244_v13 }
  0x2a   : > { %v413_v25 = vmax.f32 %v381_v15, 0.0  ;;  %v383_v27 = vadd.f32 %v351_v12, %v319_v17  ;;  %443 = vst [vmem:[%s643_s30 + $0x98] sm:$0xff] %v411_v20  ;;  %v320_v31 = vadd.f32 %v613_v2, %v281_v22  ;;  %v284_v34 = vmul.f32 %v595_v0, %v245_v18 }
  0x2b   : > { %444 = vst [vmem:[%s643_s30 + $0xa0] sm:$0xff] %v412_v21  ;;  %v321_v32 = vadd.f32 %v613_v2, %v282_v23  ;;  %v285_v35 = vmul.f32 %v595_v0, %v246_v19  ;;  %v414_v38 = vmax.f32 %v382_v26, 0.0  ;;  %v322_v40 = vadd.f32 %v613_v2, %v283_v30 }
  0x2c   : > { %445 = vst [vmem:[%s643_s30 + $0xa8] sm:$0xff] %v413_v25  ;;  %v415_v39 = vmax.f32 %v383_v27, 0.0  ;;  %v286_v43 = vmul.f32 %v595_v0, %v247_v24  ;;  %v384_v44 = vadd.f32 %v352_v28, %v320_v31  ;;  %v323_v46 = vadd.f32 %v613_v2, %v284_v34 }
  0x2d   : > { %v385_v45 = vadd.f32 %v353_v29, %v321_v32  ;;  %v324_v47 = vadd.f32 %v613_v2, %v285_v35  ;;  %446 = vst [vmem:[%s643_s30 + $0xb0] sm:$0xff] %v414_v38  ;;  %v386_v49 = vadd.f32 %v354_v33, %v322_v40  ;;  %v287_v51 = vmul.f32 %v595_v0, %v248_v36 }
  0x2e   : > { %447 = vst [vmem:[%s643_s30 + $0xb8] sm:$0xff] %v415_v39  ;;  %v325_v50 = vadd.f32 %v613_v2, %v286_v43  ;;  %v288_v52 = vmul.f32 %v595_v0, %v249_v37  ;;  %v416_v53 = vmax.f32 %v384_v44, 0.0  ;;  %v387_v55 = vadd.f32 %v355_v41, %v323_v46 }
  0x2f   : > { %v417_v54 = vmax.f32 %v385_v45, 0.0  ;;  %v388_v56 = vadd.f32 %v356_v42, %v324_v47  ;;  %v418_v59 = vmax.f32 %v386_v49, 0.0  ;;  %v326_v61 = vadd.f32 %v613_v2, %v287_v51 }
  0x30   : > { %v389_v60 = vadd.f32 %v357_v48, %v325_v50  ;;  %v327_v62 = vadd.f32 %v613_v2, %v288_v52  ;;  %448 = vst [vmem:[%s643_s30 + $0xc0] sm:$0xff] %v416_v53  ;;  %v419_v0 = vmax.f32 %v387_v55, 0.0 }
  0x31   : > { %449 = vst [vmem:[%s643_s30 + $0xc8] sm:$0xff] %v417_v54  ;;  %v420_v63 = vmax.f32 %v388_v56, 0.0  ;;  %450 = vst [vmem:[%s643_s30 + $0xd0] sm:$0xff] %v418_v59  ;;  %v390_v3 = vadd.f32 %v358_v57, %v326_v61 }
  0x32   : > { %v421_v1 = vmax.f32 %v389_v60, 0.0  ;;  %v391_v4 = vadd.f32 %v359_v58, %v327_v62  ;;  %451 = vst [vmem:[%s643_s30 + $0xd8] sm:$0xff] %v419_v0 }
  0x33   : > { %452 = vst [vmem:[%s643_s30 + $0xe0] sm:$0xff] %v420_v63  ;;  %v422_v5 = vmax.f32 %v390_v3, 0.0 }
  0x34   : > { %453 = vst [vmem:[%s643_s30 + $0xe8] sm:$0xff] %v421_v1  ;;  %v423_v6 = vmax.f32 %v391_v4, 0.0 }
  0x35   : > { %454 = vst [vmem:[%s643_s30 + $0xf0] sm:$0xff] %v422_v5 }
  0x36   : > { %455 = vst [vmem:[%s643_s30 + $0xf8] sm:$0xff] %v423_v6 }
  0x37 PF: > { %s14_s15 = sadd.s32 1, %s555_s15  }
  0x38   : > { %p11_p4 = scmp.ge.s32.totalorder %s14_s15, 4  }
  0x3a   :  { %13 = sbr.rel (!%p11_p4) target bundleno = 1 (0x1), region = 69 }

// kernel: basic_block_forward.4
= control target key start
LH: loop header
LB: loop body
LE: loop exit
PB: predicated region body
PF: predicated region fallthrough
CT: control target
= control target key end

     0   :  { %s8362_s18 = smov 0   ;;  %s9904_s0 = inlined_call_operand.vmem [shape: f32[2,256,128], index: 0, kind: input, shape index: {}]   ;;  %s9905_s1 = inlined_call_operand.vmem [shape: f32[1,128], index: 1, kind: input, shape index: {}]   ;;  %s9906_s2 = inlined_call_operand.vmem [shape: f32[1,128], index: 2, kind: input, shape index: {}]   ;;  %s9907_s3 = inlined_call_operand.vmem [shape: bf16[3,3,128,128], index: 3, kind: input, shape index: {}]   ;;  %s9908_s4 = inlined_call_operand.vmem [shape: f32[2,256,128], index: 4, kind: output, shape index: {0}]   ;;  %s9909_s5 = inlined_call_operand.vmem [shape: f32[2,2,128], index: 5, kind: output, shape index: {1}]  }
   0x1 LB: > { %s6725_s19 = sadd.s32 4294967295, %s8329_s18   ;;  %p6729_p0 = scmp.ge.s32.totalorder %s8329_s18, 1  ;;  %s8329_s18 = sphi %s8362_s18, %s16_s18  }
   0x2   : > { %p190_p1 = scmp.lt.s32.totalorder %s8329_s18, 3 }
   0x4   : > { %p191_p2 = pnand %p6729_p0, %p190_p1 }
   0x5   : > { %v8190_v0 = vld [vmem:[%s9907_s3] sm:$0xff] (!%p191_p2)   ;;  %v8376_v1 = vld [vmem:[%s9907_s3 + $0x8] sm:$0xff] (!%p191_p2)   ;;  %v8331_v2 = vmov (!%p191_p2), 0   ;;  %p222_p3 = scmp.lt.s32.totalorder (!%p191_p2), %s6725_s19, 1  ;;  %v8193_v4 = vld [vmem:[%s9907_s3 + $0x10] sm:$0xff] (!%p191_p2)   ;;  %vm853_vm0 = vcmask (!%p191_p2), 1043456  }
   0x6   : > { %194 = sbr.rel (%p191_p2) target bundleno = 662 (0x296), region = 36  ;;  %379 = vst [vmem:[#allocation2] sm:$0xf] (!%p191_p2), %v8331_v2  ;;  %380 = vst [vmem:[#allocation2 + $0x4] sm:$0xf] (!%p191_p2), %v8331_v2  ;;  %7413 = vmatprep.subr.bf16.mxu1 (!%p191_p2), %v8190_v0  ;;  %v8192_v3 = vld [vmem:[%s9907_s3 + $0x100] sm:$0xff] (!%p191_p2)  }
   0x7   : > { %381 = vst [vmem:[#allocation2 + $0x8] sm:$0x1] (!%p191_p2), %v8331_v2  ;;  %382 = vst [vmem:[#allocation2 + $0xc] sm:$0xf] (!%p191_p2), %v8331_v2  ;;  %7414 = vmatpush3.bf16.msra.mxu1 (!%p191_p2), %v8190_v0  ;;  %7605 = vmatprep.subr.bf16.mxu0 (!%p191_p2), %v8192_v3  ;;  %v8194_v5 = vld [vmem:[%s9907_s3 + $0x108] sm:$0xff] (!%p191_p2)   ;;  %v8196_v6 = vld [vmem:[%s9907_s3 + $0x110] sm:$0xff] (!%p191_p2)  }
   0x8   : > { %383 = vst [vmem:[#allocation2 + $0x10] sm:$0xf] (!%p191_p2), %v8331_v2  ;;  %384 = vst [vmem:[#allocation2 + $0x14] sm:$0x1] (!%p191_p2), %v8331_v2  ;;  %7415 = vmatprep.subr.bf16.mxu1 (!%p191_p2), %v8376_v1  ;;  %7606 = vmatpush3.bf16.msra.mxu0 (!%p191_p2), %v8192_v3  ;;  %v8195_v7 = vld [vmem:[%s9907_s3 + $0x18] sm:$0xff] (!%p191_p2)   ;;  %v8197_v9 = vld [vmem:[%s9907_s3 + $0x20] sm:$0xff] (!%p191_p2)  }
   0x9   : > { %385 = vst [vmem:[#allocation2 + $0x18] sm:$0xf] (!%p191_p2), %v8331_v2  ;;  %386 = vst [vmem:[#allocation2 + $0x1c] sm:$0xf] (!%p191_p2), %v8331_v2  ;;  %7607 = vmatprep.subr.bf16.mxu0 (!%p191_p2), %v8194_v5  ;;  %v8198_v8 = vld [vmem:[%s9907_s3 + $0x118] sm:$0xff] (!%p191_p2)   ;;  %v8200_v10 = vld [vmem:[%s9907_s3 + $0x120] sm:$0xff] (!%p191_p2)  }
   0xa   : > { %387 = vst [vmem:[#allocation2 + $0x20] sm:$0x1] (!%p191_p2), %v8331_v2  ;;  %388 = vst [vmem:[#allocation2 + $0x24] sm:$0xf] (!%p191_p2), %v8331_v2  ;;  %v8199_v12 = vld [vmem:[%s9907_s3 + $0x28] sm:$0xff] (!%p191_p2)   ;;  %v8201_v22 = vld [vmem:[%s9907_s3 + $0x30] sm:$0xff] (!%p191_p2)  }
   0xb   : > { %389 = vst [vmem:[#allocation2 + $0x28] sm:$0xf] (!%p191_p2), %v8331_v2  ;;  %390 = vst [vmem:[#allocation2 + $0x2c] sm:$0x1] (!%p191_p2), %v8331_v2  ;;  %7416 = vmatpush3.bf16.msra.mxu1 (!%p191_p2), %v8376_v1  ;;  %v8426_v15 = vld [vmem:[%s9905_s1] ss:$0 sm:$0xff] (!%p191_p2) }
   0xc   : > { %391 = vst [vmem:[#allocation2 + $0x30] sm:$0xf] (!%p191_p2), %v8331_v2  ;;  %392 = vst [vmem:[#allocation2 + $0x34] sm:$0xf] (!%p191_p2), %v8331_v2  ;;  %7417 = vmatprep.subr.bf16.mxu1 (!%p191_p2), %v8193_v4  ;;  %7608 = vmatpush3.bf16.msra.mxu0 (!%p191_p2), %v8194_v5  ;;  %v8433_v18 = vld [vmem:[%s9906_s2] ss:$0 sm:$0xff] (!%p191_p2) }
   0xd   : > { %393 = vst [vmem:[#allocation2 + $0x38] sm:$0x1] %v8331_v2  ;;  %394 = vst [vmem:[#allocation2 + $0x3c] sm:$0xf] %v8331_v2  ;;  %s9921_s19 = smov (!%p222_p3, %s6725_s19), 1  ;;  %7609 = vmatprep.subr.bf16.mxu0 %v8196_v6  ;;  %v8204_v11 = vld [vmem:[#allocation2] sm:$0xff]  }
   0xe   : > { %395 = vst [vmem:[#allocation2 + $0x40] sm:$0xf] %v8331_v2  ;;  %396 = vst [vmem:[#allocation2 + $0x44] sm:$0x1] %v8331_v2  ;;  %s7163_s11 = sshll.u32 %s9921_s19, 8  ;;  %7429 = vmatprep.mubr.bf16.mxu1 %v8204_v11  ;;  %v8202_v19 = vld [vmem:[%s9907_s3 + $0x128] sm:$0xff]  }
   0xf   : > { %397 = vst [vmem:[#allocation2 + $0x48] sm:$0xf] %v8331_v2  ;;  %398 = vst [vmem:[#allocation2 + $0x4c] sm:$0xf] %v8331_v2  ;;  %7418 = vmatpush3.bf16.msra.mxu1 %v8193_v4  ;;  %s8416_s20 = scalar_lea.vmem %s9904_s0, %s7163_s11  ;;  %v8203_v26 = vld [vmem:[%s9907_s3 + $0x38] sm:$0xff]   ;;  %v8205_v27 = vld [vmem:[%s9907_s3 + $0x130] sm:$0xff]   ;;  %s9857_s26 = scalar_lea.vmem %s9908_s4, %s7163_s11 }
  0x10   : > { %399 = vst [vmem:[#allocation2 + $0x50] sm:$0x1] %v8331_v2  ;;  %400 = vst [vmem:[#allocation2 + $0x54] sm:$0xf] %v8331_v2  ;;  %7419 = vmatprep.subr.bf16.mxu1 %v8195_v7  ;;  %7610 = vmatpush3.bf16.msra.mxu0 %v8196_v6  ;;  %v237_v13 = vld [vmem:[%s8416_s20] sm:$0xff]  ;;  %v238_v14 = vld [vmem:[%s8416_s20 + $0x8] sm:$0xff] }
  0x11   : > { %401 = vst [vmem:[#allocation2 + $0x58] sm:$0xf] %v8331_v2  ;;  %402 = vst [vmem:[#allocation2 + $0x5c] sm:$0x1] %v8331_v2  ;;  %7611 = vmatprep.subr.bf16.mxu0 %v8198_v8  ;;  %v276_v16 = vmul.f32 %v8426_v15, %v237_v13  ;;  %v277_v17 = vmul.f32 %v8426_v15, %v238_v14  ;;  %v239_v25 = vld [vmem:[%s8416_s20 + $0x10] sm:$0xff]  ;;  %vm860_vm1 = vcmask 1040384  }
  0x12   : > { %403 = vst [vmem:[#allocation2 + $0x60] sm:$0xf] %v8331_v2  ;;  %404 = vst [vmem:[#allocation2 + $0x64] sm:$0xf] %v8331_v2  ;;  %v240_v28 = vld [vmem:[%s8416_s20 + $0x18] sm:$0xff]  ;;  %v278_v29 = vmul.f32 %v8426_v15, %v239_v25  ;;  %v241_v34 = vld [vmem:[%s8416_s20 + $0x20] sm:$0xff] }
  0x13   : > { %405 = vst [vmem:[#allocation2 + $0x68] sm:$0x1] %v8331_v2  ;;  %406 = vst [vmem:[#allocation2 + $0x6c] sm:$0xf] %v8331_v2  ;;  %7420 = vmatpush3.bf16.msra.mxu1 %v8195_v7  ;;  %v315_v20 = vadd.f32 %v8433_v18, %v276_v16  ;;  %v316_v21 = vadd.f32 %v8433_v18, %v277_v17  ;;  %vm529_vm2 = vsmask.f32 256  ;;  %v279_v32 = vmul.f32 %v8426_v15, %v240_v28 }
  0x14   : > { %407 = vst [vmem:[#allocation2 + $0x70] sm:$0xf] %v8331_v2  ;;  %408 = vst [vmem:[#allocation2 + $0x74] sm:$0x1] %v8331_v2  ;;  %7421 = vmatprep.subr.bf16.mxu1 %v8197_v9  ;;  %7612 = vmatpush3.bf16.msra.mxu0 %v8198_v8  ;;  %vm530_vm3 = vsmask.f32 4368  ;;  %v317_v33 = vadd.f32 %v8433_v18, %v278_v29  ;;  %v280_v44 = vmul.f32 %v8426_v15, %v241_v34 }
  0x15   : > { %409 = vst [vmem:[#allocation2 + $0x78] sm:$0xf] %v8331_v2  ;;  %410 = vst [vmem:[#allocation2 + $0x7c] sm:$0xf] %v8331_v2  ;;  %7613 = vmatprep.subr.bf16.mxu0 %v8200_v10  ;;  %v347_v23 = vmax.f32 %v315_v20, 0.0  ;;  %v348_v24 = vmax.f32 %v316_v21, 0.0  ;;  %v318_v42 = vadd.f32 %v8433_v18, %v279_v32 }
  0x16   : > { %411 = vst [vmem:[#allocation2 + $0x80] sm:$0x1] %v8331_v2  ;;  %412 = vst [vmem:[#allocation2 + $0x84] sm:$0xf] %v8331_v2  ;;  %vm854_vm4 = vsmask.f32 7938  ;;  %v319_v55 = vadd.f32 %v8433_v18, %v280_v44 }
  0x17   : > { %413 = vst [vmem:[#allocation2 + $0x88] sm:$0xf] %v8331_v2  ;;  %414 = vst [vmem:[#allocation2 + $0x8c] sm:$0x1] %v8331_v2  ;;  %7422 = vmatpush3.bf16.msra.mxu1 %v8197_v9  ;;  %v7165_v30 = vpack.c.bf16 %v347_v23, %v347_v23  ;;  %v7166_v31 = vpack.c.bf16 %v348_v24, %v348_v24  ;;  %v242_v35 = vld [vmem:[%s8416_s20 + $0x28] sm:$0xff]  ;;  %v8208_v41 = vld [vmem:[%s9907_s3 + $0x138] sm:$0xff]  }
  0x18   : > { %415 = vst [vmem:[#allocation2 + $0x90] sm:$0xf] %v8331_v2  ;;  %416 = vst [vmem:[#allocation2 + $0x94] sm:$0xf] %v8331_v2  ;;  %7423 = vmatprep.subr.bf16.mxu1 %v8199_v12  ;;  %7614 = vmatpush3.bf16.msra.mxu0 %v8200_v10  ;;  %v349_v43 = vmax.f32 %v317_v33, 0.0  ;;  %v281_v45 = vmul.f32 %v8426_v15, %v242_v35  ;;  %v8483_v51 = vld [vmem:[%s9907_s3 + $0x40] sm:$0xff]  }
  0x19   : > { %417 = vst [vmem:[#allocation2 + $0x98] sm:$0x1] %v8331_v2  ;;  %418 = vst [vmem:[#allocation2 + $0x9c] sm:$0xf] %v8331_v2  ;;  %7615 = vmatprep.subr.bf16.mxu0 %v8202_v19  ;;  %v533_v36 = vshrl.u32 %v7165_v30, 16  ;;  %v536_v37 = vshll.u32 %v7165_v30, 16 }
  0x1a   : > { %419 = vst [vmem:[#allocation2 + $0xa0] sm:$0xf] %v8331_v2  ;;  %420 = vst [vmem:[#allocation2 + $0xa4] sm:$0x1] %v8331_v2  ;;  %v541_v38 = vshrl.u32 %v7166_v31, 16  ;;  %v544_v39 = vshll.u32 %v7166_v31, 16  ;;  %v7167_v54 = vpack.c.bf16 %v349_v43, %v349_v43  ;;  %v320_v56 = vadd.f32 %v8433_v18, %v281_v45 }
  0x1b   : > { %421 = vst [vmem:[#allocation2 + $0xa8] sm:$0xf] %v8331_v2  ;;  %422 = vst [vmem:[#allocation2 + $0xac] sm:$0xf] %v8331_v2  ;;  %7424 = vmatpush3.bf16.msra.mxu1 %v8199_v12  ;;  %v535_v47 = vrot.slane %v533_v36, 7  ;;  %v350_v53 = vmax.f32 %v318_v42, 0.0 }
  0x1c   : > { %423 = vst [vmem:[#allocation2 + $0xb0] sm:$0x1] %v8331_v2  ;;  %424 = vst [vmem:[#allocation2 + $0xb4] sm:$0xf] %v8331_v2  ;;  %7425 = vmatprep.subr.bf16.mxu1 %v8201_v22  ;;  %7616 = vmatpush3.bf16.msra.mxu0 %v8202_v19  ;;  %v543_v48 = vrot.slane %v541_v38, 7  ;;  %v8490_v61 = vld [vmem:[%s9907_s3 + $0x140] sm:$0xff]  }
  0x1d   : > { %425 = vst [vmem:[#allocation2 + $0xb8] sm:$0xf] %v8331_v2  ;;  %426 = vst [vmem:[#allocation2 + $0xbc] sm:$0x1] %v8331_v2  ;;  %7617 = vmatprep.subr.bf16.mxu0 %v8205_v27  ;;  %v856_v49 = vld [vmem:[#allocation2 + $0xc] sm:$0xf]  ;;  %v538_v57 = vor.u32 %v536_v37, %v535_v47  ;;  %v7168_v63 = vpack.c.bf16 %v350_v53, %v350_v53 }
  0x1e   : > { %427 = vst [vmem:[#allocation2 + $0xc0] sm:$0xf] %v8331_v2  ;;  %428 = vst [vmem:[#allocation2 + $0xc4] sm:$0xf] %v8331_v2  ;;  %v862_v52 = vld [vmem:[#allocation2 + $0x14] sm:$0x1]  ;;  %v546_v59 = vor.u32 %v544_v39, %v543_v48 }
  0x1f   : > { %429 = vst [vmem:[#allocation2 + $0xc8] sm:$0x1] %v8331_v2  ;;  %430 = vst [vmem:[#allocation2 + $0xcc] sm:$0xf] %v8331_v2  ;;  %7426 = vmatpush3.bf16.msra.mxu1 %v8201_v22  ;;  %v539_v58 = vrot.slane %v535_v47, 4  ;;  %v548_v60 = vrot.slane %v543_v48, 4 }
  0x20   : > { %431 = vst [vmem:[#allocation2 + $0xd0] sm:$0xf] %v8331_v2  ;;  %432 = vst [vmem:[#allocation2 + $0xd4] sm:$0x1] %v8331_v2  ;;  %7427 = vmatprep.subr.bf16.mxu1 %v8203_v26  ;;  %7618 = vmatpush3.bf16.msra.mxu0 %v8205_v27  ;;  %v243_v62 = vld [vmem:[%s8416_s20 + $0x30] sm:$0xff]  ;;  %v550_v0 = vshrl.u32 %v7167_v54, 16 }
  0x21   : > { %vm8458_vm5 = vmand %vm860_vm1, %vm529_vm2  ;;  %7619 = vmatprep.subr.bf16.mxu0 %v8208_v41  ;;  %v553_v1 = vshll.u32 %v7167_v54, 16  ;;  %v351_v2 = vmax.f32 %v319_v55, 0.0  ;;  %v244_v3 = vld [vmem:[%s8416_s20 + $0x38] sm:$0xff]  ;;  %v352_v8 = vmax.f32 %v320_v56, 0.0  ;;  %v245_v9 = vld [vmem:[%s8416_s20 + $0x40] sm:$0xff]  ;;  %v558_v11 = vshrl.u32 %v7168_v63, 16 }
  0x22   : > { %vm8470_vm6 = vmor %vm529_vm2, %vm530_vm3  ;;  %v863_v6 = vsel %vm8458_vm5, %v548_v60, %v862_v52  ;;  %v865_v7 = vld [vmem:[#allocation2 + $0x18] sm:$0xf]  ;;  %v552_v10 = vrot.slane %v550_v0, 7  ;;  %v561_v12 = vshll.u32 %v7168_v63, 16  ;;  %v282_v16 = vmul.f32 %v8426_v15, %v243_v62  ;;  %v246_v24 = vld [vmem:[%s8416_s20 + $0x48] sm:$0xff]  ;;  %s6734_s11 = sshll.u32 %s9921_s19, 1 }
  0x23   : > { %vm8476_vm7 = vmand %vm853_vm0, %vm854_vm4  ;;  %7428 = vmatpush3.bf16.msra.mxu1 %v8203_v26  ;;  %v547_v4 = vsel %vm8470_vm6, %v539_v58, %v546_v59  ;;  %864 = vst [vmem:[#allocation2 + $0x14] sm:$0x1] %v863_v6  ;;  %v7169_v13 = vpack.c.bf16 %v351_v2, %v351_v2  ;;  %v7170_v14 = vpack.c.bf16 %v352_v8, %v352_v8  ;;  %vm1403_vm8 = vsmask.f32 3328  ;;  %v869_v25 = vld [vmem:[#allocation2 + $0x20] sm:$0x1]  ;;  %s235_s29 = scalar_lea.vmem %s9909_s5, %s6734_s11 }
  0x24   : > { %v857_v5 = vsel %vm8476_vm7, %v538_v57, %v856_v49  ;;  %859 = vst [vmem:[#allocation2 + $0x10] sm:$0xf] %v547_v4  ;;  %7461 = vmatprep.subr.bf16.mxu1 %v8483_v51  ;;  %7620 = vmatpush3.bf16.msra.mxu0 %v8208_v41  ;;  %v283_v17 = vmul.f32 %v8426_v15, %v244_v3  ;;  %vm1404_vm9 = vsmask.f32 7440  ;;  %v556_v21 = vrot.slane %v552_v10, 4  ;;  %v247_v35 = vld [vmem:[%s8416_s20 + $0x50] sm:$0xff] }
  0x25   : > { %858 = vst [vmem:[#allocation2 + $0xc] sm:$0xf] %v857_v5  ;;  %v284_v19 = vmul.f32 %v8426_v15, %v245_v9  ;;  %v555_v20 = vor.u32 %v553_v1, %v552_v10  ;;  %v560_v22 = vrot.slane %v558_v11, 7  ;;  %7653 = vmatprep.subr.bf16.mxu0 %v8490_v61  ;;  %v567_v23 = vshrl.u32 %v7169_v13, 16  ;;  %v872_v34 = vld [vmem:[#allocation2 + $0x24] sm:$0xf]  ;;  %vm8551_vm10 = vmor %vm1403_vm8, %vm1404_vm9 }
  0x26   : > { %v570_v26 = vshll.u32 %v7169_v13, 16  ;;  %v575_v27 = vshrl.u32 %v7170_v14, 16  ;;  %v578_v28 = vshll.u32 %v7170_v14, 16  ;;  %v321_v29 = vadd.f32 %v8433_v18, %v282_v16  ;;  %v248_v36 = vld [vmem:[%s8416_s20 + $0x58] sm:$0xff]  ;;  %v8212_v47 = vld [vmem:[%s9907_s3 + $0x48] sm:$0xff]   ;;  %v8217_v4 = vld [vmem:[%s9907_s3 + $0x50] sm:$0xff]  }
  0x27   : > { %v563_v30 = vor.u32 %v561_v12, %v560_v22  ;;  %v565_v31 = vrot.slane %v560_v22, 4  ;;  %v866_v32 = vsel %vm8476_vm7, %v555_v20, %v865_v7  ;;  %v569_v33 = vrot.slane %v567_v23, 7  ;;  %v876_v48 = vld [vmem:[#allocation2 + $0x2c] sm:$0x1]  ;;  %v249_v9 = vld [vmem:[%s8416_s20 + $0x60] sm:$0xff] }
  0x28   : > { %867 = vst [vmem:[#allocation2 + $0x18] sm:$0xf] %v866_v32  ;;  %v577_v37 = vrot.slane %v575_v27, 7  ;;  %v322_v38 = vadd.f32 %v8433_v18, %v283_v17  ;;  %v353_v39 = vmax.f32 %v321_v29, 0.0  ;;  %v285_v41 = vmul.f32 %v8426_v15, %v246_v24  ;;  %v250_v10 = vld [vmem:[%s8416_s20 + $0x68] sm:$0xff] }
  0x29   : > { %v564_v42 = vsel %vm8470_vm6, %v556_v21, %v563_v30  ;;  %v870_v43 = vsel %vm8458_vm5, %v565_v31, %v869_v25  ;;  %v572_v44 = vor.u32 %v570_v26, %v569_v33  ;;  %v573_v45 = vrot.slane %v569_v33, 4  ;;  %v8222_v26 = vld [vmem:[%s9907_s3 + $0x58] sm:$0xff]  }
  0x2a   : > { %868 = vst [vmem:[#allocation2 + $0x1c] sm:$0xf] %v564_v42  ;;  %871 = vst [vmem:[#allocation2 + $0x20] sm:$0x1] %v870_v43  ;;  %v580_v52 = vor.u32 %v578_v28, %v577_v37  ;;  %v582_v53 = vrot.slane %v577_v37, 4  ;;  %v8521_v54 = vpack.c.bf16 %v353_v39, %v353_v39  ;;  %v8524_v55 = vadd.f32 %v8433_v18, %v284_v19 }
  0x2b   : > { %v3224_v57 = vld [vmem:[#allocation2 + $0x10] sm:$0xf]  ;;  %v3225_v58 = vld [vmem:[#allocation2 + $0x14] sm:$0x1]  ;;  %v873_v59 = vsel %vm8476_vm7, %v572_v44, %v872_v34  ;;  %v8529_v60 = vadd.f32 %v8433_v18, %v285_v41  ;;  %v286_v62 = vmul.f32 %v8426_v15, %v247_v35  ;;  %v287_v63 = vmul.f32 %v8426_v15, %v248_v36 }
  0x2c   : > { %v8206_v49 = vld [vmem:[#allocation2 + $0xc] sm:$0xff]   ;;  %v3281_v2 = vshll.u32 %v3224_v57, 16  ;;  %v3285_v3 = vshrl.u32 %v3224_v57, 16  ;;  %874 = vst [vmem:[#allocation2 + $0x24] sm:$0xf] %v873_v59  ;;  %v3291_v5 = vshll.u32 %v3225_v58, 16  ;;  %v581_v6 = vsel %vm8470_vm6, %v573_v45, %v580_v52 }
  0x2d   : > { %v3223_v56 = vld [vmem:[#allocation2 + $0xc] sm:$0xf]  ;;  %7430 = vmatmul.mubr.bf16.vlgmr.msra.gmra.mrb[0].mxu1 %v8206_v49  ;;  %v877_v7 = vsel %vm8458_vm5, %v582_v53, %v876_v48  ;;  %v354_v8 = vmax.f32 %v322_v38, 0.0  ;;  %875 = vst [vmem:[#allocation2 + $0x28] sm:$0xf] %v581_v6  ;;  %v584_v19 = vshrl.u32 %v8521_v54, 16  ;;  %v8547_v20 = vadd.f32 %v8433_v18, %v286_v62 }
  0x2e   : > { %v3272_v0 = vshrl.u32 %v3223_v56, 16  ;;  %v3275_v1 = vshll.u32 %v3223_v56, 16  ;;  %7462 = vmatpush3.bf16.msra.mxu1 %v8483_v51  ;;  %v3283_v13 = vrot.slane %v3281_v2, 5  ;;  %v3287_v14 = vrot.slane %v3285_v3, 4  ;;  %878 = vst [vmem:[#allocation2 + $0x2c] sm:$0x1] %v877_v7 }
  0x2f   : > { %7463 = vmatprep.subr.bf16.mxu1 %v8212_v47  ;;  %v3293_v16 = vrot.slane %v3291_v5, 5  ;;  %v3226_v17 = vld [vmem:[#allocation2 + $0x18] sm:$0xf]  ;;  %v8543_v51 = vpack.c.bf16 %v354_v8, %v354_v8  ;;  %v8558_v29 = vrot.slane %v584_v19, 7  ;;  %v8561_v30 = vadd.f32 %v8433_v18, %v287_v63  ;;  %v879_v6 = vld [vmem:[#allocation2 + $0x30] sm:$0xf] }
  0x30   : > { %v3274_v11 = vrot.slane %v3272_v0, 4  ;;  %v3277_v12 = vrot.slane %v3275_v1, 5  ;;  %v3288_v23 = vor.u32 %v3287_v14, %v3283_v13  ;;  %v3296_v24 = vshrl.u32 %v3226_v17, 16  ;;  %v8213_v14 = vld [vmem:[%s9907_s3 + $0x148] sm:$0xff]  }
  0x31   : > { %v3299_v25 = vshll.u32 %v3226_v17, 16  ;;  %v8209_v27 = vld [vmem:[#allocation2 + $0x18] sm:$0xff]   ;;  %v288_v31 = vmul.f32 %v8426_v15, %v249_v9  ;;  %v8565_v32 = vmul.f32 %v8426_v15, %v250_v10  ;;  %v3228_v35 = vld [vmem:[#allocation2 + $0x20] sm:$0x1]  ;;  %v587_v42 = vshll.u32 %v8521_v54, 16 }
  0x32   : > { %v3278_v22 = vor.u32 %v3277_v12, %v3274_v11  ;;  %v3227_v28 = vld [vmem:[#allocation2 + $0x1c] sm:$0xf]  ;;  %7464 = vmatpush3.bf16.msra.mxu1 %v8212_v47  ;;  %v3289_v34 = vrot.slane %v3288_v23, 4  ;;  %v3298_v36 = vrot.slane %v3296_v24, 4  ;;  %7433 = vmatprep.mubr.bf16.mxu1 %v8209_v27  ;;  %v3315_v41 = vshll.u32 %v3228_v35, 16 }
  0x33   : > { %v3301_v37 = vrot.slane %v3299_v25, 5  ;;  %7465 = vmatprep.subr.bf16.mxu1 %v8217_v4  ;;  %v3305_v38 = vshll.u32 %v3227_v28, 16  ;;  %v3309_v39 = vshrl.u32 %v3227_v28, 16  ;;  %v3229_v47 = vld [vmem:[#allocation2 + $0x24] sm:$0xf]  ;;  %v590_v48 = vrot.slane %v8558_v29, 4 }
  0x34   : > { %v3279_v33 = vrot.slane %v3278_v22, 4  ;;  %v3294_v44 = vsel %vm8551_vm10, %v3289_v34, %v3293_v16  ;;  %v3317_v56 = vrot.slane %v3315_v41, 5  ;;  %v8211_v57 = vld [vmem:[#allocation2 + $0x24] sm:$0xff]   ;;  %v3320_v54 = vshrl.u32 %v3229_v47, 16  ;;  %v883_v27 = vld [vmem:[#allocation2 + $0x38] sm:$0x1] }
  0x35   : > { %v3302_v45 = vor.u32 %v3301_v37, %v3298_v36  ;;  %v3307_v52 = vrot.slane %v3305_v38, 5  ;;  %v3311_v53 = vrot.slane %v3309_v39, 4  ;;  %v3230_v59 = vld [vmem:[#allocation2 + $0x28] sm:$0xf]  ;;  %v3231_v62 = vld [vmem:[#allocation2 + $0x2c] sm:$0x1]  ;;  %v589_v63 = vor.u32 %v587_v42, %v8558_v29  ;;  %7434 = vmatmul.mubr.bf16.gmra.mrb[4].mxu1 %v8211_v57 }
  0x36   : > { %v3284_v43 = vsel %vm8551_vm10, %v3279_v33, %v3283_v13  ;;  %7466 = vmatpush3.bf16.msra.mxu1 %v8217_v4  ;;  %v8575_v0 = vadd.f32 %v8433_v18, %v288_v31  ;;  %v3323_v2 = vshll.u32 %v3229_v47, 16  ;;  %v3329_v3 = vshll.u32 %v3230_v59, 16  ;;  %v8227_v28 = vld [vmem:[%s9907_s3 + $0x60] sm:$0xff]  }
  0x37   : > { %v6945_v49 = vcombine.low %v3284_v43, %v3294_v44  ;;  %v3303_v58 = vrot.slane %v3302_v45, 4  ;;  %7467 = vmatprep.subr.bf16.mxu1 %v8222_v26  ;;  %v3312_v1 = vor.u32 %v3311_v53, %v3307_v52  ;;  %v3333_v5 = vshrl.u32 %v3230_v59, 16  ;;  %v251_v44 = vld [vmem:[%s8416_s20 + $0x70] sm:$0xff]  ;;  %v252_v45 = vld [vmem:[%s8416_s20 + $0x78] sm:$0xff] }
  0x38   : > { %v3322_v7 = vrot.slane %v3320_v54, 4  ;;  %v3339_v8 = vshll.u32 %v3231_v62, 16  ;;  %v592_v9 = vshrl.u32 %v8543_v51, 16  ;;  %v3325_v11 = vrot.slane %v3323_v2, 5  ;;  %v886_v53 = vld [vmem:[#allocation2 + $0x3c] sm:$0xf] }
  0x39   : > { %7621 = vmatprep.mubr.bf16.mxu0 %v6945_v49  ;;  %v3308_v4 = vsel %vm8551_vm10, %v3303_v58, %v3307_v52  ;;  %v3313_v10 = vrot.slane %v3312_v1, 4  ;;  %v3331_v12 = vrot.slane %v3329_v3, 5  ;;  %v3335_v13 = vrot.slane %v3333_v5, 4 }
  0x3a   : > { %7468 = vmatpush3.bf16.msra.mxu1 %v8222_v26  ;;  %v3341_v16 = vrot.slane %v3339_v8, 5  ;;  %v594_v17 = vrot.slane %v592_v9, 7  ;;  %v595_v19 = vshll.u32 %v8543_v51, 16  ;;  %v880_v22 = vsel %vm8476_vm7, %v589_v63, %v879_v6 }
  0x3b   : > { %v3318_v23 = vsel %vm8551_vm10, %v3313_v10, %v3317_v56  ;;  %v3326_v24 = vor.u32 %v3325_v11, %v3322_v7  ;;  %v3336_v25 = vor.u32 %v3335_v13, %v3331_v12  ;;  %881 = vst [vmem:[#allocation2 + $0x30] sm:$0xf] %v880_v22  ;;  %v355_v26 = vmax.f32 %v8524_v55, 0.0  ;;  %7469 = vmatprep.subr.bf16.mxu1 %v8227_v28  ;;  %v890_v56 = vld [vmem:[#allocation2 + $0x44] sm:$0x1]  ;;  %v8231_v11 = vld [vmem:[%s9907_s3 + $0x68] sm:$0xff]  }
  0x3c   : > { %v6946_v29 = vcombine.low %v3308_v4, %v3318_v23  ;;  %v597_v31 = vor.u32 %v595_v19, %v594_v17  ;;  %v599_v33 = vrot.slane %v594_v17, 4  ;;  %v356_v51 = vmax.f32 %v8529_v60, 0.0  ;;  %v893_v7 = vld [vmem:[#allocation2 + $0x48] sm:$0xf] }
  0x3d   : > { %v3327_v34 = vrot.slane %v3326_v24, 4  ;;  %v3337_v35 = vrot.slane %v3336_v25, 4  ;;  %v7173_v36 = vpack.c.bf16 %v355_v26, %v355_v26  ;;  %v357_v37 = vmax.f32 %v8547_v20, 0.0 }
  0x3e   : > { %7622 = vmatmul.mubr.bf16.vlgmr.msra.gmra.mrb[0].mxu0 %v6946_v29  ;;  %v598_v55 = vsel %vm8470_vm6, %v590_v48, %v597_v31  ;;  %v884_v38 = vsel %vm8458_vm5, %v599_v33, %v883_v27  ;;  %v7174_v39 = vpack.c.bf16 %v356_v51, %v356_v51  ;;  %v358_v41 = vmax.f32 %v8561_v30, 0.0  ;;  %7470 = vmatpush3.bf16.msra.mxu1 %v8227_v28  ;;  %v8215_v30 = vld [vmem:[%s9907_s3 + $0x150] sm:$0xff]  }
  0x3f   : > { %7654 = vmatpush3.bf16.msra.mxu0 %v8490_v61  ;;  %v3332_v60 = vsel %vm8551_vm10, %v3327_v34, %v3331_v12  ;;  %v3342_v20 = vsel %vm8551_vm10, %v3337_v35, %v3341_v16  ;;  %882 = vst [vmem:[#allocation2 + $0x34] sm:$0xf] %v598_v55  ;;  %885 = vst [vmem:[#allocation2 + $0x38] sm:$0x1] %v884_v38  ;;  %v601_v42 = vshrl.u32 %v7173_v36, 16  ;;  %v604_v43 = vshll.u32 %v7173_v36, 16 }
  0x40   : > { %7655 = vmatprep.subr.bf16.mxu0 %v8213_v14  ;;  %v6947_v47 = vcombine.low %v3332_v60, %v3342_v20  ;;  %v609_v48 = vshrl.u32 %v7174_v39, 16  ;;  %v612_v61 = vshll.u32 %v7174_v39, 16  ;;  %v7175_v49 = vpack.c.bf16 %v357_v37, %v357_v37  ;;  %v897_v27 = vld [vmem:[#allocation2 + $0x50] sm:$0x1]  ;;  %7471 = vmatprep.subr.bf16.mxu1 %v8231_v11  ;;  %v8220_v36 = vld [vmem:[%s9907_s3 + $0x160] sm:$0xff]  }
  0x41   : > { %v603_v52 = vrot.slane %v601_v42, 7  ;;  %v7176_v57 = vpack.c.bf16 %v358_v41, %v358_v41  ;;  %v328_v58 = vadd.f32 %v8433_v18, %v8565_v32  ;;  %v359_v59 = vmax.f32 %v8575_v0, 0.0  ;;  %v8218_v32 = vld [vmem:[%s9907_s3 + $0x158] sm:$0xff]  }
  0x42   : > { %7625 = vmatprep.mubr.bf16.mxu0 %v6947_v47  ;;  %v3232_v62 = vld [vmem:[#allocation2 + $0x30] sm:$0xf]  ;;  %v611_v54 = vrot.slane %v609_v48, 7  ;;  %v618_v63 = vshrl.u32 %v7175_v49, 16  ;;  %v290_v1 = vmul.f32 %v8426_v15, %v251_v44  ;;  %v8614_v2 = vmul.f32 %v8426_v15, %v252_v45  ;;  %7472 = vmatpush3.bf16.msra.mxu1 %v8231_v11  ;;  %v253_v44 = vld [vmem:[%s8416_s20 + $0x80] sm:$0xff] }
  0x43   : > { %7656 = vmatpush3.bf16.msra.mxu0 %v8213_v14  ;;  %v3344_v3 = vshrl.u32 %v3232_v62, 16  ;;  %v3347_v5 = vshll.u32 %v3232_v62, 16  ;;  %v606_v6 = vor.u32 %v604_v43, %v603_v52  ;;  %v607_v4 = vrot.slane %v603_v52, 4  ;;  %v256_v52 = vld [vmem:[%s8416_s20 + $0x98] sm:$0xff] }
  0x44   : > { %7657 = vmatprep.subr.bf16.mxu0 %v8215_v30  ;;  %v614_v0 = vor.u32 %v612_v61, %v611_v54  ;;  %v616_v8 = vrot.slane %v611_v54, 4  ;;  %v620_v9 = vrot.slane %v618_v63, 7  ;;  %v621_v10 = vshll.u32 %v7175_v49, 16  ;;  %v254_v61 = vld [vmem:[%s8416_s20 + $0x88] sm:$0xff]  ;;  %v255_v49 = vld [vmem:[%s8416_s20 + $0x90] sm:$0xff] }
  0x45   : > { %v3346_v12 = vrot.slane %v3344_v3, 4  ;;  %v3349_v13 = vrot.slane %v3347_v5, 5  ;;  %v887_v14 = vsel %vm8476_vm7, %v606_v6, %v886_v53  ;;  %v626_v16 = vshrl.u32 %v7176_v57, 16 }
  0x46   : > { %v8214_v17 = vld [vmem:[#allocation2 + $0x30] sm:$0xff]   ;;  %v615_v22 = vsel %vm8470_vm6, %v607_v4, %v614_v0  ;;  %888 = vst [vmem:[#allocation2 + $0x3c] sm:$0xf] %v887_v14  ;;  %v891_v23 = vsel %vm8458_vm5, %v616_v8, %v890_v56  ;;  %v623_v24 = vor.u32 %v621_v10, %v620_v9  ;;  %v624_v25 = vrot.slane %v620_v9, 4  ;;  %v3234_v26 = vld [vmem:[#allocation2 + $0x38] sm:$0x1] }
  0x47   : > { %v3233_v19 = vld [vmem:[#allocation2 + $0x34] sm:$0xf]  ;;  %v3350_v28 = vor.u32 %v3349_v13, %v3346_v12  ;;  %889 = vst [vmem:[#allocation2 + $0x40] sm:$0xf] %v615_v22  ;;  %7658 = vmatpush3.bf16.msra.mxu0 %v8215_v30  ;;  %892 = vst [vmem:[#allocation2 + $0x44] sm:$0x1] %v891_v23  ;;  %7437 = vmatprep.mubr.bf16.mxu1 %v8214_v17  ;;  %v8633_v42 = vpack.c.bf16 %v359_v59, %v359_v59 }
  0x48   : > { %v3353_v29 = vshll.u32 %v3233_v19, 16  ;;  %v3357_v31 = vshrl.u32 %v3233_v19, 16  ;;  %v628_v33 = vrot.slane %v626_v16, 7  ;;  %v3363_v51 = vshll.u32 %v3234_v26, 16  ;;  %7659 = vmatprep.subr.bf16.mxu0 %v8218_v32  ;;  %v8223_v59 = vld [vmem:[%s9907_s3 + $0x168] sm:$0xff]   ;;  %v8235_v13 = vld [vmem:[%s9907_s3 + $0x70] sm:$0xff]  }
  0x49   : > { %v629_v34 = vshll.u32 %v7176_v57, 16  ;;  %v894_v35 = vsel %vm8476_vm7, %v623_v24, %v893_v7  ;;  %v360_v37 = vmax.f32 %v328_v58, 0.0  ;;  %v3351_v55 = vrot.slane %v3350_v28, 4  ;;  %7473 = vmatprep.subr.bf16.mxu1 %v8235_v13 }
  0x4a   : > { %v3355_v38 = vrot.slane %v3353_v29, 5  ;;  %v3359_v39 = vrot.slane %v3357_v31, 4  ;;  %v633_v41 = vrot.slane %v628_v33, 4  ;;  %895 = vst [vmem:[#allocation2 + $0x48] sm:$0xf] %v894_v35  ;;  %v3365_v60 = vrot.slane %v3363_v51, 5  ;;  %7474 = vmatpush3.bf16.msra.mxu1 %v8235_v13 }
  0x4b   : > { %v631_v20 = vor.u32 %v629_v34, %v628_v33  ;;  %v8635_v43 = vpack.c.bf16 %v360_v37, %v360_v37  ;;  %7660 = vmatpush3.bf16.msra.mxu0 %v8218_v32  ;;  %v8643_v48 = vadd.f32 %v8433_v18, %v290_v1  ;;  %v635_v56 = vshrl.u32 %v8633_v42, 16  ;;  %v8225_v32 = vld [vmem:[%s9907_s3 + $0x170] sm:$0xff]   ;;  %v8228_v31 = vld [vmem:[%s9907_s3 + $0x178] sm:$0xff]  }
  0x4c   : > { %v3356_v45 = vsel %vm8551_vm10, %v3351_v55, %v3355_v38  ;;  %v3360_v47 = vor.u32 %v3359_v39, %v3355_v38  ;;  %v898_v30 = vsel %vm8458_vm5, %v633_v41, %v897_v27  ;;  %7661 = vmatprep.subr.bf16.mxu0 %v8220_v36  ;;  %v638_v57 = vshll.u32 %v8633_v42, 16 }
  0x4d   : > { %v632_v53 = vsel %vm8470_vm6, %v624_v25, %v631_v20  ;;  %899 = vst [vmem:[#allocation2 + $0x50] sm:$0x1] %v898_v30  ;;  %v643_v58 = vshrl.u32 %v8635_v43, 16  ;;  %v3235_v54 = vld [vmem:[#allocation2 + $0x3c] sm:$0xf]  ;;  %v646_v63 = vshll.u32 %v8635_v43, 16  ;;  %v8659_v1 = vadd.f32 %v8433_v18, %v8614_v2 }
  0x4e   : > { %v3361_v62 = vrot.slane %v3360_v47, 4  ;;  %896 = vst [vmem:[#allocation2 + $0x4c] sm:$0xf] %v632_v53  ;;  %v292_v3 = vmul.f32 %v8426_v15, %v253_v44  ;;  %v8216_v5 = vld [vmem:[#allocation2 + $0x3c] sm:$0xff]   ;;  %v3368_v4 = vshrl.u32 %v3235_v54, 16  ;;  %v293_v7 = vmul.f32 %v8426_v15, %v254_v61 }
  0x4f   : > { %v3236_v6 = vld [vmem:[#allocation2 + $0x40] sm:$0xf]  ;;  %v8667_v0 = vmul.f32 %v8426_v15, %v255_v49  ;;  %v8670_v8 = vmul.f32 %v8426_v15, %v256_v52  ;;  %v3237_v9 = vld [vmem:[#allocation2 + $0x44] sm:$0x1]  ;;  %v3371_v10 = vshll.u32 %v3235_v54, 16  ;;  %7662 = vmatpush3.bf16.msra.mxu0 %v8220_v36  ;;  %vm2272_vm11 = vcmask 1042432   ;;  %7438 = vmatmul.mubr.bf16.gmra.mrb[8].mxu1 %v8216_v5 }
  0x50   : > { %v3366_v2 = vsel %vm8551_vm10, %v3361_v62, %v3365_v60  ;;  %v3377_v11 = vshll.u32 %v3236_v6, 16  ;;  %v3381_v12 = vshrl.u32 %v3236_v6, 16  ;;  %vm2273_vm12 = vcmask 1046532   ;;  %7663 = vmatprep.subr.bf16.mxu0 %v8223_v59  ;;  %v900_v60 = vld [vmem:[#allocation2 + $0x54] sm:$0xf] }
  0x51   : > { %v6948_v14 = vcombine.low %v3356_v45, %v3366_v2  ;;  %v3370_v16 = vrot.slane %v3368_v4, 4  ;;  %v3387_v17 = vshll.u32 %v3237_v9, 16  ;;  %v3238_v15 = vld [vmem:[#allocation2 + $0x48] sm:$0xf]  ;;  %v8678_v19 = vadd.f32 %v8433_v18, %v292_v3  ;;  %v904_v20 = vld [vmem:[#allocation2 + $0x5c] sm:$0x1]  ;;  %vm8706_vm13 = vmor %vm2272_vm11, %vm2273_vm12 }
  0x52   : > { %v3373_v22 = vrot.slane %v3371_v10, 5  ;;  %v3379_v23 = vrot.slane %v3377_v11, 5  ;;  %v3383_v24 = vrot.slane %v3381_v12, 4  ;;  %v3392_v25 = vshrl.u32 %v3238_v15, 16  ;;  %v8694_v3 = vld [vmem:[%s9907_s3 + $0x180] sm:$0xff]  }
  0x53   : > { %7626 = vmatmul.mubr.bf16.gmra.mrb[4].mxu0 %v6948_v14  ;;  %v3389_v27 = vrot.slane %v3387_v17, 5  ;;  %v3395_v26 = vshll.u32 %v3238_v15, 16  ;;  %v637_v28 = vrot.slane %v635_v56, 7  ;;  %v645_v29 = vrot.slane %v643_v58, 7  ;;  %v4041_v58 = vld [vmem:[#allocation2 + $0xc] sm:$0xe] }
  0x54   : > { %v3374_v33 = vor.u32 %v3373_v22, %v3370_v16  ;;  %v3384_v51 = vor.u32 %v3383_v24, %v3379_v23  ;;  %v3240_v34 = vld [vmem:[#allocation2 + $0x50] sm:$0x1]  ;;  %v3394_v35 = vrot.slane %v3392_v25, 4  ;;  %7664 = vmatpush3.bf16.msra.mxu0 %v8223_v59  ;;  %v361_v36 = vmax.f32 %v8643_v48, 0.0 }
  0x55   : > { %v8219_v37 = vld [vmem:[#allocation2 + $0x48] sm:$0xff]   ;;  %v3397_v38 = vrot.slane %v3395_v26, 5  ;;  %v640_v39 = vor.u32 %v638_v57, %v637_v28  ;;  %v648_v41 = vor.u32 %v646_v63, %v645_v29  ;;  %7665 = vmatprep.subr.bf16.mxu0 %v8225_v32  ;;  %v332_v42 = vadd.f32 %v8433_v18, %v293_v7  ;;  %v4042_v63 = vld [vmem:[#allocation2 + $0x10] sm:$0xf] }
  0x56   : > { %v3239_v55 = vld [vmem:[#allocation2 + $0x4c] sm:$0xf]  ;;  %v3375_v43 = vrot.slane %v3374_v33, 4  ;;  %v3385_v44 = vrot.slane %v3384_v51, 4  ;;  %7441 = vmatprep.mubr.bf16.mxu1 %v8219_v37  ;;  %v3411_v61 = vshll.u32 %v3240_v34, 16  ;;  %v641_v49 = vrot.slane %v637_v28, 4 }
  0x57   : > { %v3401_v45 = vshll.u32 %v3239_v55, 16  ;;  %v3405_v47 = vshrl.u32 %v3239_v55, 16  ;;  %v3398_v30 = vor.u32 %v3397_v38, %v3394_v35  ;;  %v650_v52 = vrot.slane %v645_v29, 4  ;;  %v907_v29 = vld [vmem:[#allocation2 + $0x60] sm:$0xf] }
  0x58   : > { %v3380_v48 = vsel %vm8551_vm10, %v3375_v43, %v3379_v23  ;;  %v3390_v53 = vsel %vm8551_vm10, %v3385_v44, %v3389_v27  ;;  %7666 = vmatpush3.bf16.msra.mxu0 %v8225_v32  ;;  %v3413_v62 = vrot.slane %v3411_v61, 5  ;;  %v649_v54 = vsel %vm8470_vm6, %v641_v49, %v648_v41  ;;  %v257_v51 = vld [vmem:[%s8416_s20 + $0xa0] sm:$0xff]  ;;  %v911_v35 = vld [vmem:[#allocation2 + $0x68] sm:$0x1] }
  0x59   : > { %v3403_v56 = vrot.slane %v3401_v45, 5  ;;  %v3407_v57 = vrot.slane %v3405_v47, 4  ;;  %v6949_v18 = vcombine.low %v3380_v48, %v3390_v53  ;;  %v3399_v59 = vrot.slane %v3398_v30, 4  ;;  %7667 = vmatprep.subr.bf16.mxu0 %v8228_v31  ;;  %903 = vst [vmem:[#allocation2 + $0x58] sm:$0xf] %v649_v54 }
  0x5a   : > { %v901_v6 = vsel %vm8476_vm7, %v640_v39, %v900_v60  ;;  %v905_v4 = vsel %vm8458_vm5, %v650_v52, %v904_v20  ;;  %v362_v32 = vmax.f32 %v8659_v1, 0.0  ;;  %v7179_v2 = vpack.c.bf16 %v361_v36, %v361_v36  ;;  %v8728_v20 = vld [vmem:[%s9906_s2] ss:$0 sm:$0xff] }
  0x5b   : > { %v3408_v5 = vor.u32 %v3407_v57, %v3403_v56  ;;  %7629 = vmatprep.mubr.bf16.mxu0 %v6949_v18  ;;  %v3404_v7 = vsel %vm8551_vm10, %v3399_v59, %v3403_v56  ;;  %902 = vst [vmem:[#allocation2 + $0x54] sm:$0xf] %v901_v6  ;;  %906 = vst [vmem:[#allocation2 + $0x5c] sm:$0x1] %v905_v4  ;;  %v363_v9 = vmax.f32 %v8678_v19, 0.0  ;;  %v364_v10 = vmax.f32 %v332_v42, 0.0 }
  0x5c   : > { %v7180_v13 = vpack.c.bf16 %v362_v32, %v362_v32  ;;  %7668 = vmatpush3.bf16.msra.mxu0 %v8228_v31  ;;  %v6969_v1 = vrot.slane %v4041_v58, 9  ;;  %v4139_v14 = vrot.slane %v4042_v63, 5  ;;  %v652_v16 = vshrl.u32 %v7179_v2, 16  ;;  %v8239_v19 = vld [vmem:[%s9907_s3 + $0x78] sm:$0xff]   ;;  %v8737_v61 = vld [vmem:[%s9905_s1] ss:$0 sm:$0xff] }
  0x5d   : > { %v3409_v12 = vrot.slane %v3408_v5, 4  ;;  %v655_v17 = vshll.u32 %v7179_v2, 16  ;;  %v7181_v15 = vpack.c.bf16 %v363_v9, %v363_v9  ;;  %v8710_v22 = vpack.c.bf16 %v364_v10, %v364_v10  ;;  %7701 = vmatprep.subr.bf16.mxu0 %v8694_v3  ;;  %7475 = vmatprep.subr.bf16.mxu1 %v8239_v19  ;;  %v4043_v59 = vld [vmem:[#allocation2 + $0x14] sm:$0x1]  ;;  %v914_v6 = vld [vmem:[#allocation2 + $0x6c] sm:$0xf] }
  0x5e   : > { %v660_v24 = vshrl.u32 %v7180_v13, 16  ;;  %v663_v25 = vshll.u32 %v7180_v13, 16  ;;  %v8720_v27 = vsel %vm8706_vm13, %v6969_v1, %v4139_v14  ;;  %v654_v28 = vrot.slane %v652_v16, 7  ;;  %7476 = vmatpush3.bf16.msra.mxu1 %v8239_v19  ;;  %v8749_v4 = vld [vmem:[%s9907_s3 + $0x80] sm:$0xff]   ;;  %v258_v19 = vld [vmem:[%s8416_s20 + $0xa8] sm:$0xff] }
  0x5f   : > { %v3414_v23 = vsel %vm8551_vm10, %v3409_v12, %v3413_v62  ;;  %v669_v31 = vshrl.u32 %v7181_v15, 16  ;;  %v672_v33 = vshll.u32 %v7181_v15, 16  ;;  %v677_v36 = vshrl.u32 %v8710_v22, 16  ;;  %7509 = vmatprep.subr.bf16.mxu1 %v8749_v4 }
  0x60   : > { %v6950_v26 = vcombine.low %v3404_v7, %v3414_v23  ;;  %v662_v34 = vrot.slane %v660_v24, 7  ;;  %v680_v37 = vshll.u32 %v8710_v22, 16  ;;  %v4141_v55 = vrot.slane %v4139_v14, 4  ;;  %v3242_v38 = vld [vmem:[#allocation2 + $0x58] sm:$0xf]  ;;  %v259_v23 = vld [vmem:[%s8416_s20 + $0xb0] sm:$0xff] }
  0x61   : > { %v657_v39 = vor.u32 %v655_v17, %v654_v28  ;;  %v658_v41 = vrot.slane %v654_v28, 4  ;;  %v671_v60 = vrot.slane %v669_v31, 7  ;;  %v333_v42 = vadd.f32 %v8728_v20, %v8667_v0  ;;  %v8753_v14 = vld [vmem:[#allocation2 + $0x18] sm:$0xe]  ;;  %v261_v31 = vld [vmem:[%s8416_s20 + $0xc0] sm:$0xff] }
  0x62   : > { %7630 = vmatmul.mubr.bf16.gmra.mrb[8].mxu0 %v6950_v26  ;;  %v8221_v43 = vld [vmem:[#allocation2 + $0x54] sm:$0xff]   ;;  %v3425_v45 = vshll.u32 %v3242_v38, 16  ;;  %v665_v47 = vor.u32 %v663_v25, %v662_v34  ;;  %v334_v30 = vadd.f32 %v8728_v20, %v8670_v8  ;;  %v296_v49 = vmul.f32 %v8737_v61, %v257_v51  ;;  %v3243_v52 = vld [vmem:[#allocation2 + $0x5c] sm:$0x1] }
  0x63   : > { %v3241_v44 = vld [vmem:[#allocation2 + $0x54] sm:$0xf]  ;;  %v3429_v56 = vshrl.u32 %v3242_v38, 16  ;;  %v667_v57 = vrot.slane %v662_v34, 4  ;;  %7442 = vmatmul.mubr.bf16.gmra.mrb[12].mxu1 %v8221_v43  ;;  %v3435_v58 = vshll.u32 %v3243_v52, 16  ;;  %v908_v8 = vsel %vm8476_vm7, %v657_v39, %v907_v29  ;;  %v260_v29 = vld [vmem:[%s8416_s20 + $0xb8] sm:$0xff] }
  0x64   : > { %v3416_v48 = vshrl.u32 %v3241_v44, 16  ;;  %v3419_v53 = vshll.u32 %v3241_v44, 16  ;;  %v3427_v0 = vrot.slane %v3425_v45, 5  ;;  %v666_v18 = vsel %vm8470_vm6, %v658_v41, %v665_v47  ;;  %909 = vst [vmem:[#allocation2 + $0x60] sm:$0xf] %v908_v8 }
  0x65   : > { %v3431_v63 = vrot.slane %v3429_v56, 4  ;;  %910 = vst [vmem:[#allocation2 + $0x64] sm:$0xf] %v666_v18  ;;  %v912_v5 = vsel %vm8458_vm5, %v667_v57, %v911_v35  ;;  %v3437_v32 = vrot.slane %v3435_v58, 5  ;;  %v674_v7 = vor.u32 %v672_v33, %v671_v60  ;;  %v4045_v8 = vld [vmem:[#allocation2 + $0x1c] sm:$0xf] }
  0x66   : > { %v3418_v62 = vrot.slane %v3416_v48, 4  ;;  %v3421_v54 = vrot.slane %v3419_v53, 5  ;;  %913 = vst [vmem:[#allocation2 + $0x68] sm:$0x1] %v912_v5  ;;  %v675_v2 = vrot.slane %v671_v60, 4  ;;  %v8751_v9 = vrot.slane %v677_v36, 7 }
  0x67   : > { %v3432_v12 = vor.u32 %v3431_v63, %v3427_v0  ;;  %v4142_v13 = vrot.slane %v4043_v59, 5  ;;  %v365_v1 = vmax.f32 %v333_v42, 0.0  ;;  %v915_v15 = vsel %vm8476_vm7, %v674_v7, %v914_v6  ;;  %v262_v36 = vld [vmem:[%s8416_s20 + $0xc8] sm:$0xff]  ;;  %v4046_v5 = vld [vmem:[#allocation2 + $0x20] sm:$0x1] }
  0x68   : > { %v3422_v10 = vor.u32 %v3421_v54, %v3418_v62  ;;  %v682_v16 = vor.u32 %v680_v37, %v8751_v9  ;;  %v684_v17 = vrot.slane %v8751_v9, 4  ;;  %v366_v22 = vmax.f32 %v334_v30, 0.0  ;;  %916 = vst [vmem:[#allocation2 + $0x6c] sm:$0xf] %v915_v15 }
  0x69   : > { %v3433_v25 = vrot.slane %v3432_v12, 4  ;;  %v8764_v26 = vsel %vm8706_vm13, %v4141_v55, %v4142_v13  ;;  %v7183_v28 = vpack.c.bf16 %v365_v1, %v365_v1  ;;  %v6970_v35 = vrot.slane %v8753_v14, 9  ;;  %v4047_v14 = vld [vmem:[#allocation2 + $0x24] sm:$0xe] }
  0x6a   : > { %v3423_v24 = vrot.slane %v3422_v10, 4  ;;  %v683_v33 = vsel %vm8470_vm6, %v675_v2, %v682_v16  ;;  %v7001_v51 = vcombine.low %v8720_v27, %v8764_v26  ;;  %v7184_v34 = vpack.c.bf16 %v366_v22, %v366_v22  ;;  %v4048_v16 = vld [vmem:[#allocation2 + $0x28] sm:$0xf]  ;;  %v928_v27 = vld [vmem:[#allocation2 + $0x84] sm:$0xf] }
  0x6b   : > { %v3438_v55 = vsel %vm8551_vm10, %v3433_v25, %v3437_v32  ;;  %917 = vst [vmem:[#allocation2 + $0x70] sm:$0xf] %v683_v33  ;;  %v686_v38 = vshrl.u32 %v7183_v28, 16  ;;  %v689_v39 = vshll.u32 %v7183_v28, 16  ;;  %v297_v43 = vmul.f32 %v8737_v61, %v258_v19  ;;  %v3244_v45 = vld [vmem:[#allocation2 + $0x60] sm:$0xf] }
  0x6c   : > { %v3428_v37 = vsel %vm8551_vm10, %v3423_v24, %v3427_v0  ;;  %v8224_v60 = vld [vmem:[#allocation2 + $0x60] sm:$0xff]   ;;  %v694_v42 = vshrl.u32 %v7184_v34, 16  ;;  %v335_v44 = vadd.f32 %v8728_v20, %v296_v49  ;;  %v298_v52 = vmul.f32 %v8737_v61, %v259_v23  ;;  %v921_v49 = vld [vmem:[#allocation2 + $0x78] sm:$0xf]  ;;  %v4049_v33 = vld [vmem:[#allocation2 + $0x2c] sm:$0x1] }
  0x6d   : > { %v6951_v41 = vcombine.low %v3428_v37, %v3438_v55  ;;  %v3245_v47 = vld [vmem:[#allocation2 + $0x64] sm:$0xf]  ;;  %v3246_v30 = vld [vmem:[#allocation2 + $0x68] sm:$0x1]  ;;  %v299_v48 = vmul.f32 %v8737_v61, %v260_v29  ;;  %v8783_v53 = vmul.f32 %v8737_v61, %v261_v31  ;;  %v8786_v56 = vmul.f32 %v8737_v61, %v262_v36  ;;  %7445 = vmatprep.mubr.bf16.mxu1 %v8224_v60 }
  0x6e   : > { %v3440_v57 = vshrl.u32 %v3244_v45, 16  ;;  %v3443_v0 = vshll.u32 %v3244_v45, 16  ;;  %v3449_v58 = vshll.u32 %v3245_v47, 16  ;;  %v3453_v18 = vshrl.u32 %v3245_v47, 16 }
  0x6f   : > { %7633 = vmatprep.mubr.bf16.mxu0 %v6951_v41  ;;  %v3459_v59 = vshll.u32 %v3246_v30, 16  ;;  %v688_v62 = vrot.slane %v686_v38, 7  ;;  %v8788_v54 = vrot.slane %v694_v42, 7  ;;  %v697_v63 = vshll.u32 %v7184_v34, 16 }
  0x70   : > { %v3442_v6 = vrot.slane %v3440_v57, 4  ;;  %v3445_v32 = vrot.slane %v3443_v0, 5  ;;  %v3451_v7 = vrot.slane %v3449_v58, 5  ;;  %v3455_v2 = vrot.slane %v3453_v18, 4  ;;  %v4050_v58 = vld [vmem:[#allocation2 + $0x30] sm:$0xe] }
  0x71   : > { %v3461_v10 = vrot.slane %v3459_v59, 5  ;;  %v691_v12 = vor.u32 %v689_v39, %v688_v62  ;;  %v692_v13 = vrot.slane %v688_v62, 4  ;;  %v699_v1 = vor.u32 %v697_v63, %v8788_v54 }
  0x72   : > { %v3446_v15 = vor.u32 %v3445_v32, %v3442_v6  ;;  %v3456_v22 = vor.u32 %v3455_v2, %v3451_v7  ;;  %v8226_v19 = vld [vmem:[#allocation2 + $0x6c] sm:$0xff]   ;;  %v701_v23 = vrot.slane %v8788_v54, 4  ;;  %v4146_v24 = vrot.slane %v4045_v8, 5 }
  0x73   : > { %v700_v25 = vsel %vm8470_vm6, %v692_v13, %v699_v1  ;;  %v922_v28 = vsel %vm8476_vm7, %v691_v12, %v921_v49  ;;  %v4149_v29 = vrot.slane %v4046_v5, 5  ;;  %v336_v31 = vadd.f32 %v8728_v20, %v297_v43  ;;  %7446 = vmatmul.mubr.bf16.gmra.mrb[16].mxu1 %v8226_v19 }
  0x74   : > { %v3447_v34 = vrot.slane %v3446_v15, 4  ;;  %v3457_v36 = vrot.slane %v3456_v22, 4  ;;  %923 = vst [vmem:[#allocation2 + $0x78] sm:$0xf] %v922_v28  ;;  %924 = vst [vmem:[#allocation2 + $0x7c] sm:$0xf] %v700_v25  ;;  %v8799_v37 = vsel %vm8706_vm13, %v6970_v35, %v4146_v24  ;;  %v337_v8 = vadd.f32 %v8728_v20, %v298_v52 }
  0x75   : > { %v4148_v55 = vrot.slane %v4146_v24, 4  ;;  %v367_v38 = vmax.f32 %v335_v44, 0.0  ;;  %v368_v39 = vmax.f32 %v336_v31, 0.0  ;;  %v6971_v41 = vrot.slane %v4047_v14, 9  ;;  %v4051_v44 = vld [vmem:[#allocation2 + $0x34] sm:$0xf] }
  0x76   : > { %v4153_v60 = vrot.slane %v4048_v16, 5  ;;  %v3452_v42 = vsel %vm8551_vm10, %v3447_v34, %v3451_v7  ;;  %v3462_v43 = vsel %vm8551_vm10, %v3457_v36, %v3461_v10  ;;  %v4156_v47 = vrot.slane %v4049_v33, 5  ;;  %v4052_v10 = vld [vmem:[#allocation2 + $0x38] sm:$0x1]  ;;  %v4053_v28 = vld [vmem:[#allocation2 + $0x3c] sm:$0xe] }
  0x77   : > { %v4150_v45 = vsel %vm8706_vm13, %v4148_v55, %v4149_v29  ;;  %v6952_v30 = vcombine.low %v3452_v42, %v3462_v43  ;;  %v7185_v35 = vpack.c.bf16 %v367_v38, %v367_v38  ;;  %v7186_v0 = vpack.c.bf16 %v368_v39, %v368_v39  ;;  %v4054_v34 = vld [vmem:[#allocation2 + $0x40] sm:$0xf]  ;;  %v8236_v38 = vld [vmem:[%s9907_s3 + $0x188] sm:$0xff]  }
  0x78   : > { %v7002_v57 = vcombine.low %v8799_v37, %v4150_v45  ;;  %v4154_v18 = vsel %vm8706_vm13, %v6971_v41, %v4153_v60  ;;  %v4155_v49 = vrot.slane %v4153_v60, 4  ;;  %v338_v59 = vadd.f32 %v8728_v20, %v299_v48  ;;  %v935_v60 = vld [vmem:[#allocation2 + $0x90] sm:$0xf] }
  0x79   : > { %7634 = vmatmul.mubr.bf16.gmra.mrb[12].mxu0 %v6952_v30  ;;  %v703_v62 = vshrl.u32 %v7185_v35, 16  ;;  %v706_v63 = vshll.u32 %v7185_v35, 16  ;;  %v711_v5 = vshrl.u32 %v7186_v0, 16  ;;  %v714_v6 = vshll.u32 %v7186_v0, 16  ;;  %v4055_v30 = vld [vmem:[#allocation2 + $0x44] sm:$0x1] }
  0x7a   : > { %7669 = vmatprep.mubr.bf16.mxu0 %v7001_v51  ;;  %v4157_v32 = vsel %vm8706_vm13, %v4155_v49, %v4156_v47  ;;  %v369_v7 = vmax.f32 %v337_v8, 0.0  ;;  %v370_v2 = vmax.f32 %v338_v59, 0.0  ;;  %v6972_v12 = vrot.slane %v4050_v58, 9  ;;  %v263_v58 = vld [vmem:[%s8416_s20 + $0xd0] sm:$0xff] }
  0x7b   : > { %v8229_v13 = vld [vmem:[#allocation2 + $0x78] sm:$0xff]   ;;  %v705_v52 = vrot.slane %v703_v62, 7  ;;  %v7003_v1 = vcombine.low %v4154_v18, %v4157_v32  ;;  %v339_v48 = vadd.f32 %v8728_v20, %v8783_v53  ;;  %v340_v14 = vadd.f32 %v8728_v20, %v8786_v56  ;;  %v4056_v62 = vld [vmem:[#allocation2 + $0x48] sm:$0xe] }
  0x7c   : > { %v8821_v16 = vrot.slane %v711_v5, 7  ;;  %v7187_v26 = vpack.c.bf16 %v369_v7, %v369_v7  ;;  %v7188_v51 = vpack.c.bf16 %v370_v2, %v370_v2  ;;  %v4160_v15 = vrot.slane %v4051_v44, 5  ;;  %7449 = vmatprep.mubr.bf16.mxu1 %v8229_v13  ;;  %v264_v44 = vld [vmem:[%s8416_s20 + $0xd8] sm:$0xff] }
  0x7d   : > { %v708_v22 = vor.u32 %v706_v63, %v705_v52  ;;  %v709_v19 = vrot.slane %v705_v52, 4  ;;  %v4163_v24 = vrot.slane %v4052_v10, 5  ;;  %v371_v25 = vmax.f32 %v339_v48, 0.0  ;;  %v8240_v63 = vld [vmem:[%s9907_s3 + $0x190] sm:$0xff]  }
  0x7e   : > { %v716_v29 = vor.u32 %v714_v6, %v8821_v16  ;;  %v718_v31 = vrot.slane %v8821_v16, 4  ;;  %v720_v53 = vshrl.u32 %v7187_v26, 16  ;;  %v723_v33 = vshll.u32 %v7187_v26, 16 }
  0x7f   : > { %v929_v56 = vsel %vm8476_vm7, %v708_v22, %v928_v27  ;;  %v728_v36 = vshrl.u32 %v7188_v51, 16  ;;  %v731_v37 = vshll.u32 %v7188_v51, 16  ;;  %v4161_v55 = vsel %vm8706_vm13, %v6972_v12, %v4160_v15  ;;  %v4058_v22 = vld [vmem:[#allocation2 + $0x50] sm:$0x1] }
  0x80   : > { %v717_v39 = vsel %vm8470_vm6, %v709_v19, %v716_v29  ;;  %930 = vst [vmem:[#allocation2 + $0x84] sm:$0xf] %v929_v56  ;;  %v722_v41 = vrot.slane %v720_v53, 7  ;;  %v4162_v42 = vrot.slane %v4160_v15, 4  ;;  %v372_v43 = vmax.f32 %v340_v14, 0.0  ;;  %v265_v19 = vld [vmem:[%s8416_s20 + $0xe0] sm:$0xff] }
  0x81   : > { %7670 = vmatmul.mubr.bf16.vlgmr.msra.gmra.mrb[0].mxu0 %v7002_v57  ;;  %931 = vst [vmem:[#allocation2 + $0x88] sm:$0xf] %v717_v39  ;;  %v8834_v45 = vrot.slane %v728_v36, 7  ;;  %v7189_v47 = vpack.c.bf16 %v371_v25, %v371_v25  ;;  %v6973_v35 = vrot.slane %v4053_v28, 9  ;;  %v4167_v0 = vrot.slane %v4054_v34, 5 }
  0x82   : > { %7702 = vmatpush3.bf16.msra.mxu0 %v8694_v3  ;;  %7673 = vmatprep.mubr.bf16.mxu0 %v7003_v1  ;;  %v725_v18 = vor.u32 %v723_v33, %v722_v41  ;;  %v726_v49 = vrot.slane %v722_v41, 4  ;;  %v4164_v8 = vsel %vm8706_vm13, %v4162_v42, %v4163_v24  ;;  %v7190_v59 = vpack.c.bf16 %v372_v43, %v372_v43  ;;  %v4057_v57 = vld [vmem:[#allocation2 + $0x4c] sm:$0xf]  ;;  %v942_v1 = vld [vmem:[#allocation2 + $0x9c] sm:$0xf] }
  0x83   : > { %v733_v5 = vor.u32 %v731_v37, %v8834_v45  ;;  %v735_v6 = vrot.slane %v8834_v45, 4  ;;  %v7004_v32 = vcombine.low %v4161_v55, %v4164_v8  ;;  %v737_v7 = vshrl.u32 %v7189_v47, 16  ;;  %7703 = vmatprep.subr.bf16.mxu0 %v8236_v38  ;;  %v266_v24 = vld [vmem:[%s8416_s20 + $0xe8] sm:$0xff]  ;;  %v8242_v33 = vld [vmem:[%s9907_s3 + $0x198] sm:$0xff]  }
  0x84   : > { %v936_v3 = vsel %vm8476_vm7, %v725_v18, %v935_v60  ;;  %v740_v2 = vshll.u32 %v7189_v47, 16  ;;  %v745_v10 = vshrl.u32 %v7190_v59, 16  ;;  %v748_v12 = vshll.u32 %v7190_v59, 16  ;;  %v4060_v43 = vld [vmem:[#allocation2 + $0x58] sm:$0xf]  ;;  %v8244_v59 = vld [vmem:[%s9907_s3 + $0x1a0] sm:$0xff]  }
  0x85   : > { %v734_v13 = vsel %vm8470_vm6, %v726_v49, %v733_v5  ;;  %937 = vst [vmem:[#allocation2 + $0x90] sm:$0xf] %v936_v3  ;;  %v739_v52 = vrot.slane %v737_v7, 7  ;;  %v4168_v48 = vsel %vm8706_vm13, %v6973_v35, %v4167_v0  ;;  %v4169_v14 = vrot.slane %v4167_v0, 4  ;;  %v4061_v47 = vld [vmem:[#allocation2 + $0x5c] sm:$0x1] }
  0x86   : > { %938 = vst [vmem:[#allocation2 + $0x94] sm:$0xf] %v734_v13  ;;  %v8852_v27 = vrot.slane %v745_v10, 7  ;;  %7704 = vmatpush3.bf16.msra.mxu0 %v8236_v38  ;;  %v4170_v26 = vrot.slane %v4055_v30, 5  ;;  %v302_v51 = vmul.f32 %v8737_v61, %v263_v58  ;;  %v303_v15 = vmul.f32 %v8737_v61, %v264_v44  ;;  %v4059_v38 = vld [vmem:[#allocation2 + $0x54] sm:$0xe] }
  0x87   : > { %v742_v25 = vor.u32 %v740_v2, %v739_v52  ;;  %v743_v28 = vrot.slane %v739_v52, 4  ;;  %v6974_v29 = vrot.slane %v4056_v62, 9  ;;  %v4174_v53 = vrot.slane %v4057_v57, 5  ;;  %7705 = vmatprep.subr.bf16.mxu0 %v8240_v63 }
  0x88   : > { %v8230_v34 = vld [vmem:[#allocation2 + $0x84] sm:$0xff]   ;;  %v750_v56 = vor.u32 %v748_v12, %v8852_v27  ;;  %v752_v36 = vrot.slane %v8852_v27, 4  ;;  %v4171_v37 = vsel %vm8706_vm13, %v4169_v14, %v4170_v26  ;;  %v341_v55 = vadd.f32 %v8728_v20, %v302_v51 }
  0x89   : > { %7674 = vmatmul.mubr.bf16.gmra.mrb[4].mxu0 %v7004_v32  ;;  %v943_v39 = vsel %vm8476_vm7, %v742_v25, %v942_v1  ;;  %v7005_v41 = vcombine.low %v4168_v48, %v4171_v37  ;;  %v342_v60 = vadd.f32 %v8728_v20, %v303_v15  ;;  %v4175_v42 = vsel %vm8706_vm13, %v6974_v29, %v4174_v53  ;;  %v8246_v48 = vld [vmem:[%s9907_s3 + $0x1a8] sm:$0xff]  }
  0x8a   : > { %7450 = vmatmul.mubr.bf16.gmra.mrb[20].mxu1 %v8230_v34  ;;  %v751_v30 = vsel %vm8470_vm6, %v743_v28, %v750_v56  ;;  %944 = vst [vmem:[#allocation2 + $0x9c] sm:$0xf] %v943_v39  ;;  %v373_v35 = vmax.f32 %v341_v55, 0.0  ;;  %v4176_v0 = vrot.slane %v4174_v53, 4  ;;  %v4177_v58 = vrot.slane %v4058_v22, 5  ;;  %7706 = vmatpush3.bf16.msra.mxu0 %v8240_v63 }
  0x8b   : > { %945 = vst [vmem:[#allocation2 + $0xa0] sm:$0xf] %v751_v30  ;;  %7677 = vmatprep.mubr.bf16.mxu0 %v7005_v41  ;;  %v374_v44 = vmax.f32 %v342_v60, 0.0  ;;  %v304_v18 = vmul.f32 %v8737_v61, %v265_v19  ;;  %v305_v49 = vmul.f32 %v8737_v61, %v266_v24  ;;  %v6975_v8 = vrot.slane %v4059_v38, 9  ;;  %7707 = vmatprep.subr.bf16.mxu0 %v8242_v33  ;;  %v1355_v61 = vld [vmem:[#allocation2] sm:$0xf] }
  0x8c   : > { %v7191_v62 = vpack.c.bf16 %v373_v35, %v373_v35  ;;  %v4178_v57 = vsel %vm8706_vm13, %v4176_v0, %v4177_v58  ;;  %v4181_v5 = vrot.slane %v4060_v43, 5  ;;  %v4184_v32 = vrot.slane %v4061_v47, 5  ;;  %v949_v51 = vld [vmem:[#allocation2 + $0xa8] sm:$0xf]  ;;  %v1356_v24 = vld [vmem:[#allocation2 + $0x4] sm:$0xf] }
  0x8d   : > { %v8233_v63 = vld [vmem:[#allocation2 + $0x90] sm:$0xff]   ;;  %v7192_v7 = vpack.c.bf16 %v374_v44, %v374_v44  ;;  %v7006_v3 = vcombine.low %v4175_v42, %v4178_v57  ;;  %v343_v2 = vadd.f32 %v8728_v20, %v304_v18  ;;  %v344_v10 = vadd.f32 %v8728_v20, %v305_v49  ;;  %v1357_v56 = vld [vmem:[#allocation2 + $0x8] sm:$0x1]  ;;  %v4062_v30 = vld [vmem:[#allocation2 + $0x60] sm:$0xe] }
  0x8e   : > { %v754_v12 = vshrl.u32 %v7191_v62, 16  ;;  %v757_v13 = vshll.u32 %v7191_v62, 16  ;;  %v4182_v52 = vsel %vm8706_vm13, %v6975_v8, %v4181_v5  ;;  %v4183_v1 = vrot.slane %v4181_v5, 4  ;;  %7708 = vmatpush3.bf16.msra.mxu0 %v8242_v33  ;;  %7453 = vmatprep.mubr.bf16.mxu1 %v8233_v63  ;;  %v8248_v35 = vld [vmem:[%s9907_s3 + $0x1b0] sm:$0xff]   ;;  %v4063_v5 = vld [vmem:[#allocation2 + $0x64] sm:$0xf] }
  0x8f   : > { %v762_v14 = vshrl.u32 %v7192_v7, 16  ;;  %v765_v26 = vshll.u32 %v7192_v7, 16  ;;  %v375_v15 = vmax.f32 %v343_v2, 0.0  ;;  %v376_v22 = vmax.f32 %v344_v10, 0.0  ;;  %7709 = vmatprep.subr.bf16.mxu0 %v8244_v59  ;;  %v956_v18 = vld [vmem:[#allocation2 + $0xb4] sm:$0xf] }
  0x90   : > { %v756_v20 = vrot.slane %v754_v12, 7  ;;  %v4185_v19 = vsel %vm8706_vm13, %v4183_v1, %v4184_v32  ;;  %v1407_v25 = vshrl.u32 %v1355_v61, 16  ;;  %v1410_v28 = vshll.u32 %v1355_v61, 16  ;;  %v1358_v32 = vld [vmem:[#allocation2 + $0xc] sm:$0xf] }
  0x91   : > { %v8889_v29 = vrot.slane %v762_v14, 7  ;;  %7678 = vmatmul.mubr.bf16.gmra.mrb[8].mxu0 %v7006_v3  ;;  %v7193_v53 = vpack.c.bf16 %v375_v15, %v375_v15  ;;  %v7194_v33 = vpack.c.bf16 %v376_v22, %v376_v22  ;;  %v7007_v34 = vcombine.low %v4182_v52, %v4185_v19  ;;  %v4064_v2 = vld [vmem:[#allocation2 + $0x68] sm:$0x1]  ;;  %v1359_v1 = vld [vmem:[#allocation2 + $0x10] sm:$0xf]  ;;  %v8250_v14 = vld [vmem:[%s9907_s3 + $0x1b8] sm:$0xff]  }
  0x92   : > { %v8234_v37 = vld [vmem:[#allocation2 + $0x9c] sm:$0xff]   ;;  %v759_v55 = vor.u32 %v757_v13, %v756_v20  ;;  %v760_v38 = vrot.slane %v756_v20, 4  ;;  %v1409_v39 = vrot.slane %v1407_v25, 4  ;;  %v1412_v41 = vrot.slane %v1410_v28, 5  ;;  %7710 = vmatpush3.bf16.msra.mxu0 %v8244_v59  ;;  %v1360_v20 = vld [vmem:[#allocation2 + $0x14] sm:$0x1] }
  0x93   : > { %v767_v60 = vor.u32 %v765_v26, %v8889_v29  ;;  %v769_v42 = vrot.slane %v8889_v29, 4  ;;  %v771_v43 = vshrl.u32 %v7193_v53, 16  ;;  %v774_v47 = vshll.u32 %v7193_v53, 16  ;;  %7681 = vmatprep.mubr.bf16.mxu0 %v7007_v34  ;;  %7711 = vmatprep.subr.bf16.mxu0 %v8246_v48  ;;  %v918_v28 = vld [vmem:[#allocation2 + $0x74] sm:$0x1] }
  0x94   : > { %7454 = vmatmul.mubr.bf16.gmra.mrb[24].mxu1 %v8234_v37  ;;  %v950_v0 = vsel %vm8476_vm7, %v759_v55, %v949_v51  ;;  %v779_v58 = vshrl.u32 %v7194_v33, 16  ;;  %v782_v44 = vshll.u32 %v7194_v33, 16  ;;  %v1413_v49 = vor.u32 %v1412_v41, %v1409_v39  ;;  %v4065_v53 = vld [vmem:[#allocation2 + $0x6c] sm:$0xe]  ;;  %v4066_v55 = vld [vmem:[#allocation2 + $0x70] sm:$0xf] }
  0x95   : > { %v768_v8 = vsel %vm8470_vm6, %v760_v38, %v767_v60  ;;  %951 = vst [vmem:[#allocation2 + $0xa8] sm:$0xf] %v950_v0  ;;  %v773_v59 = vrot.slane %v771_v43, 7  ;;  %v1416_v62 = vshll.u32 %v1356_v24, 16  ;;  %v1420_v57 = vshrl.u32 %v1356_v24, 16 }
  0x96   : > { %952 = vst [vmem:[#allocation2 + $0xac] sm:$0xf] %v768_v8  ;;  %v8900_v63 = vrot.slane %v779_v58, 7  ;;  %v1414_v7 = vrot.slane %v1413_v49, 4  ;;  %v1426_v3 = vshll.u32 %v1357_v56, 16  ;;  %v6976_v10 = vrot.slane %v4062_v30, 9  ;;  %7712 = vmatpush3.bf16.msra.mxu0 %v8246_v48 }
  0x97   : > { %v776_v61 = vor.u32 %v774_v47, %v773_v59  ;;  %v777_v12 = vrot.slane %v773_v59, 4  ;;  %v1418_v13 = vrot.slane %v1416_v62, 5  ;;  %v1422_v52 = vrot.slane %v1420_v57, 4  ;;  %7713 = vmatprep.subr.bf16.mxu0 %v8248_v35  ;;  %v1361_v38 = vld [vmem:[#allocation2 + $0x18] sm:$0xf] }
  0x98   : > { %v784_v26 = vor.u32 %v782_v44, %v8900_v63  ;;  %v786_v51 = vrot.slane %v8900_v63, 4  ;;  %v1428_v15 = vrot.slane %v1426_v3, 5  ;;  %v4188_v22 = vrot.slane %v4063_v5, 5  ;;  %v1362_v47 = vld [vmem:[#allocation2 + $0x1c] sm:$0xf] }
  0x99   : > { %v957_v48 = vsel %vm8476_vm7, %v776_v61, %v956_v18  ;;  %v1419_v19 = vsel %vm8551_vm10, %v1414_v7, %v1418_v13  ;;  %v1423_v24 = vor.u32 %v1422_v52, %v1418_v13  ;;  %v4191_v25 = vrot.slane %v4064_v2, 5  ;;  %v1363_v30 = vld [vmem:[#allocation2 + $0x20] sm:$0x1]  ;;  %v4068_v2 = vld [vmem:[#allocation2 + $0x78] sm:$0xe] }
  0x9a   : > { %v785_v33 = vsel %vm8470_vm6, %v777_v12, %v784_v26  ;;  %958 = vst [vmem:[#allocation2 + $0xb4] sm:$0xf] %v957_v48  ;;  %v4189_v34 = vsel %vm8706_vm13, %v6976_v10, %v4188_v22  ;;  %v4190_v56 = vrot.slane %v4188_v22, 4  ;;  %v1431_v37 = vshrl.u32 %v1358_v32, 16  ;;  %7714 = vmatpush3.bf16.msra.mxu0 %v8248_v35  ;;  %v8254_v35 = vld [vmem:[%s9907_s3 + $0x1c0] sm:$0xff]  }
  0x9b   : > { %959 = vst [vmem:[#allocation2 + $0xb8] sm:$0xf] %v785_v33  ;;  %v1424_v39 = vrot.slane %v1423_v24, 4  ;;  %v1434_v41 = vshll.u32 %v1358_v32, 16  ;;  %v1440_v60 = vshll.u32 %v1359_v1, 16  ;;  %v1444_v43 = vshrl.u32 %v1359_v1, 16  ;;  %7715 = vmatprep.subr.bf16.mxu0 %v8250_v14 }
  0x9c   : > { %v4192_v0 = vsel %vm8706_vm13, %v4190_v56, %v4191_v25  ;;  %v1433_v58 = vrot.slane %v1431_v37, 4  ;;  %v1450_v44 = vshll.u32 %v1360_v20, 16  ;;  %v919_v18 = vsel %vm8458_vm5, %v684_v17, %v918_v28  ;;  %v925_v5 = vld [vmem:[#allocation2 + $0x80] sm:$0x1]  ;;  %v4069_v13 = vld [vmem:[#allocation2 + $0x7c] sm:$0xf] }
  0x9d   : > { %v8237_v49 = vld [vmem:[#allocation2 + $0xa8] sm:$0xff]   ;;  %v1429_v8 = vsel %vm8551_vm10, %v1424_v39, %v1428_v15  ;;  %v7008_v59 = vcombine.low %v4189_v34, %v4192_v0  ;;  %v1436_v62 = vrot.slane %v1434_v41, 5  ;;  %v1442_v57 = vrot.slane %v1440_v60, 5  ;;  %920 = vst [vmem:[#allocation2 + $0x74] sm:$0x1] %v919_v18 }
  0x9e   : > { %v6809_v32 = vcombine.low %v1419_v19, %v1429_v8  ;;  %v1446_v7 = vrot.slane %v1444_v43, 4  ;;  %v1452_v3 = vrot.slane %v1450_v44, 5  ;;  %v6977_v9 = vrot.slane %v4065_v53, 9  ;;  %7716 = vmatpush3.bf16.msra.mxu0 %v8250_v14  ;;  %7457 = vmatprep.mubr.bf16.mxu1 %v8237_v49  ;;  %v1364_v52 = vld [vmem:[#allocation2 + $0x24] sm:$0xf] }
  0x9f   : > { %7682 = vmatmul.mubr.bf16.gmra.mrb[12].mxu0 %v7008_v59  ;;  %v1437_v17 = vor.u32 %v1436_v62, %v1433_v58  ;;  %v4195_v10 = vrot.slane %v4066_v55, 5  ;;  %v1455_v61 = vshrl.u32 %v1361_v38, 16  ;;  %v1458_v12 = vshll.u32 %v1361_v38, 16  ;;  %7749 = vmatprep.subr.bf16.mxu0 %v8254_v35  ;;  %v1365_v38 = vld [vmem:[#allocation2 + $0x28] sm:$0xf] }
  0xa0   : > { %v1447_v1 = vor.u32 %v1446_v7, %v1442_v57  ;;  %v1464_v26 = vshll.u32 %v1362_v47, 16  ;;  %v1468_v15 = vshrl.u32 %v1362_v47, 16  ;;  %v1474_v22 = vshll.u32 %v1363_v30, 16  ;;  %v1366_v47 = vld [vmem:[#allocation2 + $0x2c] sm:$0x1] }
  0xa1   : > { %v1438_v20 = vrot.slane %v1437_v17, 4  ;;  %v4196_v48 = vsel %vm8706_vm13, %v6977_v9, %v4195_v10  ;;  %v4197_v19 = vrot.slane %v4195_v10, 4  ;;  %v1457_v24 = vrot.slane %v1455_v61, 4  ;;  %v932_v44 = vld [vmem:[#allocation2 + $0x8c] sm:$0x1] }
  0xa2   : > { %v8238_v14 = vld [vmem:[#allocation2 + $0xb4] sm:$0xff]   ;;  %v1448_v25 = vrot.slane %v1447_v1, 4  ;;  %v1460_v28 = vrot.slane %v1458_v12, 5  ;;  %v1466_v53 = vrot.slane %v1464_v26, 5  ;;  %v926_v33 = vsel %vm8458_vm5, %v701_v23, %v925_v5  ;;  %v4071_v59 = vld [vmem:[#allocation2 + $0x84] sm:$0xe] }
  0xa3   : > { %v1443_v34 = vsel %vm8551_vm10, %v1438_v20, %v1442_v57  ;;  %v1470_v56 = vrot.slane %v1468_v15, 4  ;;  %v1476_v37 = vrot.slane %v1474_v22, 5  ;;  %927 = vst [vmem:[#allocation2 + $0x80] sm:$0x1] %v926_v33  ;;  %v6978_v55 = vrot.slane %v4068_v2, 9  ;;  %7458 = vmatmul.mubr.bf16.gmra.mrb[28].mxu1 %v8238_v14 }
  0xa4   : > { %v1453_v39 = vsel %vm8551_vm10, %v1448_v25, %v1452_v3  ;;  %v4067_v41 = vld [vmem:[#allocation2 + $0x74] sm:$0x1]  ;;  %v1461_v60 = vor.u32 %v1460_v28, %v1457_v24  ;;  %v4202_v43 = vrot.slane %v4069_v13, 5  ;;  %v1479_v54 = vshrl.u32 %v1364_v52, 16  ;;  %7477 = vmatprep.mubr.bf16.mxu1 %v6809_v32  ;;  %v1367_v62 = vld [vmem:[#allocation2 + $0x30] sm:$0xf] }
  0xa5   : > { %v6810_v30 = vcombine.low %v1443_v34, %v1453_v39  ;;  %v4198_v23 = vrot.slane %v4067_v41, 5  ;;  %v1471_v0 = vor.u32 %v1470_v56, %v1466_v53  ;;  %v1482_v58 = vshll.u32 %v1364_v52, 16  ;;  %v4072_v32 = vld [vmem:[#allocation2 + $0x88] sm:$0xf]  ;;  %v1368_v1 = vld [vmem:[#allocation2 + $0x34] sm:$0xf] }
  0xa6   : > { %v1462_v18 = vrot.slane %v1461_v60, 4  ;;  %v4203_v35 = vsel %vm8706_vm13, %v6978_v55, %v4202_v43  ;;  %v4204_v49 = vrot.slane %v4202_v43, 4  ;;  %v1481_v8 = vrot.slane %v1479_v54, 4  ;;  %v1369_v24 = vld [vmem:[#allocation2 + $0x38] sm:$0x1] }
  0xa7   : > { %v4199_v57 = vsel %vm8706_vm13, %v4197_v19, %v4198_v23  ;;  %v1472_v5 = vrot.slane %v1471_v0, 4  ;;  %v1484_v7 = vrot.slane %v1482_v58, 5  ;;  %v1488_v3 = vshll.u32 %v1365_v38, 16  ;;  %v939_v14 = vld [vmem:[#allocation2 + $0x98] sm:$0x1] }
  0xa8   : > { %v7009_v9 = vcombine.low %v4196_v48, %v4199_v57  ;;  %v1467_v2 = vsel %vm8551_vm10, %v1462_v18, %v1466_v53  ;;  %v1492_v17 = vshrl.u32 %v1365_v38, 16  ;;  %v1498_v10 = vshll.u32 %v1366_v47, 16  ;;  %v8243_v48 = vld [vmem:[%s9907_s3 + $0x88] sm:$0xff]   ;;  %v4074_v33 = vld [vmem:[#allocation2 + $0x90] sm:$0xe] }
  0xa9   : > { %v1477_v61 = vsel %vm8551_vm10, %v1472_v5, %v1476_v37  ;;  %v1485_v12 = vor.u32 %v1484_v7, %v1481_v8  ;;  %v1490_v13 = vrot.slane %v1488_v3, 5  ;;  %v933_v52 = vsel %vm8458_vm5, %v718_v31, %v932_v44  ;;  %v4075_v31 = vld [vmem:[#allocation2 + $0x94] sm:$0xf]  ;;  %v1370_v38 = vld [vmem:[#allocation2 + $0x3c] sm:$0xf] }
  0xaa   : > { %7685 = vmatprep.mubr.bf16.mxu0 %v7009_v9  ;;  %v6811_v26 = vcombine.low %v1467_v2, %v1477_v61  ;;  %v4070_v15 = vld [vmem:[#allocation2 + $0x80] sm:$0x1]  ;;  %v1494_v22 = vrot.slane %v1492_v17, 4  ;;  %v1500_v20 = vrot.slane %v1498_v10, 5  ;;  %934 = vst [vmem:[#allocation2 + $0x8c] sm:$0x1] %v933_v52 }
  0xab   : > { %v6979_v19 = vrot.slane %v4071_v59, 9  ;;  %v4205_v25 = vrot.slane %v4070_v15, 5  ;;  %v1486_v28 = vrot.slane %v1485_v12, 4  ;;  %v4209_v16 = vrot.slane %v4072_v32, 5  ;;  %7478 = vmatmul.mubr.bf16.vlgmr.msra.gmra.mrb[0].mxu1 %v6810_v30  ;;  %v1371_v0 = vld [vmem:[#allocation2 + $0x40] sm:$0xf] }
  0xac   : > { %v1503_v53 = vshrl.u32 %v1367_v62, 16  ;;  %v1495_v34 = vor.u32 %v1494_v22, %v1490_v13  ;;  %v1506_v56 = vshll.u32 %v1367_v62, 16  ;;  %v1512_v37 = vshll.u32 %v1368_v1, 16  ;;  %7510 = vmatpush3.bf16.msra.mxu1 %v8749_v4  ;;  %7481 = vmatprep.mubr.bf16.mxu1 %v6811_v26  ;;  %v8245_v4 = vld [vmem:[%s9907_s3 + $0x90] sm:$0xff]   ;;  %v1372_v57 = vld [vmem:[#allocation2 + $0x44] sm:$0x1] }
  0xad   : > { %v1516_v55 = vshrl.u32 %v1368_v1, 16  ;;  %v4206_v39 = vsel %vm8706_vm13, %v4204_v49, %v4205_v25  ;;  %v1491_v41 = vsel %vm8551_vm10, %v1486_v28, %v1490_v13  ;;  %v4210_v60 = vsel %vm8706_vm13, %v6979_v19, %v4209_v16  ;;  %7511 = vmatprep.subr.bf16.mxu1 %v8243_v48  ;;  %v946_v2 = vld [vmem:[#allocation2 + $0xa4] sm:$0x1]  ;;  %v4077_v61 = vld [vmem:[#allocation2 + $0x9c] sm:$0xe] }
  0xae   : > { %v4211_v43 = vrot.slane %v4209_v16, 4  ;;  %v7010_v47 = vcombine.low %v4203_v35, %v4206_v39  ;;  %v1496_v54 = vrot.slane %v1495_v34, 4  ;;  %v1505_v30 = vrot.slane %v1503_v53, 4  ;;  %v1373_v12 = vld [vmem:[#allocation2 + $0x48] sm:$0xf]  ;;  %v8247_v13 = vld [vmem:[%s9907_s3 + $0x98] sm:$0xff]  }
  0xaf   : > { %v1508_v23 = vrot.slane %v1506_v56, 5  ;;  %v1514_v58 = vrot.slane %v1512_v37, 5  ;;  %v1518_v44 = vrot.slane %v1516_v55, 4  ;;  %v1522_v18 = vshll.u32 %v1369_v24, 16  ;;  %v4078_v24 = vld [vmem:[#allocation2 + $0xa0] sm:$0xf] }
  0xb0   : > { %v940_v49 = vsel %vm8458_vm5, %v735_v6, %v939_v14  ;;  %7686 = vmatmul.mubr.bf16.gmra.mrb[16].mxu0 %v7010_v47  ;;  %v1501_v35 = vsel %vm8551_vm10, %v1496_v54, %v1500_v20  ;;  %v6980_v59 = vrot.slane %v4074_v33, 9  ;;  %v4216_v62 = vrot.slane %v4075_v31, 5  ;;  %7512 = vmatpush3.bf16.msra.mxu1 %v8243_v48  ;;  %v8249_v14 = vld [vmem:[%s9907_s3 + $0xa0] sm:$0xff]   ;;  %v1374_v33 = vld [vmem:[#allocation2 + $0x4c] sm:$0xf] }
  0xb1   : > { %v1509_v8 = vor.u32 %v1508_v23, %v1505_v30  ;;  %941 = vst [vmem:[#allocation2 + $0x98] sm:$0x1] %v940_v49  ;;  %v6812_v5 = vcombine.low %v1491_v41, %v1501_v35  ;;  %v4073_v7 = vld [vmem:[#allocation2 + $0x8c] sm:$0x1]  ;;  %v1519_v3 = vor.u32 %v1518_v44, %v1514_v58  ;;  %v1524_v32 = vrot.slane %v1522_v18, 5  ;;  %7513 = vmatprep.subr.bf16.mxu1 %v8245_v4 }
  0xb2   : > { %v1527_v9 = vshrl.u32 %v1370_v38, 16  ;;  %v4212_v45 = vrot.slane %v4073_v7, 5  ;;  %v8969_v6 = vsel %vm8706_vm13, %v6980_v59, %v4216_v62  ;;  %v4218_v10 = vrot.slane %v4216_v62, 4  ;;  %v1375_v55 = vld [vmem:[#allocation2 + $0x50] sm:$0x1] }
  0xb3   : > { %v1510_v17 = vrot.slane %v1509_v8, 4  ;;  %v1520_v52 = vrot.slane %v1519_v3, 4  ;;  %v1530_v26 = vshll.u32 %v1370_v38, 16  ;;  %v1536_v15 = vshll.u32 %v1371_v0, 16  ;;  %7482 = vmatmul.mubr.bf16.gmra.mrb[4].mxu1 %v6812_v5  ;;  %v953_v47 = vld [vmem:[#allocation2 + $0xb0] sm:$0x1] }
  0xb4   : > { %v1529_v1 = vrot.slane %v1527_v9, 4  ;;  %v4213_v22 = vsel %vm8706_vm13, %v4211_v43, %v4212_v45  ;;  %v1540_v48 = vshrl.u32 %v1371_v0, 16  ;;  %v1546_v19 = vshll.u32 %v1372_v57, 16  ;;  %7514 = vmatpush3.bf16.msra.mxu1 %v8245_v4  ;;  %v4080_v54 = vld [vmem:[#allocation2 + $0xa8] sm:$0xe] }
  0xb5   : > { %v1515_v20 = vsel %vm8551_vm10, %v1510_v17, %v1514_v58  ;;  %v7011_v25 = vcombine.low %v4210_v60, %v4213_v22  ;;  %v1525_v28 = vsel %vm8551_vm10, %v1520_v52, %v1524_v32  ;;  %v1532_v16 = vrot.slane %v1530_v26, 5  ;;  %7515 = vmatprep.subr.bf16.mxu1 %v8247_v13  ;;  %v4081_v27 = vld [vmem:[#allocation2 + $0xac] sm:$0xf]  ;;  %v1376_v49 = vld [vmem:[#allocation2 + $0x54] sm:$0xf] }
  0xb6   : > { %v1538_v53 = vrot.slane %v1536_v15, 5  ;;  %v6813_v31 = vcombine.low %v1515_v20, %v1525_v28  ;;  %v1542_v34 = vrot.slane %v1540_v48, 4  ;;  %v1548_v56 = vrot.slane %v1546_v19, 5  ;;  %v8253_v57 = vld [vmem:[%s9907_s3 + $0xa8] sm:$0xff]   ;;  %v1377_v9 = vld [vmem:[#allocation2 + $0x58] sm:$0xf] }
  0xb7   : > { %v947_v37 = vsel %vm8458_vm5, %v752_v36, %v946_v2  ;;  %7689 = vmatprep.mubr.bf16.mxu0 %v7011_v25  ;;  %v1533_v39 = vor.u32 %v1532_v16, %v1529_v1  ;;  %v6981_v41 = vrot.slane %v4077_v61, 9  ;;  %v4223_v60 = vrot.slane %v4078_v24, 5  ;;  %v1378_v61 = vld [vmem:[#allocation2 + $0x5c] sm:$0x1]  ;;  %v8257_v26 = vld [vmem:[%s9907_s3 + $0xb0] sm:$0xff]  }
  0xb8   : > { %v4076_v38 = vld [vmem:[#allocation2 + $0x98] sm:$0x1]  ;;  %948 = vst [vmem:[#allocation2 + $0xa4] sm:$0x1] %v947_v37  ;;  %v1551_v43 = vshrl.u32 %v1373_v12, 16  ;;  %7485 = vmatprep.mubr.bf16.mxu1 %v6813_v31  ;;  %v1543_v23 = vor.u32 %v1542_v34, %v1538_v53  ;;  %v1554_v0 = vshll.u32 %v1373_v12, 16  ;;  %7516 = vmatpush3.bf16.msra.mxu1 %v8247_v13  ;;  %v954_v17 = vsel %vm8458_vm5, %v769_v42, %v953_v47 }
  0xb9   : > { %v4219_v30 = vrot.slane %v4076_v38, 5  ;;  %v1560_v4 = vshll.u32 %v1374_v33, 16  ;;  %v1534_v58 = vrot.slane %v1533_v39, 4  ;;  %v8989_v36 = vsel %vm8706_vm13, %v6981_v41, %v4223_v60  ;;  %7517 = vmatprep.subr.bf16.mxu1 %v8249_v14  ;;  %955 = vst [vmem:[#allocation2 + $0xb0] sm:$0x1] %v954_v17 }
  0xba   : > { %v4225_v44 = vrot.slane %v4223_v60, 4  ;;  %v1553_v18 = vrot.slane %v1551_v43, 4  ;;  %v1544_v8 = vrot.slane %v1543_v23, 4  ;;  %v1556_v59 = vrot.slane %v1554_v0, 5  ;;  %v960_v1 = vld [vmem:[#allocation2 + $0xbc] sm:$0x1] }
  0xbb   : > { %v4220_v35 = vsel %vm8706_vm13, %v4218_v10, %v4219_v30  ;;  %v1562_v62 = vrot.slane %v1560_v4, 5  ;;  %v1539_v7 = vsel %vm8551_vm10, %v1534_v58, %v1538_v53  ;;  %v1564_v3 = vshrl.u32 %v1374_v33, 16  ;;  %v4083_v28 = vld [vmem:[#allocation2 + $0xb4] sm:$0xe]  ;;  %v4084_v34 = vld [vmem:[#allocation2 + $0xb8] sm:$0xf] }
  0xbc   : > { %v7012_v5 = vcombine.low %v8969_v6, %v4220_v35  ;;  %v1570_v32 = vshll.u32 %v1375_v55, 16  ;;  %v1549_v2 = vsel %vm8551_vm10, %v1544_v8, %v1548_v56  ;;  %v1557_v45 = vor.u32 %v1556_v59, %v1553_v18  ;;  %7518 = vmatpush3.bf16.msra.mxu1 %v8249_v14  ;;  %v1379_v14 = vld [vmem:[#allocation2 + $0x60] sm:$0xf]  ;;  %v1380_v39 = vld [vmem:[#allocation2 + $0x64] sm:$0xf]  ;;  %v8261_v30 = vld [vmem:[%s9907_s3 + $0xb8] sm:$0xff]  }
  0xbd   : > { %v6982_v10 = vrot.slane %v4080_v54, 9  ;;  %v6814_v12 = vcombine.low %v1539_v7, %v1549_v2  ;;  %v1566_v6 = vrot.slane %v1564_v3, 4  ;;  %v4230_v52 = vrot.slane %v4081_v27, 5  ;;  %7519 = vmatprep.subr.bf16.mxu1 %v8253_v57  ;;  %v1381_v54 = vld [vmem:[#allocation2 + $0x68] sm:$0x1]  ;;  %v267_v59 = vld [vmem:[%s8416_s20 + $0xf0] sm:$0xff] }
  0xbe   : > { %7690 = vmatmul.mubr.bf16.gmra.mrb[20].mxu0 %v7012_v5  ;;  %v1572_v13 = vrot.slane %v1570_v32, 5  ;;  %v1558_v22 = vrot.slane %v1557_v45, 4  ;;  %v1575_v29 = vshrl.u32 %v1376_v49, 16  ;;  %v1578_v20 = vshll.u32 %v1376_v49, 16  ;;  %v9035_v32 = vld [vmem:[%s9907_s3 + $0xc0] sm:$0xff]  }
  0xbf   : > { %v4079_v15 = vld [vmem:[#allocation2 + $0xa4] sm:$0x1]  ;;  %v1584_v48 = vshll.u32 %v1377_v9, 16  ;;  %7486 = vmatmul.mubr.bf16.gmra.mrb[8].mxu1 %v6814_v12  ;;  %v1567_v19 = vor.u32 %v1566_v6, %v1562_v62  ;;  %v9010_v24 = vsel %vm8706_vm13, %v6982_v10, %v4230_v52  ;;  %v4232_v25 = vrot.slane %v4230_v52, 4  ;;  %v1382_v10 = vld [vmem:[#allocation2 + $0x6c] sm:$0xf] }
  0xc0   : > { %v4226_v42 = vrot.slane %v4079_v15, 5  ;;  %v1563_v16 = vsel %vm8551_vm10, %v1558_v22, %v1562_v62  ;;  %v1577_v53 = vrot.slane %v1575_v29, 4  ;;  %v1580_v33 = vrot.slane %v1578_v20, 5  ;;  %7520 = vmatpush3.bf16.msra.mxu1 %v8253_v57  ;;  %v4082_v58 = vld [vmem:[#allocation2 + $0xb0] sm:$0x1]  ;;  %v268_v62 = vld [vmem:[%s8416_s20 + $0xf8] sm:$0xff] }
  0xc1   : > { %v1586_v31 = vrot.slane %v1584_v48, 5  ;;  %v1568_v37 = vrot.slane %v1567_v19, 4  ;;  %v1588_v55 = vshrl.u32 %v1377_v9, 16  ;;  %v1594_v38 = vshll.u32 %v1378_v61, 16  ;;  %7521 = vmatprep.subr.bf16.mxu1 %v8257_v26  ;;  %v8313_v19 = vld [vmem:[%s9906_s2] ss:$0 sm:$0xff] }
  0xc2   : > { %v4227_v56 = vsel %vm8706_vm13, %v4225_v44, %v4226_v42  ;;  %v1581_v60 = vor.u32 %v1580_v33, %v1577_v53  ;;  %v961_v43 = vsel %vm8458_vm5, %v786_v51, %v960_v1  ;;  %v6983_v47 = vrot.slane %v4083_v28, 9  ;;  %v1383_v1 = vld [vmem:[#allocation2 + $0x70] sm:$0xf] }
  0xc3   : > { %v7013_v41 = vcombine.low %v8989_v36, %v4227_v56  ;;  %v1573_v23 = vsel %vm8551_vm10, %v1568_v37, %v1572_v13  ;;  %v1590_v0 = vrot.slane %v1588_v55, 4  ;;  %v1596_v4 = vrot.slane %v1594_v38, 5  ;;  %962 = vst [vmem:[#allocation2 + $0xbc] sm:$0x1] %v961_v43  ;;  %v8312_v13 = vld [vmem:[%s9905_s1] ss:$0 sm:$0xff] }
  0xc4   : > { %v4237_v27 = vrot.slane %v4084_v34, 5  ;;  %v6815_v63 = vcombine.low %v1563_v16, %v1573_v23  ;;  %v1582_v51 = vrot.slane %v1581_v60, 4  ;;  %v1599_v36 = vshrl.u32 %v1379_v14, 16  ;;  %7522 = vmatpush3.bf16.msra.mxu1 %v8257_v26  ;;  %v1384_v34 = vld [vmem:[#allocation2 + $0x74] sm:$0x1] }
  0xc5   : > { %7693 = vmatprep.mubr.bf16.mxu0 %v7013_v41  ;;  %v1602_v44 = vshll.u32 %v1379_v14, 16  ;;  %v4233_v18 = vrot.slane %v4082_v58, 5  ;;  %v1591_v49 = vor.u32 %v1590_v0, %v1586_v31  ;;  %v1608_v3 = vshll.u32 %v1380_v39, 16  ;;  %7523 = vmatprep.subr.bf16.mxu1 %v8261_v30  ;;  %v1385_v60 = vld [vmem:[#allocation2 + $0x78] sm:$0xf] }
  0xc6   : > { %v4238_v35 = vsel %vm8706_vm13, %v6983_v47, %v4237_v27  ;;  %v4239_v8 = vrot.slane %v4237_v27, 4  ;;  %7489 = vmatprep.mubr.bf16.mxu1 %v6815_v63  ;;  %v1587_v57 = vsel %vm8551_vm10, %v1582_v51, %v1586_v31  ;;  %v1601_v5 = vrot.slane %v1599_v36, 4  ;;  %v1386_v23 = vld [vmem:[#allocation2 + $0x7c] sm:$0xf] }
  0xc7   : > { %v1604_v7 = vrot.slane %v1602_v44, 5  ;;  %v4234_v9 = vsel %vm8706_vm13, %v4232_v25, %v4233_v18  ;;  %v1592_v2 = vrot.slane %v1591_v49, 4  ;;  %v1612_v45 = vshrl.u32 %v1380_v39, 16 }
  0xc8   : > { %v1618_v17 = vshll.u32 %v1381_v54, 16  ;;  %v7014_v61 = vcombine.low %v9010_v24, %v4234_v9  ;;  %v1610_v6 = vrot.slane %v1608_v3, 5  ;;  %v306_v52 = vmul.f32 %v8312_v13, %v267_v59  ;;  %7524 = vmatpush3.bf16.msra.mxu1 %v8261_v30 }
  0xc9   : > { %v1605_v12 = vor.u32 %v1604_v7, %v1601_v5  ;;  %v1597_v26 = vsel %vm8551_vm10, %v1592_v2, %v1596_v4  ;;  %v1614_v15 = vrot.slane %v1612_v45, 4  ;;  %v307_v29 = vmul.f32 %v8312_v13, %v268_v62  ;;  %7557 = vmatprep.subr.bf16.mxu1 %v9035_v32  ;;  %v1387_v45 = vld [vmem:[#allocation2 + $0x80] sm:$0x1] }
  0xca   : > { %v1620_v22 = vrot.slane %v1618_v17, 5  ;;  %7694 = vmatmul.mubr.bf16.gmra.mrb[24].mxu0 %v7014_v61  ;;  %v6816_v20 = vcombine.low %v1587_v57, %v1597_v26  ;;  %v4085_v48 = vld [vmem:[#allocation2 + $0xbc] sm:$0x1]  ;;  %v345_v24 = vadd.f32 %v8313_v19, %v306_v52  ;;  %v1623_v25 = vshrl.u32 %v1382_v10, 16  ;;  %v967_v57 = vld [vmem:[#allocation2 + $0xc8] sm:$0x1] }
  0xcb   : > { %v1606_v42 = vrot.slane %v1605_v12, 4  ;;  %v4240_v28 = vrot.slane %v4085_v48, 5  ;;  %v1615_v14 = vor.u32 %v1614_v15, %v1610_v6  ;;  %v346_v16 = vadd.f32 %v8313_v19, %v307_v29  ;;  %v1388_v61 = vld [vmem:[#allocation2 + $0x84] sm:$0xf]  ;;  %v1389_v19 = vld [vmem:[#allocation2 + $0x88] sm:$0xf] }
  0xcc   : > { %v1626_v53 = vshll.u32 %v1382_v10, 16  ;;  %7490 = vmatmul.mubr.bf16.gmra.mrb[12].mxu1 %v6816_v20  ;;  %v377_v31 = vmax.f32 %v345_v24, 0.0  ;;  %v1625_v56 = vrot.slane %v1623_v25, 4  ;;  %v1632_v37 = vshll.u32 %v1383_v1, 16  ;;  %v1390_v24 = vld [vmem:[#allocation2 + $0x8c] sm:$0x1] }
  0xcd   : > { %v1611_v33 = vsel %vm8551_vm10, %v1606_v42, %v1610_v6  ;;  %v4241_v55 = vsel %vm8706_vm13, %v4239_v8, %v4240_v28  ;;  %v1616_v38 = vrot.slane %v1615_v14, 4  ;;  %v378_v39 = vmax.f32 %v346_v16, 0.0  ;;  %v963_v8 = vld [vmem:[#allocation2 + $0xc0] sm:$0xf] }
  0xce   : > { %v1628_v41 = vrot.slane %v1626_v53, 5  ;;  %v7015_v43 = vcombine.low %v4238_v35, %v4241_v55  ;;  %v7195_v47 = vpack.c.bf16 %v377_v31, %v377_v31  ;;  %v1634_v54 = vrot.slane %v1632_v37, 5  ;;  %v1391_v53 = vld [vmem:[#allocation2 + $0x90] sm:$0xf] }
  0xcf   : > { %v1636_v30 = vshrl.u32 %v1383_v1, 16  ;;  %v1621_v0 = vsel %vm8551_vm10, %v1616_v38, %v1620_v22  ;;  %v7196_v4 = vpack.c.bf16 %v378_v39, %v378_v39  ;;  %v1642_v63 = vshll.u32 %v1384_v34, 16  ;;  %v1393_v39 = vld [vmem:[#allocation2 + $0x98] sm:$0x1] }
  0xd0   : > { %v1629_v27 = vor.u32 %v1628_v41, %v1625_v56  ;;  %7697 = vmatprep.mubr.bf16.mxu0 %v7015_v43  ;;  %v6817_v58 = vcombine.low %v1611_v33, %v1621_v0  ;;  %v788_v51 = vshrl.u32 %v7195_v47, 16  ;;  %v791_v36 = vshll.u32 %v7195_v47, 16  ;;  %v1392_v56 = vld [vmem:[#allocation2 + $0x94] sm:$0xf]  ;;  %v1394_v41 = vld [vmem:[#allocation2 + $0x9c] sm:$0xf] }
  0xd1   : > { %v1638_v44 = vrot.slane %v1636_v30, 4  ;;  %v796_v18 = vshrl.u32 %v7196_v4, 16  ;;  %v799_v49 = vshll.u32 %v7196_v4, 16  ;;  %v1644_v35 = vrot.slane %v1642_v63, 5 }
  0xd2   : > { %v1630_v59 = vrot.slane %v1629_v27, 4  ;;  %7493 = vmatprep.mubr.bf16.mxu1 %v6817_v58  ;;  %v790_v62 = vrot.slane %v788_v51, 7  ;;  %v1647_v7 = vshrl.u32 %v1385_v60, 16  ;;  %v1650_v3 = vshll.u32 %v1385_v60, 16 }
  0xd3   : > { %v1639_v5 = vor.u32 %v1638_v44, %v1634_v54  ;;  %v798_v9 = vrot.slane %v796_v18, 7  ;;  %v1656_v17 = vshll.u32 %v1386_v23, 16  ;;  %v1660_v10 = vshrl.u32 %v1386_v23, 16 }
  0xd4   : > { %v1635_v2 = vsel %vm8551_vm10, %v1630_v59, %v1634_v54  ;;  %v793_v12 = vor.u32 %v791_v36, %v790_v62  ;;  %v794_v6 = vrot.slane %v790_v62, 4  ;;  %v1649_v52 = vrot.slane %v1647_v7, 4 }
  0xd5   : > { %v1640_v13 = vrot.slane %v1639_v5, 4  ;;  %v801_v1 = vor.u32 %v799_v49, %v798_v9  ;;  %v803_v26 = vrot.slane %v798_v9, 4  ;;  %v1652_v15 = vrot.slane %v1650_v3, 5 }
  0xd6   : > { %v1658_v22 = vrot.slane %v1656_v17, 5  ;;  %v964_v29 = vsel %vm8476_vm7, %v793_v12, %v963_v8  ;;  %v1662_v48 = vrot.slane %v1660_v10, 4  ;;  %v1666_v42 = vshll.u32 %v1387_v45, 16  ;;  %v1395_v10 = vld [vmem:[#allocation2 + $0xa0] sm:$0xf] }
  0xd7   : > { %v1645_v20 = vsel %vm8551_vm10, %v1640_v13, %v1644_v35  ;;  %v802_v25 = vsel %vm8470_vm6, %v794_v6, %v801_v1  ;;  %965 = vst [vmem:[#allocation2 + $0xc0] sm:$0xf] %v964_v29  ;;  %v968_v28 = vsel %vm8458_vm5, %v803_v26, %v967_v57  ;;  %v1653_v16 = vor.u32 %v1652_v15, %v1649_v52  ;;  %v1396_v52 = vld [vmem:[#allocation2 + $0xa4] sm:$0x1]  ;;  %v1397_v1 = vld [vmem:[#allocation2 + $0xa8] sm:$0xf] }
  0xd8   : > { %v6818_v14 = vcombine.low %v1635_v2, %v1645_v20  ;;  %966 = vst [vmem:[#allocation2 + $0xc4] sm:$0xf] %v802_v25  ;;  %969 = vst [vmem:[#allocation2 + $0xc8] sm:$0x1] %v968_v28  ;;  %v1663_v50 = vor.u32 %v1662_v48, %v1658_v22  ;;  %v1668_v33 = vrot.slane %v1666_v42, 5  ;;  %v1671_v31 = vshrl.u32 %v1388_v61, 16 }
  0xd9   : > { %v1674_v34 = vshll.u32 %v1388_v61, 16  ;;  %v1654_v37 = vrot.slane %v1653_v16, 4  ;;  %v1680_v55 = vshll.u32 %v1389_v19, 16  ;;  %v1684_v38 = vshrl.u32 %v1389_v19, 16  ;;  %v1398_v20 = vld [vmem:[#allocation2 + $0xac] sm:$0xf] }
  0xda   : > { %7494 = vmatmul.mubr.bf16.gmra.mrb[16].mxu1 %v6818_v14  ;;  %v1690_v46 = vshll.u32 %v1390_v24, 16  ;;  %v1664_v60 = vrot.slane %v1663_v50, 4  ;;  %v1673_v40 = vrot.slane %v1671_v31, 4  ;;  %v1695_v47 = vshrl.u32 %v1391_v53, 16  ;;  %v8251_v48 = vld [vmem:[#allocation2 + $0x18] sm:$0xff]  }
  0xdb   : > { %v1676_v43 = vrot.slane %v1674_v34, 5  ;;  %v1659_v54 = vsel %vm8551_vm10, %v1654_v37, %v1658_v22  ;;  %v1682_v30 = vrot.slane %v1680_v55, 5  ;;  %v1686_v23 = vrot.slane %v1684_v38, 4  ;;  %v1399_v50 = vld [vmem:[#allocation2 + $0xb0] sm:$0x1] }
  0xdc   : > { %v1692_v0 = vrot.slane %v1690_v46, 5  ;;  %v1669_v4 = vsel %vm8551_vm10, %v1664_v60, %v1668_v33  ;;  %v1697_v63 = vrot.slane %v1695_v47, 4  ;;  %v1698_v58 = vshll.u32 %v1391_v53, 16 }
  0xdd   : > { %v1677_v27 = vor.u32 %v1676_v43, %v1673_v40  ;;  %v6819_v51 = vcombine.low %v1659_v54, %v1669_v4  ;;  %v1687_v36 = vor.u32 %v1686_v23, %v1682_v30  ;;  %v1704_v44 = vshll.u32 %v1392_v56, 16  ;;  %v1400_v43 = vld [vmem:[#allocation2 + $0xb4] sm:$0xf] }
  0xde   : > { %v1708_v18 = vshrl.u32 %v1392_v56, 16  ;;  %v4086_v49 = vld [vmem:[#allocation2 + $0xc0] sm:$0xe]  ;;  %v1700_v59 = vrot.slane %v1698_v58, 5  ;;  %v1714_v35 = vshll.u32 %v1393_v39, 16  ;;  %v1719_v62 = vshrl.u32 %v1394_v41, 16 }
  0xdf   : > { %v1678_v8 = vrot.slane %v1677_v27, 4  ;;  %v4087_v57 = vld [vmem:[#allocation2 + $0xc4] sm:$0xf]  ;;  %v4088_v5 = vld [vmem:[#allocation2 + $0xc8] sm:$0x1]  ;;  %v6984_v7 = vrot.slane %v4086_v49, 9  ;;  %7497 = vmatprep.mubr.bf16.mxu1 %v6819_v51 }
  0xe0   : > { %v1688_v3 = vrot.slane %v1687_v36, 4  ;;  %v4244_v9 = vrot.slane %v4087_v57, 5  ;;  %v4247_v2 = vrot.slane %v4088_v5, 5  ;;  %v1701_v17 = vor.u32 %v1700_v59, %v1697_v63  ;;  %v2176_v51 = vld [vmem:[#allocation2] sm:$0xe]  ;;  %v8252_v36 = vld [vmem:[#allocation2 + $0x24] sm:$0xff]  }
  0xe1   : > { %v1683_v45 = vsel %vm8551_vm10, %v1678_v8, %v1682_v30  ;;  %v1706_v12 = vrot.slane %v1704_v44, 5  ;;  %v1710_v6 = vrot.slane %v1708_v18, 4  ;;  %v1716_v13 = vrot.slane %v1714_v35, 5  ;;  %v2177_v59 = vld [vmem:[#allocation2 + $0x4] sm:$0xf] }
  0xe2   : > { %v1693_v61 = vsel %vm8551_vm10, %v1688_v3, %v1692_v0  ;;  %v4245_v26 = vsel %vm8706_vm13, %v6984_v7, %v4244_v9  ;;  %v4246_v15 = vrot.slane %v4244_v9, 4  ;;  %v1702_v29 = vrot.slane %v1701_v17, 4  ;;  %v1401_v0 = vld [vmem:[#allocation2 + $0xb8] sm:$0xf]  ;;  %v1402_v5 = vld [vmem:[#allocation2 + $0xbc] sm:$0x1] }
  0xe3   : > { %v6820_v22 = vcombine.low %v1683_v45, %v1693_v61  ;;  %v1711_v42 = vor.u32 %v1710_v6, %v1706_v12  ;;  %v1721_v19 = vrot.slane %v1719_v62, 4  ;;  %v1722_v24 = vshll.u32 %v1394_v41, 16  ;;  %v2178_v3 = vld [vmem:[#allocation2 + $0x8] sm:$0x1]  ;;  %v8255_v9 = vld [vmem:[#allocation2 + $0x30] sm:$0xff]  }
  0xe4   : > { %v1728_v25 = vshll.u32 %v1395_v10, 16  ;;  %v4248_v28 = vsel %vm8706_vm13, %v4246_v15, %v4247_v2  ;;  %v1707_v14 = vsel %vm8551_vm10, %v1702_v29, %v1706_v12  ;;  %v1732_v16 = vshrl.u32 %v1395_v10, 16  ;;  %v9085_v61 = vld [vmem:[#allocation2 + $0xc] sm:$0xe]  ;;  %v9087_v12 = vld [vmem:[#allocation2 + $0x10] sm:$0xf] }
  0xe5   : > { %7498 = vmatmul.mubr.bf16.gmra.mrb[20].mxu1 %v6820_v22  ;;  %v1738_v53 = vshll.u32 %v1396_v52, 16  ;;  %v7016_v33 = vcombine.low %v4245_v26, %v4248_v28  ;;  %v1712_v31 = vrot.slane %v1711_v42, 4  ;;  %v1724_v34 = vrot.slane %v1722_v24, 5  ;;  %v2181_v15 = vld [vmem:[#allocation2 + $0x14] sm:$0x1] }
  0xe6   : > { %v1730_v56 = vrot.slane %v1728_v25, 5  ;;  %v1734_v37 = vrot.slane %v1732_v16, 4  ;;  %v1743_v38 = vshrl.u32 %v1397_v1, 16  ;;  %v1746_v46 = vshll.u32 %v1397_v1, 16  ;;  %v2182_v22 = vld [vmem:[#allocation2 + $0x18] sm:$0xe] }
  0xe7   : > { %v1740_v55 = vrot.slane %v1738_v53, 5  ;;  %7698 = vmatmul.mubr.bf16.gmra.mrb[28].mxu0 %v7016_v33  ;;  %v1717_v39 = vsel %vm8551_vm10, %v1712_v31, %v1716_v13  ;;  %v1725_v41 = vor.u32 %v1724_v34, %v1721_v19  ;;  %v1752_v60 = vshll.u32 %v1398_v20, 16  ;;  %v8258_v13 = vld [vmem:[%s9907_s3 + $0x1c8] sm:$0xff]   ;;  %v2183_v29 = vld [vmem:[#allocation2 + $0x1c] sm:$0xf]  ;;  %v8314_v16 = vld [vmem:[%s9907_s3 + $0x1c0] sm:$0xff]  }
  0xe8   : > { %v1756_v40 = vshrl.u32 %v1398_v20, 16  ;;  %7717 = vmatprep.mubr.bf16.mxu0 %v8251_v48  ;;  %v6821_v47 = vcombine.low %v1707_v14, %v1717_v39  ;;  %v1735_v54 = vor.u32 %v1734_v37, %v1730_v56  ;;  %v1745_v30 = vrot.slane %v1743_v38, 4  ;;  %v8256_v31 = vld [vmem:[#allocation2 + $0x3c] sm:$0xff]   ;;  %v8259_v39 = vld [vmem:[#allocation2 + $0x48] sm:$0xff]  }
  0xe9   : > { %v1748_v23 = vrot.slane %v1746_v46, 5  ;;  %v1726_v4 = vrot.slane %v1725_v41, 4  ;;  %v1754_v27 = vrot.slane %v1752_v60, 5  ;;  %v1762_v58 = vshll.u32 %v1399_v50, 16  ;;  %v2184_v46 = vld [vmem:[#allocation2 + $0x20] sm:$0x1] }
  0xea   : > { %v1758_v63 = vrot.slane %v1756_v40, 4  ;;  %7501 = vmatprep.mubr.bf16.mxu1 %v6821_v47  ;;  %v1736_v44 = vrot.slane %v1735_v54, 4  ;;  %v1767_v49 = vshrl.u32 %v1400_v43, 16  ;;  %v1770_v8 = vshll.u32 %v1400_v43, 16  ;;  %v2185_v47 = vld [vmem:[#allocation2 + $0x24] sm:$0xe] }
  0xeb   : > { %v1749_v18 = vor.u32 %v1748_v23, %v1745_v30  ;;  %v1731_v35 = vsel %vm8551_vm10, %v1726_v4, %v1730_v56  ;;  %v1764_v57 = vrot.slane %v1762_v58, 5  ;;  %v1776_v7 = vshll.u32 %v1401_v0, 16  ;;  %v8262_v56 = vld [vmem:[%s9907_s3 + $0x1d0] sm:$0xff]   ;;  %v2186_v54 = vld [vmem:[#allocation2 + $0x28] sm:$0xf] }
  0xec   : > { %v1759_v62 = vor.u32 %v1758_v63, %v1754_v27  ;;  %v1741_v2 = vsel %vm8551_vm10, %v1736_v44, %v1740_v55  ;;  %v1769_v17 = vrot.slane %v1767_v49, 4  ;;  %v1772_v10 = vrot.slane %v1770_v8, 5  ;;  %v2187_v58 = vld [vmem:[#allocation2 + $0x2c] sm:$0x1]  ;;  %v2188_v8 = vld [vmem:[#allocation2 + $0x30] sm:$0xe] }
  0xed   : > { %v1750_v45 = vrot.slane %v1749_v18, 4  ;;  %v6822_v6 = vcombine.low %v1731_v35, %v1741_v2  ;;  %v1778_v1 = vrot.slane %v1776_v7, 5  ;;  %v1780_v26 = vshrl.u32 %v1401_v0, 16  ;;  %v8266_v18 = vld [vmem:[%s9907_s3 + $0x1d8] sm:$0xff]   ;;  %v9115_v35 = vld [vmem:[#allocation2 + $0x40] sm:$0xf] }
  0xee   : > { %v1760_v52 = vrot.slane %v1759_v62, 4  ;;  %v1773_v48 = vor.u32 %v1772_v10, %v1769_v17  ;;  %v1786_v42 = vshll.u32 %v1402_v5, 16  ;;  %v6833_v19 = vrot.slane %v2176_v51, 9  ;;  %v2189_v51 = vld [vmem:[#allocation2 + $0x34] sm:$0xf] }
  0xef   : > { %v1755_v20 = vsel %vm8551_vm10, %v1750_v45, %v1754_v27  ;;  %7718 = vmatmul.mubr.bf16.vlgmr.msra.gmra.mrb[0].mxu0 %v8252_v36  ;;  %7502 = vmatmul.mubr.bf16.gmra.mrb[24].mxu1 %v6822_v6  ;;  %v1782_v25 = vrot.slane %v1780_v26, 4  ;;  %v2277_v28 = vrot.slane %v2177_v59, 5  ;;  %v2280_v14 = vrot.slane %v2178_v3, 5  ;;  %v2190_v59 = vld [vmem:[#allocation2 + $0x38] sm:$0x1]  ;;  %v8270_v26 = vld [vmem:[%s9907_s3 + $0x1e0] sm:$0xff]  }
  0xf0   : > { %v1765_v24 = vsel %vm8551_vm10, %v1760_v52, %v1764_v57  ;;  %7750 = vmatpush3.bf16.msra.mxu0 %v8314_v16  ;;  %7721 = vmatprep.mubr.bf16.mxu0 %v8255_v9  ;;  %v1774_v50 = vrot.slane %v1773_v48, 4  ;;  %v1788_v33 = vrot.slane %v1786_v42, 5  ;;  %v6834_v55 = vrot.slane %v9085_v61, 9  ;;  %v9117_v57 = vld [vmem:[#allocation2 + $0x4c] sm:$0xf]  ;;  %v8260_v48 = vld [vmem:[#allocation2 + $0x54] sm:$0xff]  }
  0xf1   : > { %v6823_v53 = vcombine.low %v1755_v20, %v1765_v24  ;;  %7751 = vmatprep.subr.bf16.mxu0 %v8258_v13  ;;  %v1783_v34 = vor.u32 %v1782_v25, %v1778_v1  ;;  %v2279_v37 = vrot.slane %v2277_v28, 4  ;;  %v2284_v38 = vrot.slane %v9087_v12, 5  ;;  %v2191_v2 = vld [vmem:[#allocation2 + $0x3c] sm:$0xe]  ;;  %v2193_v12 = vld [vmem:[#allocation2 + $0x44] sm:$0x1] }
  0xf2   : > { %v2278_v41 = vsel %vm8706_vm13, %v6833_v19, %v2277_v28  ;;  %v2287_v60 = vrot.slane %v2181_v15, 5  ;;  %v6835_v40 = vrot.slane %v2182_v22, 9  ;;  %v2291_v43 = vrot.slane %v2183_v29, 5  ;;  %v2196_v20 = vld [vmem:[#allocation2 + $0x50] sm:$0x1]  ;;  %v8263_v42 = vld [vmem:[#allocation2 + $0x60] sm:$0xff]  }
  0xf3   : > { %7505 = vmatprep.mubr.bf16.mxu1 %v6823_v53  ;;  %v1779_v30 = vsel %vm8551_vm10, %v1774_v50, %v1778_v1  ;;  %v1784_v23 = vrot.slane %v1783_v34, 4  ;;  %v2281_v0 = vsel %vm8706_vm13, %v2279_v37, %v2280_v14  ;;  %v2286_v4 = vrot.slane %v2284_v38, 4  ;;  %v2198_v1 = vld [vmem:[#allocation2 + $0x58] sm:$0xf]  ;;  %v2197_v28 = vld [vmem:[#allocation2 + $0x54] sm:$0xe] }
  0xf4   : > { %7752 = vmatpush3.bf16.msra.mxu0 %v8258_v13  ;;  %v2293_v27 = vrot.slane %v2291_v43, 4  ;;  %v2294_v63 = vrot.slane %v2184_v46, 5  ;;  %v6865_v44 = vcombine.low %v2278_v41, %v2281_v0  ;;  %v2298_v49 = vrot.slane %v2186_v54, 5  ;;  %v2194_v13 = vld [vmem:[#allocation2 + $0x48] sm:$0xe] }
  0xf5   : > { %v1789_v36 = vsel %vm8551_vm10, %v1784_v23, %v1788_v33  ;;  %7753 = vmatprep.subr.bf16.mxu0 %v8262_v56  ;;  %v2285_v5 = vsel %vm8706_vm13, %v6834_v55, %v2284_v38  ;;  %v2288_v7 = vsel %vm8706_vm13, %v2286_v4, %v2287_v60  ;;  %v9125_v3 = vsel %vm8706_vm13, %v6835_v40, %v2291_v43  ;;  %v8269_v16 = vld [vmem:[%s9907_s3 + $0xc8] sm:$0xff]   ;;  %v2199_v33 = vld [vmem:[#allocation2 + $0x5c] sm:$0x1]  ;;  %v5086_v38 = vld [vmem:[#allocation2 + $0x18] sm:$0xf] }
  0xf6   : > { %v6824_v62 = vcombine.low %v1779_v30, %v1789_v36  ;;  %v6836_v9 = vrot.slane %v2185_v47, 9  ;;  %v2295_v45 = vsel %vm8706_vm13, %v2293_v27, %v2294_v63  ;;  %v2300_v17 = vrot.slane %v2298_v49, 4  ;;  %v8274_v41 = vld [vmem:[%s9907_s3 + $0x1e8] sm:$0xff]   ;;  %v9157_v40 = vld [vmem:[#allocation2 + $0x60] sm:$0xe] }
  0xf7   : > { %7722 = vmatmul.mubr.bf16.gmra.mrb[4].mxu0 %v8256_v31  ;;  %v2301_v10 = vrot.slane %v2187_v58, 5  ;;  %v2305_v61 = vrot.slane %v2189_v51, 5  ;;  %v2312_v6 = vrot.slane %v9115_v35, 5  ;;  %v2319_v52 = vrot.slane %v9117_v57, 5  ;;  %v9159_v43 = vld [vmem:[#allocation2 + $0x64] sm:$0xf] }
  0xf8   : > { %7725 = vmatprep.mubr.bf16.mxu0 %v8259_v39  ;;  %7506 = vmatmul.mubr.bf16.gmra.mrb[28].mxu1 %v6824_v62  ;;  %v6837_v15 = vrot.slane %v2188_v8, 9  ;;  %v2308_v29 = vrot.slane %v2190_v59, 5  ;;  %v6866_v19 = vcombine.low %v2285_v5, %v2288_v7  ;;  %v6867_v24 = vcombine.low %v9125_v3, %v2295_v45  ;;  %v9163_v23 = vld [vmem:[#allocation2 + $0x68] sm:$0x1]  ;;  %v9165_v0 = vld [vmem:[#allocation2 + $0x6c] sm:$0xe] }
  0xf9   : > { %7754 = vmatpush3.bf16.msra.mxu0 %v8262_v56  ;;  %7525 = vmatprep.mubr.bf16.mxu1 %v6865_v44  ;;  %v2307_v22 = vrot.slane %v2305_v61, 4  ;;  %v9137_v25 = vsel %vm8706_vm13, %v6836_v9, %v2298_v49  ;;  %v9141_v14 = vsel %vm8706_vm13, %v2300_v17, %v2301_v10  ;;  %v6838_v53 = vrot.slane %v2191_v2, 9  ;;  %v9167_v4 = vld [vmem:[#allocation2 + $0x70] sm:$0xf]  ;;  %v5087_v27 = vld [vmem:[#allocation2 + $0x1c] sm:$0xf] }
  0xfa   : > { %7755 = vmatprep.subr.bf16.mxu0 %v8266_v18  ;;  %v6839_v50 = vrot.slane %v2194_v13, 9  ;;  %v2326_v31 = vrot.slane %v2198_v1, 5  ;;  %v2314_v34 = vrot.slane %v2312_v6, 4  ;;  %v2315_v56 = vrot.slane %v2193_v12, 5  ;;  %v9177_v51 = vld [vmem:[#allocation2 + $0x74] sm:$0x1] }
  0xfb   : > { %v2321_v37 = vrot.slane %v2319_v52, 4  ;;  %v2322_v55 = vrot.slane %v2196_v20, 5  ;;  %v9148_v46 = vsel %vm8706_vm13, %v6837_v15, %v2305_v61  ;;  %v9152_v39 = vsel %vm8706_vm13, %v2307_v22, %v2308_v29  ;;  %v9191_v62 = vld [vmem:[#allocation2 + $0x20] sm:$0x1]  ;;  %v8278_v2 = vld [vmem:[%s9907_s3 + $0x1f0] sm:$0xff]   ;;  %v8267_v12 = vld [vmem:[#allocation2 + $0x78] sm:$0xff]  }
  0xfc   : > { %v6840_v60 = vrot.slane %v2197_v28, 9  ;;  %v6868_v47 = vcombine.low %v9137_v25, %v9141_v14  ;;  %v2328_v54 = vrot.slane %v2326_v31, 4  ;;  %v2329_v30 = vrot.slane %v2199_v33, 5  ;;  %v5089_v61 = vld [vmem:[#allocation2 + $0x24] sm:$0xf] }
  0xfd   : > { %7756 = vmatpush3.bf16.msra.mxu0 %v8266_v18  ;;  %v9171_v63 = vsel %vm8706_vm13, %v6838_v53, %v2312_v6  ;;  %v9175_v58 = vsel %vm8706_vm13, %v6839_v50, %v2319_v52  ;;  %v5135_v36 = vshrl.u32 %v5086_v38, 16  ;;  %v5138_v44 = vshll.u32 %v5086_v38, 16  ;;  %v8264_v18 = vld [vmem:[#allocation2 + $0x6c] sm:$0xff]   ;;  %v8277_v52 = vld [vmem:[%s9907_s3 + $0xd8] sm:$0xff]   ;;  %v5090_v15 = vld [vmem:[#allocation2 + $0x28] sm:$0xf] }
  0xfe   : > { %7757 = vmatprep.subr.bf16.mxu0 %v8270_v26  ;;  %v6869_v49 = vcombine.low %v9148_v46, %v9152_v39  ;;  %v9184_v8 = vsel %vm8706_vm13, %v2314_v34, %v2315_v56  ;;  %v9188_v59 = vsel %vm8706_vm13, %v2321_v37, %v2322_v55  ;;  %v2333_v35 = vrot.slane %v9159_v43, 5  ;;  %v9235_v56 = vld [vmem:[#allocation2 + $0x80] sm:$0x1]  ;;  %v5091_v37 = vld [vmem:[#allocation2 + $0x2c] sm:$0x1] }
  0xff   : > { %7726 = vmatmul.mubr.bf16.gmra.mrb[8].mxu0 %v8260_v48  ;;  %v9198_v57 = vsel %vm8706_vm13, %v6840_v60, %v2326_v31  ;;  %v6841_v5 = vrot.slane %v9157_v40, 9  ;;  %v2340_v7 = vrot.slane %v9167_v4, 5  ;;  %v5144_v3 = vshll.u32 %v5087_v27, 16  ;;  %v2210_v60 = vld [vmem:[#allocation2 + $0x88] sm:$0xf]  ;;  %v8281_v25 = vld [vmem:[%s9907_s3 + $0xe0] sm:$0xff]  }
 0x100   : > { %7729 = vmatprep.mubr.bf16.mxu0 %v8263_v42  ;;  %7526 = vmatmul.mubr.bf16.vlgmr.msra.gmra.mrb[0].mxu1 %v6866_v19  ;;  %v9204_v9 = vsel %vm8706_vm13, %v2328_v54, %v2329_v30  ;;  %v5137_v45 = vrot.slane %v5135_v36, 4  ;;  %v5140_v17 = vrot.slane %v5138_v44, 5  ;;  %v5148_v10 = vshrl.u32 %v5087_v27, 16  ;;  %v9221_v42 = vld [vmem:[#allocation2 + $0x7c] sm:$0xf]  ;;  %v8268_v40 = vld [vmem:[#allocation2 + $0x84] sm:$0xff]  }
 0x101   : > { %7558 = vmatpush3.bf16.msra.mxu1 %v9035_v32  ;;  %7529 = vmatprep.mubr.bf16.mxu1 %v6867_v24  ;;  %v8273_v32 = vld [vmem:[%s9907_s3 + $0xd0] sm:$0xff]   ;;  %v6870_v6 = vcombine.low %v9171_v63, %v9184_v8  ;;  %v6871_v13 = vcombine.low %v9175_v58, %v9188_v59  ;;  %v2336_v1 = vrot.slane %v9163_v23, 5  ;;  %v2335_v22 = vrot.slane %v2333_v35, 4  ;;  %v8282_v24 = vld [vmem:[%s9907_s3 + $0x1f8] sm:$0xff]   ;;  %v2209_v30 = vld [vmem:[#allocation2 + $0x84] sm:$0xe] }
 0x102   : > { %7559 = vmatprep.subr.bf16.mxu1 %v8269_v16  ;;  %7758 = vmatpush3.bf16.msra.mxu0 %v8270_v26  ;;  %v6842_v26 = vrot.slane %v9165_v0, 9  ;;  %v2343_v29 = vrot.slane %v9177_v51, 5  ;;  %v9219_v20 = vrot.slane %v5144_v3, 5  ;;  %v5150_v48 = vrot.slane %v5148_v10, 4  ;;  %v5092_v23 = vld [vmem:[#allocation2 + $0x30] sm:$0xf] }
 0x103   : > { %7759 = vmatprep.subr.bf16.mxu0 %v8274_v41  ;;  %v6872_v19 = vcombine.low %v9198_v57, %v9204_v9  ;;  %v5154_v28 = vshll.u32 %v9191_v62, 16  ;;  %v5159_v53 = vshrl.u32 %v5089_v61, 16  ;;  %v5162_v50 = vshll.u32 %v5089_v61, 16  ;;  %v8271_v0 = vld [vmem:[#allocation2 + $0x90] sm:$0xff]   ;;  %v9261_v44 = vld [vmem:[%s9907_s3 + $0x200] sm:$0xff]  }
 0x104   : > { %v9233_v33 = vsel %vm8706_vm13, %v6841_v5, %v2333_v35  ;;  %v2342_v31 = vrot.slane %v2340_v7, 4  ;;  %v5141_v34 = vor.u32 %v5140_v17, %v5137_v45  ;;  %v5168_v55 = vshll.u32 %v5090_v15, 16  ;;  %v8283_v45 = vld [vmem:[%s9907_s3 + $0xe8] sm:$0xff]  }
 0x105   : > { %7560 = vmatpush3.bf16.msra.mxu1 %v8269_v16  ;;  %v9229_v16 = vld [vmem:[#allocation2 + $0x78] sm:$0xe]  ;;  %v2347_v38 = vrot.slane %v9221_v42, 5  ;;  %v5161_v46 = vrot.slane %v5159_v53, 4  ;;  %v5164_v39 = vrot.slane %v5162_v50, 5  ;;  %v9243_v43 = vsel %vm8706_vm13, %v2335_v22, %v2336_v1 }
 0x106   : > { %7561 = vmatprep.subr.bf16.mxu1 %v8273_v32  ;;  %7760 = vmatpush3.bf16.msra.mxu0 %v8274_v41  ;;  %v5172_v41 = vshrl.u32 %v5090_v15, 16  ;;  %v9247_v54 = vsel %vm8706_vm13, %v6842_v26, %v2340_v7  ;;  %v5151_v14 = vor.u32 %v5150_v48, %v9219_v20  ;;  %v9255_v4 = vrot.slane %v5154_v28, 5  ;;  %v5095_v53 = vld [vmem:[#allocation2 + $0x3c] sm:$0xf] }
 0x107   : > { %7730 = vmatmul.mubr.bf16.gmra.mrb[12].mxu0 %v8264_v18  ;;  %7761 = vmatprep.subr.bf16.mxu0 %v8278_v2  ;;  %v6843_v27 = vrot.slane %v9229_v16, 9  ;;  %v5165_v51 = vor.u32 %v5164_v39, %v5161_v46  ;;  %v5093_v18 = vld [vmem:[#allocation2 + $0x34] sm:$0xf]  ;;  %v2350_v35 = vrot.slane %v9235_v56, 5  ;;  %v5178_v62 = vshll.u32 %v5091_v37, 16 }
 0x108   : > { %7733 = vmatprep.mubr.bf16.mxu0 %v8267_v12  ;;  %7530 = vmatmul.mubr.bf16.gmra.mrb[4].mxu1 %v6868_v47  ;;  %v9253_v47 = vrot.slane %v5168_v55, 5  ;;  %v5174_v36 = vrot.slane %v5172_v41, 4  ;;  %v2354_v5 = vrot.slane %v2210_v60, 5  ;;  %v9268_v7 = vsel %vm8706_vm13, %v2342_v31, %v2343_v29  ;;  %v5094_v31 = vld [vmem:[#allocation2 + $0x38] sm:$0x1]  ;;  %v8285_v55 = vld [vmem:[%s9907_s3 + $0xf0] sm:$0xff]  }
 0x109   : > { %7533 = vmatprep.mubr.bf16.mxu1 %v6869_v49  ;;  %7562 = vmatpush3.bf16.msra.mxu1 %v8273_v32  ;;  %v9263_v49 = vrot.slane %v5141_v34, 4  ;;  %v2211_v32 = vld [vmem:[#allocation2 + $0x8c] sm:$0x1]  ;;  %v2349_v3 = vrot.slane %v2347_v38, 4  ;;  %v5183_v17 = vshrl.u32 %v5092_v23, 16  ;;  %v5152_v10 = vrot.slane %v5151_v14, 4 }
 0x10a   : > { %7563 = vmatprep.subr.bf16.mxu1 %v8277_v52  ;;  %7762 = vmatpush3.bf16.msra.mxu0 %v8278_v2  ;;  %v5175_v2 = vor.u32 %v5174_v36, %v9253_v47  ;;  %v6844_v61 = vrot.slane %v2209_v30, 9  ;;  %v5186_v12 = vshll.u32 %v5092_v23, 16  ;;  %v5192_v1 = vshll.u32 %v5093_v18, 16  ;;  %v5096_v34 = vld [vmem:[#allocation2 + $0x40] sm:$0xf] }
 0x10b   : > { %7763 = vmatprep.subr.bf16.mxu0 %v8282_v24  ;;  %v5166_v26 = vrot.slane %v5165_v51, 4  ;;  %v2356_v15 = vrot.slane %v2354_v5, 4  ;;  %v2357_v22 = vrot.slane %v2211_v32, 5  ;;  %v5196_v29 = vshrl.u32 %v5093_v18, 16  ;;  %v2213_v56 = vld [vmem:[#allocation2 + $0x94] sm:$0xf] }
 0x10c   : > { %v5176_v48 = vrot.slane %v5175_v2, 4  ;;  %v5180_v42 = vrot.slane %v5178_v62, 5  ;;  %v5185_v28 = vrot.slane %v5183_v17, 4  ;;  %v5188_v16 = vrot.slane %v5186_v12, 5  ;;  %v2212_v60 = vld [vmem:[#allocation2 + $0x90] sm:$0xe] }
 0x10d   : > { %7564 = vmatpush3.bf16.msra.mxu1 %v8277_v52  ;;  %v5147_v52 = vsel %vm8551_vm10, %v9263_v49, %v9219_v20  ;;  %v9288_v50 = vsel %vm8706_vm13, %v2349_v3, %v2350_v35  ;;  %v5157_v63 = vsel %vm8551_vm10, %v5152_v10, %v9255_v4  ;;  %v9298_v8 = vsel %vm8706_vm13, %v6844_v61, %v2354_v5  ;;  %v2214_v30 = vld [vmem:[#allocation2 + $0x98] sm:$0x1]  ;;  %v5097_v51 = vld [vmem:[#allocation2 + $0x44] sm:$0x1]  ;;  %v5098_v49 = vld [vmem:[#allocation2 + $0x48] sm:$0xf] }
 0x10e   : > { %7565 = vmatprep.subr.bf16.mxu1 %v8281_v25  ;;  %7764 = vmatpush3.bf16.msra.mxu0 %v8282_v24  ;;  %v9284_v24 = vsel %vm8706_vm13, %v6843_v27, %v2347_v38  ;;  %v5198_v20 = vrot.slane %v5196_v29, 4  ;;  %v5171_v37 = vsel %vm8551_vm10, %v5166_v26, %v9253_v47  ;;  %v9307_v58 = vsel %vm8706_vm13, %v2356_v15, %v2357_v22  ;;  %v8272_v38 = vld [vmem:[#allocation2 + $0x9c] sm:$0xff]   ;;  %v5099_v5 = vld [vmem:[#allocation2 + $0x4c] sm:$0xf] }
 0x10f   : > { %7734 = vmatmul.mubr.bf16.gmra.mrb[16].mxu0 %v8268_v40  ;;  %7797 = vmatprep.subr.bf16.mxu0 %v9261_v44  ;;  %v5207_v59 = vshrl.u32 %v5095_v53, 16  ;;  %v5181_v46 = vsel %vm8551_vm10, %v5176_v48, %v5180_v42  ;;  %v5189_v39 = vor.u32 %v5188_v16, %v5185_v28  ;;  %v5202_v41 = vshll.u32 %v5094_v31, 16  ;;  %v9327_v32 = vld [vmem:[#allocation2 + $0xa0] sm:$0xf]  ;;  %v8287_v3 = vld [vmem:[%s9907_s3 + $0xf8] sm:$0xff]  }
 0x110   : > { %7737 = vmatprep.mubr.bf16.mxu0 %v8271_v0  ;;  %7534 = vmatmul.mubr.bf16.gmra.mrb[8].mxu1 %v6870_v6  ;;  %v9300_v6 = vrot.slane %v5192_v1, 5  ;;  %v5216_v40 = vshll.u32 %v5096_v34, 16  ;;  %v6873_v14 = vcombine.low %v9233_v33, %v9243_v43  ;;  %v6874_v47 = vcombine.low %v9247_v54, %v9268_v7  ;;  %v9338_v61 = vld [vmem:[#allocation2 + $0x9c] sm:$0xe]  ;;  %v9343_v22 = vld [vmem:[#allocation2 + $0xac] sm:$0xf] }
 0x111   : > { %7537 = vmatprep.mubr.bf16.mxu1 %v6871_v13  ;;  %7566 = vmatpush3.bf16.msra.mxu1 %v8281_v25  ;;  %v5210_v13 = vshll.u32 %v5095_v53, 16  ;;  %v8275_v25 = vld [vmem:[#allocation2 + $0xa8] sm:$0xff]   ;;  %v2361_v23 = vrot.slane %v2213_v56, 5  ;;  %v5220_v0 = vshrl.u32 %v5096_v34, 16  ;;  %v6875_v4 = vcombine.low %v9284_v24, %v9288_v50  ;;  %v2217_v42 = vld [vmem:[#allocation2 + $0xa4] sm:$0x1] }
 0x112   : > { %7567 = vmatprep.subr.bf16.mxu1 %v8283_v45  ;;  %v5199_v27 = vor.u32 %v5198_v20, %v9300_v6  ;;  %v5209_v36 = vrot.slane %v5207_v59, 4  ;;  %v9321_v35 = vcombine.low %v5147_v52, %v5157_v63  ;;  %v9323_v62 = vcombine.low %v5171_v37, %v5181_v46  ;;  %v5100_v28 = vld [vmem:[#allocation2 + $0x50] sm:$0x1]  ;;  %v8276_v52 = vld [vmem:[#allocation2 + $0xb4] sm:$0xff]   ;;  %v2218_v34 = vld [vmem:[#allocation2 + $0xa8] sm:$0xe] }
 0x113   : > { %v5212_v18 = vrot.slane %v5210_v13, 5  ;;  %v6876_v33 = vcombine.low %v9298_v8, %v9307_v58  ;;  %v6845_v43 = vrot.slane %v2212_v60, 9  ;;  %v9332_v2 = vrot.slane %v5189_v39, 4  ;;  %v2220_v59 = vld [vmem:[#allocation2 + $0xb0] sm:$0x1] }
 0x114   : > { %v9336_v17 = vrot.slane %v5216_v40, 5  ;;  %v5222_v10 = vrot.slane %v5220_v0, 4  ;;  %v2363_v12 = vrot.slane %v2361_v23, 4  ;;  %v2364_v1 = vrot.slane %v2214_v30, 5  ;;  %v5101_v13 = vld [vmem:[#allocation2 + $0x54] sm:$0xf] }
 0x115   : > { %7568 = vmatpush3.bf16.msra.mxu1 %v8283_v45  ;;  %v9334_v45 = vrot.slane %v5202_v41, 5  ;;  %v5226_v26 = vshll.u32 %v5097_v51, 16  ;;  %v5231_v15 = vshrl.u32 %v5098_v49, 16  ;;  %v5200_v29 = vrot.slane %v5199_v27, 4  ;;  %v5102_v60 = vld [vmem:[#allocation2 + $0x58] sm:$0xf] }
 0x116   : > { %7569 = vmatprep.subr.bf16.mxu1 %v8285_v55  ;;  %v5213_v48 = vor.u32 %v5212_v18, %v5209_v36  ;;  %v5234_v16 = vshll.u32 %v5098_v49, 16  ;;  %v5240_v53 = vshll.u32 %v5099_v5, 16  ;;  %v9347_v31 = vsel %vm8706_vm13, %v6845_v43, %v2361_v23  ;;  %v9374_v51 = vld [vmem:[%s9907_s3 + $0x100] sm:$0xff]  }
 0x117   : > { %7738 = vmatmul.mubr.bf16.gmra.mrb[20].mxu0 %v8272_v38  ;;  %v2368_v57 = vrot.slane %v9327_v32, 5  ;;  %v5233_v9 = vrot.slane %v5231_v15, 4  ;;  %v5195_v63 = vsel %vm8551_vm10, %v9332_v2, %v9300_v6  ;;  %v5223_v20 = vor.u32 %v5222_v10, %v9336_v17  ;;  %v9379_v32 = vld [vmem:[#allocation2 + $0xb8] sm:$0xf] }
 0x118   : > { %7741 = vmatprep.mubr.bf16.mxu0 %v8275_v25  ;;  %7538 = vmatmul.mubr.bf16.gmra.mrb[12].mxu1 %v6872_v19  ;;  %v5244_v19 = vshrl.u32 %v5099_v5, 16  ;;  %v5236_v56 = vrot.slane %v5234_v16, 5  ;;  %v9355_v37 = vrot.slane %v5240_v53, 5  ;;  %v9359_v38 = vsel %vm8706_vm13, %v2363_v12, %v2364_v1  ;;  %v5104_v5 = vld [vmem:[#allocation2 + $0x60] sm:$0xf]  ;;  %v8280_v12 = vld [vmem:[#allocation2 + $0xcc] sm:$0xff]  }
 0x119   : > { %7541 = vmatprep.mubr.bf16.mxu1 %v6873_v14  ;;  %7570 = vmatpush3.bf16.msra.mxu1 %v8285_v55  ;;  %v8279_v55 = vld [vmem:[#allocation2 + $0xc0] sm:$0xff]   ;;  %v9361_v46 = vrot.slane %v5226_v26, 5  ;;  %v6846_v39 = vrot.slane %v9338_v61, 9  ;;  %v5205_v6 = vsel %vm8551_vm10, %v5200_v29, %v9334_v45  ;;  %v9367_v40 = vrot.slane %v5213_v48, 4  ;;  %v5103_v29 = vld [vmem:[#allocation2 + $0x5c] sm:$0x1] }
 0x11a   : > { %7571 = vmatprep.subr.bf16.mxu1 %v8287_v3  ;;  %v5246_v41 = vrot.slane %v5244_v19, 4  ;;  %v5237_v25 = vor.u32 %v5236_v56, %v5233_v9  ;;  %v2375_v14 = vrot.slane %v9343_v22, 5  ;;  %v2370_v30 = vrot.slane %v2368_v57, 4  ;;  %v5105_v61 = vld [vmem:[#allocation2 + $0x64] sm:$0xf] }
 0x11b   : > { %v2371_v23 = vrot.slane %v2217_v42, 5  ;;  %v5250_v27 = vshll.u32 %v5100_v28, 16  ;;  %v9377_v36 = vrot.slane %v5223_v20, 4  ;;  %v6847_v18 = vrot.slane %v2218_v34, 9  ;;  %v2221_v28 = vld [vmem:[#allocation2 + $0xb4] sm:$0xe] }
 0x11c   : > { %v5247_v0 = vor.u32 %v5246_v41, %v9355_v37  ;;  %v5255_v49 = vshrl.u32 %v5101_v13, 16  ;;  %v5258_v43 = vshll.u32 %v5101_v13, 16  ;;  %v2378_v2 = vrot.slane %v2220_v59, 5  ;;  %v2223_v53 = vld [vmem:[#allocation2 + $0xbc] sm:$0x1] }
 0x11d   : > { %7572 = vmatpush3.bf16.msra.mxu1 %v8287_v3  ;;  %v6877_v3 = vcombine.low %v9347_v31, %v9359_v38  ;;  %v5264_v45 = vshll.u32 %v5102_v60, 16  ;;  %v5268_v10 = vshrl.u32 %v5102_v60, 16  ;;  %v9389_v1 = vcombine.low %v5195_v63, %v5205_v6  ;;  %v5106_v19 = vld [vmem:[#allocation2 + $0x68] sm:$0x1]  ;;  %v5107_v20 = vld [vmem:[#allocation2 + $0x6c] sm:$0xf] }
 0x11e   : > { %7845 = vmatprep.subr.bf16.mxu1 %v9374_v51  ;;  %v9393_v26 = vsel %vm8706_vm13, %v6846_v39, %v2368_v57  ;;  %v5238_v54 = vrot.slane %v5237_v25, 4  ;;  %v2377_v7 = vrot.slane %v2375_v14, 4  ;;  %v9401_v15 = vsel %vm8706_vm13, %v2370_v30, %v2371_v23  ;;  %v5108_v25 = vld [vmem:[#allocation2 + $0x70] sm:$0xf]  ;;  %v5109_v23 = vld [vmem:[#allocation2 + $0x74] sm:$0x1] }
 0x11f   : > { %7742 = vmatmul.mubr.bf16.gmra.mrb[24].mxu0 %v8276_v52  ;;  %v5248_v22 = vrot.slane %v5247_v0, 4  ;;  %v5252_v24 = vrot.slane %v5250_v27, 5  ;;  %v5229_v50 = vsel %vm8551_vm10, %v9377_v36, %v9361_v46  ;;  %v5257_v48 = vrot.slane %v5255_v49, 4 }
 0x120   : > { %7745 = vmatprep.mubr.bf16.mxu0 %v8279_v55  ;;  %7542 = vmatmul.mubr.bf16.gmra.mrb[16].mxu1 %v6874_v47  ;;  %v5219_v47 = vsel %vm8551_vm10, %v9367_v40, %v9336_v17  ;;  %v5260_v42 = vrot.slane %v5258_v43, 5  ;;  %v9411_v17 = vrot.slane %v5264_v45, 5  ;;  %v5270_v16 = vrot.slane %v5268_v10, 4 }
 0x121   : > { %7545 = vmatprep.mubr.bf16.mxu1 %v6875_v4  ;;  %v9409_v4 = vsel %vm8706_vm13, %v6847_v18, %v2375_v14  ;;  %v2382_v52 = vrot.slane %v9379_v32, 5  ;;  %v5279_v31 = vshrl.u32 %v5104_v5, 16  ;;  %v5243_v57 = vsel %vm8551_vm10, %v5238_v54, %v9355_v37  ;;  %v8286_v18 = vld [vmem:[%s9907_s3 + $0x208] sm:$0xff]  }
 0x122   : > { %v9419_v9 = vsel %vm8706_vm13, %v2377_v7, %v2378_v2  ;;  %v5282_v34 = vshll.u32 %v5104_v5, 16  ;;  %v5288_v63 = vshll.u32 %v5105_v61, 16  ;;  %v5253_v56 = vsel %vm8551_vm10, %v5248_v22, %v5252_v24 }
 0x123   : > { %v5274_v59 = vshll.u32 %v5103_v29, 16  ;;  %v5281_v13 = vrot.slane %v5279_v31, 4  ;;  %v5292_v55 = vshrl.u32 %v5105_v61, 16  ;;  %v5261_v38 = vor.u32 %v5260_v42, %v5257_v48  ;;  %v5112_v31 = vld [vmem:[#allocation2 + $0x80] sm:$0x1] }
 0x124   : > { %v6848_v46 = vrot.slane %v2221_v28, 9  ;;  %v5284_v39 = vrot.slane %v5282_v34, 5  ;;  %v9423_v41 = vrot.slane %v5288_v63, 5  ;;  %v5271_v37 = vor.u32 %v5270_v16, %v9411_v17 }
 0x125   : > { %v2384_v60 = vrot.slane %v2382_v52, 4  ;;  %v2385_v6 = vrot.slane %v2223_v53, 5  ;;  %v5294_v40 = vrot.slane %v5292_v55, 4  ;;  %v6878_v14 = vcombine.low %v9393_v26, %v9401_v15  ;;  %v5114_v15 = vld [vmem:[#allocation2 + $0x88] sm:$0xf] }
 0x126   : > { %v5285_v30 = vor.u32 %v5284_v39, %v5281_v13  ;;  %v5303_v0 = vshrl.u32 %v5107_v20, 16  ;;  %v5306_v27 = vshll.u32 %v5107_v20, 16  ;;  %v9432_v36 = vcombine.low %v5219_v47, %v5229_v50  ;;  %v5117_v13 = vld [vmem:[#allocation2 + $0x94] sm:$0xf]  ;;  %v8291_v39 = vld [vmem:[%s9907_s3 + $0x218] sm:$0xff]  }
 0x127   : > { %7746 = vmatmul.mubr.bf16.gmra.mrb[28].mxu0 %v8280_v12  ;;  %v6879_v8 = vcombine.low %v9409_v4, %v9419_v9  ;;  %v9436_v58 = vrot.slane %v5274_v59, 5  ;;  %v9441_v49 = vcombine.low %v5243_v57, %v5253_v56  ;;  %v5295_v43 = vor.u32 %v5294_v40, %v9423_v41  ;;  %v5113_v12 = vld [vmem:[#allocation2 + $0x84] sm:$0xf]  ;;  %v5115_v56 = vld [vmem:[#allocation2 + $0x8c] sm:$0x1] }
 0x128   : > { %7765 = vmatprep.mubr.bf16.mxu0 %v9321_v35  ;;  %7546 = vmatmul.mubr.bf16.gmra.mrb[20].mxu1 %v6876_v33  ;;  %v5298_v35 = vshll.u32 %v5106_v19, 16  ;;  %v5110_v33 = vld [vmem:[#allocation2 + $0x78] sm:$0xf]  ;;  %v5312_v32 = vshll.u32 %v5108_v25, 16  ;;  %v5316_v5 = vshrl.u32 %v5108_v25, 16  ;;  %v9444_v2 = vrot.slane %v5261_v38, 4 }
 0x129   : > { %7549 = vmatprep.mubr.bf16.mxu1 %v6877_v3  ;;  %v5111_v3 = vld [vmem:[#allocation2 + $0x7c] sm:$0xf]  ;;  %v9446_v45 = vrot.slane %v5271_v37, 4  ;;  %v9450_v10 = vsel %vm8706_vm13, %v6848_v46, %v2382_v52  ;;  %v9454_v61 = vsel %vm8706_vm13, %v2384_v60, %v2385_v6  ;;  %v9456_v26 = vrot.slane %v5285_v30, 4  ;;  %v8288_v52 = vld [vmem:[%s9907_s3 + $0x210] sm:$0xff]  }
 0x12a   : > { %v5305_v54 = vrot.slane %v5303_v0, 4  ;;  %v5308_v7 = vrot.slane %v5306_v27, 5  ;;  %v5327_v47 = vshrl.u32 %v5110_v33, 16  ;;  %v9458_v22 = vrot.slane %v5298_v35, 5  ;;  %v5116_v19 = vld [vmem:[#allocation2 + $0x90] sm:$0xf] }
 0x12b   : > { %v5322_v24 = vshll.u32 %v5109_v23, 16  ;;  %v5330_v50 = vshll.u32 %v5110_v33, 16  ;;  %v5336_v4 = vshll.u32 %v5111_v3, 16  ;;  %v9461_v29 = vrot.slane %v5295_v43, 4  ;;  %v8289_v0 = vld [vmem:[#allocation2 + $0xc] sm:$0xff]  }
 0x12c   : > { %v9463_v48 = vrot.slane %v5312_v32, 5  ;;  %v5318_v42 = vrot.slane %v5316_v5, 4  ;;  %v5340_v28 = vshrl.u32 %v5111_v3, 16  ;;  %v5267_v16 = vsel %vm8551_vm10, %v9444_v2, %v9411_v17  ;;  %v5118_v2 = vld [vmem:[#allocation2 + $0x98] sm:$0x1] }
 0x12d   : > { %v6880_v53 = vcombine.low %v9450_v10, %v9454_v61  ;;  %v5309_v17 = vor.u32 %v5308_v7, %v5305_v54  ;;  %v5329_v57 = vrot.slane %v5327_v47, 4  ;;  %v5354_v9 = vshll.u32 %v5113_v12, 16  ;;  %v5120_v47 = vld [vmem:[#allocation2 + $0xa0] sm:$0xf] }
 0x12e   : > { %v5332_v34 = vrot.slane %v5330_v50, 5  ;;  %v9484_v63 = vrot.slane %v5336_v4, 5  ;;  %v5342_v20 = vrot.slane %v5340_v28, 4  ;;  %v5360_v59 = vshll.u32 %v5114_v15, 16 }
 0x12f   : > { %7766 = vmatmul.mubr.bf16.vlgmr.msra.gmra.mrb[0].mxu0 %v9323_v62  ;;  %v5277_v62 = vsel %vm8551_vm10, %v9446_v45, %v9436_v58  ;;  %v5301_v55 = vsel %vm8551_vm10, %v9461_v29, %v9458_v22  ;;  %v5319_v38 = vor.u32 %v5318_v42, %v9463_v48  ;;  %v9491_v46 = vrot.slane %v5322_v24, 5  ;;  %v8297_v29 = vld [vmem:[%s9907_s3 + $0x228] sm:$0xff]  }
 0x130   : > { %7798 = vmatpush3.bf16.msra.mxu0 %v9261_v44  ;;  %7769 = vmatprep.mubr.bf16.mxu0 %v9389_v1  ;;  %v5351_v44 = vshrl.u32 %v5113_v12, 16  ;;  %v5291_v1 = vsel %vm8551_vm10, %v9456_v26, %v9423_v41  ;;  %v5364_v41 = vshrl.u32 %v5114_v15, 16  ;;  %v5356_v60 = vrot.slane %v5354_v9, 5  ;;  %v5119_v12 = vld [vmem:[#allocation2 + $0x9c] sm:$0xf] }
 0x131   : > { %7550 = vmatmul.mubr.bf16.gmra.mrb[24].mxu1 %v6878_v14  ;;  %7799 = vmatprep.subr.bf16.mxu0 %v8286_v18  ;;  %v9496_v6 = vrot.slane %v5360_v59, 5  ;;  %v5375_v40 = vshrl.u32 %v5116_v19, 16  ;;  %v5310_v25 = vrot.slane %v5309_v17, 4  ;;  %v5346_v14 = vshll.u32 %v5112_v31, 16  ;;  %v8290_v15 = vld [vmem:[#allocation2 + $0x18] sm:$0xff]   ;;  %v8300_v59 = vld [vmem:[%s9907_s3 + $0x230] sm:$0xff]  }
 0x132   : > { %7553 = vmatprep.mubr.bf16.mxu1 %v6879_v8  ;;  %v5353_v37 = vrot.slane %v5351_v44, 4  ;;  %v5366_v30 = vrot.slane %v5364_v41, 4  ;;  %v5378_v23 = vshll.u32 %v5116_v19, 16  ;;  %v5333_v27 = vor.u32 %v5332_v34, %v5329_v57  ;;  %v5122_v42 = vld [vmem:[#allocation2 + $0xa8] sm:$0xf] }
 0x133   : > { %v5343_v8 = vor.u32 %v5342_v20, %v9484_v63  ;;  %v5384_v58 = vshll.u32 %v5117_v13, 16  ;;  %v5388_v35 = vshrl.u32 %v5117_v13, 16  ;;  %v5320_v33 = vrot.slane %v5319_v38, 4  ;;  %v5123_v44 = vld [vmem:[#allocation2 + $0xac] sm:$0xf] }
 0x134   : > { %7800 = vmatpush3.bf16.msra.mxu0 %v8286_v18  ;;  %v5370_v18 = vshll.u32 %v5115_v56, 16  ;;  %v5377_v43 = vrot.slane %v5375_v40, 4  ;;  %v5380_v32 = vrot.slane %v5378_v23, 5  ;;  %v5357_v5 = vor.u32 %v5356_v60, %v5353_v37  ;;  %v5121_v38 = vld [vmem:[#allocation2 + $0xa4] sm:$0x1] }
 0x135   : > { %7801 = vmatprep.subr.bf16.mxu0 %v8288_v52  ;;  %v5367_v3 = vor.u32 %v5366_v30, %v9496_v6  ;;  %v9502_v45 = vrot.slane %v5384_v58, 5  ;;  %v5390_v10 = vrot.slane %v5388_v35, 4  ;;  %v7086_v61 = vcombine.low %v5267_v16, %v5277_v62  ;;  %v8292_v62 = vld [vmem:[#allocation2 + $0x24] sm:$0xff]   ;;  %v5125_v41 = vld [vmem:[#allocation2 + $0xb4] sm:$0xf] }
 0x136   : > { %v7087_v26 = vcombine.low %v5291_v1, %v5301_v55  ;;  %v5334_v54 = vrot.slane %v5333_v27, 4  ;;  %v5348_v7 = vrot.slane %v5346_v14, 5  ;;  %v9507_v22 = vrot.slane %v5370_v18, 5  ;;  %v8293_v27 = vld [vmem:[#allocation2 + $0x30] sm:$0xff]   ;;  %v5128_v18 = vld [vmem:[#allocation2 + $0xc0] sm:$0xf] }
 0x137   : > { %7770 = vmatmul.mubr.bf16.gmra.mrb[4].mxu0 %v9432_v36  ;;  %v8294_v36 = vld [vmem:[%s9907_s3 + $0x220] sm:$0xff]   ;;  %v5381_v24 = vor.u32 %v5380_v32, %v5377_v43  ;;  %v5391_v50 = vor.u32 %v5390_v10, %v9502_v45  ;;  %v5394_v4 = vshll.u32 %v5118_v2, 16  ;;  %v5315_v28 = vsel %vm8551_vm10, %v5310_v25, %v9463_v48  ;;  %v5124_v35 = vld [vmem:[#allocation2 + $0xb0] sm:$0x1]  ;;  %v8303_v2 = vld [vmem:[%s9907_s3 + $0x238] sm:$0xff]  }
 0x138   : > { %7773 = vmatprep.mubr.bf16.mxu0 %v9441_v49  ;;  %7802 = vmatpush3.bf16.msra.mxu0 %v8288_v52  ;;  %v5344_v49 = vrot.slane %v5343_v8, 4  ;;  %v5325_v16 = vsel %vm8551_vm10, %v5320_v33, %v9491_v46  ;;  %v5368_v52 = vrot.slane %v5367_v3, 4  ;;  %v5399_v1 = vshrl.u32 %v5119_v12, 16  ;;  %v8316_v8 = vld [vmem:[%s9907_s3 + $0x108] sm:$0xff]  }
 0x139   : > { %7554 = vmatmul.mubr.bf16.gmra.mrb[28].mxu1 %v6880_v53  ;;  %7803 = vmatprep.subr.bf16.mxu0 %v8291_v39  ;;  %v5358_v53 = vrot.slane %v5357_v5, 4  ;;  %v5402_v17 = vshll.u32 %v5119_v12, 16  ;;  %v5408_v31 = vshll.u32 %v5120_v47, 16  ;;  %v5412_v57 = vshrl.u32 %v5120_v47, 16  ;;  %v5129_v12 = vld [vmem:[#allocation2 + $0xc4] sm:$0xf] }
 0x13a   : > { %7573 = vmatprep.mubr.bf16.mxu1 %v8289_v0  ;;  %v5423_v9 = vshrl.u32 %v5122_v42, 16  ;;  %v5426_v19 = vshll.u32 %v5122_v42, 16  ;;  %v7088_v34 = vcombine.low %v5315_v28, %v5325_v16  ;;  %v5382_v20 = vrot.slane %v5381_v24, 4  ;;  %v5126_v0 = vld [vmem:[#allocation2 + $0xb8] sm:$0xf]  ;;  %v8317_v24 = vld [vmem:[%s9907_s3 + $0x110] sm:$0xff]  }
 0x13b   : > { %v5392_v48 = vrot.slane %v5391_v50, 4  ;;  %v5396_v56 = vrot.slane %v5394_v4, 5  ;;  %v5339_v13 = vsel %vm8551_vm10, %v5334_v54, %v9484_v63  ;;  %v5349_v55 = vsel %vm8551_vm10, %v5344_v49, %v5348_v7  ;;  %v8295_v49 = vld [vmem:[#allocation2 + $0x3c] sm:$0xff]  }
 0x13c   : > { %7804 = vmatpush3.bf16.msra.mxu0 %v8291_v39  ;;  %v5432_v46 = vshll.u32 %v5123_v44, 16  ;;  %v5436_v39 = vshrl.u32 %v5123_v44, 16  ;;  %v5401_v37 = vrot.slane %v5399_v1, 4  ;;  %v5404_v60 = vrot.slane %v5402_v17, 5  ;;  %v5127_v28 = vld [vmem:[#allocation2 + $0xbc] sm:$0x1] }
 0x13d   : > { %7805 = vmatprep.subr.bf16.mxu0 %v8294_v36  ;;  %v9527_v40 = vrot.slane %v5408_v31, 5  ;;  %v5414_v25 = vrot.slane %v5412_v57, 4  ;;  %v5363_v63 = vsel %vm8551_vm10, %v5358_v53, %v9496_v6  ;;  %v5373_v14 = vsel %vm8551_vm10, %v5368_v52, %v9507_v22  ;;  %v5132_v52 = vld [vmem:[#allocation2 + $0xd0] sm:$0xf]  ;;  %v5130_v57 = vld [vmem:[#allocation2 + $0xc8] sm:$0x1] }
 0x13e   : > { %v5425_v30 = vrot.slane %v5423_v9, 4  ;;  %v5428_v23 = vrot.slane %v5426_v19, 5  ;;  %v5397_v6 = vsel %vm8551_vm10, %v5392_v48, %v5396_v56  ;;  %v5418_v58 = vshll.u32 %v5121_v38, 16  ;;  %v8318_v48 = vld [vmem:[%s9907_s3 + $0x118] sm:$0xff]  }
 0x13f   : > { %7774 = vmatmul.mubr.bf16.gmra.mrb[8].mxu0 %v7086_v61  ;;  %v5447_v33 = vshrl.u32 %v5125_v41, 16  ;;  %v7089_v43 = vcombine.low %v5339_v13, %v5349_v55  ;;  %v9544_v32 = vrot.slane %v5432_v46, 5  ;;  %v5438_v5 = vrot.slane %v5436_v39, 4 }
 0x140   : > { %7777 = vmatprep.mubr.bf16.mxu0 %v7087_v26  ;;  %7806 = vmatpush3.bf16.msra.mxu0 %v8294_v36  ;;  %v5450_v3 = vshll.u32 %v5125_v41, 16  ;;  %v5405_v10 = vor.u32 %v5404_v60, %v5401_v37  ;;  %v5456_v61 = vshll.u32 %v5126_v0, 16  ;;  %v5460_v36 = vshrl.u32 %v5126_v0, 16  ;;  %v8296_v37 = vld [vmem:[#allocation2 + $0x48] sm:$0xff]   ;;  %v8298_v0 = vld [vmem:[#allocation2 + $0x54] sm:$0xff]  }
 0x141   : > { %7574 = vmatmul.mubr.bf16.vlgmr.msra.gmra.mrb[0].mxu1 %v8290_v15  ;;  %7807 = vmatprep.subr.bf16.mxu0 %v8297_v29  ;;  %v7090_v26 = vcombine.low %v5363_v63, %v5373_v14  ;;  %v5429_v7 = vor.u32 %v5428_v23, %v5425_v30  ;;  %v5442_v47 = vshll.u32 %v5124_v35, 16  ;;  %v5131_v15 = vld [vmem:[#allocation2 + $0xcc] sm:$0xf]  ;;  %v9550_v22 = vrot.slane %v5418_v58, 5  ;;  %v5133_v63 = vld [vmem:[#allocation2 + $0xd4] sm:$0x1] }
 0x142   : > { %7853 = vmatpush3.bf16.msra.mxu1 %v9374_v51  ;;  %7577 = vmatprep.mubr.bf16.mxu1 %v8292_v62  ;;  %v5387_v51 = vsel %vm8551_vm10, %v5382_v20, %v9502_v45  ;;  %v5415_v45 = vor.u32 %v5414_v25, %v9527_v40  ;;  %v5449_v50 = vrot.slane %v5447_v33, 4  ;;  %v5471_v4 = vshrl.u32 %v5128_v18, 16  ;;  %v5905_v33 = vld [vmem:[#allocation2 + $0x1c] sm:$0xf] }
 0x143   : > { %7846 = vmatprep.subr.bf16.mxu1 %v8316_v8  ;;  %v7091_v54 = vcombine.low %v5387_v51, %v5397_v6  ;;  %v5439_v42 = vor.u32 %v5438_v5, %v9544_v32  ;;  %v5452_v16 = vrot.slane %v5450_v3, 5  ;;  %v5480_v62 = vshll.u32 %v5129_v12, 16 }
 0x144   : > { %7808 = vmatpush3.bf16.msra.mxu0 %v8297_v29  ;;  %v5474_v29 = vshll.u32 %v5128_v18, 16  ;;  %v5484_v53 = vshrl.u32 %v5129_v12, 16  ;;  %v5406_v44 = vrot.slane %v5405_v10, 4  ;;  %v5416_v1 = vrot.slane %v5415_v45, 4  ;;  %v9581_v10 = vld [vmem:[#allocation2 + $0x28] sm:$0xf] }
 0x145   : > { %7809 = vmatprep.subr.bf16.mxu0 %v8300_v59  ;;  %v9556_v17 = vrot.slane %v5456_v61, 5  ;;  %v5462_v31 = vrot.slane %v5460_v36, 4  ;;  %v5430_v9 = vrot.slane %v5429_v7, 4  ;;  %v5444_v19 = vrot.slane %v5442_v47, 5  ;;  %v5906_v36 = vld [vmem:[#allocation2 + $0x20] sm:$0x1] }
 0x146   : > { %7854 = vmatpush3.bf16.msra.mxu1 %v8316_v8  ;;  %v5498_v20 = vshll.u32 %v5131_v15, 16  ;;  %v5473_v56 = vrot.slane %v5471_v4, 4  ;;  %v5504_v13 = vshll.u32 %v5132_v52, 16  ;;  %v5508_v55 = vshrl.u32 %v5132_v52, 16  ;;  %v9583_v12 = vld [vmem:[#allocation2 + $0x34] sm:$0xf] }
 0x147   : > { %7778 = vmatmul.mubr.bf16.gmra.mrb[12].mxu0 %v7088_v34  ;;  %7847 = vmatprep.subr.bf16.mxu1 %v8317_v24  ;;  %v5495_v34 = vshrl.u32 %v5131_v15, 16  ;;  %v5440_v38 = vrot.slane %v5439_v42, 4  ;;  %v5453_v46 = vor.u32 %v5452_v16, %v5449_v50  ;;  %v9561_v39 = vrot.slane %v5480_v62, 5  ;;  %v5907_v7 = vld [vmem:[#allocation2 + $0x24] sm:$0xe] }
 0x148   : > { %7781 = vmatprep.mubr.bf16.mxu0 %v7089_v43  ;;  %7810 = vmatpush3.bf16.msra.mxu0 %v8300_v59  ;;  %v5476_v59 = vrot.slane %v5474_v29, 5  ;;  %v5486_v41 = vrot.slane %v5484_v53, 4  ;;  %v5463_v60 = vor.u32 %v5462_v31, %v9556_v17  ;;  %v5466_v25 = vshll.u32 %v5127_v28, 16  ;;  %v5909_v50 = vld [vmem:[#allocation2 + $0x2c] sm:$0x1] }
 0x149   : > { %7578 = vmatmul.mubr.bf16.gmra.mrb[4].mxu1 %v8293_v27  ;;  %7811 = vmatprep.subr.bf16.mxu0 %v8303_v2  ;;  %v5497_v14 = vrot.slane %v5495_v34, 4  ;;  %v5500_v30 = vrot.slane %v5498_v20, 5  ;;  %v5411_v23 = vsel %vm8551_vm10, %v5406_v44, %v9527_v40  ;;  %v5490_v27 = vshll.u32 %v5130_v57, 16  ;;  %v8319_v40 = vld [vmem:[%s9907_s3 + $0x120] sm:$0xff]   ;;  %v8320_v29 = vld [vmem:[%s9907_s3 + $0x128] sm:$0xff]  }
 0x14a   : > { %7581 = vmatprep.mubr.bf16.mxu1 %v8295_v49  ;;  %7855 = vmatpush3.bf16.msra.mxu1 %v8317_v24  ;;  %v9567_v8 = vrot.slane %v5504_v13, 5  ;;  %v5510_v51 = vrot.slane %v5508_v55, 4  ;;  %v5421_v6 = vsel %vm8551_vm10, %v5416_v1, %v9550_v22  ;;  %v5435_v58 = vsel %vm8551_vm10, %v5430_v9, %v9544_v32  ;;  %v8299_v22 = vld [vmem:[#allocation2 + $0x60] sm:$0xff]   ;;  %v8301_v28 = vld [vmem:[#allocation2 + $0x6c] sm:$0xff]   ;;  %v5912_v9 = vld [vmem:[#allocation2 + $0x38] sm:$0x1] }
 0x14b   : > { %7848 = vmatprep.subr.bf16.mxu1 %v8318_v48  ;;  %v5477_v35 = vor.u32 %v5476_v59, %v5473_v56  ;;  %v5445_v18 = vsel %vm8551_vm10, %v5440_v38, %v5444_v19  ;;  %v5454_v43 = vrot.slane %v5453_v46, 4  ;;  %v5487_v5 = vor.u32 %v5486_v41, %v9561_v39  ;;  %v5910_v53 = vld [vmem:[#allocation2 + $0x30] sm:$0xe]  ;;  %v5914_v20 = vld [vmem:[#allocation2 + $0x40] sm:$0xf] }
 0x14c   : > { %7812 = vmatpush3.bf16.msra.mxu0 %v8303_v2  ;;  %v5514_v3 = vshll.u32 %v5133_v63, 16  ;;  %v5904_v2 = vld [vmem:[#allocation2 + $0x18] sm:$0xe]  ;;  %v5464_v32 = vrot.slane %v5463_v60, 4  ;;  %v5468_v45 = vrot.slane %v5466_v25, 5  ;;  %v5501_v61 = vor.u32 %v5500_v30, %v5497_v14 }
 0x14d   : > { %v6002_v49 = vrot.slane %v5905_v33, 5  ;;  %v7092_v47 = vcombine.low %v5411_v23, %v5421_v6  ;;  %v7093_v15 = vcombine.low %v5435_v58, %v5445_v18  ;;  %v5478_v24 = vrot.slane %v5477_v35, 4  ;;  %v5913_v55 = vld [vmem:[#allocation2 + $0x3c] sm:$0xe]  ;;  %v9627_v35 = vld [vmem:[#allocation2 + $0x58] sm:$0xf] }
 0x14e   : > { %7856 = vmatpush3.bf16.msra.mxu1 %v8318_v48  ;;  %v6009_v4 = vrot.slane %v9581_v10, 5  ;;  %v5488_v42 = vrot.slane %v5487_v5, 4  ;;  %v5516_v16 = vrot.slane %v5514_v3, 5  ;;  %v7105_v62 = vrot.slane %v5904_v2, 9  ;;  %v5916_v5 = vld [vmem:[#allocation2 + $0x48] sm:$0xe] }
 0x14f   : > { %7782 = vmatmul.mubr.bf16.gmra.mrb[16].mxu0 %v7090_v26  ;;  %7849 = vmatprep.subr.bf16.mxu1 %v8319_v40  ;;  %v5492_v26 = vrot.slane %v5490_v27, 5  ;;  %v6016_v52 = vrot.slane %v9583_v12, 5  ;;  %v5459_v44 = vsel %vm8551_vm10, %v5454_v43, %v9556_v17  ;;  %v5469_v1 = vsel %vm8551_vm10, %v5464_v32, %v5468_v45  ;;  %v8321_v17 = vld [vmem:[%s9907_s3 + $0x130] sm:$0xff]   ;;  %v8302_v27 = vld [vmem:[#allocation2 + $0x78] sm:$0xff]   ;;  %v9640_v2 = vld [vmem:[#allocation2 + $0x64] sm:$0xf] }
 0x150   : > { %7785 = vmatprep.mubr.bf16.mxu0 %v7091_v54  ;;  %v5511_v54 = vor.u32 %v5510_v51, %v9567_v8  ;;  %v5502_v31 = vrot.slane %v5501_v61, 4  ;;  %v6005_v57 = vrot.slane %v5906_v36, 5  ;;  %v6004_v34 = vrot.slane %v6002_v49, 4  ;;  %v5918_v3 = vld [vmem:[#allocation2 + $0x50] sm:$0x1] }
 0x151   : > { %7582 = vmatmul.mubr.bf16.gmra.mrb[8].mxu1 %v8296_v37  ;;  %v7106_v48 = vrot.slane %v5907_v7, 9  ;;  %v6011_v56 = vrot.slane %v6009_v4, 4  ;;  %v6012_v59 = vrot.slane %v5909_v50, 5  ;;  %v7107_v13 = vrot.slane %v5910_v53, 9  ;;  %v5915_v37 = vld [vmem:[#allocation2 + $0x44] sm:$0x1] }
 0x152   : > { %7585 = vmatprep.mubr.bf16.mxu1 %v8298_v0  ;;  %7857 = vmatpush3.bf16.msra.mxu1 %v8319_v40  ;;  %v5512_v19 = vrot.slane %v5511_v54, 4  ;;  %v7094_v38 = vcombine.low %v5459_v44, %v5469_v1  ;;  %v6018_v46 = vrot.slane %v6016_v52, 4  ;;  %v6019_v41 = vrot.slane %v5912_v9, 5  ;;  %v8322_v40 = vld [vmem:[%s9907_s3 + $0x138] sm:$0xff]   ;;  %v3247_v45 = vld [vmem:[#allocation2 + $0x6c] sm:$0xf] }
 0x153   : > { %7850 = vmatprep.subr.bf16.mxu1 %v8320_v29  ;;  %v5483_v60 = vsel %vm8551_vm10, %v5478_v24, %v9561_v39  ;;  %v5493_v25 = vsel %vm8551_vm10, %v5488_v42, %v5492_v26  ;;  %v9606_v63 = vsel %vm8706_vm13, %v7105_v62, %v6002_v49  ;;  %v6023_v14 = vrot.slane %v5914_v20, 5  ;;  %v9617_v39 = vld [vmem:[#allocation2 + $0x4c] sm:$0xf]  ;;  %v3248_v61 = vld [vmem:[#allocation2 + $0x70] sm:$0xf]  ;;  %v8304_v26 = vld [vmem:[#allocation2 + $0x84] sm:$0xff]  }
 0x154   : > { %v5507_v30 = vsel %vm8551_vm10, %v5502_v31, %v9567_v8  ;;  %v5517_v23 = vsel %vm8551_vm10, %v5512_v19, %v5516_v16  ;;  %v9615_v0 = vsel %vm8706_vm13, %v6004_v34, %v6005_v57  ;;  %v9621_v51 = vsel %vm8706_vm13, %v7106_v48, %v6009_v4  ;;  %v5919_v49 = vld [vmem:[#allocation2 + $0x54] sm:$0xe]  ;;  %v5921_v7 = vld [vmem:[#allocation2 + $0x5c] sm:$0x1]  ;;  %v5922_v24 = vld [vmem:[#allocation2 + $0x60] sm:$0xe] }
 0x155   : > { %v9625_v6 = vsel %vm8706_vm13, %v6011_v56, %v6012_v59  ;;  %v7108_v8 = vrot.slane %v5913_v55, 9  ;;  %v6026_v58 = vrot.slane %v5915_v37, 5  ;;  %v7095_v33 = vcombine.low %v5483_v60, %v5493_v25  ;;  %v5924_v50 = vld [vmem:[#allocation2 + $0x68] sm:$0x1]  ;;  %v3250_v31 = vld [vmem:[#allocation2 + $0x78] sm:$0xf] }
 0x156   : > { %7858 = vmatpush3.bf16.msra.mxu1 %v8320_v29  ;;  %v9634_v18 = vsel %vm8706_vm13, %v7107_v13, %v6016_v52  ;;  %v9638_v43 = vsel %vm8706_vm13, %v6018_v46, %v6019_v41  ;;  %v6025_v10 = vrot.slane %v6023_v14, 4  ;;  %v6030_v32 = vrot.slane %v9617_v39, 5  ;;  %v3251_v20 = vld [vmem:[#allocation2 + $0x7c] sm:$0xf]  ;;  %v3249_v55 = vld [vmem:[#allocation2 + $0x74] sm:$0x1] }
 0x157   : > { %7786 = vmatmul.mubr.bf16.gmra.mrb[20].mxu0 %v7092_v47  ;;  %7851 = vmatprep.subr.bf16.mxu1 %v8321_v17  ;;  %v7096_v36 = vcombine.low %v5507_v30, %v5517_v23  ;;  %v7137_v12 = vcombine.low %v9606_v63, %v9615_v0  ;;  %v7138_v54 = vcombine.low %v9621_v51, %v9625_v6  ;;  %v6037_v47 = vrot.slane %v9627_v35, 5  ;;  %v8305_v37 = vld [vmem:[#allocation2 + $0x90] sm:$0xff]   ;;  %v5925_v25 = vld [vmem:[#allocation2 + $0x6c] sm:$0xe]  ;;  %v8306_v23 = vld [vmem:[#allocation2 + $0x9c] sm:$0xff]  }
 0x158   : > { %7789 = vmatprep.mubr.bf16.mxu0 %v7093_v15  ;;  %v7139_v15 = vcombine.low %v9634_v18, %v9638_v43  ;;  %v6044_v4 = vrot.slane %v9640_v2, 5  ;;  %v3464_v29 = vshrl.u32 %v3247_v45, 16  ;;  %v7109_v42 = vrot.slane %v5916_v5, 9  ;;  %v3253_v35 = vld [vmem:[#allocation2 + $0x84] sm:$0xf] }
 0x159   : > { %7586 = vmatmul.mubr.bf16.gmra.mrb[12].mxu1 %v8299_v22  ;;  %v9652_v22 = vsel %vm8706_vm13, %v7108_v8, %v6023_v14  ;;  %v3473_v16 = vshll.u32 %v3248_v61, 16  ;;  %v3477_v62 = vshrl.u32 %v3248_v61, 16  ;;  %v9657_v53 = vsel %vm8706_vm13, %v6025_v10, %v6026_v58  ;;  %v3252_v8 = vld [vmem:[#allocation2 + $0x80] sm:$0x1]  ;;  %v3254_v10 = vld [vmem:[#allocation2 + $0x88] sm:$0xf] }
 0x15a   : > { %7589 = vmatprep.mubr.bf16.mxu1 %v8301_v28  ;;  %7859 = vmatpush3.bf16.msra.mxu1 %v8321_v17  ;;  %v3467_v28 = vshll.u32 %v3247_v45, 16  ;;  %v6032_v52 = vrot.slane %v6030_v32, 4  ;;  %v6033_v44 = vrot.slane %v5918_v3, 5  ;;  %v7110_v1 = vrot.slane %v5919_v49, 9  ;;  %v5926_v3 = vld [vmem:[#allocation2 + $0x70] sm:$0xf] }
 0x15b   : > { %7852 = vmatprep.subr.bf16.mxu1 %v8322_v40  ;;  %v6039_v57 = vrot.slane %v6037_v47, 4  ;;  %v6040_v9 = vrot.slane %v5921_v7, 5  ;;  %v7111_v19 = vrot.slane %v5922_v24, 9  ;;  %v6047_v34 = vrot.slane %v5924_v50, 5  ;;  %v9721_v18 = vld [vmem:[#allocation2 + $0x84] sm:$0xe] }
 0x15c   : > { %v6046_v48 = vrot.slane %v6044_v4, 4  ;;  %v3466_v56 = vrot.slane %v3464_v29, 4  ;;  %v3488_v59 = vshrl.u32 %v3250_v31, 16  ;;  %v3491_v13 = vshll.u32 %v3250_v31, 16  ;;  %v8308_v31 = vld [vmem:[#allocation2 + $0xb4] sm:$0xff]  }
 0x15d   : > { %v3469_v17 = vrot.slane %v3467_v28, 5  ;;  %v3479_v46 = vrot.slane %v3477_v62, 4  ;;  %v3497_v41 = vshll.u32 %v3251_v20, 16  ;;  %v7140_v60 = vcombine.low %v9652_v22, %v9657_v53 }
 0x15e   : > { %7860 = vmatpush3.bf16.msra.mxu1 %v8322_v40  ;;  %v3490_v63 = vrot.slane %v3488_v59, 4  ;;  %v3493_v14 = vrot.slane %v3491_v13, 5  ;;  %v3501_v30 = vshrl.u32 %v3251_v20, 16  ;;  %v9665_v0 = vsel %vm8706_vm13, %v7109_v42, %v6030_v32  ;;  %v3256_v20 = vld [vmem:[#allocation2 + $0x90] sm:$0xf] }
 0x15f   : > { %7790 = vmatmul.mubr.bf16.gmra.mrb[24].mxu0 %v7094_v38  ;;  %v9659_v38 = vrot.slane %v3473_v16, 5  ;;  %v9669_v39 = vsel %vm8706_vm13, %v6032_v52, %v6033_v44  ;;  %v9675_v58 = vrot.slane %v3497_v41, 5  ;;  %v9679_v40 = vsel %vm8706_vm13, %v6039_v57, %v6040_v9  ;;  %v5928_v52 = vld [vmem:[#allocation2 + $0x78] sm:$0xe]  ;;  %v5929_v44 = vld [vmem:[#allocation2 + $0x7c] sm:$0xf] }
 0x160   : > { %7793 = vmatprep.mubr.bf16.mxu0 %v7095_v33  ;;  %v9683_v33 = vsel %vm8706_vm13, %v7111_v19, %v6044_v4  ;;  %v9687_v5 = vsel %vm8706_vm13, %v6046_v48, %v6047_v34  ;;  %v3503_v2 = vrot.slane %v3501_v30, 4  ;;  %v3470_v32 = vor.u32 %v3469_v17, %v3466_v56  ;;  %v3255_v41 = vld [vmem:[#allocation2 + $0x8c] sm:$0x1] }
 0x161   : > { %7590 = vmatmul.mubr.bf16.gmra.mrb[16].mxu1 %v8302_v27  ;;  %v9673_v27 = vsel %vm8706_vm13, %v7110_v1, %v6037_v47  ;;  %v3480_v45 = vor.u32 %v3479_v46, %v9659_v38  ;;  %v3483_v61 = vshll.u32 %v3249_v55, 16  ;;  %v7141_v49 = vcombine.low %v9665_v0, %v9669_v39  ;;  %v3257_v55 = vld [vmem:[#allocation2 + $0x94] sm:$0xf] }
 0x162   : > { %7593 = vmatprep.mubr.bf16.mxu1 %v8304_v26  ;;  %v3494_v26 = vor.u32 %v3493_v14, %v3490_v63  ;;  %v3504_v7 = vor.u32 %v3503_v2, %v9675_v58  ;;  %v3507_v47 = vshll.u32 %v3252_v8, 16  ;;  %v3512_v24 = vshrl.u32 %v3253_v35, 16  ;;  %v9706_v14 = vld [vmem:[#allocation2 + $0x80] sm:$0x1] }
 0x163   : > { %v7112_v50 = vrot.slane %v5925_v25, 9  ;;  %v6051_v4 = vrot.slane %v5926_v3, 5  ;;  %v3515_v29 = vshll.u32 %v3253_v35, 16  ;;  %v3521_v42 = vshll.u32 %v3254_v10, 16 }
 0x164   : > { %v7142_v28 = vcombine.low %v9673_v27, %v9679_v40  ;;  %v7143_v16 = vcombine.low %v9683_v33, %v9687_v5  ;;  %v3525_v1 = vshrl.u32 %v3254_v10, 16  ;;  %v3471_v57 = vrot.slane %v3470_v32, 4 }
 0x165   : > { %v3481_v9 = vrot.slane %v3480_v45, 4  ;;  %v3485_v19 = vrot.slane %v3483_v61, 5  ;;  %v3495_v34 = vrot.slane %v3494_v26, 4  ;;  %v3505_v48 = vrot.slane %v3504_v7, 4  ;;  %v9731_v45 = vld [vmem:[#allocation2 + $0x88] sm:$0xf] }
 0x166   : > { %v3509_v56 = vrot.slane %v3507_v47, 5  ;;  %v3514_v59 = vrot.slane %v3512_v24, 4  ;;  %v3517_v13 = vrot.slane %v3515_v29, 5  ;;  %v6053_v17 = vrot.slane %v6051_v4, 4  ;;  %v3259_v61 = vld [vmem:[#allocation2 + $0x9c] sm:$0xf] }
 0x167   : > { %7794 = vmatmul.mubr.bf16.gmra.mrb[28].mxu0 %v7096_v36  ;;  %v5927_v36 = vld [vmem:[#allocation2 + $0x74] sm:$0x1]  ;;  %v6058_v46 = vrot.slane %v5929_v44, 5  ;;  %v3527_v25 = vrot.slane %v3525_v1, 4  ;;  %v9704_v63 = vsel %vm8706_vm13, %v7112_v50, %v6051_v4  ;;  %v7113_v30 = vrot.slane %v5928_v52, 9  ;;  %v8309_v4 = vld [vmem:[#allocation2 + $0xc0] sm:$0xff]  }
 0x168   : > { %7813 = vmatprep.mubr.bf16.mxu0 %v7137_v12  ;;  %v8307_v12 = vld [vmem:[#allocation2 + $0xa8] sm:$0xff]   ;;  %v6054_v62 = vrot.slane %v5927_v36, 5  ;;  %v3539_v8 = vshll.u32 %v3256_v20, 16  ;;  %v3476_v35 = vsel %vm8551_vm10, %v3471_v57, %v9659_v38  ;;  %v3486_v51 = vsel %vm8551_vm10, %v3481_v9, %v3485_v19  ;;  %v3258_v7 = vld [vmem:[#allocation2 + $0x98] sm:$0x1] }
 0x169   : > { %7594 = vmatmul.mubr.bf16.gmra.mrb[20].mxu1 %v8305_v37  ;;  %v9697_v37 = vrot.slane %v3521_v42, 5  ;;  %v3500_v6 = vsel %vm8551_vm10, %v3495_v34, %v9675_v58  ;;  %v3510_v3 = vsel %vm8551_vm10, %v3505_v48, %v3509_v56  ;;  %v3518_v2 = vor.u32 %v3517_v13, %v3514_v59  ;;  %v3260_v50 = vld [vmem:[#allocation2 + $0xa0] sm:$0xf]  ;;  %v5933_v42 = vld [vmem:[#allocation2 + $0x8c] sm:$0x1] }
 0x16a   : > { %7597 = vmatprep.mubr.bf16.mxu1 %v8306_v23  ;;  %v3536_v23 = vshrl.u32 %v3256_v20, 16  ;;  %v3531_v10 = vshll.u32 %v3255_v41, 16  ;;  %v3549_v43 = vshrl.u32 %v3257_v55, 16  ;;  %v9727_v38 = vrot.slane %v6058_v46, 4  ;;  %v5934_v57 = vld [vmem:[#allocation2 + $0x90] sm:$0xe] }
 0x16b   : > { %v6061_v32 = vrot.slane %v9706_v14, 5  ;;  %v3528_v58 = vor.u32 %v3527_v25, %v9697_v37  ;;  %v6953_v36 = vcombine.low %v3476_v35, %v3486_v51  ;;  %v9735_v26 = vsel %vm8706_vm13, %v7113_v30, %v6058_v46  ;;  %v5935_v9 = vld [vmem:[#allocation2 + $0x94] sm:$0xf]  ;;  %v3261_v48 = vld [vmem:[#allocation2 + $0xa4] sm:$0x1] }
 0x16c   : > { %v3538_v47 = vrot.slane %v3536_v23, 4  ;;  %v3541_v24 = vrot.slane %v3539_v8, 5  ;;  %v9737_v29 = vcombine.low %v3500_v6, %v3510_v3  ;;  %v3551_v52 = vrot.slane %v3549_v43, 4  ;;  %v3262_v35 = vld [vmem:[#allocation2 + $0xa8] sm:$0xf] }
 0x16d   : > { %v3519_v44 = vrot.slane %v3518_v2, 4  ;;  %v3533_v1 = vrot.slane %v3531_v10, 5  ;;  %v3560_v19 = vshrl.u32 %v3259_v61, 16  ;;  %v3529_v34 = vrot.slane %v3528_v58, 4  ;;  %v3263_v6 = vld [vmem:[#allocation2 + $0xac] sm:$0xf] }
 0x16e   : > { %v3555_v20 = vshll.u32 %v3258_v7, 16  ;;  %v3563_v56 = vshll.u32 %v3259_v61, 16  ;;  %v3569_v59 = vshll.u32 %v3260_v50, 16  ;;  %v6068_v13 = vrot.slane %v5933_v42, 5 }
 0x16f   : > { %7814 = vmatmul.mubr.bf16.vlgmr.msra.gmra.mrb[0].mxu0 %v7138_v54  ;;  %v3545_v54 = vshll.u32 %v3257_v55, 16  ;;  %v3542_v55 = vor.u32 %v3541_v24, %v3538_v47  ;;  %v3562_v46 = vrot.slane %v3560_v19, 4  ;;  %v3573_v41 = vshrl.u32 %v3260_v50, 16  ;;  %v3264_v24 = vld [vmem:[#allocation2 + $0xb0] sm:$0x1] }
 0x170   : > { %7817 = vmatprep.mubr.bf16.mxu0 %v7139_v15  ;;  %v9725_v15 = vsel %vm8706_vm13, %v6053_v17, %v6054_v62  ;;  %v5936_v17 = vld [vmem:[#allocation2 + $0x98] sm:$0x1]  ;;  %v6072_v30 = vrot.slane %v5935_v9, 5  ;;  %v3565_v23 = vrot.slane %v3563_v56, 5  ;;  %v9750_v8 = vrot.slane %v3569_v59, 5 }
 0x171   : > { %7598 = vmatmul.mubr.bf16.gmra.mrb[24].mxu1 %v8307_v12  ;;  %v7114_v12 = vrot.slane %v9721_v18, 9  ;;  %v9740_v62 = vrot.slane %v3545_v54, 5  ;;  %v3524_v22 = vsel %vm8551_vm10, %v3519_v44, %v9697_v37  ;;  %v3579_v51 = vshll.u32 %v3261_v48, 16  ;;  %v3265_v44 = vld [vmem:[#allocation2 + $0xb4] sm:$0xf] }
 0x172   : > { %7601 = vmatprep.mubr.bf16.mxu1 %v8308_v31  ;;  %v6065_v31 = vrot.slane %v9731_v45, 5  ;;  %v3534_v0 = vsel %vm8551_vm10, %v3529_v34, %v3533_v1  ;;  %v3557_v39 = vrot.slane %v3555_v20, 5  ;;  %v3566_v54 = vor.u32 %v3565_v23, %v3562_v46  ;;  %v3266_v34 = vld [vmem:[#allocation2 + $0xb8] sm:$0xf]  ;;  %v9802_v56 = vld [vmem:[#allocation2 + $0xa0] sm:$0xf] }
 0x173   : > { %v3552_v25 = vor.u32 %v3551_v52, %v9740_v62  ;;  %v3543_v3 = vrot.slane %v3542_v55, 4  ;;  %v3584_v10 = vshrl.u32 %v3262_v35, 16  ;;  %v3587_v18 = vshll.u32 %v3262_v35, 16  ;;  %v5941_v35 = vld [vmem:[#allocation2 + $0xac] sm:$0xf] }
 0x174   : > { %v6067_v53 = vrot.slane %v6065_v31, 4  ;;  %v6074_v58 = vrot.slane %v6072_v30, 4  ;;  %v6075_v45 = vrot.slane %v5936_v17, 5  ;;  %v3593_v37 = vshll.u32 %v3263_v6, 16 }
 0x175   : > { %v3553_v43 = vrot.slane %v3552_v25, 4  ;;  %v3567_v61 = vrot.slane %v3566_v54, 4  ;;  %v3581_v47 = vrot.slane %v3579_v51, 5  ;;  %v6955_v50 = vcombine.low %v3524_v22, %v3534_v0  ;;  %v3268_v25 = vld [vmem:[#allocation2 + $0xc0] sm:$0xf] }
 0x176   : > { %v3589_v42 = vrot.slane %v3587_v18, 5  ;;  %v9758_v52 = vrot.slane %v3593_v37, 5  ;;  %v6062_v1 = vsel %vm8706_vm13, %v9727_v38, %v6061_v32  ;;  %v9774_v9 = vsel %vm8706_vm13, %v6067_v53, %v6068_v13  ;;  %v3267_v38 = vld [vmem:[#allocation2 + $0xbc] sm:$0x1]  ;;  %v5937_v51 = vld [vmem:[#allocation2 + $0x9c] sm:$0xe] }
 0x177   : > { %7818 = vmatmul.mubr.bf16.gmra.mrb[4].mxu0 %v7140_v60  ;;  %v3575_v60 = vrot.slane %v3573_v41, 4  ;;  %v3548_v27 = vsel %vm8551_vm10, %v3543_v3, %v9740_v62  ;;  %v3558_v40 = vsel %vm8551_vm10, %v3553_v43, %v3557_v39  ;;  %v9790_v14 = vsel %vm8706_vm13, %v6074_v58, %v6075_v45  ;;  %v3270_v39 = vld [vmem:[#allocation2 + $0xc8] sm:$0x1]  ;;  %v5939_v3 = vld [vmem:[#allocation2 + $0xa4] sm:$0x1] }
 0x178   : > { %7821 = vmatprep.mubr.bf16.mxu0 %v7141_v49  ;;  %v7115_v49 = vrot.slane %v5934_v57, 9  ;;  %v9770_v57 = vsel %vm8706_vm13, %v7114_v12, %v6065_v31  ;;  %v3572_v33 = vsel %vm8551_vm10, %v3567_v61, %v9750_v8  ;;  %v3608_v32 = vshrl.u32 %v3265_v44, 16  ;;  %v5940_v58 = vld [vmem:[#allocation2 + $0xa8] sm:$0xe] }
 0x179   : > { %7602 = vmatmul.mubr.bf16.gmra.mrb[28].mxu1 %v8309_v4  ;;  %v3576_v2 = vor.u32 %v3575_v60, %v9750_v8  ;;  %v3586_v4 = vrot.slane %v3584_v10, 4  ;;  %v3611_v31 = vshll.u32 %v3265_v44, 16  ;;  %v3617_v20 = vshll.u32 %v3266_v34, 16 }
 0x17a   : > { %7637 = vmatprep.mubr.bf16.mxu1 %v6953_v36  ;;  %v3597_v36 = vshrl.u32 %v3263_v6, 16  ;;  %v7144_v48 = vcombine.low %v9704_v63, %v9725_v15  ;;  %v3610_v59 = vrot.slane %v3608_v32, 4  ;;  %v3621_v13 = vshrl.u32 %v3266_v34, 16  ;;  %v3269_v15 = vld [vmem:[#allocation2 + $0xc4] sm:$0xf] }
 0x17b   : > { %v3577_v7 = vrot.slane %v3576_v2, 4  ;;  %v3590_v12 = vor.u32 %v3589_v42, %v3586_v4  ;;  %v7146_v55 = vcombine.low %v9770_v57, %v9774_v9  ;;  %v3613_v17 = vrot.slane %v3611_v31, 5  ;;  %v5947_v32 = vld [vmem:[#allocation2 + $0xc4] sm:$0xf] }
 0x17c   : > { %v3599_v19 = vrot.slane %v3597_v36, 4  ;;  %v3619_v46 = vrot.slane %v3617_v20, 5  ;;  %v3627_v41 = vshll.u32 %v3267_v38, 16  ;;  %v3623_v63 = vrot.slane %v3621_v13, 4  ;;  %v5942_v36 = vld [vmem:[#allocation2 + $0xb0] sm:$0x1] }
 0x17d   : > { %v3582_v5 = vsel %vm8551_vm10, %v3577_v7, %v3581_v47  ;;  %v3614_v60 = vor.u32 %v3613_v17, %v3610_v59  ;;  %v3635_v54 = vshll.u32 %v3268_v25, 16  ;;  %v6079_v2 = vrot.slane %v9802_v56, 5  ;;  %v5943_v56 = vld [vmem:[#allocation2 + $0xb4] sm:$0xe]  ;;  %v5945_v59 = vld [vmem:[#allocation2 + $0xbc] sm:$0x1] }
 0x17e   : > { %v3600_v62 = vor.u32 %v3599_v19, %v9758_v52  ;;  %v6957_v8 = vcombine.low %v3572_v33, %v3582_v5  ;;  %v3624_v6 = vor.u32 %v3623_v63, %v3619_v46  ;;  %v3629_v0 = vrot.slane %v3627_v41, 5  ;;  %v5948_v41 = vld [vmem:[#allocation2 + $0xc8] sm:$0x1] }
 0x17f   : > { %7822 = vmatmul.mubr.bf16.gmra.mrb[8].mxu0 %v7142_v28  ;;  %v9786_v28 = vsel %vm8706_vm13, %v7115_v49, %v6072_v30  ;;  %v6956_v30 = vcombine.low %v3548_v27, %v3558_v40  ;;  %v3632_v49 = vshrl.u32 %v3268_v25, 16  ;;  %v6086_v10 = vrot.slane %v5941_v35, 5 }
 0x180   : > { %7825 = vmatprep.mubr.bf16.mxu0 %v7143_v16  ;;  %v3603_v16 = vshll.u32 %v3264_v24, 16  ;;  %v7147_v23 = vcombine.low %v9786_v28, %v9790_v14  ;;  %v3601_v22 = vrot.slane %v3600_v62, 4  ;;  %v3615_v18 = vrot.slane %v3614_v60, 4  ;;  %v5944_v14 = vld [vmem:[#allocation2 + $0xb8] sm:$0xf] }
 0x181   : > { %7638 = vmatmul.mubr.bf16.vlgmr.msra.gmra.mrb[16].mxu1 %v9737_v29  ;;  %v7145_v29 = vcombine.low %v9735_v26, %v6062_v1  ;;  %v3591_v26 = vrot.slane %v3590_v12, 4  ;;  %v3641_v43 = vshll.u32 %v3269_v15, 16  ;;  %v3625_v45 = vrot.slane %v3624_v6, 4 }
 0x182   : > { %7641 = vmatprep.mubr.bf16.mxu1 %v6955_v50  ;;  %v3605_v53 = vrot.slane %v3603_v16, 5  ;;  %v3634_v37 = vrot.slane %v3632_v49, 4  ;;  %v3637_v61 = vrot.slane %v3635_v54, 5  ;;  %v3645_v7 = vshrl.u32 %v3269_v15, 16  ;;  %v5951_v49 = vld [vmem:[#allocation2 + $0xd4] sm:$0x1] }
 0x183   : > { %v3596_v47 = vsel %vm8551_vm10, %v3591_v26, %v9758_v52  ;;  %v3643_v50 = vrot.slane %v3641_v43, 5  ;;  %v3651_v4 = vshll.u32 %v3270_v39, 16  ;;  %v3620_v42 = vsel %vm8551_vm10, %v3615_v18, %v3619_v46  ;;  %v5946_v46 = vld [vmem:[#allocation2 + $0xc0] sm:$0xe]  ;;  %v5949_v39 = vld [vmem:[#allocation2 + $0xcc] sm:$0xe] }
 0x184   : > { %v3606_v24 = vsel %vm8551_vm10, %v3601_v22, %v3605_v53  ;;  %v3630_v44 = vsel %vm8551_vm10, %v3625_v45, %v3629_v0  ;;  %v3638_v1 = vor.u32 %v3637_v61, %v3634_v37  ;;  %v3647_v57 = vrot.slane %v3645_v7, 4  ;;  %v5950_v53 = vld [vmem:[#allocation2 + $0xd0] sm:$0xf] }
 0x185   : > { %v7116_v9 = vrot.slane %v5937_v51, 9  ;;  %v6081_v19 = vrot.slane %v6079_v2, 4  ;;  %v6082_v34 = vrot.slane %v5939_v3, 5  ;;  %v7117_v27 = vrot.slane %v5940_v58, 9 }
 0x186   : > { %v6958_v40 = vcombine.low %v3596_v47, %v3606_v24  ;;  %v6088_v52 = vrot.slane %v6086_v10, 4  ;;  %v6089_v28 = vrot.slane %v5942_v36, 5  ;;  %v3648_v33 = vor.u32 %v3647_v57, %v3643_v50 }
 0x187   : > { %7826 = vmatmul.mubr.bf16.gmra.mrb[12].mxu0 %v7144_v48  ;;  %v6959_v5 = vcombine.low %v3620_v42, %v3630_v44  ;;  %v3639_v16 = vrot.slane %v3638_v1, 4  ;;  %v3653_v38 = vrot.slane %v3651_v4, 5  ;;  %v6080_v62 = vsel %vm8706_vm13, %v7116_v9, %v6079_v2 }
 0x188   : > { %7829 = vmatprep.mubr.bf16.mxu0 %v7145_v29  ;;  %v3649_v12 = vrot.slane %v3648_v33, 4  ;;  %v6083_v31 = vsel %vm8706_vm13, %v6081_v19, %v6082_v34  ;;  %v6093_v20 = vrot.slane %v5944_v14, 5  ;;  %v6087_v48 = vsel %vm8706_vm13, %v7117_v27, %v6086_v10 }
 0x189   : > { %7642 = vmatmul.mubr.bf16.gmra.mrb[20].mxu1 %v6956_v30  ;;  %v6090_v29 = vsel %vm8706_vm13, %v6088_v52, %v6089_v28  ;;  %v6100_v13 = vrot.slane %v5947_v32, 5  ;;  %v7148_v25 = vcombine.low %v6080_v62, %v6083_v31  ;;  %v6096_v35 = vrot.slane %v5945_v59, 5 }
 0x18a   : > { %7645 = vmatprep.mubr.bf16.mxu1 %v6957_v8  ;;  %v3654_v17 = vsel %vm8551_vm10, %v3649_v12, %v3653_v38  ;;  %v7149_v30 = vcombine.low %v6087_v48, %v6090_v29  ;;  %v6095_v8 = vrot.slane %v6093_v20, 4  ;;  %v7119_v15 = vrot.slane %v5946_v46, 9 }
 0x18b   : > { %v6102_v26 = vrot.slane %v6100_v13, 4  ;;  %v6103_v22 = vrot.slane %v5948_v41, 5  ;;  %v6107_v51 = vrot.slane %v5950_v53, 5  ;;  %v7120_v2 = vrot.slane %v5949_v39, 9 }
 0x18c   : > { %v6097_v21 = vsel %vm8706_vm13, %v6095_v8, %v6096_v35  ;;  %v6101_v6 = vsel %vm8706_vm13, %v7119_v15, %v6100_v13  ;;  %v6110_v18 = vrot.slane %v5951_v49, 5 }
 0x18d   : > { %v6104_v0 = vsel %vm8706_vm13, %v6102_v26, %v6103_v22  ;;  %v6109_v10 = vrot.slane %v6107_v51, 4  ;;  %v6108_v43 = vsel %vm8706_vm13, %v7120_v2, %v6107_v51 }
 0x18e   : > { %v7151_v3 = vcombine.low %v6101_v6, %v6104_v0 }
 0x18f   : > { %7830 = vmatmul.mubr.bf16.gmra.mrb[16].mxu0 %v7146_v55  ;;  %v3644_v55 = vsel %vm8551_vm10, %v3639_v16, %v3643_v50  ;;  %v6111_v58 = vsel %vm8706_vm13, %v6109_v10, %v6110_v18 }
 0x190   : > { %7833 = vmatprep.mubr.bf16.mxu0 %v7147_v23  ;;  %v7118_v23 = vrot.slane %v5943_v56, 9  ;;  %v6960_v63 = vcombine.low %v3644_v55, %v3654_v17  ;;  %v7152_v45 = vcombine.low %v6108_v43, %v6111_v58 }
 0x191   : > { %7646 = vmatmul.mubr.bf16.gmra.mrb[24].mxu1 %v6958_v40 }
 0x192   : > { %7649 = vmatprep.mubr.bf16.mxu1 %v6959_v5  ;;  %v6094_v60 = vsel %vm8706_vm13, %v7118_v23, %v6093_v20 }
 0x193   : > { %v7150_v54 = vcombine.low %v6094_v60, %v6097_v21 }
 0x197   : > { %7834 = vmatmul.mubr.bf16.gmra.mrb[20].mxu0 %v7148_v25 }
 0x198   : > { %7837 = vmatprep.mubr.bf16.mxu0 %v7149_v30 }
 0x199   : > { %7650 = vmatmul.mubr.bf16.gmra.mrb[28].mxu1 %v6960_v63 }
 0x19f   : > { %7838 = vmatmul.mubr.bf16.gmra.mrb[24].mxu0 %v7150_v54 }
 0x1a0   : > { %7841 = vmatprep.mubr.bf16.mxu0 %v7151_v3 }
 0x1a7   : > { %7842 = vmatmul.mubr.bf16.gmra.mrb[28].mxu0 %v7152_v45 }
 0x214   : > { %v7575_v37 = vpop.f32.mrb[0].mxu1 }
 0x215   : > { %v3000_v61 = vpop.f32.mrb[1].mxu1 }
 0x216   : > { %v7576_v7 = vpop.f32.mrb[2].mxu1 }
 0x217   : > { %v3003_v47 = vpop.f32.mrb[3].mxu1 }
 0x21c   : > { %v7579_v24 = vpop.f32.mrb[4].mxu1 }
 0x21d   : > { %v3016_v36 = vpop.f32.mrb[5].mxu1 }
 0x21e   : > { %v7580_v50 = vpop.f32.mrb[6].mxu1 }
 0x21f   : > { %v3019_v4 = vpop.f32.mrb[7].mxu1 }
 0x224   : > { %v7583_v42 = vpop.f32.mrb[8].mxu1 }
 0x225   : > { %v3032_v44 = vpop.f32.mrb[9].mxu1 }
 0x226   : > { %v7584_v1 = vpop.f32.mrb[10].mxu1 }
 0x227   : > { %v9842_v57 = vpop.f32.mrb[11].mxu1 }
 0x22c   : > { %v9844_v9 = vpop.f32.mrb[12].mxu1 }
 0x22d   : > { %v9846_v11 = vpop.f32.mrb[13].mxu1 }
 0x22e   : > { %v9848_v19 = vpop.f32.mrb[14].mxu1 }
 0x22f   : > { %v9850_v34 = vpop.f32.mrb[15].mxu1 }
 0x242   : > { %v7815_v27 = vpop.f32.mrb[0].mxu0 }
 0x243   : > { %v7863_v40 = vadd.f32 %v7815_v27, %v7575_v37  ;;  %v6275_v52 = vpop.f32.mrb[1].mxu0 }
 0x244   : > { %v7866_v28 = vadd.f32 %v6275_v52, %v3000_v61  ;;  %v7816_v14 = vpop.f32.mrb[2].mxu0 }
 0x245   : > { %6468 = vst [vmem:[%s9857_s26 + $0x10] sm:$0xff] %v7863_v40  ;;  %v7869_v33 = vadd.f32 %v7816_v14, %v7576_v7  ;;  %v6278_v5 = vpop.f32.mrb[3].mxu0  ;;  %v6569_v62 = vmul.f32 %v7863_v40, %v7863_v40 }
 0x246   : > { %6466 = vst [vmem:[%s9857_s26] sm:$0xff] %v7866_v28  ;;  %v7872_v16 = vadd.f32 %v6278_v5, %v3003_v47  ;;  %v6567_v38 = vmul.f32 %v7866_v28, %v7866_v28 }
 0x247   : > { %6469 = vst [vmem:[%s9857_s26 + $0x18] sm:$0xff] %v7869_v33  ;;  %v6570_v59 = vmul.f32 %v7869_v33, %v7869_v33 }
 0x248   : > { %6467 = vst [vmem:[%s9857_s26 + $0x8] sm:$0xff] %v7872_v16  ;;  %v6530_v32 = vadd.f32 %v7872_v16, %v7866_v28  ;;  %v6568_v12 = vmul.f32 %v7872_v16, %v7872_v16 }
 0x24a   : > { %v6531_v31 = vadd.f32 %v7863_v40, %v6530_v32  ;;  %v6599_v20 = vadd.f32 %v6568_v12, %v6567_v38  ;;  %v7819_v48 = vpop.f32.mrb[4].mxu0 }
 0x24b   : > { %v7875_v29 = vadd.f32 %v7819_v48, %v7579_v24  ;;  %v6291_v56 = vpop.f32.mrb[5].mxu0 }
 0x24c   : > { %v6600_v13 = vadd.f32 %v6599_v20, %v6569_v62  ;;  %v7878_v55 = vadd.f32 %v6291_v56, %v3016_v36  ;;  %v6532_v17 = vadd.f32 %v7869_v33, %v6531_v31  ;;  %v7820_v46 = vpop.f32.mrb[6].mxu0 }
 0x24d   : > { %6472 = vst [vmem:[%s9857_s26 + $0x30] sm:$0xff] %v7875_v29  ;;  %v7881_v41 = vadd.f32 %v7820_v46, %v7580_v50  ;;  %v6294_v25 = vpop.f32.mrb[7].mxu0  ;;  %v6573_v22 = vmul.f32 %v7875_v29, %v7875_v29 }
 0x24e   : > { %6470 = vst [vmem:[%s9857_s26 + $0x20] sm:$0xff] %v7878_v55  ;;  %v6533_v30 = vadd.f32 %v7878_v55, %v6532_v17  ;;  %v6571_v23 = vmul.f32 %v7878_v55, %v7878_v55  ;;  %v6601_v8 = vadd.f32 %v6600_v13, %v6570_v59  ;;  %v7884_v35 = vadd.f32 %v6294_v25, %v3019_v4 }
 0x24f   : > { %6473 = vst [vmem:[%s9857_s26 + $0x38] sm:$0xff] %v7881_v41  ;;  %v6574_v0 = vmul.f32 %v7881_v41, %v7881_v41 }
 0x250   : > { %v6602_v63 = vadd.f32 %v6601_v8, %v6571_v23  ;;  %6471 = vst [vmem:[%s9857_s26 + $0x28] sm:$0xff] %v7884_v35  ;;  %v6534_v15 = vadd.f32 %v7884_v35, %v6533_v30  ;;  %v6572_v26 = vmul.f32 %v7884_v35, %v7884_v35 }
 0x252   : > { %v6535_v53 = vadd.f32 %v7875_v29, %v6534_v15  ;;  %v6603_v60 = vadd.f32 %v6602_v63, %v6572_v26  ;;  %v7823_v21 = vpop.f32.mrb[8].mxu0 }
 0x253   : > { %v7887_v51 = vadd.f32 %v7823_v21, %v7583_v42  ;;  %v6307_v6 = vpop.f32.mrb[9].mxu0 }
 0x254   : > { %v6604_v39 = vadd.f32 %v6603_v60, %v6573_v22  ;;  %v7890_v49 = vadd.f32 %v6307_v6, %v3032_v44  ;;  %v6536_v54 = vadd.f32 %v7881_v41, %v6535_v53  ;;  %v7824_v3 = vpop.f32.mrb[10].mxu0  ;;  %v7639_v2 = vpop.f32.mrb[16].mxu1 }
 0x255   : > { %6476 = vst [vmem:[%s9857_s26 + $0x50] sm:$0xff] %v7887_v51  ;;  %v7893_v10 = vadd.f32 %v7824_v3, %v7584_v1  ;;  %v6310_v18 = vpop.f32.mrb[11].mxu0  ;;  %v3882_v43 = vpop.f32.mrb[17].mxu1  ;;  %v6577_v4 = vmul.f32 %v7887_v51, %v7887_v51 }
 0x256   : > { %6474 = vst [vmem:[%s9857_s26 + $0x40] sm:$0xff] %v7890_v49  ;;  %v6537_v58 = vadd.f32 %v7890_v49, %v6536_v54  ;;  %v6575_v45 = vmul.f32 %v7890_v49, %v7890_v49  ;;  %v6605_v37 = vadd.f32 %v6604_v39, %v6574_v0  ;;  %v7896_v61 = vadd.f32 %v6310_v18, %v9842_v57  ;;  %v7640_v7 = vpop.f32.mrb[18].mxu1 }
 0x257   : > { %6477 = vst [vmem:[%s9857_s26 + $0x58] sm:$0xff] %v7893_v10  ;;  %v3885_v47 = vpop.f32.mrb[19].mxu1  ;;  %v6578_v52 = vmul.f32 %v7893_v10, %v7893_v10 }
 0x258   : > { %v6606_v24 = vadd.f32 %v6605_v37, %v6575_v45  ;;  %6475 = vst [vmem:[%s9857_s26 + $0x48] sm:$0xff] %v7896_v61  ;;  %v6538_v36 = vadd.f32 %v7896_v61, %v6537_v58  ;;  %v6576_v50 = vmul.f32 %v7896_v61, %v7896_v61 }
 0x25a   : > { %v6539_v42 = vadd.f32 %v7887_v51, %v6538_v36  ;;  %v6607_v44 = vadd.f32 %v6606_v24, %v6576_v50  ;;  %v7827_v1 = vpop.f32.mrb[12].mxu0 }
 0x25b   : > { %v7899_v27 = vadd.f32 %v7827_v1, %v9844_v9  ;;  %v6323_v40 = vpop.f32.mrb[13].mxu0 }
 0x25c   : > { %v6608_v28 = vadd.f32 %v6607_v44, %v6577_v4  ;;  %v7902_v57 = vadd.f32 %v6323_v40, %v9846_v11  ;;  %v6540_v14 = vadd.f32 %v7893_v10, %v6539_v42  ;;  %v7828_v33 = vpop.f32.mrb[14].mxu0  ;;  %v7643_v5 = vpop.f32.mrb[20].mxu1 }
 0x25d   : > { %6480 = vst [vmem:[%s9857_s26 + $0x70] sm:$0xff] %v7899_v27  ;;  %v7905_v16 = vadd.f32 %v7828_v33, %v9848_v19  ;;  %v6326_v38 = vpop.f32.mrb[15].mxu0  ;;  %v3898_v32 = vpop.f32.mrb[21].mxu1  ;;  %v6581_v59 = vmul.f32 %v7899_v27, %v7899_v27 }
 0x25e   : > { %6478 = vst [vmem:[%s9857_s26 + $0x60] sm:$0xff] %v7902_v57  ;;  %v6541_v12 = vadd.f32 %v7902_v57, %v6540_v14  ;;  %v6579_v62 = vmul.f32 %v7902_v57, %v7902_v57  ;;  %v6609_v31 = vadd.f32 %v6608_v28, %v6578_v52  ;;  %v7908_v9 = vadd.f32 %v6326_v38, %v9850_v34  ;;  %v7644_v20 = vpop.f32.mrb[22].mxu1 }
 0x25f   : > { %6481 = vst [vmem:[%s9857_s26 + $0x78] sm:$0xff] %v7905_v16  ;;  %v3901_v48 = vpop.f32.mrb[23].mxu1  ;;  %v6582_v41 = vmul.f32 %v7905_v16, %v7905_v16 }
 0x260   : > { %v6610_v29 = vadd.f32 %v6609_v31, %v6579_v62  ;;  %6479 = vst [vmem:[%s9857_s26 + $0x68] sm:$0xff] %v7908_v9  ;;  %v6542_v11 = vadd.f32 %v7908_v9, %v6541_v12  ;;  %v6580_v56 = vmul.f32 %v7908_v9, %v7908_v9 }
 0x262   : > { %v6543_v13 = vadd.f32 %v7899_v27, %v6542_v11  ;;  %v6611_v19 = vadd.f32 %v6610_v29, %v6580_v56  ;;  %v7831_v55 = vpop.f32.mrb[16].mxu0 }
 0x263   : > { %v7911_v17 = vadd.f32 %v7831_v55, %v7639_v2  ;;  %v6339_v46 = vpop.f32.mrb[17].mxu0 }
 0x264   : > { %v6612_v25 = vadd.f32 %v6611_v19, %v6581_v59  ;;  %v7914_v30 = vadd.f32 %v6339_v46, %v3882_v43  ;;  %v6544_v34 = vadd.f32 %v7905_v16, %v6543_v13  ;;  %v7832_v23 = vpop.f32.mrb[18].mxu0  ;;  %v7647_v8 = vpop.f32.mrb[24].mxu1 }
 0x265   : > { %6484 = vst [vmem:[%s9857_s26 + $0x90] sm:$0xff] %v7911_v17  ;;  %v7917_v35 = vadd.f32 %v7832_v23, %v7640_v7  ;;  %v6342_v63 = vpop.f32.mrb[19].mxu0  ;;  %v3914_v15 = vpop.f32.mrb[25].mxu1  ;;  %v6585_v49 = vmul.f32 %v7911_v17, %v7911_v17 }
 0x266   : > { %6482 = vst [vmem:[%s9857_s26 + $0x80] sm:$0xff] %v7914_v30  ;;  %v6545_v26 = vadd.f32 %v7914_v30, %v6544_v34  ;;  %v6583_v22 = vmul.f32 %v7914_v30, %v7914_v30  ;;  %v6613_v53 = vadd.f32 %v6612_v25, %v6582_v41  ;;  %v7920_v60 = vadd.f32 %v6342_v63, %v3885_v47  ;;  %v7648_v21 = vpop.f32.mrb[26].mxu1 }
 0x267   : > { %6485 = vst [vmem:[%s9857_s26 + $0x98] sm:$0xff] %v7917_v35  ;;  %v3917_v51 = vpop.f32.mrb[27].mxu1  ;;  %v6586_v43 = vmul.f32 %v7917_v35, %v7917_v35 }
 0x268   : > { %v6614_v6 = vadd.f32 %v6613_v53, %v6583_v22  ;;  %6483 = vst [vmem:[%s9857_s26 + $0x88] sm:$0xff] %v7920_v60  ;;  %v6546_v0 = vadd.f32 %v7920_v60, %v6545_v26  ;;  %v6584_v39 = vmul.f32 %v7920_v60, %v7920_v60 }
 0x26a   : > { %v6547_v54 = vadd.f32 %v7911_v17, %v6546_v0  ;;  %v6615_v3 = vadd.f32 %v6614_v6, %v6584_v39  ;;  %v7835_v2 = vpop.f32.mrb[20].mxu0 }
 0x26b   : > { %v7923_v10 = vadd.f32 %v7835_v2, %v7643_v5  ;;  %v6355_v18 = vpop.f32.mrb[21].mxu0 }
 0x26c   : > { %v6616_v58 = vadd.f32 %v6615_v3, %v6585_v49  ;;  %v7926_v45 = vadd.f32 %v6355_v18, %v3898_v32  ;;  %v6548_v37 = vadd.f32 %v7917_v35, %v6547_v54  ;;  %v7836_v61 = vpop.f32.mrb[22].mxu0  ;;  %v7651_v7 = vpop.f32.mrb[28].mxu1 }
 0x26d   : > { %6488 = vst [vmem:[%s9857_s26 + $0xb0] sm:$0xff] %v7923_v10  ;;  %v7929_v47 = vadd.f32 %v7836_v61, %v7644_v20  ;;  %v6358_v24 = vpop.f32.mrb[23].mxu0  ;;  %v3930_v36 = vpop.f32.mrb[29].mxu1  ;;  %v6589_v57 = vmul.f32 %v7923_v10, %v7923_v10 }
 0x26e   : > { %6486 = vst [vmem:[%s9857_s26 + $0xa0] sm:$0xff] %v7926_v45  ;;  %v6549_v50 = vadd.f32 %v7926_v45, %v6548_v37  ;;  %v6587_v4 = vmul.f32 %v7926_v45, %v7926_v45  ;;  %v6617_v42 = vadd.f32 %v6616_v58, %v6586_v43  ;;  %v7932_v44 = vadd.f32 %v6358_v24, %v3901_v48  ;;  %v7652_v1 = vpop.f32.mrb[30].mxu1 }
 0x26f   : > { %6489 = vst [vmem:[%s9857_s26 + $0xb8] sm:$0xff] %v7929_v47  ;;  %v3933_v27 = vpop.f32.mrb[31].mxu1  ;;  %v6590_v32 = vmul.f32 %v7929_v47, %v7929_v47 }
 0x270   : > { %v6618_v40 = vadd.f32 %v6617_v42, %v6587_v4  ;;  %6487 = vst [vmem:[%s9857_s26 + $0xa8] sm:$0xff] %v7932_v44  ;;  %v6550_v52 = vadd.f32 %v7932_v44, %v6549_v50  ;;  %v6588_v28 = vmul.f32 %v7932_v44, %v7932_v44 }
 0x272   : > { %v6551_v14 = vadd.f32 %v7923_v10, %v6550_v52  ;;  %v6619_v33 = vadd.f32 %v6618_v40, %v6588_v28  ;;  %v7839_v5 = vpop.f32.mrb[24].mxu0 }
 0x273   : > { %v7935_v16 = vadd.f32 %v7839_v5, %v7647_v8  ;;  %v6371_v38 = vpop.f32.mrb[25].mxu0 }
 0x274   : > { %v6620_v12 = vadd.f32 %v6619_v33, %v6589_v57  ;;  %v7938_v62 = vadd.f32 %v6371_v38, %v3914_v15  ;;  %v6552_v31 = vadd.f32 %v7929_v47, %v6551_v14  ;;  %v7840_v9 = vpop.f32.mrb[26].mxu0 }
 0x275   : > { %6492 = vst [vmem:[%s9857_s26 + $0xd0] sm:$0xff] %v7935_v16  ;;  %v7941_v20 = vadd.f32 %v7840_v9, %v7648_v21  ;;  %v6374_v48 = vpop.f32.mrb[27].mxu0  ;;  %v6593_v17 = vmul.f32 %v7935_v16, %v7935_v16 }
 0x276   : > { %6490 = vst [vmem:[%s9857_s26 + $0xc0] sm:$0xff] %v7938_v62  ;;  %v6553_v29 = vadd.f32 %v7938_v62, %v6552_v31  ;;  %v6591_v11 = vmul.f32 %v7938_v62, %v7938_v62  ;;  %v6621_v56 = vadd.f32 %v6620_v12, %v6590_v32  ;;  %v7944_v59 = vadd.f32 %v6374_v48, %v3917_v51 }
 0x277   : > { %6493 = vst [vmem:[%s9857_s26 + $0xd8] sm:$0xff] %v7941_v20  ;;  %v6594_v23 = vmul.f32 %v7941_v20, %v7941_v20 }
 0x278   : > { %v6622_v13 = vadd.f32 %v6621_v56, %v6591_v11  ;;  %6491 = vst [vmem:[%s9857_s26 + $0xc8] sm:$0xff] %v7944_v59  ;;  %v6554_v19 = vadd.f32 %v7944_v59, %v6553_v29  ;;  %v6592_v55 = vmul.f32 %v7944_v59, %v7944_v59 }
 0x27a   : > { %v6555_v46 = vadd.f32 %v7935_v16, %v6554_v19  ;;  %v6623_v41 = vadd.f32 %v6622_v13, %v6592_v55  ;;  %v7843_v25 = vpop.f32.mrb[28].mxu0 }
 0x27b   : > { %v7947_v30 = vadd.f32 %v7843_v25, %v7651_v7  ;;  %v6387_v34 = vpop.f32.mrb[29].mxu0 }
 0x27c   : > { %v6624_v8 = vadd.f32 %v6623_v41, %v6593_v17  ;;  %v7950_v35 = vadd.f32 %v6387_v34, %v3930_v36  ;;  %v6556_v63 = vadd.f32 %v7941_v20, %v6555_v46  ;;  %v7844_v15 = vpop.f32.mrb[30].mxu0 }
 0x27d   : > { %6496 = vst [vmem:[%s9857_s26 + $0xf0] sm:$0xff] %v7947_v30  ;;  %v7953_v26 = vadd.f32 %v7844_v15, %v7652_v1  ;;  %v6390_v22 = vpop.f32.mrb[31].mxu0  ;;  %v6597_v49 = vmul.f32 %v7947_v30, %v7947_v30 }
 0x27e   : > { %6494 = vst [vmem:[%s9857_s26 + $0xe0] sm:$0xff] %v7950_v35  ;;  %v6557_v53 = vadd.f32 %v7950_v35, %v6556_v63  ;;  %v6595_v60 = vmul.f32 %v7950_v35, %v7950_v35  ;;  %v6625_v21 = vadd.f32 %v6624_v8, %v6594_v23  ;;  %v7956_v51 = vadd.f32 %v6390_v22, %v3933_v27 }
 0x27f   : > { %6497 = vst [vmem:[%s9857_s26 + $0xf8] sm:$0xff] %v7953_v26  ;;  %v6598_v2 = vmul.f32 %v7953_v26, %v7953_v26 }
 0x280   : > { %v6626_v6 = vadd.f32 %v6625_v21, %v6595_v60  ;;  %6495 = vst [vmem:[%s9857_s26 + $0xe8] sm:$0xff] %v7956_v51  ;;  %v6558_v0 = vadd.f32 %v7956_v51, %v6557_v53  ;;  %v6596_v39 = vmul.f32 %v7956_v51, %v7956_v51 }
 0x282   : > { %v6559_v54 = vadd.f32 %v7947_v30, %v6558_v0  ;;  %v6627_v3 = vadd.f32 %v6626_v6, %v6596_v39 }
 0x284   : > { %v6560_v10 = vadd.f32 %v7953_v26, %v6559_v54  ;;  %v6628_v18 = vadd.f32 %v6627_v3, %v6597_v49 }
 0x286   : > { %v6561_v43 = vrot.slane %v6560_v10, 4  ;;  %v6629_v58 = vadd.f32 %v6628_v18, %v6598_v2 }
 0x288   : > { %v6562_v45 = vadd.f32 %v6561_v43, %v6560_v10  ;;  %v6630_v37 = vrot.slane %v6629_v58, 4 }
 0x28a   : > { %v6563_v61 = vrot.slane %v6562_v45, 2  ;;  %v6631_v7 = vadd.f32 %v6630_v37, %v6629_v58 }
 0x28c   : > { %v6564_v47 = vadd.f32 %v6563_v61, %v6562_v45  ;;  %v6632_v24 = vrot.slane %v6631_v7, 2 }
 0x28e   : > { %v6565_v36 = vrot.slane %v6564_v47, 1  ;;  %v6633_v50 = vadd.f32 %v6632_v24, %v6631_v7 }
 0x290   : > { %v6634_v4 = vrot.slane %v6633_v50, 1  ;;  %v6566_v42 = vadd.f32 %v6565_v36, %v6564_v47 }
 0x292   : > { %v6635_v44 = vadd.f32 %v6634_v4, %v6633_v50 }
 0x294   : > { %v6637_v1 = vsel %vm860_vm1, %v6566_v42, %v6635_v44 }
 0x295   : > { %6638 = vst [vmem:[%s235_s29] sm:$0x3] %v6637_v1 }
 0x296 PF: > { %s16_s18 = sadd.s32 1, %s8329_s18  }
 0x297   : > { %p13_p4 = scmp.ge.s32.totalorder %s16_s18, 4  }
 0x299   :  { %15 = sbr.rel (!%p13_p4) target bundleno = 1 (0x1), region = 88 }

// kernel: basic_block_forward.3
= control target key start
LH: loop header
LB: loop body
LE: loop exit
PB: predicated region body
PF: predicated region fallthrough
CT: control target
= control target key end

     0   :  { %s8021_s12 = smov 0   ;;  %s9055_s0 = inlined_call_operand.vmem [shape: bf16[2,256,128], index: 0, kind: input, shape index: {}]   ;;  %s9056_s1 = inlined_call_operand.vmem [shape: bf16[3,3,128,128], index: 1, kind: input, shape index: {}]   ;;  %s9057_s2 = inlined_call_operand.vmem [shape: f32[2,256,128], index: 2, kind: output, shape index: {0}]   ;;  %s9058_s3 = inlined_call_operand.vmem [shape: f32[2,2,128], index: 3, kind: output, shape index: {1}]  }
   0x1 LB: > { %s6465_s13 = sadd.s32 4294967295, %s7998_s12   ;;  %p6469_p0 = scmp.ge.s32.totalorder %s7998_s12, 1  ;;  %s7998_s12 = sphi %s8021_s12, %s14_s12  }
   0x2   : > { %p140_p1 = scmp.lt.s32.totalorder %s7998_s12, 3 }
   0x4   : > { %p141_p2 = pnand %p6469_p0, %p140_p1 }
   0x5   : > { %v7864_v0 = vld [vmem:[%s9056_s1] sm:$0xff] (!%p141_p2)   ;;  %v8000_v2 = vmov (!%p141_p2), 0   ;;  %v7866_v3 = vld [vmem:[%s9056_s1 + $0x8] sm:$0xff] (!%p141_p2)   ;;  %p168_p3 = scmp.lt.s32.totalorder (!%p141_p2), %s6465_s13, 1  ;;  %v7868_v5 = vld [vmem:[%s9056_s1 + $0x10] sm:$0xff] (!%p141_p2)   ;;  %vm600_vm0 = vcmask (!%p141_p2), 1040384  }
   0x6   : > { %144 = sbr.rel (%p141_p2) target bundleno = 629 (0x275), region = 28  ;;  %v7865_v1 = vld [vmem:[%s9056_s1 + $0x100] sm:$0xff] (!%p141_p2)   ;;  %215 = vst [vmem:[#allocation2] sm:$0xf] (!%p141_p2), %v8000_v2  ;;  %216 = vst [vmem:[#allocation2 + $0x4] sm:$0xf] (!%p141_p2), %v8000_v2  ;;  %7087 = vmatprep.subr.bf16.mxu1 (!%p141_p2), %v7864_v0 }
   0x7   : > { %217 = vst [vmem:[#allocation2 + $0x8] sm:$0x1] (!%p141_p2), %v8000_v2  ;;  %218 = vst [vmem:[#allocation2 + $0xc] sm:$0xf] (!%p141_p2), %v8000_v2  ;;  %7279 = vmatprep.subr.bf16.mxu0 (!%p141_p2), %v7865_v1  ;;  %7088 = vmatpush3.bf16.msra.mxu1 (!%p141_p2), %v7864_v0  ;;  %v7867_v4 = vld [vmem:[%s9056_s1 + $0x108] sm:$0xff] (!%p141_p2)   ;;  %v7869_v6 = vld [vmem:[%s9056_s1 + $0x110] sm:$0xff] (!%p141_p2)  }
   0x8   : > { %219 = vst [vmem:[#allocation2 + $0x10] sm:$0xf] (!%p141_p2), %v8000_v2  ;;  %220 = vst [vmem:[#allocation2 + $0x14] sm:$0x1] (!%p141_p2), %v8000_v2  ;;  %7280 = vmatpush3.bf16.msra.mxu0 (!%p141_p2), %v7865_v1  ;;  %7089 = vmatprep.subr.bf16.mxu1 (!%p141_p2), %v7866_v3  ;;  %v7870_v7 = vld [vmem:[%s9056_s1 + $0x18] sm:$0xff] (!%p141_p2)   ;;  %v7872_v9 = vld [vmem:[%s9056_s1 + $0x20] sm:$0xff] (!%p141_p2)  }
   0x9   : > { %221 = vst [vmem:[#allocation2 + $0x18] sm:$0xf] (!%p141_p2), %v8000_v2  ;;  %222 = vst [vmem:[#allocation2 + $0x1c] sm:$0xf] (!%p141_p2), %v8000_v2  ;;  %7281 = vmatprep.subr.bf16.mxu0 (!%p141_p2), %v7867_v4  ;;  %v7871_v8 = vld [vmem:[%s9056_s1 + $0x118] sm:$0xff] (!%p141_p2)   ;;  %v7873_v10 = vld [vmem:[%s9056_s1 + $0x120] sm:$0xff] (!%p141_p2)  }
   0xa   : > { %223 = vst [vmem:[#allocation2 + $0x20] sm:$0x1] (!%p141_p2), %v8000_v2  ;;  %224 = vst [vmem:[#allocation2 + $0x24] sm:$0xf] (!%p141_p2), %v8000_v2  ;;  %v7874_v11 = vld [vmem:[%s9056_s1 + $0x28] sm:$0xff] (!%p141_p2)   ;;  %vm593_vm1 = vcmask (!%p141_p2), 1043456  }
   0xb   : > { %225 = vst [vmem:[#allocation2 + $0x28] sm:$0xf] (!%p141_p2), %v8000_v2  ;;  %226 = vst [vmem:[#allocation2 + $0x2c] sm:$0x1] (!%p141_p2), %v8000_v2  ;;  %7090 = vmatpush3.bf16.msra.mxu1 (!%p141_p2), %v7866_v3  ;;  %v7875_v12 = vld [vmem:[%s9056_s1 + $0x128] sm:$0xff] (!%p141_p2)   ;;  %v7876_v20 = vld [vmem:[%s9056_s1 + $0x30] sm:$0xff] (!%p141_p2)  }
   0xc   : > { %227 = vst [vmem:[#allocation2 + $0x30] sm:$0xf] (!%p141_p2), %v8000_v2  ;;  %228 = vst [vmem:[#allocation2 + $0x34] sm:$0xf] (!%p141_p2), %v8000_v2  ;;  %7282 = vmatpush3.bf16.msra.mxu0 (!%p141_p2), %v7867_v4  ;;  %7091 = vmatprep.subr.bf16.mxu1 (!%p141_p2), %v7868_v5  ;;  %vm269_vm2 = vsmask.f32 (!%p141_p2), 256 }
   0xd   : > { %229 = vst [vmem:[#allocation2 + $0x38] sm:$0x1] %v8000_v2  ;;  %230 = vst [vmem:[#allocation2 + $0x3c] sm:$0xf] %v8000_v2  ;;  %s9070_s13 = smov (!%p168_p3, %s6465_s13), 1  ;;  %7283 = vmatprep.subr.bf16.mxu0 %v7869_v6  ;;  %v7880_v13 = vld [vmem:[#allocation2] sm:$0xff]  }
   0xe   : > { %231 = vst [vmem:[#allocation2 + $0x40] sm:$0xf] %v8000_v2  ;;  %232 = vst [vmem:[#allocation2 + $0x44] sm:$0x1] %v8000_v2  ;;  %s6869_s30 = sshll.u32 %s9070_s13, 7  ;;  %7103 = vmatprep.mubr.bf16.mxu1 %v7880_v13  ;;  %v7877_v23 = vld [vmem:[%s9056_s1 + $0x130] sm:$0xff]  }
   0xf   : > { %233 = vst [vmem:[#allocation2 + $0x48] sm:$0xf] %v8000_v2  ;;  %234 = vst [vmem:[#allocation2 + $0x4c] sm:$0xf] %v8000_v2  ;;  %7092 = vmatpush3.bf16.msra.mxu1 %v7868_v5  ;;  %s8072_s14 = scalar_lea.vmem %s9055_s0, %s6869_s30  ;;  %vm270_vm3 = vsmask.f32 4368 }
  0x10   : > { %235 = vst [vmem:[#allocation2 + $0x50] sm:$0x1] %v8000_v2  ;;  %236 = vst [vmem:[#allocation2 + $0x54] sm:$0xf] %v8000_v2  ;;  %7284 = vmatpush3.bf16.msra.mxu0 %v7869_v6  ;;  %7093 = vmatprep.subr.bf16.mxu1 %v7870_v7  ;;  %v183_v14 = vld [vmem:[%s8072_s14] sm:$0xf] }
  0x11   : > { %237 = vst [vmem:[#allocation2 + $0x58] sm:$0xf] %v8000_v2  ;;  %238 = vst [vmem:[#allocation2 + $0x5c] sm:$0x1] %v8000_v2  ;;  %7285 = vmatprep.subr.bf16.mxu0 %v7871_v8  ;;  %v184_v15 = vld [vmem:[%s8072_s14 + $0x4] sm:$0xf] }
  0x12   : > { %239 = vst [vmem:[#allocation2 + $0x60] sm:$0xf] %v8000_v2  ;;  %240 = vst [vmem:[#allocation2 + $0x64] sm:$0xf] %v8000_v2  ;;  %v273_v16 = vshrl.u32 %v183_v14, 16  ;;  %v276_v17 = vshll.u32 %v183_v14, 16 }
  0x13   : > { %241 = vst [vmem:[#allocation2 + $0x68] sm:$0x1] %v8000_v2  ;;  %242 = vst [vmem:[#allocation2 + $0x6c] sm:$0xf] %v8000_v2  ;;  %7094 = vmatpush3.bf16.msra.mxu1 %v7870_v7  ;;  %v281_v18 = vshrl.u32 %v184_v15, 16  ;;  %v284_v22 = vshll.u32 %v184_v15, 16 }
  0x14   : > { %243 = vst [vmem:[#allocation2 + $0x70] sm:$0xf] %v8000_v2  ;;  %244 = vst [vmem:[#allocation2 + $0x74] sm:$0x1] %v8000_v2  ;;  %7286 = vmatpush3.bf16.msra.mxu0 %v7871_v8  ;;  %7095 = vmatprep.subr.bf16.mxu1 %v7872_v9  ;;  %vm594_vm6 = vsmask.f32 7938 }
  0x15   : > { %245 = vst [vmem:[#allocation2 + $0x78] sm:$0xf] %v8000_v2  ;;  %246 = vst [vmem:[#allocation2 + $0x7c] sm:$0xf] %v8000_v2  ;;  %7287 = vmatprep.subr.bf16.mxu0 %v7873_v10  ;;  %v275_v24 = vrot.slane %v273_v16, 7  ;;  %v283_v25 = vrot.slane %v281_v18, 7 }
  0x16   : > { %247 = vst [vmem:[#allocation2 + $0x80] sm:$0x1] %v8000_v2  ;;  %248 = vst [vmem:[#allocation2 + $0x84] sm:$0xf] %v8000_v2  ;;  %v596_v27 = vld [vmem:[#allocation2 + $0xc] sm:$0xf] }
  0x17   : > { %249 = vst [vmem:[#allocation2 + $0x88] sm:$0xf] %v8000_v2  ;;  %250 = vst [vmem:[#allocation2 + $0x8c] sm:$0x1] %v8000_v2  ;;  %7096 = vmatpush3.bf16.msra.mxu1 %v7872_v9  ;;  %v602_v28 = vld [vmem:[#allocation2 + $0x14] sm:$0x1]  ;;  %v278_v29 = vor.u32 %v276_v17, %v275_v24  ;;  %v286_v31 = vor.u32 %v284_v22, %v283_v25 }
  0x18   : > { %251 = vst [vmem:[#allocation2 + $0x90] sm:$0xf] %v8000_v2  ;;  %252 = vst [vmem:[#allocation2 + $0x94] sm:$0xf] %v8000_v2  ;;  %7288 = vmatpush3.bf16.msra.mxu0 %v7873_v10  ;;  %7097 = vmatprep.subr.bf16.mxu1 %v7874_v11  ;;  %v279_v30 = vrot.slane %v275_v24, 4  ;;  %v288_v32 = vrot.slane %v283_v25, 4 }
  0x19   : > { %253 = vst [vmem:[#allocation2 + $0x98] sm:$0x1] %v8000_v2  ;;  %254 = vst [vmem:[#allocation2 + $0x9c] sm:$0xf] %v8000_v2  ;;  %7289 = vmatprep.subr.bf16.mxu0 %v7875_v12  ;;  %v185_v33 = vld [vmem:[%s8072_s14 + $0x8] sm:$0xf] }
  0x1a   : > { %255 = vst [vmem:[#allocation2 + $0xa0] sm:$0xf] %v8000_v2  ;;  %256 = vst [vmem:[#allocation2 + $0xa4] sm:$0x1] %v8000_v2  ;;  %v186_v34 = vld [vmem:[%s8072_s14 + $0xc] sm:$0xf] }
  0x1b   : > { %257 = vst [vmem:[#allocation2 + $0xa8] sm:$0xf] %v8000_v2  ;;  %258 = vst [vmem:[#allocation2 + $0xac] sm:$0xf] %v8000_v2  ;;  %7098 = vmatpush3.bf16.msra.mxu1 %v7874_v11  ;;  %v7878_v35 = vld [vmem:[%s9056_s1 + $0x38] sm:$0xff]   ;;  %v290_v37 = vshrl.u32 %v185_v33, 16 }
  0x1c   : > { %259 = vst [vmem:[#allocation2 + $0xb0] sm:$0x1] %v8000_v2  ;;  %260 = vst [vmem:[#allocation2 + $0xb4] sm:$0xf] %v8000_v2  ;;  %v7879_v36 = vld [vmem:[%s9056_s1 + $0x138] sm:$0xff]   ;;  %v293_v38 = vshll.u32 %v185_v33, 16  ;;  %7290 = vmatpush3.bf16.msra.mxu0 %v7875_v12  ;;  %7099 = vmatprep.subr.bf16.mxu1 %v7876_v20 }
  0x1d   : > { %261 = vst [vmem:[#allocation2 + $0xb8] sm:$0xf] %v8000_v2  ;;  %262 = vst [vmem:[#allocation2 + $0xbc] sm:$0x1] %v8000_v2  ;;  %v298_v39 = vshrl.u32 %v186_v34, 16  ;;  %v301_v40 = vshll.u32 %v186_v34, 16  ;;  %7291 = vmatprep.subr.bf16.mxu0 %v7877_v23 }
  0x1e   : > { %263 = vst [vmem:[#allocation2 + $0xc0] sm:$0xf] %v8000_v2  ;;  %264 = vst [vmem:[#allocation2 + $0xc4] sm:$0xf] %v8000_v2  ;;  %v605_v44 = vld [vmem:[#allocation2 + $0x18] sm:$0xf] }
  0x1f   : > { %265 = vst [vmem:[#allocation2 + $0xc8] sm:$0x1] %v8000_v2  ;;  %266 = vst [vmem:[#allocation2 + $0xcc] sm:$0xf] %v8000_v2  ;;  %v292_v45 = vrot.slane %v290_v37, 7  ;;  %v300_v46 = vrot.slane %v298_v39, 7  ;;  %7100 = vmatpush3.bf16.msra.mxu1 %v7876_v20 }
  0x20   : > { %267 = vst [vmem:[#allocation2 + $0xd0] sm:$0xf] %v8000_v2  ;;  %268 = vst [vmem:[#allocation2 + $0xd4] sm:$0x1] %v8000_v2  ;;  %v609_v47 = vld [vmem:[#allocation2 + $0x20] sm:$0x1]  ;;  %7292 = vmatpush3.bf16.msra.mxu0 %v7877_v23  ;;  %7101 = vmatprep.subr.bf16.mxu1 %v7878_v35 }
  0x21   : > { %vm8080_vm4 = vmand %vm600_vm0, %vm269_vm2  ;;  %v187_v48 = vld [vmem:[%s8072_s14 + $0x10] sm:$0xf]  ;;  %v188_v49 = vld [vmem:[%s8072_s14 + $0x14] sm:$0xf]  ;;  %vm1143_vm8 = vsmask.f32 3328  ;;  %v295_v51 = vor.u32 %v293_v38, %v292_v45  ;;  %v303_v53 = vor.u32 %v301_v40, %v300_v46  ;;  %7293 = vmatprep.subr.bf16.mxu0 %v7879_v36 }
  0x22   : > { %vm8087_vm5 = vmor %vm269_vm2, %vm270_vm3  ;;  %v603_v43 = vsel %vm8080_vm4, %v288_v32, %v602_v28  ;;  %v8118_v50 = vld [vmem:[%s9056_s1 + $0x40] sm:$0xff]   ;;  %v296_v52 = vrot.slane %v292_v45, 4  ;;  %v305_v54 = vrot.slane %v300_v46, 4  ;;  %v307_v56 = vshrl.u32 %v187_v48, 16  ;;  %v189_v63 = vld [vmem:[%s8072_s14 + $0x18] sm:$0xf] }
  0x23   : > { %vm8095_vm7 = vmand %vm593_vm1, %vm594_vm6  ;;  %v287_v41 = vsel %vm8087_vm5, %v279_v30, %v286_v31  ;;  %604 = vst [vmem:[#allocation2 + $0x14] sm:$0x1] %v603_v43  ;;  %v8123_v55 = vld [vmem:[%s9056_s1 + $0x140] sm:$0xff]   ;;  %v310_v57 = vshll.u32 %v187_v48, 16  ;;  %v315_v58 = vshrl.u32 %v188_v49, 16  ;;  %v318_v59 = vshll.u32 %v188_v49, 16  ;;  %7102 = vmatpush3.bf16.msra.mxu1 %v7878_v35 }
  0x24   : > { %v597_v42 = vsel %vm8095_vm7, %v278_v29, %v596_v27  ;;  %599 = vst [vmem:[#allocation2 + $0x10] sm:$0xf] %v287_v41  ;;  %vm1144_vm9 = vsmask.f32 7440  ;;  %v304_v60 = vsel %vm8087_vm5, %v296_v52, %v303_v53  ;;  %v606_v61 = vsel %vm8095_vm7, %v295_v51, %v605_v44  ;;  %v612_v2 = vld [vmem:[#allocation2 + $0x24] sm:$0xf]  ;;  %7294 = vmatpush3.bf16.msra.mxu0 %v7879_v36 }
  0x25   : > { %598 = vst [vmem:[#allocation2 + $0xc] sm:$0xf] %v597_v42  ;;  %v610_v62 = vsel %vm8080_vm4, %v305_v54, %v609_v47  ;;  %607 = vst [vmem:[#allocation2 + $0x18] sm:$0xf] %v606_v61  ;;  %v309_v0 = vrot.slane %v307_v56, 7  ;;  %v317_v1 = vrot.slane %v315_v58, 7  ;;  %7135 = vmatprep.subr.bf16.mxu1 %v8118_v50  ;;  %7327 = vmatprep.subr.bf16.mxu0 %v8123_v55 }
  0x26   : > { %608 = vst [vmem:[#allocation2 + $0x1c] sm:$0xf] %v304_v60  ;;  %611 = vst [vmem:[#allocation2 + $0x20] sm:$0x1] %v610_v62  ;;  %v8133_v3 = vld [vmem:[%s8072_s14 + $0x1c] sm:$0xf] }
  0x27   : > { %v616_v4 = vld [vmem:[#allocation2 + $0x2c] sm:$0x1]  ;;  %v324_v5 = vshrl.u32 %v189_v63, 16  ;;  %v327_v6 = vshll.u32 %v189_v63, 16  ;;  %v332_v7 = vshrl.u32 %v8133_v3, 16  ;;  %v335_v8 = vshll.u32 %v8133_v3, 16  ;;  %vm8151_vm10 = vmor %vm1143_vm8, %vm1144_vm9 }
  0x28   : > { %v312_v12 = vor.u32 %v310_v57, %v309_v0  ;;  %v320_v13 = vor.u32 %v318_v59, %v317_v1  ;;  %v7887_v14 = vld [vmem:[%s9056_s1 + $0x48] sm:$0xff]   ;;  %v313_v23 = vrot.slane %v309_v0, 4  ;;  %v322_v24 = vrot.slane %v317_v1, 4  ;;  %v619_v45 = vld [vmem:[#allocation2 + $0x30] sm:$0xf]  ;;  %s6870_s30 = sshll.u32 %s9070_s13, 8 }
  0x29   : > { %v326_v34 = vrot.slane %v324_v5, 7  ;;  %v191_v60 = vld [vmem:[%s8072_s14 + $0x20] sm:$0xf]  ;;  %v334_v1 = vrot.slane %v332_v7, 7  ;;  %v7884_v7 = vld [vmem:[%s9056_s1 + $0x148] sm:$0xff]   ;;  %vm2012_vm11 = vcmask 1042432   ;;  %s9008_s6 = scalar_lea.vmem %s9057_s2, %s6870_s30 }
  0x2a   : > { %v2965_v11 = vld [vmem:[#allocation2 + $0x14] sm:$0x1]  ;;  %v613_v25 = vsel %vm8095_vm7, %v312_v12, %v612_v2  ;;  %v321_v32 = vsel %vm8087_vm5, %v313_v23, %v320_v13  ;;  %v617_v33 = vsel %vm8080_vm4, %v322_v24, %v616_v4  ;;  %v623_v24 = vld [vmem:[#allocation2 + $0x38] sm:$0x1]  ;;  %vm2013_vm12 = vcmask 1046532   ;;  %s6474_s7 = sshll.u32 %s9070_s13, 1 }
  0x2b   : > { %v2964_v10 = vld [vmem:[#allocation2 + $0x10] sm:$0xf]  ;;  %v3031_v20 = vshll.u32 %v2965_v11, 16  ;;  %614 = vst [vmem:[#allocation2 + $0x24] sm:$0xf] %v613_v25  ;;  %v330_v59 = vrot.slane %v326_v34, 4  ;;  %vm8293_vm13 = vmor %vm2012_vm11, %vm2013_vm12  ;;  %s181_s10 = scalar_lea.vmem %s9058_s3, %s6474_s7 }
  0x2c   : > { %v2963_v9 = vld [vmem:[#allocation2 + $0xc] sm:$0xf]  ;;  %v3021_v17 = vshll.u32 %v2964_v10, 16  ;;  %v3025_v18 = vshrl.u32 %v2964_v10, 16  ;;  %v2966_v37 = vld [vmem:[#allocation2 + $0x18] sm:$0xf] }
  0x2d   : > { %v3012_v15 = vshrl.u32 %v2963_v9, 16  ;;  %v3015_v16 = vshll.u32 %v2963_v9, 16  ;;  %v7881_v22 = vld [vmem:[#allocation2 + $0xc] sm:$0xff]   ;;  %v3033_v31 = vrot.slane %v3031_v20, 5  ;;  %v2967_v38 = vld [vmem:[#allocation2 + $0x1c] sm:$0xf] }
  0x2e   : > { %v3023_v29 = vrot.slane %v3021_v17, 5  ;;  %v3027_v30 = vrot.slane %v3025_v18, 4  ;;  %7104 = vmatmul.mubr.bf16.vlgmr.msra.gmra.mrb[0].mxu1 %v7881_v22  ;;  %v2968_v39 = vld [vmem:[#allocation2 + $0x20] sm:$0x1]  ;;  %615 = vst [vmem:[#allocation2 + $0x28] sm:$0xf] %v321_v32 }
  0x2f   : > { %v3014_v27 = vrot.slane %v3012_v15, 4  ;;  %v3017_v28 = vrot.slane %v3015_v16, 5  ;;  %7136 = vmatpush3.bf16.msra.mxu1 %v8118_v50  ;;  %618 = vst [vmem:[#allocation2 + $0x2c] sm:$0x1] %v617_v33  ;;  %v3036_v41 = vshrl.u32 %v2966_v37, 16  ;;  %v3039_v42 = vshll.u32 %v2966_v37, 16 }
  0x30   : > { %v3028_v36 = vor.u32 %v3027_v30, %v3023_v29  ;;  %v3045_v43 = vshll.u32 %v2967_v38, 16  ;;  %v3049_v44 = vshrl.u32 %v2967_v38, 16  ;;  %7137 = vmatprep.subr.bf16.mxu1 %v7887_v14  ;;  %v3055_v48 = vshll.u32 %v2968_v39, 16  ;;  %v7885_v49 = vld [vmem:[#allocation2 + $0x18] sm:$0xff]   ;;  %v7892_v2 = vld [vmem:[%s9056_s1 + $0x50] sm:$0xff]  }
  0x31   : > { %v3018_v35 = vor.u32 %v3017_v28, %v3014_v27  ;;  %v329_v50 = vor.u32 %v327_v6, %v326_v34  ;;  %v3038_v51 = vrot.slane %v3036_v41, 4  ;;  %v3041_v52 = vrot.slane %v3039_v42, 5  ;;  %7107 = vmatprep.mubr.bf16.mxu1 %v7885_v49  ;;  %v192_v25 = vld [vmem:[%s8072_s14 + $0x24] sm:$0xf]  ;;  %v626_v41 = vld [vmem:[#allocation2 + $0x3c] sm:$0xf] }
  0x32   : > { %v3029_v47 = vrot.slane %v3028_v36, 4  ;;  %v3047_v53 = vrot.slane %v3045_v43, 5  ;;  %v3051_v54 = vrot.slane %v3049_v44, 4  ;;  %v3057_v58 = vrot.slane %v3055_v48, 5  ;;  %v2969_v0 = vld [vmem:[#allocation2 + $0x24] sm:$0xf] }
  0x33   : > { %v3019_v46 = vrot.slane %v3018_v35, 4  ;;  %7138 = vmatpush3.bf16.msra.mxu1 %v7887_v14  ;;  %v3042_v62 = vor.u32 %v3041_v52, %v3038_v51  ;;  %v3060_v4 = vshrl.u32 %v2969_v0, 16  ;;  %v3063_v5 = vshll.u32 %v2969_v0, 16  ;;  %v193_v35 = vld [vmem:[%s8072_s14 + $0x28] sm:$0xf]  ;;  %v7888_v43 = vld [vmem:[%s9056_s1 + $0x150] sm:$0xff]  }
  0x34   : > { %v3034_v57 = vsel %vm8151_vm10, %v3029_v47, %v3033_v31  ;;  %v3052_v63 = vor.u32 %v3051_v54, %v3047_v53  ;;  %v620_v6 = vsel %vm8095_vm7, %v329_v50, %v619_v45  ;;  %v341_v9 = vshrl.u32 %v191_v60, 16  ;;  %7139 = vmatprep.subr.bf16.mxu1 %v7892_v2 }
  0x35   : > { %v3024_v56 = vsel %vm8151_vm10, %v3019_v46, %v3023_v29  ;;  %v3043_v10 = vrot.slane %v3042_v62, 4  ;;  %v2970_v12 = vld [vmem:[#allocation2 + $0x28] sm:$0xf]  ;;  %v337_v14 = vor.u32 %v335_v8, %v334_v1  ;;  %621 = vst [vmem:[#allocation2 + $0x30] sm:$0xf] %v620_v6  ;;  %v3062_v15 = vrot.slane %v3060_v4, 4 }
  0x36   : > { %v6651_v61 = vcombine.low %v3024_v56, %v3034_v57  ;;  %v3053_v11 = vrot.slane %v3052_v63, 4  ;;  %v2971_v13 = vld [vmem:[#allocation2 + $0x2c] sm:$0x1]  ;;  %v3065_v16 = vrot.slane %v3063_v5, 5  ;;  %v3069_v17 = vshll.u32 %v2970_v12, 16  ;;  %v7886_v8 = vld [vmem:[#allocation2 + $0x24] sm:$0xff]  }
  0x37   : > { %v3073_v18 = vshrl.u32 %v2970_v12, 16  ;;  %7140 = vmatpush3.bf16.msra.mxu1 %v7892_v2  ;;  %v3048_v20 = vsel %vm8151_vm10, %v3043_v10, %v3047_v53  ;;  %v3079_v3 = vshll.u32 %v2971_v13, 16  ;;  %v338_v23 = vsel %vm8087_vm5, %v330_v59, %v337_v14  ;;  %v630_v46 = vld [vmem:[#allocation2 + $0x44] sm:$0x1]  ;;  %v7897_v57 = vld [vmem:[%s9056_s1 + $0x58] sm:$0xff]  }
  0x38   : > { %7295 = vmatprep.mubr.bf16.mxu0 %v6651_v61  ;;  %v3058_v22 = vsel %vm8151_vm10, %v3053_v11, %v3057_v58  ;;  %v3066_v28 = vor.u32 %v3065_v16, %v3062_v15  ;;  %v3071_v29 = vrot.slane %v3069_v17, 5  ;;  %622 = vst [vmem:[#allocation2 + $0x34] sm:$0xf] %v338_v23  ;;  %7108 = vmatmul.mubr.bf16.gmra.mrb[4].mxu1 %v7886_v8  ;;  %v339_v32 = vrot.slane %v334_v1, 4  ;;  %v633_v62 = vld [vmem:[#allocation2 + $0x48] sm:$0xf] }
  0x39   : > { %v6652_v27 = vcombine.low %v3048_v20, %v3058_v22  ;;  %v3075_v30 = vrot.slane %v3073_v18, 4  ;;  %v3081_v31 = vrot.slane %v3079_v3, 5  ;;  %v343_v33 = vrot.slane %v341_v9, 7  ;;  %7141 = vmatprep.subr.bf16.mxu1 %v7897_v57  ;;  %v7889_v6 = vld [vmem:[%s9056_s1 + $0x158] sm:$0xff]   ;;  %v195_v15 = vld [vmem:[%s8072_s14 + $0x30] sm:$0xf] }
  0x3a   : > { %v344_v34 = vshll.u32 %v191_v60, 16  ;;  %v3067_v36 = vrot.slane %v3066_v28, 4  ;;  %v349_v38 = vshrl.u32 %v192_v25, 16  ;;  %v352_v39 = vshll.u32 %v192_v25, 16  ;;  %v8209_v16 = vld [vmem:[%s8072_s14 + $0x34] sm:$0xf] }
  0x3b   : > { %7296 = vmatmul.mubr.bf16.vlgmr.msra.gmra.mrb[0].mxu0 %v6652_v27  ;;  %v3076_v37 = vor.u32 %v3075_v30, %v3071_v29  ;;  %v624_v42 = vsel %vm8080_vm4, %v339_v32, %v623_v24  ;;  %v347_v45 = vrot.slane %v343_v33, 4  ;;  %v358_v47 = vshrl.u32 %v193_v35, 16  ;;  %7142 = vmatpush3.bf16.msra.mxu1 %v7897_v57  ;;  %v7893_v25 = vld [vmem:[%s9056_s1 + $0x160] sm:$0xff]   ;;  %v637_v30 = vld [vmem:[#allocation2 + $0x50] sm:$0x1] }
  0x3c   : > { %7328 = vmatpush3.bf16.msra.mxu0 %v8123_v55  ;;  %v346_v44 = vor.u32 %v344_v34, %v343_v33  ;;  %v3072_v48 = vsel %vm8151_vm10, %v3067_v36, %v3071_v29  ;;  %625 = vst [vmem:[#allocation2 + $0x38] sm:$0x1] %v624_v42  ;;  %v2972_v50 = vld [vmem:[#allocation2 + $0x30] sm:$0xf]  ;;  %v351_v51 = vrot.slane %v349_v38, 7  ;;  %v361_v61 = vshll.u32 %v193_v35, 16 }
  0x3d   : > { %7329 = vmatprep.subr.bf16.mxu0 %v7884_v7  ;;  %v3077_v49 = vrot.slane %v3076_v37, 4  ;;  %v194_v55 = vld [vmem:[%s8072_s14 + $0x2c] sm:$0xf]  ;;  %v3084_v52 = vshrl.u32 %v2972_v50, 16  ;;  %v3087_v53 = vshll.u32 %v2972_v50, 16  ;;  %v8191_v56 = vrot.slane %v358_v47, 7 }
  0x3e   : > { %v627_v54 = vsel %vm8095_vm7, %v346_v44, %v626_v41  ;;  %v354_v59 = vor.u32 %v352_v39, %v351_v51  ;;  %v356_v60 = vrot.slane %v351_v51, 4  ;;  %v369_v20 = vshll.u32 %v194_v55, 16  ;;  %v7902_v33 = vld [vmem:[%s9056_s1 + $0x60] sm:$0xff]   ;;  %v640_v39 = vld [vmem:[#allocation2 + $0x54] sm:$0xf]  ;;  %v8232_v47 = vld [vmem:[%s9056_s1 + $0x168] sm:$0xff]  }
  0x3f   : > { %v3082_v58 = vsel %vm8151_vm10, %v3077_v49, %v3081_v31  ;;  %628 = vst [vmem:[#allocation2 + $0x3c] sm:$0xf] %v627_v54  ;;  %v2973_v0 = vld [vmem:[#allocation2 + $0x34] sm:$0xf]  ;;  %v3086_v1 = vrot.slane %v3084_v52, 4  ;;  %v3089_v2 = vrot.slane %v3087_v53, 5  ;;  %v363_v13 = vor.u32 %v361_v61, %v8191_v56  ;;  %7143 = vmatprep.subr.bf16.mxu1 %v7902_v33 }
  0x40   : > { %7330 = vmatpush3.bf16.msra.mxu0 %v7884_v7  ;;  %v6653_v63 = vcombine.low %v3072_v48, %v3082_v58  ;;  %v3093_v4 = vshll.u32 %v2973_v0, 16  ;;  %v3097_v5 = vshrl.u32 %v2973_v0, 16  ;;  %v7890_v9 = vld [vmem:[#allocation2 + $0x30] sm:$0xff]   ;;  %v355_v10 = vsel %vm8087_vm5, %v347_v45, %v354_v59  ;;  %v197_v50 = vld [vmem:[%s8072_s14 + $0x38] sm:$0xf]  ;;  %7144 = vmatpush3.bf16.msra.mxu1 %v7902_v33  ;;  %v7905_v51 = vld [vmem:[%s9056_s1 + $0x68] sm:$0xff]  }
  0x41   : > { %7331 = vmatprep.subr.bf16.mxu0 %v7888_v43  ;;  %v631_v11 = vsel %vm8080_vm4, %v356_v60, %v630_v46  ;;  %v3090_v12 = vor.u32 %v3089_v2, %v3086_v1  ;;  %629 = vst [vmem:[#allocation2 + $0x40] sm:$0xf] %v355_v10  ;;  %v364_v14 = vrot.slane %v8191_v56, 4  ;;  %v366_v7 = vshrl.u32 %v194_v55, 16  ;;  %7111 = vmatprep.mubr.bf16.mxu1 %v7890_v9  ;;  %v644_v1 = vld [vmem:[#allocation2 + $0x5c] sm:$0x1] }
  0x42   : > { %7299 = vmatprep.mubr.bf16.mxu0 %v6653_v63  ;;  %632 = vst [vmem:[#allocation2 + $0x44] sm:$0x1] %v631_v11  ;;  %v3095_v17 = vrot.slane %v3093_v4, 5  ;;  %v3099_v18 = vrot.slane %v3097_v5, 4  ;;  %v375_v22 = vshrl.u32 %v195_v15, 16  ;;  %v634_v24 = vsel %vm8095_vm7, %v363_v13, %v633_v62  ;;  %7145 = vmatprep.subr.bf16.mxu1 %v7905_v51 }
  0x43   : > { %v2974_v3 = vld [vmem:[#allocation2 + $0x38] sm:$0x1]  ;;  %v3091_v8 = vrot.slane %v3090_v12, 4  ;;  %v368_v23 = vrot.slane %v366_v7, 7  ;;  %v378_v27 = vshll.u32 %v195_v15, 16  ;;  %v383_v32 = vshrl.u32 %v8209_v16, 16 }
  0x44   : > { %7332 = vmatpush3.bf16.msra.mxu0 %v7888_v43  ;;  %v3100_v28 = vor.u32 %v3099_v18, %v3095_v17  ;;  %v3103_v29 = vshll.u32 %v2974_v3, 16  ;;  %635 = vst [vmem:[#allocation2 + $0x48] sm:$0xf] %v634_v24  ;;  %v8216_v31 = vrot.slane %v375_v22, 7  ;;  %v386_v38 = vshll.u32 %v8209_v16, 16  ;;  %7146 = vmatpush3.bf16.msra.mxu1 %v7905_v51  ;;  %v7909_v22 = vld [vmem:[%s9056_s1 + $0x70] sm:$0xff]  }
  0x45   : > { %7333 = vmatprep.subr.bf16.mxu0 %v7889_v6  ;;  %v3096_v34 = vsel %vm8151_vm10, %v3091_v8, %v3095_v17  ;;  %v371_v36 = vor.u32 %v369_v20, %v368_v23  ;;  %v373_v37 = vrot.slane %v368_v23, 4  ;;  %v385_v63 = vrot.slane %v383_v32, 7  ;;  %v198_v2 = vld [vmem:[%s8072_s14 + $0x3c] sm:$0xf]  ;;  %v7898_v20 = vld [vmem:[%s9056_s1 + $0x170] sm:$0xff]   ;;  %7147 = vmatprep.subr.bf16.mxu1 %v7909_v22 }
  0x46   : > { %v2975_v35 = vld [vmem:[#allocation2 + $0x3c] sm:$0xf]  ;;  %v3101_v41 = vrot.slane %v3100_v28, 4  ;;  %v3105_v42 = vrot.slane %v3103_v29, 5  ;;  %v380_v48 = vor.u32 %v378_v27, %v8216_v31  ;;  %v381_v49 = vrot.slane %v8216_v31, 4 }
  0x47   : > { %v3108_v43 = vshrl.u32 %v2975_v35, 16  ;;  %v3111_v44 = vshll.u32 %v2975_v35, 16  ;;  %v372_v45 = vsel %vm8087_vm5, %v364_v14, %v371_v36  ;;  %v638_v46 = vsel %vm8080_vm4, %v373_v37, %v637_v30  ;;  %v647_v32 = vld [vmem:[#allocation2 + $0x60] sm:$0xf]  ;;  %v7899_v37 = vld [vmem:[%s9056_s1 + $0x178] sm:$0xff]  }
  0x48   : > { %7334 = vmatpush3.bf16.msra.mxu0 %v7889_v6  ;;  %v3106_v55 = vsel %vm8151_vm10, %v3101_v41, %v3105_v42  ;;  %v2976_v52 = vld [vmem:[#allocation2 + $0x40] sm:$0xf]  ;;  %636 = vst [vmem:[#allocation2 + $0x4c] sm:$0xf] %v372_v45  ;;  %639 = vst [vmem:[#allocation2 + $0x50] sm:$0x1] %v638_v46  ;;  %v641_v0 = vsel %vm8095_vm7, %v380_v48, %v640_v39  ;;  %v388_v7 = vor.u32 %v386_v38, %v385_v63 }
  0x49   : > { %v2977_v53 = vld [vmem:[#allocation2 + $0x44] sm:$0x1]  ;;  %v3110_v54 = vrot.slane %v3108_v43, 4  ;;  %v3113_v56 = vrot.slane %v3111_v44, 5  ;;  %7335 = vmatprep.subr.bf16.mxu0 %v7893_v25  ;;  %v6654_v57 = vcombine.low %v3096_v34, %v3106_v55  ;;  %v3117_v58 = vshll.u32 %v2976_v52, 16  ;;  %v7891_v61 = vld [vmem:[#allocation2 + $0x3c] sm:$0xff]   ;;  %7148 = vmatpush3.bf16.msra.mxu1 %v7909_v22 }
  0x4a   : > { %v3121_v59 = vshrl.u32 %v2976_v52, 16  ;;  %v3127_v60 = vshll.u32 %v2977_v53, 16  ;;  %v392_v4 = vshrl.u32 %v197_v50, 16  ;;  %7112 = vmatmul.mubr.bf16.gmra.mrb[8].mxu1 %v7891_v61  ;;  %642 = vst [vmem:[#allocation2 + $0x54] sm:$0xf] %v641_v0  ;;  %v395_v11 = vshll.u32 %v197_v50, 16 }
  0x4b   : > { %v3114_v62 = vor.u32 %v3113_v56, %v3110_v54  ;;  %7300 = vmatmul.mubr.bf16.gmra.mrb[4].mxu0 %v6654_v57  ;;  %v3119_v5 = vrot.slane %v3117_v58, 5  ;;  %v2978_v10 = vld [vmem:[#allocation2 + $0x48] sm:$0xf]  ;;  %v390_v16 = vrot.slane %v385_v63, 4  ;;  %v400_v18 = vshrl.u32 %v198_v2, 16  ;;  %v7913_v44 = vld [vmem:[%s9056_s1 + $0x78] sm:$0xff]  }
  0x4c   : > { %v3123_v6 = vrot.slane %v3121_v59, 4  ;;  %v3129_v9 = vrot.slane %v3127_v60, 5  ;;  %v3132_v13 = vshrl.u32 %v2978_v10, 16  ;;  %v3135_v14 = vshll.u32 %v2978_v10, 16  ;;  %7336 = vmatpush3.bf16.msra.mxu0 %v7893_v25  ;;  %v651_v43 = vld [vmem:[#allocation2 + $0x68] sm:$0x1]  ;;  %7149 = vmatprep.subr.bf16.mxu1 %v7913_v44 }
  0x4d   : > { %v3115_v12 = vrot.slane %v3114_v62, 4  ;;  %7337 = vmatprep.subr.bf16.mxu0 %v8232_v47  ;;  %v394_v17 = vrot.slane %v392_v4, 7  ;;  %v389_v23 = vsel %vm8087_vm5, %v381_v49, %v388_v7  ;;  %v645_v30 = vsel %vm8080_vm4, %v390_v16, %v644_v1  ;;  %v8270_v52 = vld [vmem:[%s9056_s1 + $0x80] sm:$0xff]   ;;  %v3781_v62 = vld [vmem:[#allocation2 + $0xc] sm:$0xe]  ;;  %7150 = vmatpush3.bf16.msra.mxu1 %v7913_v44 }
  0x4e   : > { %v3124_v15 = vor.u32 %v3123_v6, %v3119_v5  ;;  %v3134_v3 = vrot.slane %v3132_v13, 4  ;;  %v3137_v8 = vrot.slane %v3135_v14, 5  ;;  %643 = vst [vmem:[#allocation2 + $0x58] sm:$0xf] %v389_v23  ;;  %646 = vst [vmem:[#allocation2 + $0x5c] sm:$0x1] %v645_v30  ;;  %7183 = vmatprep.subr.bf16.mxu1 %v8270_v52 }
  0x4f   : > { %v3120_v24 = vsel %vm8151_vm10, %v3115_v12, %v3119_v5  ;;  %v2979_v27 = vld [vmem:[#allocation2 + $0x4c] sm:$0xf]  ;;  %v2980_v28 = vld [vmem:[#allocation2 + $0x50] sm:$0x1]  ;;  %v397_v31 = vor.u32 %v395_v11, %v394_v17  ;;  %v398_v39 = vrot.slane %v394_v17, 4  ;;  %v402_v41 = vrot.slane %v400_v18, 7 }
  0x50   : > { %v3125_v25 = vrot.slane %v3124_v15, 4  ;;  %v7895_v29 = vld [vmem:[#allocation2 + $0x48] sm:$0xff]   ;;  %v3138_v33 = vor.u32 %v3137_v8, %v3134_v3  ;;  %v3141_v34 = vshll.u32 %v2979_v27, 16  ;;  %v3145_v35 = vshrl.u32 %v2979_v27, 16  ;;  %7338 = vmatpush3.bf16.msra.mxu0 %v8232_v47  ;;  %v8277_v58 = vld [vmem:[%s9056_s1 + $0x180] sm:$0xff]  }
  0x51   : > { %v3151_v36 = vshll.u32 %v2980_v28, 16  ;;  %7115 = vmatprep.mubr.bf16.mxu1 %v7895_v29  ;;  %v403_v42 = vshll.u32 %v198_v2, 16  ;;  %7339 = vmatprep.subr.bf16.mxu0 %v7898_v20  ;;  %v2981_v49 = vld [vmem:[#allocation2 + $0x54] sm:$0xf]  ;;  %v407_v56 = vrot.slane %v402_v41, 4  ;;  %v648_v57 = vsel %vm8095_vm7, %v397_v31, %v647_v32 }
  0x52   : > { %v3130_v38 = vsel %vm8151_vm10, %v3125_v25, %v3129_v9  ;;  %v3139_v46 = vrot.slane %v3138_v33, 4  ;;  %v3143_v47 = vrot.slane %v3141_v34, 5  ;;  %v3147_v48 = vrot.slane %v3145_v35, 4  ;;  %649 = vst [vmem:[#allocation2 + $0x60] sm:$0xf] %v648_v57 }
  0x53   : > { %v6655_v45 = vcombine.low %v3120_v24, %v3130_v38  ;;  %v3156_v50 = vshrl.u32 %v2981_v49, 16  ;;  %v3159_v51 = vshll.u32 %v2981_v49, 16  ;;  %v405_v55 = vor.u32 %v403_v42, %v402_v41  ;;  %v3782_v63 = vld [vmem:[#allocation2 + $0x10] sm:$0xf]  ;;  %v3783_v12 = vld [vmem:[#allocation2 + $0x14] sm:$0x1] }
  0x54   : > { %v3148_v53 = vor.u32 %v3147_v48, %v3143_v47  ;;  %v3153_v54 = vrot.slane %v3151_v36, 5  ;;  %7340 = vmatpush3.bf16.msra.mxu0 %v7898_v20  ;;  %v3144_v0 = vsel %vm8151_vm10, %v3139_v46, %v3143_v47  ;;  %v652_v5 = vsel %vm8080_vm4, %v407_v56, %v651_v43  ;;  %v199_v16 = vld [vmem:[%s8072_s14 + $0x40] sm:$0xf]  ;;  %v200_v3 = vld [vmem:[%s8072_s14 + $0x44] sm:$0xf] }
  0x55   : > { %7303 = vmatprep.mubr.bf16.mxu0 %v6655_v45  ;;  %v3158_v59 = vrot.slane %v3156_v50, 4  ;;  %v3161_v60 = vrot.slane %v3159_v51, 5  ;;  %v406_v61 = vsel %vm8087_vm5, %v398_v39, %v405_v55  ;;  %7341 = vmatprep.subr.bf16.mxu0 %v7899_v37  ;;  %v2982_v2 = vld [vmem:[#allocation2 + $0x58] sm:$0xf]  ;;  %v2983_v6 = vld [vmem:[#allocation2 + $0x5c] sm:$0x1] }
  0x56   : > { %v3149_v1 = vrot.slane %v3148_v53, 4  ;;  %v7896_v4 = vld [vmem:[#allocation2 + $0x54] sm:$0xff]   ;;  %650 = vst [vmem:[#allocation2 + $0x64] sm:$0xf] %v406_v61  ;;  %v3165_v10 = vshll.u32 %v2982_v2, 16  ;;  %v3169_v11 = vshrl.u32 %v2982_v2, 16 }
  0x57   : > { %v3162_v9 = vor.u32 %v3161_v60, %v3158_v59  ;;  %653 = vst [vmem:[#allocation2 + $0x68] sm:$0x1] %v652_v5  ;;  %v3175_v14 = vshll.u32 %v2983_v6, 16  ;;  %7116 = vmatmul.mubr.bf16.gmra.mrb[12].mxu1 %v7896_v4  ;;  %v6675_v7 = vrot.slane %v3781_v62, 9  ;;  %v3879_v15 = vrot.slane %v3782_v63, 5 }
  0x58   : > { %v3154_v13 = vsel %vm8151_vm10, %v3149_v1, %v3153_v54  ;;  %7342 = vmatpush3.bf16.msra.mxu0 %v7899_v37  ;;  %v3167_v20 = vrot.slane %v3165_v10, 5  ;;  %v3171_v22 = vrot.slane %v3169_v11, 4  ;;  %v3882_v24 = vrot.slane %v3783_v12, 5  ;;  %v654_v34 = vld [vmem:[#allocation2 + $0x6c] sm:$0xf] }
  0x59   : > { %v6656_v17 = vcombine.low %v3144_v0, %v3154_v13  ;;  %v3163_v18 = vrot.slane %v3162_v9, 4  ;;  %7375 = vmatprep.subr.bf16.mxu0 %v8277_v58  ;;  %v3177_v8 = vrot.slane %v3175_v14, 5  ;;  %v3881_v23 = vrot.slane %v3879_v15, 4  ;;  %v2984_v31 = vld [vmem:[#allocation2 + $0x60] sm:$0xf] }
  0x5a   : > { %v409_v25 = vshrl.u32 %v199_v16, 16  ;;  %v3172_v27 = vor.u32 %v3171_v22, %v3167_v20  ;;  %v412_v29 = vshll.u32 %v199_v16, 16  ;;  %v417_v30 = vshrl.u32 %v200_v3, 16  ;;  %v3784_v51 = vld [vmem:[#allocation2 + $0x18] sm:$0xe] }
  0x5b   : > { %7304 = vmatmul.mubr.bf16.gmra.mrb[8].mxu0 %v6656_v17  ;;  %v420_v33 = vshll.u32 %v200_v3, 16  ;;  %v3168_v35 = vsel %vm8151_vm10, %v3163_v18, %v3167_v20  ;;  %v3180_v38 = vshrl.u32 %v2984_v31, 16  ;;  %v3183_v39 = vshll.u32 %v2984_v31, 16  ;;  %v3785_v57 = vld [vmem:[#allocation2 + $0x1c] sm:$0xf] }
  0x5c   : > { %v411_v32 = vrot.slane %v409_v25, 7  ;;  %v3173_v36 = vrot.slane %v3172_v27, 4  ;;  %v3880_v45 = vsel %vm8293_vm13, %v6675_v7, %v3879_v15  ;;  %v3883_v56 = vsel %vm8293_vm13, %v3881_v23, %v3882_v24  ;;  %v3786_v63 = vld [vmem:[#allocation2 + $0x20] sm:$0x1]  ;;  %v201_v0 = vld [vmem:[%s8072_s14 + $0x48] sm:$0xf] }
  0x5d   : > { %v2985_v37 = vld [vmem:[#allocation2 + $0x64] sm:$0xf]  ;;  %v3182_v48 = vrot.slane %v3180_v38, 4  ;;  %v3185_v49 = vrot.slane %v3183_v39, 5  ;;  %v8305_v61 = vrot.slane %v417_v30, 7  ;;  %v6676_v4 = vrot.slane %v3784_v51, 9 }
  0x5e   : > { %v7900_v41 = vld [vmem:[#allocation2 + $0x60] sm:$0xff]   ;;  %v2986_v42 = vld [vmem:[#allocation2 + $0x68] sm:$0x1]  ;;  %v3189_v43 = vshll.u32 %v2985_v37, 16  ;;  %v3193_v44 = vshrl.u32 %v2985_v37, 16  ;;  %v414_v46 = vor.u32 %v412_v29, %v411_v32  ;;  %v3178_v47 = vsel %vm8151_vm10, %v3173_v36, %v3177_v8 }
  0x5f   : > { %v3199_v50 = vshll.u32 %v2986_v42, 16  ;;  %7119 = vmatprep.mubr.bf16.mxu1 %v7900_v41  ;;  %v6657_v55 = vcombine.low %v3168_v35, %v3178_v47  ;;  %v3186_v59 = vor.u32 %v3185_v49, %v3182_v48  ;;  %v415_v60 = vrot.slane %v411_v32, 4  ;;  %v202_v6 = vld [vmem:[%s8072_s14 + $0x4c] sm:$0xf]  ;;  %v661_v7 = vld [vmem:[#allocation2 + $0x78] sm:$0xf] }
  0x60   : > { %v3191_v53 = vrot.slane %v3189_v43, 5  ;;  %v3195_v54 = vrot.slane %v3193_v44, 4  ;;  %v655_v62 = vsel %vm8095_vm7, %v414_v46, %v654_v34  ;;  %v3886_v5 = vrot.slane %v3785_v57, 5  ;;  %v3787_v15 = vld [vmem:[#allocation2 + $0x24] sm:$0xe] }
  0x61   : > { %7307 = vmatprep.mubr.bf16.mxu0 %v6657_v55  ;;  %v3201_v2 = vrot.slane %v3199_v50, 5  ;;  %656 = vst [vmem:[#allocation2 + $0x6c] sm:$0xf] %v655_v62  ;;  %v3187_v9 = vrot.slane %v3186_v59, 4  ;;  %v422_v10 = vor.u32 %v420_v33, %v8305_v61  ;;  %v3889_v11 = vrot.slane %v3786_v63, 5 }
  0x62   : > { %v3196_v1 = vor.u32 %v3195_v54, %v3191_v53  ;;  %v426_v12 = vshrl.u32 %v201_v0, 16  ;;  %v429_v14 = vshll.u32 %v201_v0, 16  ;;  %v434_v20 = vshrl.u32 %v202_v6, 16  ;;  %v3788_v22 = vld [vmem:[#allocation2 + $0x28] sm:$0xf] }
  0x63   : > { %v3192_v16 = vsel %vm8151_vm10, %v3187_v9, %v3191_v53  ;;  %v423_v17 = vsel %vm8087_vm5, %v415_v60, %v422_v10  ;;  %v3789_v3 = vld [vmem:[#allocation2 + $0x2c] sm:$0x1]  ;;  %v6707_v23 = vcombine.low %v3880_v45, %v3883_v56  ;;  %v3888_v24 = vrot.slane %v3886_v5, 4  ;;  %v203_v27 = vld [vmem:[%s8072_s14 + $0x50] sm:$0xf] }
  0x64   : > { %v3197_v13 = vrot.slane %v3196_v1, 4  ;;  %v428_v18 = vrot.slane %v426_v12, 7  ;;  %657 = vst [vmem:[#allocation2 + $0x70] sm:$0xf] %v423_v17  ;;  %v437_v25 = vshll.u32 %v202_v6, 16  ;;  %v6677_v33 = vrot.slane %v3787_v15, 9 }
  0x65   : > { %v204_v29 = vld [vmem:[%s8072_s14 + $0x54] sm:$0xf]  ;;  %v8320_v34 = vrot.slane %v434_v20, 7  ;;  %v3893_v35 = vrot.slane %v3788_v22, 5  ;;  %v3896_v36 = vrot.slane %v3789_v3, 5  ;;  %v443_v37 = vshrl.u32 %v203_v27, 16 }
  0x66   : > { %v3202_v8 = vsel %vm8151_vm10, %v3197_v13, %v3201_v2  ;;  %v431_v31 = vor.u32 %v429_v14, %v428_v18  ;;  %v432_v32 = vrot.slane %v428_v18, 4  ;;  %v446_v39 = vshll.u32 %v203_v27, 16  ;;  %v668_v47 = vld [vmem:[#allocation2 + $0x84] sm:$0xf]  ;;  %v3790_v48 = vld [vmem:[#allocation2 + $0x30] sm:$0xe] }
  0x67   : > { %v6658_v30 = vcombine.low %v3192_v16, %v3202_v8  ;;  %v451_v41 = vshrl.u32 %v204_v29, 16  ;;  %v454_v42 = vshll.u32 %v204_v29, 16  ;;  %v3887_v43 = vsel %vm8293_vm13, %v6676_v4, %v3886_v5  ;;  %v3791_v49 = vld [vmem:[#allocation2 + $0x34] sm:$0xf]  ;;  %v3792_v53 = vld [vmem:[#allocation2 + $0x38] sm:$0x1] }
  0x68   : > { %v662_v38 = vsel %vm8095_vm7, %v431_v31, %v661_v7  ;;  %v3890_v44 = vsel %vm8293_vm13, %v3888_v24, %v3889_v11  ;;  %v439_v45 = vor.u32 %v437_v25, %v8320_v34  ;;  %v3895_v46 = vrot.slane %v3893_v35, 4  ;;  %v205_v2 = vld [vmem:[%s8072_s14 + $0x58] sm:$0xf]  ;;  %v206_v9 = vld [vmem:[%s8072_s14 + $0x5c] sm:$0xf]  ;;  %v7910_v11 = vld [vmem:[%s9056_s1 + $0x188] sm:$0xff]  }
  0x69   : > { %7308 = vmatmul.mubr.bf16.gmra.mrb[12].mxu0 %v6658_v30  ;;  %663 = vst [vmem:[#allocation2 + $0x78] sm:$0xf] %v662_v38  ;;  %v3894_v50 = vsel %vm8293_vm13, %v6677_v33, %v3893_v35  ;;  %v445_v51 = vrot.slane %v443_v37, 7  ;;  %v8331_v55 = vrot.slane %v451_v41, 7  ;;  %v3900_v54 = vrot.slane %v3791_v49, 5  ;;  %v7914_v37 = vld [vmem:[%s9056_s1 + $0x190] sm:$0xff]  }
  0x6a   : > { %7343 = vmatprep.mubr.bf16.mxu0 %v6707_v23  ;;  %v440_v56 = vsel %vm8087_vm5, %v432_v32, %v439_v45  ;;  %v3897_v57 = vsel %vm8293_vm13, %v3895_v46, %v3896_v36  ;;  %v6678_v59 = vrot.slane %v3790_v48, 9  ;;  %v6708_v62 = vcombine.low %v3887_v43, %v3890_v44  ;;  %v675_v15 = vld [vmem:[#allocation2 + $0x90] sm:$0xf]  ;;  %v3793_v16 = vld [vmem:[#allocation2 + $0x3c] sm:$0xe] }
  0x6b   : > { %v7901_v60 = vld [vmem:[#allocation2 + $0x6c] sm:$0xff]   ;;  %664 = vst [vmem:[#allocation2 + $0x7c] sm:$0xf] %v440_v56  ;;  %v448_v63 = vor.u32 %v446_v39, %v445_v51  ;;  %v449_v0 = vrot.slane %v445_v51, 4  ;;  %v456_v1 = vor.u32 %v454_v42, %v8331_v55  ;;  %v6709_v4 = vcombine.low %v3894_v50, %v3897_v57  ;;  %v3794_v20 = vld [vmem:[#allocation2 + $0x40] sm:$0xf] }
  0x6c   : > { %v3902_v5 = vrot.slane %v3900_v54, 4  ;;  %v3903_v6 = vrot.slane %v3792_v53, 5  ;;  %v460_v10 = vshrl.u32 %v205_v2, 16  ;;  %7120 = vmatmul.mubr.bf16.gmra.mrb[16].mxu1 %v7901_v60  ;;  %v463_v14 = vshll.u32 %v205_v2, 16  ;;  %v3795_v22 = vld [vmem:[#allocation2 + $0x44] sm:$0x1] }
  0x6d   : > { %v457_v12 = vsel %vm8087_vm5, %v449_v0, %v456_v1  ;;  %v669_v13 = vsel %vm8095_vm7, %v448_v63, %v668_v47  ;;  %v468_v7 = vshrl.u32 %v206_v9, 16  ;;  %v471_v18 = vshll.u32 %v206_v9, 16  ;;  %v207_v31 = vld [vmem:[%s8072_s14 + $0x60] sm:$0xf]  ;;  %v208_v32 = vld [vmem:[%s8072_s14 + $0x64] sm:$0xf] }
  0x6e   : > { %670 = vst [vmem:[#allocation2 + $0x84] sm:$0xf] %v669_v13  ;;  %671 = vst [vmem:[#allocation2 + $0x88] sm:$0xf] %v457_v12  ;;  %v462_v17 = vrot.slane %v460_v10, 7  ;;  %v3901_v3 = vsel %vm8293_vm13, %v6678_v59, %v3900_v54  ;;  %v6679_v23 = vrot.slane %v3793_v16, 9  ;;  %v3904_v25 = vsel %vm8293_vm13, %v3902_v5, %v3903_v6 }
  0x6f   : > { %v8349_v8 = vrot.slane %v468_v7, 7  ;;  %v3907_v24 = vrot.slane %v3794_v20, 5  ;;  %v3910_v30 = vrot.slane %v3795_v22, 5  ;;  %v477_v39 = vshrl.u32 %v207_v31, 16  ;;  %v682_v47 = vld [vmem:[#allocation2 + $0x9c] sm:$0xf] }
  0x70   : > { %v465_v27 = vor.u32 %v463_v14, %v462_v17  ;;  %v466_v29 = vrot.slane %v462_v17, 4  ;;  %v480_v41 = vshll.u32 %v207_v31, 16  ;;  %v485_v42 = vshrl.u32 %v208_v32, 16  ;;  %v3796_v48 = vld [vmem:[#allocation2 + $0x48] sm:$0xe]  ;;  %v7916_v49 = vld [vmem:[%s9056_s1 + $0x198] sm:$0xff]  }
  0x71   : > { %7344 = vmatmul.mubr.bf16.vlgmr.msra.gmra.mrb[0].mxu0 %v6708_v62  ;;  %v473_v33 = vor.u32 %v471_v18, %v8349_v8  ;;  %v3908_v35 = vsel %vm8293_vm13, %v6679_v23, %v3907_v24  ;;  %v3909_v36 = vrot.slane %v3907_v24, 4  ;;  %v6710_v43 = vcombine.low %v3901_v3, %v3904_v25  ;;  %v3797_v54 = vld [vmem:[#allocation2 + $0x4c] sm:$0xf]  ;;  %v3798_v56 = vld [vmem:[#allocation2 + $0x50] sm:$0x1]  ;;  %v7918_v17 = vld [vmem:[%s9056_s1 + $0x1a0] sm:$0xff]  }
  0x72   : > { %7347 = vmatprep.mubr.bf16.mxu0 %v6709_v4  ;;  %7376 = vmatpush3.bf16.msra.mxu0 %v8277_v58  ;;  %v7903_v38 = vld [vmem:[#allocation2 + $0x78] sm:$0xff]   ;;  %v676_v58 = vsel %vm8095_vm7, %v465_v27, %v675_v15  ;;  %v488_v46 = vshll.u32 %v208_v32, 16  ;;  %v479_v51 = vrot.slane %v477_v39, 7  ;;  %v8371_v53 = vrot.slane %v485_v42, 7  ;;  %v209_v2 = vld [vmem:[%s8072_s14 + $0x68] sm:$0xf] }
  0x73   : > { %7377 = vmatprep.subr.bf16.mxu0 %v7910_v11  ;;  %v474_v44 = vsel %vm8087_vm5, %v466_v29, %v473_v33  ;;  %677 = vst [vmem:[#allocation2 + $0x90] sm:$0xf] %v676_v58  ;;  %v3911_v45 = vsel %vm8293_vm13, %v3909_v36, %v3910_v30  ;;  %7123 = vmatprep.mubr.bf16.mxu1 %v7903_v38  ;;  %v6680_v59 = vrot.slane %v3796_v48, 9  ;;  %v3914_v0 = vrot.slane %v3797_v54, 5  ;;  %v210_v4 = vld [vmem:[%s8072_s14 + $0x6c] sm:$0xf] }
  0x74   : > { %678 = vst [vmem:[#allocation2 + $0x94] sm:$0xf] %v474_v44  ;;  %v6711_v50 = vcombine.low %v3908_v35, %v3911_v45  ;;  %v482_v60 = vor.u32 %v480_v41, %v479_v51  ;;  %v483_v62 = vrot.slane %v479_v51, 4  ;;  %v490_v63 = vor.u32 %v488_v46, %v8371_v53  ;;  %v689_v15 = vld [vmem:[#allocation2 + $0xa8] sm:$0xf] }
  0x75   : > { %v7904_v57 = vld [vmem:[#allocation2 + $0x84] sm:$0xff]   ;;  %v3917_v1 = vrot.slane %v3798_v56, 5  ;;  %v494_v9 = vshrl.u32 %v209_v2, 16  ;;  %v497_v10 = vshll.u32 %v209_v2, 16  ;;  %v3915_v12 = vsel %vm8293_vm13, %v6680_v59, %v3914_v0  ;;  %v3800_v16 = vld [vmem:[#allocation2 + $0x58] sm:$0xf] }
  0x76   : > { %7378 = vmatpush3.bf16.msra.mxu0 %v7910_v11  ;;  %7124 = vmatmul.mubr.bf16.gmra.mrb[20].mxu1 %v7904_v57  ;;  %v491_v5 = vsel %vm8087_vm5, %v483_v62, %v490_v63  ;;  %v683_v6 = vsel %vm8095_vm7, %v482_v60, %v682_v47  ;;  %v3799_v11 = vld [vmem:[#allocation2 + $0x54] sm:$0xe]  ;;  %v3916_v13 = vrot.slane %v3914_v0, 4  ;;  %v502_v14 = vshrl.u32 %v210_v4, 16  ;;  %v3801_v20 = vld [vmem:[#allocation2 + $0x5c] sm:$0x1] }
  0x77   : > { %7379 = vmatprep.subr.bf16.mxu0 %v7914_v37  ;;  %684 = vst [vmem:[#allocation2 + $0x9c] sm:$0xf] %v683_v6  ;;  %685 = vst [vmem:[#allocation2 + $0xa0] sm:$0xf] %v491_v5  ;;  %v505_v7 = vshll.u32 %v210_v4, 16  ;;  %v496_v18 = vrot.slane %v494_v9, 7 }
  0x78   : > { %v6681_v22 = vrot.slane %v3799_v11, 9  ;;  %v3918_v23 = vsel %vm8293_vm13, %v3916_v13, %v3917_v1  ;;  %v8387_v24 = vrot.slane %v502_v14, 7  ;;  %v3921_v25 = vrot.slane %v3800_v16, 5  ;;  %v211_v32 = vld [vmem:[%s8072_s14 + $0x70] sm:$0xf]  ;;  %v7920_v38 = vld [vmem:[%s9056_s1 + $0x1a8] sm:$0xff]  }
  0x79   : > { %7348 = vmatmul.mubr.bf16.gmra.mrb[4].mxu0 %v6710_v43  ;;  %v3924_v27 = vrot.slane %v3801_v20, 5  ;;  %v6712_v29 = vcombine.low %v3915_v12, %v3918_v23  ;;  %v499_v30 = vor.u32 %v497_v10, %v496_v18  ;;  %v500_v31 = vrot.slane %v496_v18, 4  ;;  %v212_v33 = vld [vmem:[%s8072_s14 + $0x74] sm:$0xf]  ;;  %v3802_v48 = vld [vmem:[#allocation2 + $0x60] sm:$0xe] }
  0x7a   : > { %7351 = vmatprep.mubr.bf16.mxu0 %v6711_v50  ;;  %7380 = vmatpush3.bf16.msra.mxu0 %v7914_v37  ;;  %v507_v35 = vor.u32 %v505_v7, %v8387_v24  ;;  %v3922_v36 = vsel %vm8293_vm13, %v6681_v22, %v3921_v25  ;;  %v3923_v37 = vrot.slane %v3921_v25, 4  ;;  %v511_v39 = vshrl.u32 %v211_v32, 16  ;;  %v696_v47 = vld [vmem:[#allocation2 + $0xb4] sm:$0xf]  ;;  %v3804_v59 = vld [vmem:[#allocation2 + $0x68] sm:$0x1] }
  0x7b   : > { %7381 = vmatprep.subr.bf16.mxu0 %v7916_v49  ;;  %v7907_v3 = vld [vmem:[#allocation2 + $0x90] sm:$0xff]   ;;  %v690_v58 = vsel %vm8095_vm7, %v499_v30, %v689_v15  ;;  %v514_v41 = vshll.u32 %v211_v32, 16  ;;  %v519_v42 = vshrl.u32 %v212_v33, 16  ;;  %v424_v43 = vrot.slane %v8305_v61, 4  ;;  %v1095_v9 = vld [vmem:[#allocation2] sm:$0xf] }
  0x7c   : > { %7127 = vmatprep.mubr.bf16.mxu1 %v7907_v3  ;;  %v508_v44 = vsel %vm8087_vm5, %v500_v31, %v507_v35  ;;  %691 = vst [vmem:[#allocation2 + $0xa8] sm:$0xf] %v690_v58  ;;  %v3925_v45 = vsel %vm8293_vm13, %v3923_v37, %v3924_v27  ;;  %v522_v46 = vshll.u32 %v212_v33, 16  ;;  %v7922_v50 = vld [vmem:[%s9056_s1 + $0x1b0] sm:$0xff]   ;;  %v513_v61 = vrot.slane %v511_v39, 7 }
  0x7d   : > { %692 = vst [vmem:[#allocation2 + $0xac] sm:$0xf] %v508_v44  ;;  %v6713_v54 = vcombine.low %v3922_v36, %v3925_v45  ;;  %v441_v56 = vrot.slane %v8320_v34, 4  ;;  %v8408_v57 = vrot.slane %v519_v42, 7  ;;  %v6682_v60 = vrot.slane %v3802_v48, 9 }
  0x7e   : > { %7382 = vmatpush3.bf16.msra.mxu0 %v7916_v49  ;;  %v3803_v49 = vld [vmem:[#allocation2 + $0x64] sm:$0xf]  ;;  %v7908_v51 = vld [vmem:[#allocation2 + $0x9c] sm:$0xff]   ;;  %v516_v63 = vor.u32 %v514_v41, %v513_v61  ;;  %v517_v0 = vrot.slane %v513_v61, 4  ;;  %v3931_v1 = vrot.slane %v3804_v59, 5  ;;  %v458_v2 = vrot.slane %v8331_v55, 4 }
  0x7f   : > { %7383 = vmatprep.subr.bf16.mxu0 %v7918_v17  ;;  %v3928_v62 = vrot.slane %v3803_v49, 5  ;;  %7128 = vmatmul.mubr.bf16.gmra.mrb[24].mxu1 %v7908_v51  ;;  %v524_v4 = vor.u32 %v522_v46, %v8408_v57  ;;  %v1096_v10 = vld [vmem:[#allocation2 + $0x4] sm:$0xf]  ;;  %v1097_v12 = vld [vmem:[#allocation2 + $0x8] sm:$0x1]  ;;  %v1147_v13 = vshrl.u32 %v1095_v9, 16 }
  0x80   : > { %v697_v11 = vsel %vm8095_vm7, %v516_v63, %v696_v47  ;;  %v1150_v14 = vshll.u32 %v1095_v9, 16  ;;  %v1156_v7 = vshll.u32 %v1096_v10, 16  ;;  %v1166_v18 = vshll.u32 %v1097_v12, 16  ;;  %v658_v20 = vld [vmem:[#allocation2 + $0x74] sm:$0x1]  ;;  %v8429_v46 = vld [vmem:[%s9056_s1 + $0x1c0] sm:$0xff]  }
  0x81   : > { %7352 = vmatmul.mubr.bf16.gmra.mrb[8].mxu0 %v6712_v29  ;;  %v3929_v5 = vsel %vm8293_vm13, %v6682_v60, %v3928_v62  ;;  %v3930_v6 = vrot.slane %v3928_v62, 4  ;;  %v525_v15 = vsel %vm8087_vm5, %v517_v0, %v524_v4  ;;  %698 = vst [vmem:[#allocation2 + $0xb4] sm:$0xf] %v697_v11  ;;  %v1149_v3 = vrot.slane %v1147_v13, 4  ;;  %v3805_v27 = vld [vmem:[#allocation2 + $0x6c] sm:$0xe] }
  0x82   : > { %7384 = vmatpush3.bf16.msra.mxu0 %v7918_v17  ;;  %7355 = vmatprep.mubr.bf16.mxu0 %v6713_v54  ;;  %v1160_v17 = vshrl.u32 %v1096_v10, 16  ;;  %699 = vst [vmem:[#allocation2 + $0xb8] sm:$0xf] %v525_v15  ;;  %v1152_v23 = vrot.slane %v1150_v14, 5  ;;  %v1158_v25 = vrot.slane %v1156_v7, 5  ;;  %v7923_v29 = vld [vmem:[%s9056_s1 + $0x1b8] sm:$0xff]   ;;  %v659_v35 = vsel %vm8080_vm4, %v424_v43, %v658_v20 }
  0x83   : > { %7385 = vmatprep.subr.bf16.mxu0 %v7920_v38  ;;  %v3932_v16 = vsel %vm8293_vm13, %v3930_v6, %v3931_v1  ;;  %v475_v30 = vrot.slane %v8349_v8, 4  ;;  %v1168_v33 = vrot.slane %v1166_v18, 5  ;;  %660 = vst [vmem:[#allocation2 + $0x74] sm:$0x1] %v659_v35  ;;  %v3806_v37 = vld [vmem:[#allocation2 + $0x70] sm:$0xf] }
  0x84   : > { %v6714_v22 = vcombine.low %v3929_v5, %v3932_v16  ;;  %v7911_v31 = vld [vmem:[#allocation2 + $0xa8] sm:$0xff]   ;;  %v1162_v32 = vrot.slane %v1160_v17, 4  ;;  %v1153_v36 = vor.u32 %v1152_v23, %v1149_v3  ;;  %v1099_v58 = vld [vmem:[#allocation2 + $0x10] sm:$0xf]  ;;  %v3935_v41 = vrot.slane %v3806_v37, 5 }
  0x85   : > { %7131 = vmatprep.mubr.bf16.mxu1 %v7911_v31  ;;  %v1100_v42 = vld [vmem:[#allocation2 + $0x14] sm:$0x1]  ;;  %v1180_v43 = vshll.u32 %v1099_v58, 16  ;;  %v1184_v48 = vshrl.u32 %v1099_v58, 16  ;;  %v6683_v54 = vrot.slane %v3805_v27, 9  ;;  %v492_v14 = vrot.slane %v8371_v53, 4 }
  0x86   : > { %7386 = vmatpush3.bf16.msra.mxu0 %v7920_v38  ;;  %v1098_v38 = vld [vmem:[#allocation2 + $0xc] sm:$0xf]  ;;  %v1163_v39 = vor.u32 %v1162_v32, %v1158_v25  ;;  %v1154_v47 = vrot.slane %v1153_v36, 4  ;;  %v1190_v49 = vshll.u32 %v1100_v42, 16  ;;  %v3937_v61 = vrot.slane %v3935_v41, 4 }
  0x87   : > { %7387 = vmatprep.subr.bf16.mxu0 %v7922_v50  ;;  %v1171_v44 = vshrl.u32 %v1098_v38, 16  ;;  %v1174_v45 = vshll.u32 %v1098_v38, 16  ;;  %v1182_v63 = vrot.slane %v1180_v43, 5  ;;  %v665_v5 = vld [vmem:[#allocation2 + $0x80] sm:$0x1]  ;;  %v509_v7 = vrot.slane %v8387_v24, 4 }
  0x88   : > { %v1164_v51 = vrot.slane %v1163_v39, 4  ;;  %v1159_v60 = vsel %vm8151_vm10, %v1154_v47, %v1158_v25  ;;  %v1192_v4 = vrot.slane %v1190_v49, 5  ;;  %v666_v11 = vsel %vm8080_vm4, %v441_v56, %v665_v5  ;;  %v3808_v12 = vld [vmem:[#allocation2 + $0x78] sm:$0xe]  ;;  %v3809_v13 = vld [vmem:[#allocation2 + $0x7c] sm:$0xf] }
  0x89   : > { %7356 = vmatmul.mubr.bf16.gmra.mrb[12].mxu0 %v6714_v22  ;;  %v1173_v59 = vrot.slane %v1171_v44, 4  ;;  %v1176_v62 = vrot.slane %v1174_v45, 5  ;;  %v7912_v0 = vld [vmem:[#allocation2 + $0xb4] sm:$0xff]   ;;  %v3936_v16 = vsel %vm8293_vm13, %v6683_v54, %v3935_v41  ;;  %667 = vst [vmem:[#allocation2 + $0x80] sm:$0x1] %v666_v11  ;;  %v6684_v20 = vrot.slane %v3808_v12, 9 }
  0x8a   : > { %7388 = vmatpush3.bf16.msra.mxu0 %v7922_v50  ;;  %v1186_v50 = vrot.slane %v1184_v48, 4  ;;  %v1169_v1 = vsel %vm8151_vm10, %v1164_v51, %v1168_v33  ;;  %7132 = vmatmul.mubr.bf16.gmra.mrb[28].mxu1 %v7912_v0  ;;  %v3807_v15 = vld [vmem:[#allocation2 + $0x74] sm:$0x1]  ;;  %v1101_v56 = vld [vmem:[#allocation2 + $0x18] sm:$0xf]  ;;  %v3942_v22 = vrot.slane %v3809_v13, 5 }
  0x8b   : > { %7389 = vmatprep.subr.bf16.mxu0 %v7923_v29  ;;  %v6515_v6 = vcombine.low %v1159_v60, %v1169_v1  ;;  %v1177_v9 = vor.u32 %v1176_v62, %v1173_v59  ;;  %v3938_v17 = vrot.slane %v3807_v15, 5  ;;  %v1102_v3 = vld [vmem:[#allocation2 + $0x1c] sm:$0xf]  ;;  %v1103_v23 = vld [vmem:[#allocation2 + $0x20] sm:$0x1]  ;;  %v1195_v25 = vshrl.u32 %v1101_v56, 16 }
  0x8c   : > { %v1187_v10 = vor.u32 %v1186_v50, %v1182_v63  ;;  %v1198_v32 = vshll.u32 %v1101_v56, 16  ;;  %v672_v33 = vld [vmem:[#allocation2 + $0x8c] sm:$0x1]  ;;  %v3811_v35 = vld [vmem:[#allocation2 + $0x84] sm:$0xe]  ;;  %v1204_v58 = vshll.u32 %v1102_v3, 16  ;;  %v3943_v60 = vsel %vm8293_vm13, %v6684_v20, %v3942_v22 }
  0x8d   : > { %7151 = vmatprep.mubr.bf16.mxu1 %v6515_v6  ;;  %v1178_v34 = vrot.slane %v1177_v9, 4  ;;  %v3939_v27 = vsel %vm8293_vm13, %v3937_v61, %v3938_v17  ;;  %v1197_v38 = vrot.slane %v1195_v25, 4  ;;  %v1104_v39 = vld [vmem:[#allocation2 + $0x24] sm:$0xf]  ;;  %v1208_v42 = vshrl.u32 %v1102_v3, 16  ;;  %v7917_v43 = vld [vmem:[%s9056_s1 + $0x88] sm:$0xff]  }
  0x8e   : > { %7390 = vmatpush3.bf16.msra.mxu0 %v7923_v29  ;;  %v1188_v18 = vrot.slane %v1187_v10, 4  ;;  %v6715_v36 = vcombine.low %v3936_v16, %v3939_v27  ;;  %v1200_v41 = vrot.slane %v1198_v32, 5  ;;  %v1214_v44 = vshll.u32 %v1103_v23, 16  ;;  %v3812_v47 = vld [vmem:[#allocation2 + $0x88] sm:$0xf]  ;;  %v7919_v11 = vld [vmem:[%s9056_s1 + $0x90] sm:$0xff]  }
  0x8f   : > { %7423 = vmatprep.subr.bf16.mxu0 %v8429_v46  ;;  %v1183_v29 = vsel %vm8151_vm10, %v1178_v34, %v1182_v63  ;;  %v673_v45 = vsel %vm8080_vm4, %v458_v2, %v672_v33  ;;  %v3944_v48 = vrot.slane %v3942_v22, 4  ;;  %v1206_v49 = vrot.slane %v1204_v58, 5  ;;  %v1105_v54 = vld [vmem:[#allocation2 + $0x28] sm:$0xf]  ;;  %v1106_v63 = vld [vmem:[#allocation2 + $0x2c] sm:$0x1] }
  0x90   : > { %v1193_v31 = vsel %vm8151_vm10, %v1188_v18, %v1192_v4  ;;  %7359 = vmatprep.mubr.bf16.mxu0 %v6715_v36  ;;  %674 = vst [vmem:[#allocation2 + $0x8c] sm:$0x1] %v673_v45  ;;  %v6685_v51 = vrot.slane %v3811_v35, 9  ;;  %v1219_v61 = vshrl.u32 %v1104_v39, 16  ;;  %v3810_v59 = vld [vmem:[#allocation2 + $0x80] sm:$0x1]  ;;  %v1201_v55 = vor.u32 %v1200_v41, %v1197_v38 }
  0x91   : > { %v6516_v37 = vcombine.low %v1183_v29, %v1193_v31  ;;  %v1210_v62 = vrot.slane %v1208_v42, 4  ;;  %v1222_v2 = vshll.u32 %v1104_v39, 16  ;;  %v3945_v50 = vrot.slane %v3810_v59, 5  ;;  %v679_v17 = vld [vmem:[#allocation2 + $0x98] sm:$0x1] }
  0x92   : > { %v1216_v0 = vrot.slane %v1214_v44, 5  ;;  %v3949_v1 = vrot.slane %v3812_v47, 5  ;;  %v1221_v4 = vrot.slane %v1219_v61, 4  ;;  %v1202_v5 = vrot.slane %v1201_v55, 4  ;;  %v3814_v34 = vld [vmem:[#allocation2 + $0x90] sm:$0xe] }
  0x93   : > { %7152 = vmatmul.mubr.bf16.vlgmr.msra.gmra.mrb[0].mxu1 %v6516_v37  ;;  %v1211_v6 = vor.u32 %v1210_v62, %v1206_v49  ;;  %v1224_v9 = vrot.slane %v1222_v2, 5  ;;  %v1228_v10 = vshll.u32 %v1105_v54, 16  ;;  %v3946_v12 = vsel %vm8293_vm13, %v3944_v48, %v3945_v50  ;;  %v3815_v22 = vld [vmem:[#allocation2 + $0x94] sm:$0xf]  ;;  %v7921_v36 = vld [vmem:[%s9056_s1 + $0x98] sm:$0xff]   ;;  %v7925_v62 = vld [vmem:[%s9056_s1 + $0xa0] sm:$0xff]  }
  0x94   : > { %7184 = vmatpush3.bf16.msra.mxu1 %v8270_v52  ;;  %v3950_v13 = vsel %vm8293_vm13, %v6685_v51, %v3949_v1  ;;  %v1232_v15 = vshrl.u32 %v1105_v54, 16  ;;  %v1238_v16 = vshll.u32 %v1106_v63, 16  ;;  %v6716_v52 = vcombine.low %v3943_v60, %v3946_v12  ;;  %v1107_v39 = vld [vmem:[#allocation2 + $0x30] sm:$0xf]  ;;  %v1109_v44 = vld [vmem:[#allocation2 + $0x38] sm:$0x1] }
  0x95   : > { %7185 = vmatprep.subr.bf16.mxu1 %v7917_v43  ;;  %v1207_v18 = vsel %vm8151_vm10, %v1202_v5, %v1206_v49  ;;  %v1212_v20 = vrot.slane %v1211_v6, 4  ;;  %v1225_v56 = vor.u32 %v1224_v9, %v1221_v4  ;;  %v3951_v3 = vrot.slane %v3949_v1, 4  ;;  %v686_v47 = vld [vmem:[#allocation2 + $0xa4] sm:$0x1]  ;;  %v3818_v55 = vld [vmem:[#allocation2 + $0xa0] sm:$0xf] }
  0x96   : > { %v1230_v23 = vrot.slane %v1228_v10, 5  ;;  %v1234_v25 = vrot.slane %v1232_v15, 4  ;;  %v680_v27 = vsel %vm8080_vm4, %v475_v30, %v679_v17  ;;  %7360 = vmatmul.mubr.bf16.gmra.mrb[16].mxu0 %v6716_v52  ;;  %v1240_v33 = vrot.slane %v1238_v16, 5  ;;  %v1108_v30 = vld [vmem:[#allocation2 + $0x34] sm:$0xf] }
  0x97   : > { %v1217_v29 = vsel %vm8151_vm10, %v1212_v20, %v1216_v0  ;;  %v3813_v31 = vld [vmem:[#allocation2 + $0x8c] sm:$0x1]  ;;  %v1226_v32 = vrot.slane %v1225_v56, 4  ;;  %681 = vst [vmem:[#allocation2 + $0x98] sm:$0x1] %v680_v27  ;;  %v3956_v35 = vrot.slane %v3815_v22, 5  ;;  %v687_v0 = vsel %vm8080_vm4, %v492_v14, %v686_v47 }
  0x98   : > { %7186 = vmatpush3.bf16.msra.mxu1 %v7917_v43  ;;  %v6517_v37 = vcombine.low %v1207_v18, %v1217_v29  ;;  %v3952_v38 = vrot.slane %v3813_v31, 5  ;;  %v1235_v8 = vor.u32 %v1234_v25, %v1230_v23  ;;  %v6686_v58 = vrot.slane %v3814_v34, 9  ;;  %v1110_v1 = vld [vmem:[#allocation2 + $0x3c] sm:$0xf]  ;;  %v1111_v4 = vld [vmem:[#allocation2 + $0x40] sm:$0xf] }
  0x99   : > { %7187 = vmatprep.subr.bf16.mxu1 %v7919_v11  ;;  %v1231_v41 = vsel %vm8151_vm10, %v1226_v32, %v1230_v23  ;;  %v3958_v42 = vrot.slane %v3956_v35, 4  ;;  %v1243_v45 = vshrl.u32 %v1107_v39, 16  ;;  %v1246_v49 = vshll.u32 %v1107_v39, 16  ;;  %688 = vst [vmem:[#allocation2 + $0xa4] sm:$0x1] %v687_v0  ;;  %v7928_v32 = vld [vmem:[%s9056_s1 + $0xa8] sm:$0xff]  }
  0x9a   : > { %7155 = vmatprep.mubr.bf16.mxu1 %v6517_v37  ;;  %v3953_v43 = vsel %vm8293_vm13, %v3951_v3, %v3952_v38  ;;  %v1236_v48 = vrot.slane %v1235_v8, 4  ;;  %v1252_v51 = vshll.u32 %v1108_v30, 16  ;;  %v1256_v59 = vshrl.u32 %v1108_v30, 16  ;;  %v1112_v12 = vld [vmem:[#allocation2 + $0x44] sm:$0x1] }
  0x9b   : > { %v6717_v54 = vcombine.low %v3950_v13, %v3953_v43  ;;  %v1245_v61 = vrot.slane %v1243_v45, 4  ;;  %v1262_v60 = vshll.u32 %v1109_v44, 16  ;;  %v1248_v2 = vrot.slane %v1246_v49, 5  ;;  %v693_v31 = vld [vmem:[#allocation2 + $0xb0] sm:$0x1] }
  0x9c   : > { %7188 = vmatpush3.bf16.msra.mxu1 %v7919_v11  ;;  %v1241_v63 = vsel %vm8151_vm10, %v1236_v48, %v1240_v33  ;;  %v1254_v50 = vrot.slane %v1252_v51, 5  ;;  %v3957_v6 = vsel %vm8293_vm13, %v6686_v58, %v3956_v35  ;;  %v1258_v9 = vrot.slane %v1256_v59, 4  ;;  %v3817_v11 = vld [vmem:[#allocation2 + $0x9c] sm:$0xe]  ;;  %v3821_v8 = vld [vmem:[#allocation2 + $0xac] sm:$0xf] }
  0x9d   : > { %7189 = vmatprep.subr.bf16.mxu1 %v7921_v36  ;;  %7363 = vmatprep.mubr.bf16.mxu0 %v6717_v54  ;;  %v6518_v5 = vcombine.low %v1231_v41, %v1241_v63  ;;  %v1264_v10 = vrot.slane %v1262_v60, 5  ;;  %v1249_v15 = vor.u32 %v1248_v2, %v1245_v61  ;;  %v3963_v16 = vrot.slane %v3818_v55, 5  ;;  %v3820_v30 = vld [vmem:[#allocation2 + $0xa8] sm:$0xe]  ;;  %v1114_v54 = vld [vmem:[#allocation2 + $0x4c] sm:$0xf] }
  0x9e   : > { %v3816_v13 = vld [vmem:[#allocation2 + $0x98] sm:$0x1]  ;;  %v1267_v53 = vshrl.u32 %v1110_v1, 16  ;;  %v1270_v17 = vshll.u32 %v1110_v1, 16  ;;  %v1259_v34 = vor.u32 %v1258_v9, %v1254_v50  ;;  %v1276_v52 = vshll.u32 %v1111_v4, 16 }
  0x9f   : > { %7156 = vmatmul.mubr.bf16.gmra.mrb[4].mxu1 %v6518_v5  ;;  %v3959_v14 = vrot.slane %v3816_v13, 5  ;;  %v1280_v18 = vshrl.u32 %v1111_v4, 16  ;;  %v1250_v20 = vrot.slane %v1249_v15, 4  ;;  %v6687_v56 = vrot.slane %v3817_v11, 9  ;;  %v1113_v43 = vld [vmem:[#allocation2 + $0x48] sm:$0xf] }
  0xa0   : > { %v3965_v22 = vrot.slane %v3963_v16, 4  ;;  %v1269_v3 = vrot.slane %v1267_v53, 4  ;;  %7190 = vmatpush3.bf16.msra.mxu1 %v7921_v36  ;;  %v1260_v25 = vrot.slane %v1259_v34, 4  ;;  %v1272_v27 = vrot.slane %v1270_v17, 5  ;;  %v1115_v55 = vld [vmem:[#allocation2 + $0x50] sm:$0x1] }
  0xa1   : > { %v3960_v23 = vsel %vm8293_vm13, %v3958_v42, %v3959_v14  ;;  %v1278_v29 = vrot.slane %v1276_v52, 5  ;;  %7191 = vmatprep.subr.bf16.mxu1 %v7925_v62  ;;  %v1255_v35 = vsel %vm8151_vm10, %v1250_v20, %v1254_v50  ;;  %v1282_v37 = vrot.slane %v1280_v18, 4  ;;  %v3819_v42 = vld [vmem:[#allocation2 + $0xa4] sm:$0x1]  ;;  %v700_v0 = vld [vmem:[#allocation2 + $0xbc] sm:$0x1] }
  0xa2   : > { %v6718_v33 = vcombine.low %v3957_v6, %v3960_v23  ;;  %v1286_v38 = vshll.u32 %v1112_v12, 16  ;;  %v1265_v36 = vsel %vm8151_vm10, %v1260_v25, %v1264_v10  ;;  %v1273_v58 = vor.u32 %v1272_v27, %v1269_v3  ;;  %v8516_v1 = vld [vmem:[#allocation2 + $0xb8] sm:$0xf]  ;;  %v8520_v10 = vld [vmem:[#allocation2 + $0xb4] sm:$0xe] }
  0xa3   : > { %v694_v39 = vsel %vm8080_vm4, %v509_v7, %v693_v31  ;;  %v6519_v41 = vcombine.low %v1255_v35, %v1265_v36  ;;  %v1283_v44 = vor.u32 %v1282_v37, %v1278_v29  ;;  %v3970_v47 = vrot.slane %v3821_v8, 5  ;;  %v7932_v7 = vld [vmem:[%s9056_s1 + $0xb0] sm:$0xff]   ;;  %v1117_v53 = vld [vmem:[#allocation2 + $0x58] sm:$0xf]  ;;  %v1118_v20 = vld [vmem:[#allocation2 + $0x5c] sm:$0x1] }
  0xa4   : > { %7364 = vmatmul.mubr.bf16.gmra.mrb[20].mxu0 %v6718_v33  ;;  %v1288_v45 = vrot.slane %v1286_v38, 5  ;;  %695 = vst [vmem:[#allocation2 + $0xb0] sm:$0x1] %v694_v39  ;;  %7192 = vmatpush3.bf16.msra.mxu1 %v7925_v62  ;;  %v526_v48 = vrot.slane %v8408_v57, 4  ;;  %v3964_v49 = vsel %vm8293_vm13, %v6687_v56, %v3963_v16  ;;  %v3966_v51 = vrot.slane %v3819_v42, 5  ;;  %v7936_v17 = vld [vmem:[%s9056_s1 + $0xb8] sm:$0xff]  }
  0xa5   : > { %v1274_v24 = vrot.slane %v1273_v58, 4  ;;  %7193 = vmatprep.subr.bf16.mxu1 %v7928_v32  ;;  %7159 = vmatprep.mubr.bf16.mxu1 %v6519_v41  ;;  %v1284_v61 = vrot.slane %v1283_v44, 4  ;;  %v6688_v59 = vrot.slane %v3820_v30, 9  ;;  %v3972_v60 = vrot.slane %v3970_v47, 4  ;;  %v1116_v11 = vld [vmem:[#allocation2 + $0x54] sm:$0xf] }
  0xa6   : > { %v1291_v63 = vshrl.u32 %v1113_v43, 16  ;;  %v3967_v57 = vsel %vm8293_vm13, %v3965_v22, %v3966_v51  ;;  %v1294_v2 = vshll.u32 %v1113_v43, 16  ;;  %v1300_v50 = vshll.u32 %v1114_v54, 16  ;;  %v8534_v33 = vld [vmem:[%s9056_s1 + $0xc0] sm:$0xff]   ;;  %v213_v36 = vld [vmem:[%s8072_s14 + $0x78] sm:$0xf] }
  0xa7   : > { %v1279_v62 = vsel %vm8151_vm10, %v1274_v24, %v1278_v29  ;;  %v6719_v4 = vcombine.low %v3964_v49, %v3967_v57  ;;  %v1289_v5 = vsel %vm8151_vm10, %v1284_v61, %v1288_v45  ;;  %v1304_v9 = vshrl.u32 %v1114_v54, 16  ;;  %v214_v42 = vld [vmem:[%s8072_s14 + $0x7c] sm:$0xf] }
  0xa8   : > { %v1293_v6 = vrot.slane %v1291_v63, 4  ;;  %7194 = vmatpush3.bf16.msra.mxu1 %v7928_v32  ;;  %v6520_v12 = vcombine.low %v1279_v62, %v1289_v5  ;;  %v1296_v13 = vrot.slane %v1294_v2, 5  ;;  %v1302_v15 = vrot.slane %v1300_v50, 5  ;;  %v707_v2 = vld [vmem:[#allocation2 + $0xc8] sm:$0x1] }
  0xa9   : > { %v1310_v16 = vshll.u32 %v1115_v55, 16  ;;  %7195 = vmatprep.subr.bf16.mxu1 %v7932_v7  ;;  %7367 = vmatprep.mubr.bf16.mxu0 %v6719_v4  ;;  %v3971_v14 = vsel %vm8293_vm13, %v6688_v59, %v3970_v47  ;;  %v1306_v34 = vrot.slane %v1304_v9, 4  ;;  %v701_v52 = vsel %vm8080_vm4, %v526_v48, %v700_v0  ;;  %v1119_v5 = vld [vmem:[#allocation2 + $0x60] sm:$0xf] }
  0xaa   : > { %v3977_v18 = vrot.slane %v8516_v1, 5  ;;  %7160 = vmatmul.mubr.bf16.gmra.mrb[8].mxu1 %v6520_v12  ;;  %v1297_v22 = vor.u32 %v1296_v13, %v1293_v6  ;;  %702 = vst [vmem:[#allocation2 + $0xbc] sm:$0x1] %v701_v52  ;;  %v6689_v3 = vrot.slane %v8520_v10, 9  ;;  %v1315_v23 = vshrl.u32 %v1116_v11, 16 }
  0xab   : > { %v3822_v56 = vld [vmem:[#allocation2 + $0xb0] sm:$0x1]  ;;  %v1318_v25 = vshll.u32 %v1116_v11, 16  ;;  %v1307_v29 = vor.u32 %v1306_v34, %v1302_v15  ;;  %v1312_v31 = vrot.slane %v1310_v16, 5  ;;  %v1324_v8 = vshll.u32 %v1117_v53, 16 }
  0xac   : > { %v3973_v27 = vrot.slane %v3822_v56, 5  ;;  %v3979_v32 = vrot.slane %v3977_v18, 4  ;;  %7196 = vmatpush3.bf16.msra.mxu1 %v7932_v7  ;;  %v1298_v35 = vrot.slane %v1297_v22, 4  ;;  %v1317_v37 = vrot.slane %v1315_v23, 4  ;;  %v1120_v6 = vld [vmem:[#allocation2 + $0x64] sm:$0xf] }
  0xad   : > { %v1320_v38 = vrot.slane %v1318_v25, 5  ;;  %7197 = vmatprep.subr.bf16.mxu1 %v7936_v17  ;;  %v1308_v39 = vrot.slane %v1307_v29, 4  ;;  %v1328_v30 = vshrl.u32 %v1117_v53, 16  ;;  %v1334_v41 = vshll.u32 %v1118_v20, 16  ;;  %v1121_v12 = vld [vmem:[#allocation2 + $0x68] sm:$0x1] }
  0xae   : > { %v3974_v58 = vsel %vm8293_vm13, %v3972_v60, %v3973_v27  ;;  %v1303_v45 = vsel %vm8151_vm10, %v1298_v35, %v1302_v15  ;;  %v1326_v43 = vrot.slane %v1324_v8, 5  ;;  %v528_v24 = vshrl.u32 %v213_v36, 16  ;;  %v703_v60 = vld [vmem:[#allocation2 + $0xc0] sm:$0xf]  ;;  %v1122_v20 = vld [vmem:[#allocation2 + $0x6c] sm:$0xf] }
  0xaf   : > { %v6720_v44 = vcombine.low %v3971_v14, %v3974_v58  ;;  %v1321_v47 = vor.u32 %v1320_v38, %v1317_v37  ;;  %v1313_v48 = vsel %vm8151_vm10, %v1308_v39, %v1312_v31  ;;  %v1330_v49 = vrot.slane %v1328_v30, 4  ;;  %v1123_v56 = vld [vmem:[#allocation2 + $0x70] sm:$0xf]  ;;  %v1124_v27 = vld [vmem:[#allocation2 + $0x74] sm:$0x1] }
  0xb0   : > { %v1336_v51 = vrot.slane %v1334_v41, 5  ;;  %7198 = vmatpush3.bf16.msra.mxu1 %v7936_v17  ;;  %v6521_v54 = vcombine.low %v1303_v45, %v1313_v48  ;;  %v531_v61 = vshll.u32 %v213_v36, 16  ;;  %v536_v59 = vshrl.u32 %v214_v42, 16 }
  0xb1   : > { %7368 = vmatmul.mubr.bf16.gmra.mrb[24].mxu0 %v6720_v44  ;;  %v1322_v7 = vrot.slane %v1321_v47, 4  ;;  %7231 = vmatprep.subr.bf16.mxu1 %v8534_v33  ;;  %v3825_v55 = vld [vmem:[#allocation2 + $0xbc] sm:$0x1]  ;;  %v1331_v63 = vor.u32 %v1330_v49, %v1326_v43  ;;  %v530_v57 = vrot.slane %v528_v24, 7  ;;  %v539_v62 = vshll.u32 %v214_v42, 16 }
  0xb2   : > { %7163 = vmatprep.mubr.bf16.mxu1 %v6521_v54  ;;  %v3978_v50 = vsel %vm8293_vm13, %v6689_v3, %v3977_v18  ;;  %v3980_v0 = vrot.slane %v3825_v55, 5  ;;  %v538_v4 = vrot.slane %v536_v59, 7  ;;  %v1339_v13 = vshrl.u32 %v1119_v5, 16  ;;  %v1125_v42 = vld [vmem:[#allocation2 + $0x78] sm:$0xf] }
  0xb3   : > { %v1327_v1 = vsel %vm8151_vm10, %v1322_v7, %v1326_v43  ;;  %v1332_v9 = vrot.slane %v1331_v63, 4  ;;  %v533_v10 = vor.u32 %v531_v61, %v530_v57  ;;  %v534_v11 = vrot.slane %v530_v57, 4  ;;  %v1126_v43 = vld [vmem:[#allocation2 + $0x7c] sm:$0xf] }
  0xb4   : > { %v3981_v15 = vsel %vm8293_vm13, %v3979_v32, %v3980_v0  ;;  %v541_v16 = vor.u32 %v539_v62, %v538_v4  ;;  %v543_v53 = vrot.slane %v538_v4, 4  ;;  %v1342_v17 = vshll.u32 %v1119_v5, 16 }
  0xb5   : > { %v6721_v14 = vcombine.low %v3978_v50, %v3981_v15  ;;  %v1337_v34 = vsel %vm8151_vm10, %v1332_v9, %v1336_v51  ;;  %v704_v52 = vsel %vm8095_vm7, %v533_v10, %v703_v60  ;;  %v1341_v18 = vrot.slane %v1339_v13, 4  ;;  %v1127_v60 = vld [vmem:[#allocation2 + $0x80] sm:$0x1]  ;;  %v1129_v13 = vld [vmem:[#allocation2 + $0x88] sm:$0xf] }
  0xb6   : > { %v6522_v22 = vcombine.low %v1327_v1, %v1337_v34  ;;  %v542_v3 = vsel %vm8087_vm5, %v534_v11, %v541_v16  ;;  %705 = vst [vmem:[#allocation2 + $0xc0] sm:$0xf] %v704_v52  ;;  %v708_v23 = vsel %vm8080_vm4, %v543_v53, %v707_v2  ;;  %v1344_v25 = vrot.slane %v1342_v17, 5 }
  0xb7   : > { %7371 = vmatprep.mubr.bf16.mxu0 %v6721_v14  ;;  %706 = vst [vmem:[#allocation2 + $0xc4] sm:$0xf] %v542_v3  ;;  %709 = vst [vmem:[#allocation2 + $0xc8] sm:$0x1] %v708_v23  ;;  %v1348_v29 = vshll.u32 %v1120_v6, 16  ;;  %v1352_v31 = vshrl.u32 %v1120_v6, 16 }
  0xb8   : > { %v1358_v26 = vshll.u32 %v1121_v12, 16  ;;  %v1363_v32 = vshrl.u32 %v1122_v20, 16  ;;  %7164 = vmatmul.mubr.bf16.gmra.mrb[12].mxu1 %v6522_v22  ;;  %v1345_v35 = vor.u32 %v1344_v25, %v1341_v18  ;;  %v1366_v37 = vshll.u32 %v1122_v20, 16  ;;  %v1128_v6 = vld [vmem:[#allocation2 + $0x84] sm:$0xf]  ;;  %v7924_v22 = vld [vmem:[#allocation2 + $0x18] sm:$0xff]  }
  0xb9   : > { %v1372_v38 = vshll.u32 %v1123_v56, 16  ;;  %v1376_v8 = vshrl.u32 %v1123_v56, 16  ;;  %v1350_v21 = vrot.slane %v1348_v29, 5  ;;  %v1354_v36 = vrot.slane %v1352_v31, 4  ;;  %v1130_v14 = vld [vmem:[#allocation2 + $0x8c] sm:$0x1] }
  0xba   : > { %v1365_v58 = vrot.slane %v1363_v32, 4  ;;  %v1346_v39 = vrot.slane %v1345_v35, 4  ;;  %v1368_v19 = vrot.slane %v1366_v37, 5  ;;  %v1360_v45 = vrot.slane %v1358_v26, 5 }
  0xbb   : > { %v1374_v30 = vrot.slane %v1372_v38, 5  ;;  %v1378_v41 = vrot.slane %v1376_v8, 4  ;;  %v1355_v44 = vor.u32 %v1354_v36, %v1350_v21  ;;  %v1382_v47 = vshll.u32 %v1124_v27, 16  ;;  %v1131_v8 = vld [vmem:[#allocation2 + $0x90] sm:$0xf] }
  0xbc   : > { %v1387_v48 = vshrl.u32 %v1125_v42, 16  ;;  %v1351_v49 = vsel %vm8151_vm10, %v1346_v39, %v1350_v21  ;;  %v1369_v51 = vor.u32 %v1368_v19, %v1365_v58  ;;  %v1390_v54 = vshll.u32 %v1125_v42, 16  ;;  %v1132_v58 = vld [vmem:[#allocation2 + $0x94] sm:$0xf]  ;;  %v1133_v39 = vld [vmem:[#allocation2 + $0x98] sm:$0x1] }
  0xbd   : > { %v1379_v24 = vor.u32 %v1378_v41, %v1374_v30  ;;  %v3826_v7 = vld [vmem:[#allocation2 + $0xc0] sm:$0xe]  ;;  %v1356_v61 = vrot.slane %v1355_v44, 4  ;;  %v1384_v59 = vrot.slane %v1382_v47, 5  ;;  %v1396_v63 = vshll.u32 %v1126_v43, 16 }
  0xbe   : > { %v1389_v55 = vrot.slane %v1387_v48, 4  ;;  %v3827_v57 = vld [vmem:[#allocation2 + $0xc4] sm:$0xf]  ;;  %v3828_v62 = vld [vmem:[#allocation2 + $0xc8] sm:$0x1]  ;;  %v6690_v2 = vrot.slane %v3826_v7, 9 }
  0xbf   : > { %v1370_v50 = vrot.slane %v1369_v51, 4  ;;  %v3984_v0 = vrot.slane %v3827_v57, 5  ;;  %v3987_v1 = vrot.slane %v3828_v62, 5  ;;  %v1361_v4 = vsel %vm8151_vm10, %v1356_v61, %v1360_v45  ;;  %v7926_v45 = vld [vmem:[#allocation2 + $0x24] sm:$0xff]   ;;  %v1134_v61 = vld [vmem:[#allocation2 + $0x9c] sm:$0xf] }
  0xc0   : > { %v1380_v5 = vrot.slane %v1379_v24, 4  ;;  %v6523_v9 = vcombine.low %v1351_v49, %v1361_v4  ;;  %v1392_v11 = vrot.slane %v1390_v54, 5  ;;  %v1398_v12 = vrot.slane %v1396_v63, 5 }
  0xc1   : > { %v1375_v10 = vsel %vm8151_vm10, %v1370_v50, %v1374_v30  ;;  %v3985_v15 = vsel %vm8293_vm13, %v6690_v2, %v3984_v0  ;;  %v3986_v16 = vrot.slane %v3984_v0, 4  ;;  %v1400_v17 = vshrl.u32 %v1126_v43, 16  ;;  %v1136_v2 = vld [vmem:[#allocation2 + $0xa4] sm:$0x1] }
  0xc2   : > { %v1385_v53 = vsel %vm8151_vm10, %v1380_v5, %v1384_v59  ;;  %7167 = vmatprep.mubr.bf16.mxu1 %v6523_v9  ;;  %v1393_v52 = vor.u32 %v1392_v11, %v1389_v55  ;;  %v1406_v18 = vshll.u32 %v1127_v60, 16  ;;  %v1411_v20 = vshrl.u32 %v1128_v6, 16  ;;  %v1135_v59 = vld [vmem:[#allocation2 + $0xa0] sm:$0xf]  ;;  %v7927_v55 = vld [vmem:[#allocation2 + $0x30] sm:$0xff]   ;;  %v7934_v11 = vld [vmem:[%s9056_s1 + $0x1c8] sm:$0xff]  }
  0xc3   : > { %v6524_v34 = vcombine.low %v1375_v10, %v1385_v53  ;;  %v3988_v56 = vsel %vm8293_vm13, %v3986_v16, %v3987_v1  ;;  %v1402_v3 = vrot.slane %v1400_v17, 4  ;;  %v1414_v23 = vshll.u32 %v1128_v6, 16 }
  0xc4   : > { %v1420_v25 = vshll.u32 %v1129_v13, 16  ;;  %v6722_v27 = vcombine.low %v3985_v15, %v3988_v56  ;;  %v1394_v29 = vrot.slane %v1393_v52, 4  ;;  %v1408_v31 = vrot.slane %v1406_v18, 5  ;;  %v7938_v52 = vld [vmem:[%s9056_s1 + $0x1d0] sm:$0xff]  }
  0xc5   : > { %7168 = vmatmul.mubr.bf16.gmra.mrb[16].mxu1 %v6524_v34  ;;  %v1413_v26 = vrot.slane %v1411_v20, 4  ;;  %v1403_v32 = vor.u32 %v1402_v3, %v1398_v12  ;;  %v1416_v35 = vrot.slane %v1414_v23, 5  ;;  %v1424_v38 = vshrl.u32 %v1129_v13, 16  ;;  %v7929_v3 = vld [vmem:[#allocation2 + $0x3c] sm:$0xff]  }
  0xc6   : > { %v1422_v37 = vrot.slane %v1420_v25, 5  ;;  %7372 = vmatmul.mubr.bf16.gmra.mrb[28].mxu0 %v6722_v27  ;;  %v1399_v21 = vsel %vm8151_vm10, %v1394_v29, %v1398_v12  ;;  %v1430_v36 = vshll.u32 %v1130_v14, 16  ;;  %v1435_v19 = vshrl.u32 %v1131_v8, 16  ;;  %v1138_v27 = vld [vmem:[#allocation2 + $0xac] sm:$0xf] }
  0xc7   : > { %7391 = vmatprep.mubr.bf16.mxu0 %v7924_v22  ;;  %v1404_v30 = vrot.slane %v1403_v32, 4  ;;  %v1417_v41 = vor.u32 %v1416_v35, %v1413_v26  ;;  %v1426_v42 = vrot.slane %v1424_v38, 4  ;;  %v1438_v44 = vshll.u32 %v1131_v8, 16  ;;  %v1137_v22 = vld [vmem:[#allocation2 + $0xa8] sm:$0xf] }
  0xc8   : > { %v1432_v47 = vrot.slane %v1430_v36, 5  ;;  %v1437_v43 = vrot.slane %v1435_v19, 4  ;;  %v1444_v48 = vshll.u32 %v1132_v58, 16  ;;  %v1448_v49 = vshrl.u32 %v1132_v58, 16  ;;  %v1139_v29 = vld [vmem:[#allocation2 + $0xb0] sm:$0x1] }
  0xc9   : > { %v1409_v51 = vsel %vm8151_vm10, %v1404_v30, %v1408_v31  ;;  %v1418_v24 = vrot.slane %v1417_v41, 4  ;;  %v1427_v54 = vor.u32 %v1426_v42, %v1422_v37  ;;  %v1440_v7 = vrot.slane %v1438_v44, 5  ;;  %v7931_v35 = vld [vmem:[#allocation2 + $0x48] sm:$0xff]   ;;  %v7942_v19 = vld [vmem:[%s9056_s1 + $0x1d8] sm:$0xff]  }
  0xca   : > { %v6525_v60 = vcombine.low %v1399_v21, %v1409_v51  ;;  %v1446_v63 = vrot.slane %v1444_v48, 5  ;;  %v1450_v57 = vrot.slane %v1448_v49, 4  ;;  %v1454_v62 = vshll.u32 %v1133_v39, 16  ;;  %v1140_v39 = vld [vmem:[#allocation2 + $0xb4] sm:$0xf] }
  0xcb   : > { %v1423_v50 = vsel %vm8151_vm10, %v1418_v24, %v1422_v37  ;;  %v1428_v0 = vrot.slane %v1427_v54, 4  ;;  %v1441_v1 = vor.u32 %v1440_v7, %v1437_v43  ;;  %v1459_v4 = vshrl.u32 %v1134_v61, 16  ;;  %v1141_v44 = vld [vmem:[#allocation2 + $0xb8] sm:$0xf]  ;;  %v1142_v49 = vld [vmem:[#allocation2 + $0xbc] sm:$0x1] }
  0xcc   : > { %7171 = vmatprep.mubr.bf16.mxu1 %v6525_v60  ;;  %v1451_v5 = vor.u32 %v1450_v57, %v1446_v63  ;;  %v1456_v6 = vrot.slane %v1454_v62, 5  ;;  %v1462_v9 = vshll.u32 %v1134_v61, 16  ;;  %v1468_v10 = vshll.u32 %v1135_v59, 16 }
  0xcd   : > { %v1433_v12 = vsel %vm8151_vm10, %v1428_v0, %v1432_v47  ;;  %v1442_v13 = vrot.slane %v1441_v1, 4  ;;  %v1461_v15 = vrot.slane %v1459_v4, 4  ;;  %v1472_v16 = vshrl.u32 %v1135_v59, 16  ;;  %v1916_v4 = vld [vmem:[#allocation2] sm:$0xe] }
  0xce   : > { %7392 = vmatmul.mubr.bf16.vlgmr.msra.gmra.mrb[0].mxu0 %v7926_v45  ;;  %v6526_v53 = vcombine.low %v1423_v50, %v1433_v12  ;;  %v1452_v17 = vrot.slane %v1451_v5, 4  ;;  %v1464_v14 = vrot.slane %v1462_v9, 5  ;;  %v1470_v34 = vrot.slane %v1468_v10, 5  ;;  %v7946_v5 = vld [vmem:[%s9056_s1 + $0x1e0] sm:$0xff]  }
  0xcf   : > { %7395 = vmatprep.mubr.bf16.mxu0 %v7927_v55  ;;  %7424 = vmatpush3.bf16.msra.mxu0 %v8429_v46  ;;  %v1447_v18 = vsel %vm8151_vm10, %v1442_v13, %v1446_v63  ;;  %v1474_v20 = vrot.slane %v1472_v16, 4  ;;  %v1478_v56 = vshll.u32 %v1136_v2, 16  ;;  %v1483_v31 = vshrl.u32 %v1137_v22, 16  ;;  %v1917_v10 = vld [vmem:[#allocation2 + $0x4] sm:$0xf] }
  0xd0   : > { %7172 = vmatmul.mubr.bf16.gmra.mrb[20].mxu1 %v6526_v53  ;;  %v1457_v23 = vsel %vm8151_vm10, %v1452_v17, %v1456_v6  ;;  %v1465_v25 = vor.u32 %v1464_v14, %v1461_v15  ;;  %7425 = vmatprep.subr.bf16.mxu0 %v7934_v11  ;;  %v1486_v26 = vshll.u32 %v1137_v22, 16  ;;  %v1492_v38 = vshll.u32 %v1138_v27, 16  ;;  %v7933_v6 = vld [vmem:[#allocation2 + $0x54] sm:$0xff]   ;;  %v7935_v13 = vld [vmem:[#allocation2 + $0x60] sm:$0xff]   ;;  %v1920_v22 = vld [vmem:[#allocation2 + $0x10] sm:$0xf] }
  0xd1   : > { %v6527_v32 = vcombine.low %v1447_v18, %v1457_v23  ;;  %v1475_v46 = vor.u32 %v1474_v20, %v1470_v34  ;;  %v1480_v37 = vrot.slane %v1478_v56, 5  ;;  %v1485_v21 = vrot.slane %v1483_v31, 4  ;;  %v1919_v18 = vld [vmem:[#allocation2 + $0xc] sm:$0xe] }
  0xd2   : > { %v1466_v8 = vrot.slane %v1465_v25, 4  ;;  %v1488_v36 = vrot.slane %v1486_v26, 5  ;;  %v1496_v58 = vshrl.u32 %v1138_v27, 16  ;;  %v1494_v41 = vrot.slane %v1492_v38, 5  ;;  %v7950_v23 = vld [vmem:[%s9056_s1 + $0x1e8] sm:$0xff]  }
  0xd3   : > { %7175 = vmatprep.mubr.bf16.mxu1 %v6527_v32  ;;  %v1476_v30 = vrot.slane %v1475_v46, 4  ;;  %7426 = vmatpush3.bf16.msra.mxu0 %v7934_v11  ;;  %v1502_v42 = vshll.u32 %v1139_v29, 16  ;;  %v1507_v45 = vshrl.u32 %v1140_v39, 16  ;;  %v1510_v51 = vshll.u32 %v1140_v39, 16  ;;  %v1918_v11 = vld [vmem:[#allocation2 + $0x8] sm:$0x1] }
  0xd4   : > { %v1471_v47 = vsel %vm8151_vm10, %v1466_v8, %v1470_v34  ;;  %v1489_v43 = vor.u32 %v1488_v36, %v1485_v21  ;;  %v1498_v48 = vrot.slane %v1496_v58, 4  ;;  %7427 = vmatprep.subr.bf16.mxu0 %v7938_v52  ;;  %v1516_v61 = vshll.u32 %v1141_v44, 16  ;;  %v7954_v32 = vld [vmem:[%s9056_s1 + $0x1f0] sm:$0xff]   ;;  %v1922_v21 = vld [vmem:[#allocation2 + $0x18] sm:$0xe] }
  0xd5   : > { %v1481_v24 = vsel %vm8151_vm10, %v1476_v30, %v1480_v37  ;;  %v1504_v54 = vrot.slane %v1502_v42, 5  ;;  %v1509_v7 = vrot.slane %v1507_v45, 4  ;;  %v1512_v63 = vrot.slane %v1510_v51, 5  ;;  %v1923_v36 = vld [vmem:[#allocation2 + $0x1c] sm:$0xf]  ;;  %v7937_v39 = vld [vmem:[#allocation2 + $0x6c] sm:$0xff]  }
  0xd6   : > { %7396 = vmatmul.mubr.bf16.gmra.mrb[4].mxu0 %v7929_v3  ;;  %v6528_v59 = vcombine.low %v1471_v47, %v1481_v24  ;;  %v1490_v60 = vrot.slane %v1489_v43, 4  ;;  %v1499_v55 = vor.u32 %v1498_v48, %v1494_v41  ;;  %v1518_v57 = vrot.slane %v1516_v61, 5  ;;  %v1921_v3 = vld [vmem:[#allocation2 + $0x14] sm:$0x1]  ;;  %v1924_v58 = vld [vmem:[#allocation2 + $0x20] sm:$0x1] }
  0xd7   : > { %7399 = vmatprep.mubr.bf16.mxu0 %v7931_v35  ;;  %v1520_v62 = vshrl.u32 %v1141_v44, 16  ;;  %v1526_v2 = vshll.u32 %v1142_v49, 16  ;;  %7428 = vmatpush3.bf16.msra.mxu0 %v7938_v52  ;;  %v1513_v1 = vor.u32 %v1512_v63, %v1509_v7  ;;  %v6539_v16 = vrot.slane %v1916_v4, 9  ;;  %v1925_v42 = vld [vmem:[#allocation2 + $0x24] sm:$0xe]  ;;  %v7939_v45 = vld [vmem:[#allocation2 + $0x78] sm:$0xff]  }
  0xd8   : > { %7176 = vmatmul.mubr.bf16.gmra.mrb[24].mxu1 %v6528_v59  ;;  %v1495_v50 = vsel %vm8151_vm10, %v1490_v60, %v1494_v41  ;;  %v1500_v0 = vrot.slane %v1499_v55, 4  ;;  %7429 = vmatprep.subr.bf16.mxu0 %v7942_v19  ;;  %v2017_v53 = vrot.slane %v1917_v10, 5  ;;  %v2020_v52 = vrot.slane %v1918_v11, 5  ;;  %v1926_v44 = vld [vmem:[#allocation2 + $0x28] sm:$0xf] }
  0xd9   : > { %v1522_v9 = vrot.slane %v1520_v62, 4  ;;  %v1514_v15 = vrot.slane %v1513_v1, 4  ;;  %v1528_v34 = vrot.slane %v1526_v2, 5  ;;  %v6540_v29 = vrot.slane %v1919_v18, 9  ;;  %v1927_v49 = vld [vmem:[#allocation2 + $0x2c] sm:$0x1] }
  0xda   : > { %v1505_v12 = vsel %vm8151_vm10, %v1500_v0, %v1504_v54  ;;  %v2018_v20 = vsel %vm8293_vm13, %v6539_v16, %v2017_v53  ;;  %v2019_v56 = vrot.slane %v2017_v53, 4  ;;  %v2024_v31 = vrot.slane %v1920_v22, 5  ;;  %v7955_v54 = vld [vmem:[%s9056_s1 + $0x1f8] sm:$0xff]   ;;  %v7944_v55 = vld [vmem:[%s9056_s1 + $0xc8] sm:$0xff]   ;;  %v1928_v63 = vld [vmem:[#allocation2 + $0x30] sm:$0xe] }
  0xdb   : > { %v6529_v17 = vcombine.low %v1495_v50, %v1505_v12  ;;  %v1523_v14 = vor.u32 %v1522_v9, %v1518_v57  ;;  %7430 = vmatpush3.bf16.msra.mxu0 %v7942_v19  ;;  %v1519_v25 = vsel %vm8151_vm10, %v1514_v15, %v1518_v57  ;;  %v2027_v38 = vrot.slane %v1921_v3, 5  ;;  %v1929_v2 = vld [vmem:[#allocation2 + $0x34] sm:$0xf]  ;;  %v1930_v50 = vld [vmem:[#allocation2 + $0x38] sm:$0x1]  ;;  %v8635_v1 = vld [vmem:[%s9056_s1 + $0x200] sm:$0xff]  }
  0xdc   : > { %7431 = vmatprep.subr.bf16.mxu0 %v7946_v5  ;;  %v2021_v26 = vsel %vm8293_vm13, %v2019_v56, %v2020_v52  ;;  %v2026_v37 = vrot.slane %v2024_v31, 4  ;;  %v6541_v19 = vrot.slane %v1922_v21, 9  ;;  %v2031_v30 = vrot.slane %v1923_v36, 5  ;;  %v1932_v9 = vld [vmem:[#allocation2 + $0x40] sm:$0xf]  ;;  %v7941_v11 = vld [vmem:[#allocation2 + $0x84] sm:$0xff]  }
  0xdd   : > { %7179 = vmatprep.mubr.bf16.mxu1 %v6529_v17  ;;  %v1524_v27 = vrot.slane %v1523_v14, 4  ;;  %v6571_v46 = vcombine.low %v2018_v20, %v2021_v26  ;;  %v2034_v41 = vrot.slane %v1924_v58, 5  ;;  %v2025_v47 = vsel %vm8293_vm13, %v6540_v29, %v2024_v31  ;;  %v1933_v10 = vld [vmem:[#allocation2 + $0x44] sm:$0x1]  ;;  %v7943_v12 = vld [vmem:[#allocation2 + $0x90] sm:$0xff]   ;;  %v7952_v26 = vld [vmem:[%s9056_s1 + $0xd8] sm:$0xff]  }
  0xde   : > { %7400 = vmatmul.mubr.bf16.gmra.mrb[8].mxu0 %v7933_v6  ;;  %v2028_v43 = vsel %vm8293_vm13, %v2026_v37, %v2027_v38  ;;  %v2033_v48 = vrot.slane %v2031_v30, 4  ;;  %v2038_v51 = vrot.slane %v1926_v44, 5  ;;  %v2032_v24 = vsel %vm8293_vm13, %v6541_v19, %v2031_v30  ;;  %v1931_v6 = vld [vmem:[#allocation2 + $0x3c] sm:$0xe]  ;;  %v7948_v14 = vld [vmem:[%s9056_s1 + $0xd0] sm:$0xff]  }
  0xdf   : > { %7403 = vmatprep.mubr.bf16.mxu0 %v7935_v13  ;;  %v1529_v35 = vsel %vm8151_vm10, %v1524_v27, %v1528_v34  ;;  %7432 = vmatpush3.bf16.msra.mxu0 %v7946_v5  ;;  %v6542_v61 = vrot.slane %v1925_v42, 9  ;;  %v2041_v59 = vrot.slane %v1927_v49, 5  ;;  %v6572_v60 = vcombine.low %v2025_v47, %v2028_v43  ;;  %v1934_v20 = vld [vmem:[#allocation2 + $0x48] sm:$0xe]  ;;  %v1935_v56 = vld [vmem:[#allocation2 + $0x4c] sm:$0xf] }
  0xe0   : > { %v6530_v8 = vcombine.low %v1519_v25, %v1529_v35  ;;  %7433 = vmatprep.subr.bf16.mxu0 %v7950_v23  ;;  %v2035_v7 = vsel %vm8293_vm13, %v2033_v48, %v2034_v41  ;;  %v2040_v62 = vrot.slane %v2038_v51, 4  ;;  %v6543_v0 = vrot.slane %v1928_v63, 9  ;;  %v1936_v3 = vld [vmem:[#allocation2 + $0x50] sm:$0x1]  ;;  %v1937_v31 = vld [vmem:[#allocation2 + $0x54] sm:$0xe] }
  0xe1   : > { %v6573_v57 = vcombine.low %v2032_v24, %v2035_v7  ;;  %v2045_v4 = vrot.slane %v1929_v2, 5  ;;  %v2048_v5 = vrot.slane %v1930_v50, 5  ;;  %v2052_v15 = vrot.slane %v1932_v9, 5  ;;  %v1939_v37 = vld [vmem:[#allocation2 + $0x5c] sm:$0x1]  ;;  %v7956_v42 = vld [vmem:[%s9056_s1 + $0xe0] sm:$0xff]  }
  0xe2   : > { %7180 = vmatmul.mubr.bf16.gmra.mrb[28].mxu1 %v6530_v8  ;;  %v2039_v16 = vsel %vm8293_vm13, %v6542_v61, %v2038_v51  ;;  %v2042_v53 = vsel %vm8293_vm13, %v2040_v62, %v2041_v59  ;;  %v6544_v17 = vrot.slane %v1931_v6, 9  ;;  %v2055_v18 = vrot.slane %v1933_v10, 5  ;;  %v7947_v8 = vld [vmem:[#allocation2 + $0xa8] sm:$0xff]   ;;  %v1940_v44 = vld [vmem:[#allocation2 + $0x60] sm:$0xe] }
  0xe3   : > { %7199 = vmatprep.mubr.bf16.mxu1 %v6571_v46  ;;  %7434 = vmatpush3.bf16.msra.mxu0 %v7950_v23  ;;  %v2047_v13 = vrot.slane %v2045_v4, 4  ;;  %v2046_v34 = vsel %vm8293_vm13, %v6543_v0, %v2045_v4  ;;  %v6574_v22 = vcombine.low %v2039_v16, %v2042_v53  ;;  %v6545_v23 = vrot.slane %v1934_v20, 9  ;;  %v1938_v46 = vld [vmem:[#allocation2 + $0x58] sm:$0xf]  ;;  %v1942_v48 = vld [vmem:[#allocation2 + $0x68] sm:$0x1] }
  0xe4   : > { %7435 = vmatprep.subr.bf16.mxu0 %v7954_v32  ;;  %v2059_v25 = vrot.slane %v1935_v56, 5  ;;  %v2062_v29 = vrot.slane %v1936_v3, 5  ;;  %v6546_v38 = vrot.slane %v1937_v31, 9  ;;  %v2066_v21 = vrot.slane %v1938_v46, 5  ;;  %v4826_v24 = vld [vmem:[#allocation2 + $0x18] sm:$0xf] }
  0xe5   : > { %v2049_v52 = vsel %vm8293_vm13, %v2047_v13, %v2048_v5  ;;  %v2069_v36 = vrot.slane %v1939_v37, 5  ;;  %v2053_v58 = vsel %vm8293_vm13, %v6544_v17, %v2052_v15  ;;  %v6547_v49 = vrot.slane %v1940_v44, 9  ;;  %v4827_v59 = vld [vmem:[#allocation2 + $0x1c] sm:$0xf]  ;;  %v1943_v50 = vld [vmem:[#allocation2 + $0x6c] sm:$0xe] }
  0xe6   : > { %7404 = vmatmul.mubr.bf16.gmra.mrb[12].mxu0 %v7937_v39  ;;  %v6575_v27 = vcombine.low %v2046_v34, %v2049_v52  ;;  %v2061_v35 = vrot.slane %v2059_v25, 4  ;;  %v2060_v19 = vsel %vm8293_vm13, %v6545_v23, %v2059_v25  ;;  %v2068_v41 = vrot.slane %v2066_v21, 4  ;;  %v7957_v0 = vld [vmem:[%s9056_s1 + $0xe8] sm:$0xff]   ;;  %v1944_v9 = vld [vmem:[#allocation2 + $0x70] sm:$0xf]  ;;  %v7951_v17 = vld [vmem:[#allocation2 + $0xc0] sm:$0xff]  }
  0xe7   : > { %7407 = vmatprep.mubr.bf16.mxu0 %v7939_v45  ;;  %7436 = vmatpush3.bf16.msra.mxu0 %v7954_v32  ;;  %v7945_v32 = vld [vmem:[#allocation2 + $0x9c] sm:$0xff]   ;;  %v1941_v45 = vld [vmem:[#allocation2 + $0x64] sm:$0xf]  ;;  %v2076_v61 = vrot.slane %v1942_v48, 5  ;;  %v4878_v62 = vshll.u32 %v4826_v24, 16  ;;  %v4884_v2 = vshll.u32 %v4827_v59, 16 }
  0xe8   : > { %7437 = vmatprep.subr.bf16.mxu0 %v7955_v54  ;;  %v2063_v30 = vsel %vm8293_vm13, %v2061_v35, %v2062_v29  ;;  %v2073_v51 = vrot.slane %v1941_v45, 5  ;;  %v8670_v7 = vsel %vm8293_vm13, %v2068_v41, %v2069_v36  ;;  %v4888_v5 = vshrl.u32 %v4827_v59, 16  ;;  %v1945_v16 = vld [vmem:[#allocation2 + $0x74] sm:$0x1]  ;;  %v4829_v3 = vld [vmem:[#allocation2 + $0x24] sm:$0xf] }
  0xe9   : > { %v6577_v43 = vcombine.low %v2060_v19, %v2063_v30  ;;  %v6548_v10 = vrot.slane %v1943_v50, 9  ;;  %v4880_v13 = vrot.slane %v4878_v62, 5  ;;  %v2080_v53 = vrot.slane %v1944_v9, 5  ;;  %v4831_v29 = vld [vmem:[#allocation2 + $0x2c] sm:$0x1]  ;;  %v7961_v45 = vld [vmem:[%s9056_s1 + $0xf8] sm:$0xff]  }
  0xea   : > { %7200 = vmatmul.mubr.bf16.vlgmr.msra.gmra.mrb[0].mxu1 %v6572_v60  ;;  %v4828_v60 = vld [vmem:[#allocation2 + $0x20] sm:$0x1]  ;;  %v8674_v63 = vsel %vm8293_vm13, %v6547_v49, %v2073_v51  ;;  %v4890_v34 = vrot.slane %v4888_v5, 4  ;;  %v2083_v52 = vrot.slane %v1945_v16, 5  ;;  %v4899_v31 = vshrl.u32 %v4829_v3, 16 }
  0xeb   : > { %7232 = vmatpush3.bf16.msra.mxu1 %v8534_v33  ;;  %7203 = vmatprep.mubr.bf16.mxu1 %v6573_v57  ;;  %v2054_v33 = vrot.slane %v2052_v15, 4  ;;  %v2075_v57 = vrot.slane %v2073_v51, 4  ;;  %v4894_v6 = vshll.u32 %v4828_v60, 16  ;;  %v4886_v15 = vrot.slane %v4884_v2, 5  ;;  %v1948_v44 = vld [vmem:[#allocation2 + $0x80] sm:$0x1] }
  0xec   : > { %7233 = vmatprep.subr.bf16.mxu1 %v7944_v55  ;;  %7438 = vmatpush3.bf16.msra.mxu0 %v7955_v54  ;;  %v8666_v54 = vsel %vm8293_vm13, %v6546_v38, %v2066_v21  ;;  %v8690_v56 = vsel %vm8293_vm13, %v6548_v10, %v2080_v53  ;;  %v1946_v38 = vld [vmem:[#allocation2 + $0x78] sm:$0xe]  ;;  %v4901_v36 = vrot.slane %v4899_v31, 4  ;;  %v4832_v51 = vld [vmem:[#allocation2 + $0x30] sm:$0xf]  ;;  %v2090_v59 = vrot.slane %v1948_v44, 5 }
  0xed   : > { %7471 = vmatprep.subr.bf16.mxu0 %v8635_v1  ;;  %v2056_v39 = vsel %vm8293_vm13, %v2054_v33, %v2055_v18  ;;  %v7959_v33 = vld [vmem:[%s9056_s1 + $0xf0] sm:$0xff]   ;;  %v4896_v20 = vrot.slane %v4894_v6, 5  ;;  %v4891_v25 = vor.u32 %v4890_v34, %v4886_v15  ;;  %v6549_v48 = vrot.slane %v1946_v38, 9  ;;  %v4834_v60 = vld [vmem:[#allocation2 + $0x38] sm:$0x1] }
  0xee   : > { %7408 = vmatmul.mubr.bf16.gmra.mrb[16].mxu0 %v7941_v11  ;;  %v6576_v47 = vcombine.low %v2053_v58, %v2056_v39  ;;  %v7949_v11 = vld [vmem:[#allocation2 + $0xb4] sm:$0xff]   ;;  %v1947_v39 = vld [vmem:[#allocation2 + $0x7c] sm:$0xf]  ;;  %v4923_v50 = vshrl.u32 %v4832_v51, 16  ;;  %v4926_v5 = vshll.u32 %v4832_v51, 16 }
  0xef   : > { %7411 = vmatprep.mubr.bf16.mxu0 %v7943_v12  ;;  %7234 = vmatpush3.bf16.msra.mxu1 %v7944_v55  ;;  %v4875_v55 = vshrl.u32 %v4826_v24, 16  ;;  %v8681_v12 = vsel %vm8293_vm13, %v2075_v57, %v2076_v61  ;;  %v2087_v49 = vrot.slane %v1947_v39, 5  ;;  %v4833_v24 = vld [vmem:[#allocation2 + $0x34] sm:$0xf]  ;;  %v1951_v10 = vld [vmem:[#allocation2 + $0x8c] sm:$0x1] }
  0xf0   : > { %7235 = vmatprep.subr.bf16.mxu1 %v7948_v14  ;;  %v6579_v23 = vcombine.low %v8674_v63, %v8681_v12  ;;  %v7953_v63 = vld [vmem:[#allocation2 + $0xcc] sm:$0xff]   ;;  %v4932_v6 = vshll.u32 %v4833_v24, 16  ;;  %v4936_v9 = vshrl.u32 %v4833_v24, 16  ;;  %v4835_v34 = vld [vmem:[#allocation2 + $0x3c] sm:$0xf] }
  0xf1   : > { %v4877_v4 = vrot.slane %v4875_v55, 4  ;;  %v1949_v55 = vld [vmem:[#allocation2 + $0x84] sm:$0xe]  ;;  %v2088_v62 = vsel %vm8293_vm13, %v6549_v48, %v2087_v49  ;;  %v2089_v2 = vrot.slane %v2087_v49, 4  ;;  %v1952_v39 = vld [vmem:[#allocation2 + $0x90] sm:$0xe] }
  0xf2   : > { %7204 = vmatmul.mubr.bf16.gmra.mrb[4].mxu1 %v6574_v22  ;;  %v2082_v22 = vrot.slane %v2080_v53, 4  ;;  %v1953_v44 = vld [vmem:[#allocation2 + $0x94] sm:$0xf]  ;;  %v1954_v48 = vld [vmem:[#allocation2 + $0x98] sm:$0x1]  ;;  %v6551_v49 = vrot.slane %v1952_v39, 9 }
  0xf3   : > { %7207 = vmatprep.mubr.bf16.mxu1 %v6575_v27  ;;  %7236 = vmatpush3.bf16.msra.mxu1 %v7948_v14  ;;  %v6578_v14 = vcombine.low %v8666_v54, %v8670_v7  ;;  %v4881_v18 = vor.u32 %v4880_v13, %v4877_v4  ;;  %v4830_v27 = vld [vmem:[#allocation2 + $0x28] sm:$0xf]  ;;  %v2091_v12 = vsel %vm8293_vm13, %v2089_v2, %v2090_v59  ;;  %v4925_v13 = vrot.slane %v4923_v50, 4 }
  0xf4   : > { %7237 = vmatprep.subr.bf16.mxu1 %v7952_v26  ;;  %v8696_v35 = vsel %vm8293_vm13, %v2082_v22, %v2083_v52  ;;  %v4908_v46 = vshll.u32 %v4830_v27, 16  ;;  %v4912_v37 = vshrl.u32 %v4830_v27, 16  ;;  %v6581_v53 = vcombine.low %v2088_v62, %v2091_v12  ;;  %v4836_v52 = vld [vmem:[#allocation2 + $0x40] sm:$0xf]  ;;  %v4838_v51 = vld [vmem:[#allocation2 + $0x48] sm:$0xf] }
  0xf5   : > { %v6580_v21 = vcombine.low %v8690_v56, %v8696_v35  ;;  %v6550_v22 = vrot.slane %v1949_v55, 9  ;;  %v2097_v27 = vrot.slane %v1951_v10, 5  ;;  %v2104_v55 = vrot.slane %v1954_v48, 5  ;;  %v7962_v12 = vld [vmem:[%s9056_s1 + $0x210] sm:$0xff]   ;;  %v4844_v48 = vld [vmem:[#allocation2 + $0x60] sm:$0xf] }
  0xf6   : > { %7412 = vmatmul.mubr.bf16.gmra.mrb[20].mxu0 %v7945_v32  ;;  %v4882_v32 = vrot.slane %v4881_v18, 4  ;;  %v4910_v30 = vrot.slane %v4908_v46, 5  ;;  %v4914_v41 = vrot.slane %v4912_v37, 4  ;;  %v4960_v46 = vshrl.u32 %v4836_v52, 16  ;;  %v8718_v37 = vld [vmem:[%s9056_s1 + $0x100] sm:$0xff]  }
  0xf7   : > { %7415 = vmatprep.mubr.bf16.mxu0 %v7947_v8  ;;  %7238 = vmatpush3.bf16.msra.mxu1 %v7952_v26  ;;  %v4902_v26 = vshll.u32 %v4829_v3, 16  ;;  %v4892_v8 = vrot.slane %v4891_v25, 4  ;;  %v4837_v3 = vld [vmem:[#allocation2 + $0x44] sm:$0x1]  ;;  %v4971_v50 = vshrl.u32 %v4838_v51, 16 }
  0xf8   : > { %7239 = vmatprep.subr.bf16.mxu1 %v7956_v42  ;;  %v4887_v19 = vsel %vm8151_vm10, %v4882_v32, %v4886_v15  ;;  %v4915_v7 = vor.u32 %v4914_v41, %v4910_v30  ;;  %v4942_v15 = vshll.u32 %v4834_v60, 16  ;;  %v4956_v32 = vshll.u32 %v4836_v52, 16 }
  0xf9   : > { %v4904_v58 = vrot.slane %v4902_v26, 5  ;;  %v4950_v26 = vshll.u32 %v4835_v34, 16  ;;  %v2101_v60 = vrot.slane %v1953_v44, 5 }
  0xfa   : > { %7208 = vmatmul.mubr.bf16.gmra.mrb[8].mxu1 %v6576_v47  ;;  %v4897_v47 = vsel %vm8151_vm10, %v4892_v8, %v4896_v20  ;;  %v4916_v4 = vrot.slane %v4915_v7, 4  ;;  %v4944_v20 = vrot.slane %v4942_v15, 5  ;;  %v4958_v41 = vrot.slane %v4956_v32, 5  ;;  %v7960_v7 = vld [vmem:[%s9056_s1 + $0x208] sm:$0xff]   ;;  %v7965_v32 = vld [vmem:[%s9056_s1 + $0x218] sm:$0xff]  }
  0xfb   : > { %7211 = vmatprep.mubr.bf16.mxu1 %v6577_v43  ;;  %7240 = vmatpush3.bf16.msra.mxu1 %v7956_v42  ;;  %v4918_v42 = vshll.u32 %v4831_v29, 16  ;;  %v4905_v43 = vor.u32 %v4904_v58, %v4901_v36  ;;  %v6787_v54 = vcombine.low %v4887_v19, %v4897_v47  ;;  %v4947_v29 = vshrl.u32 %v4835_v34, 16 }
  0xfc   : > { %7241 = vmatprep.subr.bf16.mxu1 %v7957_v0 }
  0xfd   : > { %v4920_v61 = vrot.slane %v4918_v42, 5  ;;  %v4906_v57 = vrot.slane %v4905_v43, 4  ;;  %v4949_v58 = vrot.slane %v4947_v29, 4  ;;  %v4962_v42 = vrot.slane %v4960_v46, 4 }
  0xfe   : > { %7416 = vmatmul.mubr.bf16.gmra.mrb[24].mxu0 %v7949_v11  ;;  %v4966_v43 = vshll.u32 %v4837_v3, 16 }
  0xff   : > { %7419 = vmatprep.mubr.bf16.mxu0 %v7951_v17  ;;  %7242 = vmatpush3.bf16.msra.mxu1 %v7957_v0  ;;  %v1950_v0 = vld [vmem:[#allocation2 + $0x88] sm:$0xf]  ;;  %v4911_v11 = vsel %vm8151_vm10, %v4906_v57, %v4910_v30  ;;  %v4921_v16 = vsel %vm8151_vm10, %v4916_v4, %v4920_v61  ;;  %v4928_v17 = vrot.slane %v4926_v5, 5  ;;  %v4952_v30 = vrot.slane %v4950_v26, 5  ;;  %v1955_v57 = vld [vmem:[#allocation2 + $0x9c] sm:$0xe] }
 0x100   : > { %7243 = vmatprep.subr.bf16.mxu1 %v7959_v33  ;;  %v6788_v18 = vcombine.low %v4911_v11, %v4921_v16  ;;  %v2094_v25 = vrot.slane %v1950_v0, 5  ;;  %v4963_v24 = vor.u32 %v4962_v42, %v4958_v41  ;;  %v4968_v59 = vrot.slane %v4966_v43, 5  ;;  %v1956_v4 = vld [vmem:[#allocation2 + $0xa0] sm:$0xf]  ;;  %v1957_v5 = vld [vmem:[#allocation2 + $0xa4] sm:$0x1] }
 0x101   : > { %v4974_v0 = vshll.u32 %v4838_v51, 16  ;;  %v4973_v16 = vrot.slane %v4971_v50, 4  ;;  %v6552_v3 = vrot.slane %v1955_v57, 9  ;;  %v2111_v29 = vrot.slane %v1957_v5, 5  ;;  %v1958_v26 = vld [vmem:[#allocation2 + $0xa8] sm:$0xe] }
 0x102   : > { %7212 = vmatmul.mubr.bf16.gmra.mrb[12].mxu1 %v6578_v14  ;;  %v4934_v14 = vrot.slane %v4932_v6, 5  ;;  %v2095_v8 = vsel %vm8293_vm13, %v6550_v22, %v2094_v25  ;;  %v2096_v36 = vrot.slane %v2094_v25, 4  ;;  %v4964_v2 = vrot.slane %v4963_v24, 4  ;;  %v1960_v42 = vld [vmem:[#allocation2 + $0xb0] sm:$0x1] }
 0x103   : > { %7215 = vmatprep.mubr.bf16.mxu1 %v6579_v23  ;;  %7244 = vmatpush3.bf16.msra.mxu1 %v7959_v33  ;;  %v4938_v33 = vrot.slane %v4936_v9, 4  ;;  %v4929_v23 = vor.u32 %v4928_v17, %v4925_v13  ;;  %v2102_v6 = vsel %vm8293_vm13, %v6551_v49, %v2101_v60  ;;  %v2103_v9 = vrot.slane %v2101_v60, 4  ;;  %v4841_v17 = vld [vmem:[#allocation2 + $0x54] sm:$0xf]  ;;  %v1962_v50 = vld [vmem:[#allocation2 + $0xb8] sm:$0xf] }
 0x104   : > { %7245 = vmatprep.subr.bf16.mxu1 %v7961_v45  ;;  %v2098_v47 = vsel %vm8293_vm13, %v2096_v36, %v2097_v27  ;;  %v4969_v15 = vsel %vm8151_vm10, %v4964_v2, %v4968_v59  ;;  %v2108_v27 = vrot.slane %v1956_v4, 5  ;;  %v4846_v59 = vld [vmem:[#allocation2 + $0x68] sm:$0x1]  ;;  %v1961_v60 = vld [vmem:[#allocation2 + $0xb4] sm:$0xe]  ;;  %v5019_v2 = vshrl.u32 %v4844_v48, 16 }
 0x105   : > { %v4939_v31 = vor.u32 %v4938_v33, %v4934_v14  ;;  %v4930_v38 = vrot.slane %v4929_v23, 4  ;;  %v6582_v35 = vcombine.low %v2095_v8, %v2098_v47  ;;  %v4843_v23 = vld [vmem:[#allocation2 + $0x5c] sm:$0x1]  ;;  %v4998_v8 = vshll.u32 %v4841_v17, 16 }
 0x106   : > { %7420 = vmatmul.mubr.bf16.gmra.mrb[28].mxu0 %v7953_v63  ;;  %v4840_v63 = vld [vmem:[#allocation2 + $0x50] sm:$0x1]  ;;  %v5022_v5 = vshll.u32 %v4844_v48, 16 }
 0x107   : > { %7439 = vmatprep.mubr.bf16.mxu0 %v6787_v54  ;;  %7246 = vmatpush3.bf16.msra.mxu1 %v7961_v45  ;;  %v4940_v19 = vrot.slane %v4939_v31, 4  ;;  %v4935_v45 = vsel %vm8151_vm10, %v4930_v38, %v4934_v14  ;;  %v4839_v54 = vld [vmem:[#allocation2 + $0x4c] sm:$0xf]  ;;  %v2105_v14 = vsel %vm8293_vm13, %v2103_v9, %v2104_v55  ;;  %v4990_v22 = vshll.u32 %v4840_v63, 16  ;;  %v7968_v55 = vld [vmem:[%s9056_s1 + $0x220] sm:$0xff]  }
 0x108   : > { %7519 = vmatprep.subr.bf16.mxu1 %v8718_v37  ;;  %v4980_v10 = vshll.u32 %v4839_v54, 16  ;;  %v4984_v11 = vshrl.u32 %v4839_v54, 16  ;;  %v6583_v33 = vcombine.low %v2102_v6, %v2105_v14  ;;  %v4995_v31 = vshrl.u32 %v4841_v17, 16  ;;  %v1963_v9 = vld [vmem:[#allocation2 + $0xbc] sm:$0x1]  ;;  %v7971_v14 = vld [vmem:[%s9056_s1 + $0x228] sm:$0xff]  }
 0x109   : > { %v4945_v56 = vsel %vm8151_vm10, %v4940_v19, %v4944_v20  ;;  %v4992_v38 = vrot.slane %v4990_v22, 5  ;;  %v2109_v19 = vsel %vm8293_vm13, %v6552_v3, %v2108_v27 }
 0x10a   : > { %7216 = vmatmul.mubr.bf16.gmra.mrb[16].mxu1 %v6580_v21  ;;  %v4953_v21 = vor.u32 %v4952_v30, %v4949_v58  ;;  %v6789_v61 = vcombine.low %v4935_v45, %v4945_v56  ;;  %v4982_v34 = vrot.slane %v4980_v10, 5  ;;  %v4986_v52 = vrot.slane %v4984_v11, 4  ;;  %v1959_v58 = vld [vmem:[#allocation2 + $0xac] sm:$0xf] }
 0x10b   : > { %7219 = vmatprep.mubr.bf16.mxu1 %v6581_v53  ;;  %v4976_v53 = vrot.slane %v4974_v0, 5  ;;  %v2110_v30 = vrot.slane %v2108_v27, 4  ;;  %v5000_v45 = vrot.slane %v4998_v8, 5  ;;  %v5014_v56 = vshll.u32 %v4843_v23, 16  ;;  %v4849_v27 = vld [vmem:[#allocation2 + $0x74] sm:$0x1] }
 0x10c   : > { %v4954_v62 = vrot.slane %v4953_v21, 4  ;;  %v4987_v25 = vor.u32 %v4986_v52, %v4982_v34  ;;  %v4845_v21 = vld [vmem:[#allocation2 + $0x64] sm:$0xf]  ;;  %v2115_v57 = vrot.slane %v1959_v58, 5  ;;  %v7963_v58 = vld [vmem:[#allocation2 + $0xc] sm:$0xff]   ;;  %v5062_v48 = vshll.u32 %v4849_v27, 16 }
 0x10d   : > { %v4977_v20 = vor.u32 %v4976_v53, %v4973_v16  ;;  %v2112_v51 = vsel %vm8293_vm13, %v2110_v30, %v2111_v29  ;;  %v5016_v63 = vrot.slane %v5014_v56, 5  ;;  %v5028_v6 = vshll.u32 %v4845_v21, 16 }
 0x10e   : > { %7440 = vmatmul.mubr.bf16.vlgmr.msra.gmra.mrb[0].mxu0 %v6788_v18  ;;  %v4959_v13 = vsel %vm8151_vm10, %v4954_v62, %v4958_v41  ;;  %v4842_v18 = vld [vmem:[#allocation2 + $0x58] sm:$0xf]  ;;  %v4988_v39 = vrot.slane %v4987_v25, 4  ;;  %v4997_v41 = vrot.slane %v4995_v31, 4  ;;  %v6584_v54 = vcombine.low %v2109_v19, %v2112_v51  ;;  %v4852_v51 = vld [vmem:[#allocation2 + $0x80] sm:$0x1] }
 0x10f   : > { %7443 = vmatprep.mubr.bf16.mxu0 %v6789_v61  ;;  %7472 = vmatpush3.bf16.msra.mxu0 %v8635_v1  ;;  %v6790_v1 = vcombine.low %v4959_v13, %v4969_v15  ;;  %v4978_v46 = vrot.slane %v4977_v20, 4  ;;  %v5004_v36 = vshll.u32 %v4842_v18, 16  ;;  %v5008_v43 = vshrl.u32 %v4842_v18, 16  ;;  %v4848_v20 = vld [vmem:[#allocation2 + $0x70] sm:$0xf] }
 0x110   : > { %7473 = vmatprep.subr.bf16.mxu0 %v7960_v7  ;;  %v4993_v49 = vsel %vm8151_vm10, %v4988_v39, %v4992_v38  ;;  %v2118_v62 = vrot.slane %v1960_v42, 5  ;;  %v2117_v11 = vrot.slane %v2115_v57, 4  ;;  %v5032_v13 = vshrl.u32 %v4845_v21, 16  ;;  %v7974_v39 = vld [vmem:[%s9056_s1 + $0x230] sm:$0xff]  }
 0x111   : > { %v4983_v44 = vsel %vm8151_vm10, %v4978_v46, %v4982_v34  ;;  %v5006_v47 = vrot.slane %v5004_v36, 5  ;;  %v5010_v61 = vrot.slane %v5008_v43, 4  ;;  %v5024_v53 = vrot.slane %v5022_v5, 5 }
 0x112   : > { %7220 = vmatmul.mubr.bf16.gmra.mrb[20].mxu1 %v6582_v35  ;;  %v6553_v35 = vrot.slane %v1958_v26, 9  ;;  %v6791_v24 = vcombine.low %v4983_v44, %v4993_v49  ;;  %v5030_v17 = vrot.slane %v5028_v6, 5  ;;  %v2119_v34 = vsel %vm8293_vm13, %v2117_v11, %v2118_v62  ;;  %v4850_v44 = vld [vmem:[#allocation2 + $0x78] sm:$0xf]  ;;  %v4851_v49 = vld [vmem:[#allocation2 + $0x7c] sm:$0xf] }
 0x113   : > { %7474 = vmatpush3.bf16.msra.mxu0 %v7960_v7  ;;  %7223 = vmatprep.mubr.bf16.mxu1 %v6583_v33  ;;  %v5001_v7 = vor.u32 %v5000_v45, %v4997_v41  ;;  %v5011_v4 = vor.u32 %v5010_v61, %v5006_v47  ;;  %v5034_v52 = vrot.slane %v5032_v13, 4  ;;  %v5038_v18 = vshll.u32 %v4846_v59, 16  ;;  %v4855_v6 = vld [vmem:[#allocation2 + $0x8c] sm:$0x1] }
 0x114   : > { %7475 = vmatprep.subr.bf16.mxu0 %v7962_v12  ;;  %v2116_v10 = vsel %vm8293_vm13, %v6553_v35, %v2115_v57  ;;  %v6554_v33 = vrot.slane %v1961_v60, 9  ;;  %v2122_v25 = vrot.slane %v1962_v50, 5  ;;  %v5052_v41 = vshll.u32 %v4848_v20, 16  ;;  %v4853_v60 = vld [vmem:[#allocation2 + $0x84] sm:$0xf] }
 0x115   : > { %v5002_v0 = vrot.slane %v5001_v7, 4  ;;  %v5012_v16 = vrot.slane %v5011_v4, 4  ;;  %v6585_v3 = vcombine.low %v2116_v10, %v2119_v34  ;;  %v5035_v31 = vor.u32 %v5034_v52, %v5030_v17  ;;  %v4854_v50 = vld [vmem:[#allocation2 + $0x88] sm:$0xf]  ;;  %v7964_v52 = vld [vmem:[#allocation2 + $0x18] sm:$0xff]  }
 0x116   : > { %7444 = vmatmul.mubr.bf16.gmra.mrb[4].mxu0 %v6790_v1  ;;  %v4847_v1 = vld [vmem:[#allocation2 + $0x6c] sm:$0xf]  ;;  %v5040_v26 = vrot.slane %v5038_v18, 5  ;;  %v2123_v38 = vsel %vm8293_vm13, %v6554_v33, %v2122_v25  ;;  %v2124_v8 = vrot.slane %v2122_v25, 4  ;;  %v5056_v42 = vshrl.u32 %v4848_v20, 16 }
 0x117   : > { %7476 = vmatpush3.bf16.msra.mxu0 %v7962_v12  ;;  %7447 = vmatprep.mubr.bf16.mxu0 %v6791_v24  ;;  %v5021_v12 = vrot.slane %v5019_v2, 4  ;;  %v5007_v15 = vsel %vm8151_vm10, %v5002_v0, %v5006_v47  ;;  %v5017_v22 = vsel %vm8151_vm10, %v5012_v16, %v5016_v63  ;;  %v5043_v36 = vshrl.u32 %v4847_v1, 16  ;;  %v4856_v25 = vld [vmem:[#allocation2 + $0x90] sm:$0xf] }
 0x118   : > { %7477 = vmatprep.subr.bf16.mxu0 %v7965_v32  ;;  %v6792_v29 = vcombine.low %v5007_v15, %v5017_v22  ;;  %v5036_v19 = vrot.slane %v5035_v31, 4  ;;  %v5046_v30 = vshll.u32 %v4847_v1, 16  ;;  %v5054_v24 = vrot.slane %v5052_v41, 5 }
 0x119   : > { %v5025_v23 = vor.u32 %v5024_v53, %v5021_v12  ;;  %v5045_v43 = vrot.slane %v5043_v36, 4  ;;  %v5058_v7 = vrot.slane %v5056_v42, 4  ;;  %v5064_v61 = vrot.slane %v5062_v48, 5  ;;  %v4858_v36 = vld [vmem:[#allocation2 + $0x98] sm:$0x1] }
 0x11a   : > { %7224 = vmatmul.mubr.bf16.gmra.mrb[24].mxu1 %v6584_v54  ;;  %v5041_v56 = vsel %vm8151_vm10, %v5036_v19, %v5040_v26  ;;  %v5048_v21 = vrot.slane %v5046_v30, 5  ;;  %v5067_v59 = vshrl.u32 %v4850_v44, 16  ;;  %v5070_v57 = vshll.u32 %v4850_v44, 16  ;;  %v4860_v48 = vld [vmem:[#allocation2 + $0xa0] sm:$0xf] }
 0x11b   : > { %7478 = vmatpush3.bf16.msra.mxu0 %v7965_v32  ;;  %v2125_v32 = vrot.slane %v1963_v9, 5  ;;  %7227 = vmatprep.mubr.bf16.mxu1 %v6585_v3  ;;  %v5026_v46 = vrot.slane %v5025_v23, 4  ;;  %v5076_v62 = vshll.u32 %v4851_v49, 16  ;;  %v5080_v2 = vshrl.u32 %v4851_v49, 16  ;;  %v7966_v23 = vld [vmem:[#allocation2 + $0x24] sm:$0xff]  }
 0x11c   : > { %7479 = vmatprep.subr.bf16.mxu0 %v7968_v55  ;;  %v5049_v63 = vor.u32 %v5048_v21, %v5045_v43  ;;  %v5059_v0 = vor.u32 %v5058_v7, %v5054_v24  ;;  %v5069_v4 = vrot.slane %v5067_v59, 4  ;;  %v5086_v5 = vshll.u32 %v4852_v51, 16  ;;  %v4859_v43 = vld [vmem:[#allocation2 + $0x9c] sm:$0xf]  ;;  %v7985_v21 = vld [vmem:[%s9056_s1 + $0x108] sm:$0xff]  }
 0x11d   : > { %v5031_v45 = vsel %vm8151_vm10, %v5026_v46, %v5030_v17  ;;  %v2126_v47 = vsel %vm8293_vm13, %v2124_v8, %v2125_v32  ;;  %v5091_v9 = vshrl.u32 %v4853_v60, 16  ;;  %v5072_v11 = vrot.slane %v5070_v57, 5  ;;  %v4857_v32 = vld [vmem:[#allocation2 + $0x94] sm:$0xf] }
 0x11e   : > { %7448 = vmatmul.mubr.bf16.gmra.mrb[8].mxu0 %v6792_v29  ;;  %v6586_v35 = vcombine.low %v2123_v38, %v2126_v47  ;;  %v6793_v54 = vcombine.low %v5031_v45, %v5041_v56  ;;  %v5050_v10 = vrot.slane %v5049_v63, 4  ;;  %v5078_v12 = vrot.slane %v5076_v62, 5  ;;  %v7967_v63 = vld [vmem:[#allocation2 + $0x30] sm:$0xff]  }
 0x11f   : > { %7480 = vmatpush3.bf16.msra.mxu0 %v7968_v55  ;;  %v7975_v55 = vld [vmem:[%s9056_s1 + $0x238] sm:$0xff]   ;;  %v5082_v13 = vrot.slane %v5080_v2, 4  ;;  %v5060_v15 = vrot.slane %v5059_v0, 4  ;;  %v5088_v16 = vrot.slane %v5086_v5, 5  ;;  %v5093_v53 = vrot.slane %v5091_v9, 4 }
 0x120   : > { %7481 = vmatprep.subr.bf16.mxu0 %v7971_v14  ;;  %7451 = vmatprep.mubr.bf16.mxu0 %v6793_v54  ;;  %v5094_v17 = vshll.u32 %v4853_v60, 16  ;;  %v5055_v1 = vsel %vm8151_vm10, %v5050_v10, %v5054_v24  ;;  %v5100_v18 = vshll.u32 %v4854_v50, 16  ;;  %v5104_v22 = vshrl.u32 %v4854_v50, 16  ;;  %v4861_v24 = vld [vmem:[#allocation2 + $0xa4] sm:$0x1] }
 0x121   : > { %v5083_v34 = vor.u32 %v5082_v13, %v5078_v12  ;;  %v5065_v33 = vsel %vm8151_vm10, %v5060_v15, %v5064_v61  ;;  %v5110_v3 = vshll.u32 %v4855_v6, 16  ;;  %v5118_v30 = vshll.u32 %v4856_v25, 16 }
 0x122   : > { %7228 = vmatmul.mubr.bf16.gmra.mrb[28].mxu1 %v6586_v35  ;;  %v5096_v20 = vrot.slane %v5094_v17, 5  ;;  %v6794_v27 = vcombine.low %v5055_v1, %v5065_v33  ;;  %v5102_v26 = vrot.slane %v5100_v18, 5  ;;  %v5106_v38 = vrot.slane %v5104_v22, 4  ;;  %v4864_v17 = vld [vmem:[#allocation2 + $0xb0] sm:$0x1] }
 0x123   : > { %7482 = vmatpush3.bf16.msra.mxu0 %v7971_v14  ;;  %7247 = vmatprep.mubr.bf16.mxu1 %v7963_v58  ;;  %v5073_v14 = vor.u32 %v5072_v11, %v5069_v4  ;;  %v5084_v31 = vrot.slane %v5083_v34, 4  ;;  %v5112_v8 = vrot.slane %v5110_v3, 5  ;;  %v5115_v58 = vshrl.u32 %v4856_v25, 16  ;;  %v7969_v4 = vld [vmem:[#allocation2 + $0x3c] sm:$0xff]   ;;  %v4862_v11 = vld [vmem:[#allocation2 + $0xa8] sm:$0xf] }
 0x124   : > { %7483 = vmatprep.subr.bf16.mxu0 %v7974_v39  ;;  %v5097_v46 = vor.u32 %v5096_v20, %v5093_v53  ;;  %v5124_v41 = vshll.u32 %v4857_v32, 16  ;;  %v5107_v45 = vor.u32 %v5106_v38, %v5102_v26  ;;  %v5120_v49 = vrot.slane %v5118_v30, 5  ;;  %v4863_v53 = vld [vmem:[#allocation2 + $0xac] sm:$0xf] }
 0x125   : > { %v5074_v29 = vrot.slane %v5073_v14, 4  ;;  %v5089_v19 = vsel %vm8151_vm10, %v5084_v31, %v5088_v16  ;;  %v5117_v47 = vrot.slane %v5115_v58, 4  ;;  %v5128_v56 = vshrl.u32 %v4857_v32, 16  ;;  %v7987_v31 = vld [vmem:[%s9056_s1 + $0x118] sm:$0xff]   ;;  %v7970_v30 = vld [vmem:[#allocation2 + $0x48] sm:$0xff]  }
 0x126   : > { %7452 = vmatmul.mubr.bf16.gmra.mrb[12].mxu0 %v6794_v27  ;;  %v5098_v44 = vrot.slane %v5097_v46, 4  ;;  %v5126_v51 = vrot.slane %v5124_v41, 5  ;;  %v5134_v35 = vshll.u32 %v4858_v36, 16  ;;  %v5108_v7 = vrot.slane %v5107_v45, 4  ;;  %v4867_v36 = vld [vmem:[#allocation2 + $0xbc] sm:$0x1] }
 0x127   : > { %7484 = vmatpush3.bf16.msra.mxu0 %v7974_v39  ;;  %v5079_v39 = vsel %vm8151_vm10, %v5074_v29, %v5078_v12  ;;  %v5142_v61 = vshll.u32 %v4859_v43, 16  ;;  %v5121_v59 = vor.u32 %v5120_v49, %v5117_v47  ;;  %v5130_v60 = vrot.slane %v5128_v56, 4  ;;  %v7986_v12 = vld [vmem:[%s9056_s1 + $0x110] sm:$0xff]  }
 0x128   : > { %7485 = vmatprep.subr.bf16.mxu0 %v7975_v55  ;;  %v6795_v42 = vcombine.low %v5079_v39, %v5089_v19  ;;  %v5103_v54 = vsel %vm8151_vm10, %v5098_v44, %v5102_v26  ;;  %v5148_v57 = vshll.u32 %v4860_v48, 16  ;;  %v5113_v62 = vsel %vm8151_vm10, %v5108_v7, %v5112_v8  ;;  %v4865_v29 = vld [vmem:[#allocation2 + $0xb4] sm:$0xf]  ;;  %v4866_v8 = vld [vmem:[#allocation2 + $0xb8] sm:$0xf] }
 0x129   : > { %v5144_v50 = vrot.slane %v5142_v61, 5  ;;  %v5152_v0 = vshrl.u32 %v4860_v48, 16  ;;  %v6796_v5 = vcombine.low %v5103_v54, %v5113_v62  ;;  %v5122_v6 = vrot.slane %v5121_v59, 4 }
 0x12a   : > { %7248 = vmatmul.mubr.bf16.vlgmr.msra.gmra.mrb[0].mxu1 %v7964_v52  ;;  %7455 = vmatprep.mubr.bf16.mxu0 %v6795_v42  ;;  %v5131_v9 = vor.u32 %v5130_v60, %v5126_v51  ;;  %v5150_v10 = vrot.slane %v5148_v57, 5  ;;  %v5158_v16 = vshll.u32 %v4861_v24, 16  ;;  %v5163_v34 = vshrl.u32 %v4862_v11, 16 }
 0x12b   : > { %7486 = vmatpush3.bf16.msra.mxu0 %v7975_v55  ;;  %7527 = vmatpush3.bf16.msra.mxu1 %v8718_v37  ;;  %v5139_v37 = vshrl.u32 %v4859_v43, 16  ;;  %v5136_v55 = vrot.slane %v5134_v35, 5  ;;  %v5154_v15 = vrot.slane %v5152_v0, 4  ;;  %v5127_v1 = vsel %vm8151_vm10, %v5122_v6, %v5126_v51  ;;  %v7972_v43 = vld [vmem:[#allocation2 + $0x54] sm:$0xff]   ;;  %v7988_v35 = vld [vmem:[%s9056_s1 + $0x120] sm:$0xff]  }
 0x12c   : > { %7251 = vmatprep.mubr.bf16.mxu1 %v7966_v23  ;;  %7520 = vmatprep.subr.bf16.mxu1 %v7985_v21  ;;  %v5132_v14 = vrot.slane %v5131_v9, 4  ;;  %v5166_v52 = vshll.u32 %v4862_v11, 16  ;;  %v5160_v20 = vrot.slane %v5158_v16, 5  ;;  %v5172_v22 = vshll.u32 %v4863_v53, 16  ;;  %v7973_v9 = vld [vmem:[#allocation2 + $0x60] sm:$0xff]   ;;  %v7989_v11 = vld [vmem:[%s9056_s1 + $0x128] sm:$0xff]  }
 0x12d   : > { %v5141_v2 = vrot.slane %v5139_v37, 4  ;;  %v5155_v33 = vor.u32 %v5154_v15, %v5150_v10  ;;  %v5165_v23 = vrot.slane %v5163_v34, 4  ;;  %v5176_v27 = vshrl.u32 %v4863_v53, 16  ;;  %v4868_v37 = vld [vmem:[#allocation2 + $0xc0] sm:$0xf] }
 0x12e   : > { %7456 = vmatmul.mubr.bf16.gmra.mrb[16].mxu0 %v6796_v5  ;;  %v5137_v3 = vsel %vm8151_vm10, %v5132_v14, %v5136_v55  ;;  %v5168_v25 = vrot.slane %v5166_v52, 5  ;;  %v5174_v38 = vrot.slane %v5172_v22, 5  ;;  %v5182_v19 = vshll.u32 %v4864_v17, 16  ;;  %v4869_v55 = vld [vmem:[#allocation2 + $0xc4] sm:$0xf]  ;;  %v7976_v17 = vld [vmem:[#allocation2 + $0x6c] sm:$0xff]  }
 0x12f   : > { %7528 = vmatpush3.bf16.msra.mxu1 %v7985_v21  ;;  %v5145_v13 = vor.u32 %v5144_v50, %v5141_v2  ;;  %v6797_v26 = vcombine.low %v5127_v1, %v5137_v3  ;;  %v5156_v46 = vrot.slane %v5155_v33, 4  ;;  %v5178_v39 = vrot.slane %v5176_v27, 4  ;;  %v4872_v53 = vld [vmem:[#allocation2 + $0xd0] sm:$0xf] }
 0x130   : > { %7521 = vmatprep.subr.bf16.mxu1 %v7986_v12  ;;  %v5169_v58 = vor.u32 %v5168_v25, %v5165_v23  ;;  %v5187_v41 = vshrl.u32 %v4865_v29, 16  ;;  %v5190_v44 = vshll.u32 %v4865_v29, 16  ;;  %v5196_v45 = vshll.u32 %v4866_v8, 16 }
 0x131   : > { %v5146_v18 = vrot.slane %v5145_v13, 4  ;;  %7459 = vmatprep.mubr.bf16.mxu0 %v6797_v26  ;;  %v5161_v42 = vsel %vm8151_vm10, %v5156_v46, %v5160_v20  ;;  %v5200_v47 = vshrl.u32 %v4866_v8, 16  ;;  %v5179_v51 = vor.u32 %v5178_v39, %v5174_v38 }
 0x132   : > { %7252 = vmatmul.mubr.bf16.gmra.mrb[4].mxu1 %v7967_v63  ;;  %v5170_v49 = vrot.slane %v5169_v58, 4  ;;  %v5184_v56 = vrot.slane %v5182_v19, 5  ;;  %v5189_v21 = vrot.slane %v5187_v41, 4  ;;  %v5192_v24 = vrot.slane %v5190_v44, 5  ;;  %v4870_v63 = vld [vmem:[#allocation2 + $0xc8] sm:$0x1] }
 0x133   : > { %7255 = vmatprep.mubr.bf16.mxu1 %v7969_v4  ;;  %7529 = vmatpush3.bf16.msra.mxu1 %v7986_v12  ;;  %v5151_v32 = vsel %vm8151_vm10, %v5146_v18, %v5150_v10  ;;  %v5198_v54 = vrot.slane %v5196_v45, 5  ;;  %v5202_v7 = vrot.slane %v5200_v47, 4  ;;  %v5180_v59 = vrot.slane %v5179_v51, 4  ;;  %v4871_v10 = vld [vmem:[#allocation2 + $0xcc] sm:$0xf]  ;;  %v7991_v51 = vld [vmem:[%s9056_s1 + $0x138] sm:$0xff]  }
 0x134   : > { %7522 = vmatprep.subr.bf16.mxu1 %v7987_v31  ;;  %v6798_v48 = vcombine.low %v5151_v32, %v5161_v42  ;;  %v5175_v61 = vsel %vm8151_vm10, %v5170_v49, %v5174_v38  ;;  %v5206_v60 = vshll.u32 %v4867_v36, 16  ;;  %v5193_v57 = vor.u32 %v5192_v24, %v5189_v21  ;;  %v4873_v18 = vld [vmem:[#allocation2 + $0xd4] sm:$0x1]  ;;  %v5644_v41 = vld [vmem:[#allocation2 + $0x18] sm:$0xe] }
 0x135   : > { %v5203_v62 = vor.u32 %v5202_v7, %v5198_v54  ;;  %v5211_v2 = vshrl.u32 %v4868_v37, 16  ;;  %v5214_v50 = vshll.u32 %v4868_v37, 16  ;;  %v5185_v0 = vsel %vm8151_vm10, %v5180_v59, %v5184_v56  ;;  %v5645_v42 = vld [vmem:[#allocation2 + $0x1c] sm:$0xf]  ;;  %v5648_v37 = vld [vmem:[#allocation2 + $0x28] sm:$0xf] }
 0x136   : > { %7460 = vmatmul.mubr.bf16.gmra.mrb[20].mxu0 %v6798_v48  ;;  %v5208_v4 = vrot.slane %v5206_v60, 5  ;;  %v5220_v5 = vshll.u32 %v4869_v55, 16  ;;  %v5224_v6 = vshrl.u32 %v4869_v55, 16  ;;  %v6799_v12 = vcombine.low %v5175_v61, %v5185_v0  ;;  %v7977_v49 = vld [vmem:[#allocation2 + $0x78] sm:$0xff]   ;;  %v5649_v61 = vld [vmem:[#allocation2 + $0x2c] sm:$0x1] }
 0x137   : > { %7530 = vmatpush3.bf16.msra.mxu1 %v7987_v31  ;;  %v5194_v13 = vrot.slane %v5193_v57, 4  ;;  %v5204_v15 = vrot.slane %v5203_v62, 4  ;;  %v5213_v16 = vrot.slane %v5211_v2, 4  ;;  %v5216_v1 = vrot.slane %v5214_v50, 5  ;;  %v7990_v31 = vld [vmem:[%s9056_s1 + $0x130] sm:$0xff]   ;;  %v7978_v59 = vld [vmem:[#allocation2 + $0x84] sm:$0xff]  }
 0x138   : > { %7523 = vmatprep.subr.bf16.mxu1 %v7988_v35  ;;  %v5222_v14 = vrot.slane %v5220_v5, 5  ;;  %v5226_v34 = vrot.slane %v5224_v6, 4  ;;  %v5230_v52 = vshll.u32 %v4870_v63, 16  ;;  %7463 = vmatprep.mubr.bf16.mxu0 %v6799_v12  ;;  %v5235_v22 = vshrl.u32 %v4871_v10, 16  ;;  %v5650_v50 = vld [vmem:[#allocation2 + $0x30] sm:$0xe] }
 0x139   : > { %v5199_v33 = vsel %vm8151_vm10, %v5194_v13, %v5198_v54  ;;  %v5209_v20 = vsel %vm8151_vm10, %v5204_v15, %v5208_v4  ;;  %v5238_v3 = vshll.u32 %v4871_v10, 16  ;;  %v5217_v25 = vor.u32 %v5216_v1, %v5213_v16  ;;  %v5647_v54 = vld [vmem:[#allocation2 + $0x24] sm:$0xe]  ;;  %v5651_v0 = vld [vmem:[#allocation2 + $0x34] sm:$0xf] }
 0x13a   : > { %7256 = vmatmul.mubr.bf16.gmra.mrb[8].mxu1 %v7970_v30  ;;  %v6800_v23 = vcombine.low %v5199_v33, %v5209_v20  ;;  %v5227_v27 = vor.u32 %v5226_v34, %v5222_v14  ;;  %v5232_v29 = vrot.slane %v5230_v52, 5  ;;  %v5237_v26 = vrot.slane %v5235_v22, 4  ;;  %v5653_v16 = vld [vmem:[#allocation2 + $0x3c] sm:$0xe]  ;;  %v5654_v1 = vld [vmem:[#allocation2 + $0x40] sm:$0xf] }
 0x13b   : > { %7259 = vmatprep.mubr.bf16.mxu1 %v7972_v43  ;;  %7531 = vmatpush3.bf16.msra.mxu1 %v7988_v35  ;;  %v5240_v32 = vrot.slane %v5238_v3, 5  ;;  %v5244_v46 = vshll.u32 %v4872_v53, 16  ;;  %v5248_v38 = vshrl.u32 %v4872_v53, 16  ;;  %v5218_v8 = vrot.slane %v5217_v25, 4  ;;  %v5646_v43 = vld [vmem:[#allocation2 + $0x20] sm:$0x1] }
 0x13c   : > { %7524 = vmatprep.subr.bf16.mxu1 %v7989_v11  ;;  %v5228_v36 = vrot.slane %v5227_v27, 4  ;;  %v5254_v58 = vshll.u32 %v4873_v18, 16  ;;  %v6811_v48 = vrot.slane %v5644_v41, 9  ;;  %v5742_v24 = vrot.slane %v5645_v42, 5  ;;  %v7979_v34 = vld [vmem:[#allocation2 + $0x90] sm:$0xff]   ;;  %v7980_v3 = vld [vmem:[#allocation2 + $0x9c] sm:$0xff]  }
 0x13d   : > { %v5241_v39 = vor.u32 %v5240_v32, %v5237_v26  ;;  %v5246_v19 = vrot.slane %v5244_v46, 5  ;;  %v5250_v30 = vrot.slane %v5248_v38, 4  ;;  %v5223_v44 = vsel %vm8151_vm10, %v5218_v8, %v5222_v14  ;;  %v5655_v14 = vld [vmem:[#allocation2 + $0x44] sm:$0x1]  ;;  %v5657_v25 = vld [vmem:[#allocation2 + $0x4c] sm:$0xf] }
 0x13e   : > { %7464 = vmatmul.mubr.bf16.gmra.mrb[24].mxu0 %v6800_v23  ;;  %v5233_v45 = vsel %vm8151_vm10, %v5228_v36, %v5232_v29  ;;  %v5256_v47 = vrot.slane %v5254_v58, 5  ;;  %v5745_v7 = vrot.slane %v5646_v43, 5  ;;  %v5743_v63 = vsel %vm8293_vm13, %v6811_v48, %v5742_v24  ;;  %v5656_v23 = vld [vmem:[#allocation2 + $0x48] sm:$0xe]  ;;  %v5658_v26 = vld [vmem:[#allocation2 + $0x50] sm:$0x1] }
 0x13f   : > { %7532 = vmatpush3.bf16.msra.mxu1 %v7989_v11  ;;  %v6801_v56 = vcombine.low %v5223_v44, %v5233_v45  ;;  %v5242_v35 = vrot.slane %v5241_v39, 4  ;;  %v5251_v21 = vor.u32 %v5250_v30, %v5246_v19  ;;  %v5744_v57 = vrot.slane %v5742_v24, 4  ;;  %v5659_v8 = vld [vmem:[#allocation2 + $0x54] sm:$0xe]  ;;  %v5660_v58 = vld [vmem:[#allocation2 + $0x58] sm:$0xf] }
 0x140   : > { %7525 = vmatprep.subr.bf16.mxu1 %v7990_v31  ;;  %v6812_v62 = vrot.slane %v5647_v54, 9  ;;  %v5749_v2 = vrot.slane %v5648_v37, 5  ;;  %v5752_v6 = vrot.slane %v5649_v61, 5  ;;  %v5756_v10 = vrot.slane %v5651_v0, 5  ;;  %v5661_v39 = vld [vmem:[#allocation2 + $0x5c] sm:$0x1] }
 0x141   : > { %7467 = vmatprep.mubr.bf16.mxu0 %v6801_v56  ;;  %v5247_v60 = vsel %vm8151_vm10, %v5242_v35, %v5246_v19  ;;  %v5252_v55 = vrot.slane %v5251_v21, 4  ;;  %v5746_v5 = vsel %vm8293_vm13, %v5744_v57, %v5745_v7  ;;  %v6813_v15 = vrot.slane %v5650_v50, 9  ;;  %v5662_v48 = vld [vmem:[#allocation2 + $0x60] sm:$0xe]  ;;  %v5664_v21 = vld [vmem:[#allocation2 + $0x68] sm:$0x1] }
 0x142   : > { %7260 = vmatmul.mubr.bf16.gmra.mrb[12].mxu1 %v7973_v9  ;;  %v5652_v9 = vld [vmem:[#allocation2 + $0x38] sm:$0x1]  ;;  %v6843_v12 = vcombine.low %v5743_v63, %v5746_v5  ;;  %v5751_v13 = vrot.slane %v5749_v2, 4  ;;  %v5758_v53 = vrot.slane %v5756_v10, 4  ;;  %v6814_v52 = vrot.slane %v5653_v16, 9  ;;  %v7981_v54 = vld [vmem:[#allocation2 + $0xa8] sm:$0xff]  }
 0x143   : > { %7263 = vmatprep.mubr.bf16.mxu1 %v7976_v17  ;;  %7533 = vmatpush3.bf16.msra.mxu1 %v7990_v31  ;;  %v5257_v4 = vsel %vm8151_vm10, %v5252_v55, %v5256_v47  ;;  %v5759_v17 = vrot.slane %v5652_v9, 5  ;;  %v5763_v18 = vrot.slane %v5654_v1, 5  ;;  %v5766_v33 = vrot.slane %v5655_v14, 5  ;;  %v5665_v61 = vld [vmem:[#allocation2 + $0x6c] sm:$0xe]  ;;  %v7982_v63 = vld [vmem:[#allocation2 + $0xb4] sm:$0xff]  }
 0x144   : > { %7526 = vmatprep.subr.bf16.mxu1 %v7991_v51  ;;  %v6802_v11 = vcombine.low %v5247_v60, %v5257_v4  ;;  %v5750_v20 = vsel %vm8293_vm13, %v6812_v62, %v5749_v2  ;;  %v5753_v22 = vsel %vm8293_vm13, %v5751_v13, %v5752_v6  ;;  %v5757_v27 = vsel %vm8293_vm13, %v6813_v15, %v5756_v10  ;;  %v5666_v57 = vld [vmem:[#allocation2 + $0x70] sm:$0xf]  ;;  %v5667_v62 = vld [vmem:[#allocation2 + $0x74] sm:$0x1]  ;;  %v2987_v6 = vld [vmem:[#allocation2 + $0x6c] sm:$0xf] }
 0x145   : > { %v5760_v29 = vsel %vm8293_vm13, %v5758_v53, %v5759_v17  ;;  %v5765_v31 = vrot.slane %v5763_v18, 4  ;;  %v6815_v32 = vrot.slane %v5656_v23, 9  ;;  %v5770_v46 = vrot.slane %v5657_v25, 5  ;;  %v2988_v9 = vld [vmem:[#allocation2 + $0x70] sm:$0xf] }
 0x146   : > { %7468 = vmatmul.mubr.bf16.gmra.mrb[28].mxu0 %v6802_v11  ;;  %v5773_v38 = vrot.slane %v5658_v26, 5  ;;  %v6844_v36 = vcombine.low %v5750_v20, %v5753_v22  ;;  %v6816_v19 = vrot.slane %v5659_v8, 9  ;;  %v6845_v30 = vcombine.low %v5757_v27, %v5760_v29  ;;  %v2989_v11 = vld [vmem:[#allocation2 + $0x74] sm:$0x1]  ;;  %v5668_v14 = vld [vmem:[#allocation2 + $0x78] sm:$0xe] }
 0x147   : > { %7534 = vmatpush3.bf16.msra.mxu1 %v7991_v51  ;;  %7487 = vmatprep.mubr.bf16.mxu0 %v6843_v12  ;;  %v5772_v41 = vrot.slane %v5770_v46, 4  ;;  %v5777_v42 = vrot.slane %v5660_v58, 5  ;;  %v5764_v44 = vsel %vm8293_vm13, %v6814_v52, %v5763_v18  ;;  %v5767_v45 = vsel %vm8293_vm13, %v5765_v31, %v5766_v33  ;;  %v5670_v22 = vld [vmem:[#allocation2 + $0x80] sm:$0x1]  ;;  %v2990_v29 = vld [vmem:[#allocation2 + $0x78] sm:$0xf] }
 0x148   : > { %v8862_v47 = vsel %vm8293_vm13, %v6815_v32, %v5770_v46  ;;  %v5780_v43 = vrot.slane %v5661_v39, 5  ;;  %v6817_v24 = vrot.slane %v5662_v48, 9  ;;  %v5787_v37 = vrot.slane %v5664_v21, 5  ;;  %v2992_v58 = vld [vmem:[#allocation2 + $0x80] sm:$0x1] }
 0x149   : > { %v5774_v51 = vsel %vm8293_vm13, %v5772_v41, %v5773_v38  ;;  %v8868_v56 = vsel %vm8293_vm13, %v6816_v19, %v5777_v42  ;;  %v5779_v35 = vrot.slane %v5777_v42, 4  ;;  %v6818_v2 = vrot.slane %v5665_v61, 9  ;;  %v2991_v38 = vld [vmem:[#allocation2 + $0x7c] sm:$0xf]  ;;  %v2993_v61 = vld [vmem:[#allocation2 + $0x84] sm:$0xf] }
 0x14a   : > { %7264 = vmatmul.mubr.bf16.gmra.mrb[16].mxu1 %v7977_v49  ;;  %v5663_v49 = vld [vmem:[#allocation2 + $0x64] sm:$0xf]  ;;  %v6847_v60 = vcombine.low %v8862_v47, %v5774_v51  ;;  %v5791_v5 = vrot.slane %v5666_v57, 5  ;;  %v5794_v10 = vrot.slane %v5667_v62, 5  ;;  %v3204_v12 = vshrl.u32 %v2987_v6, 16 }
 0x14b   : > { %7267 = vmatprep.mubr.bf16.mxu1 %v7978_v59  ;;  %v5784_v7 = vrot.slane %v5663_v49, 5  ;;  %v6846_v59 = vcombine.low %v5764_v44, %v5767_v45  ;;  %v8873_v55 = vsel %vm8293_vm13, %v5779_v35, %v5780_v43  ;;  %v3207_v13 = vshll.u32 %v2987_v6, 16  ;;  %v5671_v47 = vld [vmem:[#allocation2 + $0x84] sm:$0xe]  ;;  %v5672_v35 = vld [vmem:[#allocation2 + $0x88] sm:$0xf] }
 0x14c   : > { %v6848_v50 = vcombine.low %v8868_v56, %v8873_v55  ;;  %v3213_v15 = vshll.u32 %v2988_v9, 16  ;;  %v8887_v53 = vsel %vm8293_vm13, %v6818_v2, %v5791_v5  ;;  %v5793_v17 = vrot.slane %v5791_v5, 4  ;;  %v2994_v62 = vld [vmem:[#allocation2 + $0x88] sm:$0xf]  ;;  %v2996_v56 = vld [vmem:[#allocation2 + $0x90] sm:$0xf] }
 0x14d   : > { %v8879_v0 = vsel %vm8293_vm13, %v6817_v24, %v5784_v7  ;;  %v5786_v4 = vrot.slane %v5784_v7, 4  ;;  %v3217_v1 = vshrl.u32 %v2988_v9, 16  ;;  %v3206_v18 = vrot.slane %v3204_v12, 4  ;;  %v2995_v9 = vld [vmem:[#allocation2 + $0x8c] sm:$0x1] }
 0x14e   : > { %7488 = vmatmul.mubr.bf16.vlgmr.msra.gmra.mrb[0].mxu0 %v6844_v36  ;;  %v3209_v33 = vrot.slane %v3207_v13, 5  ;;  %v3215_v20 = vrot.slane %v3213_v15, 5  ;;  %v3223_v25 = vshll.u32 %v2989_v11, 16  ;;  %v6819_v27 = vrot.slane %v5668_v14, 9  ;;  %v5674_v15 = vld [vmem:[#allocation2 + $0x90] sm:$0xe] }
 0x14f   : > { %7491 = vmatprep.mubr.bf16.mxu0 %v6845_v30  ;;  %v8883_v16 = vsel %vm8293_vm13, %v5786_v4, %v5787_v37  ;;  %v3219_v23 = vrot.slane %v3217_v1, 4  ;;  %v5801_v46 = vrot.slane %v5670_v22, 5  ;;  %v3228_v39 = vshrl.u32 %v2990_v29, 16  ;;  %v7983_v30 = vld [vmem:[#allocation2 + $0xc0] sm:$0xff]   ;;  %v5673_v37 = vld [vmem:[#allocation2 + $0x8c] sm:$0x1] }
 0x150   : > { %v6849_v52 = vcombine.low %v8879_v0, %v8883_v16  ;;  %v3210_v26 = vor.u32 %v3209_v33, %v3206_v18  ;;  %v3225_v36 = vrot.slane %v3223_v25, 5  ;;  %v3231_v19 = vshll.u32 %v2990_v29, 16  ;;  %v5675_v18 = vld [vmem:[#allocation2 + $0x94] sm:$0xf]  ;;  %v5676_v25 = vld [vmem:[#allocation2 + $0x98] sm:$0x1] }
 0x151   : > { %v3220_v8 = vor.u32 %v3219_v23, %v3215_v20  ;;  %v3237_v45 = vshll.u32 %v2991_v38, 16  ;;  %v3230_v48 = vrot.slane %v3228_v39, 4  ;;  %v3241_v51 = vshrl.u32 %v2991_v38, 16 }
 0x152   : > { %7268 = vmatmul.mubr.bf16.gmra.mrb[20].mxu1 %v7979_v34  ;;  %v5669_v34 = vld [vmem:[#allocation2 + $0x7c] sm:$0xf]  ;;  %v3211_v41 = vrot.slane %v3210_v26, 4  ;;  %v3233_v49 = vrot.slane %v3231_v19, 5  ;;  %v3247_v7 = vshll.u32 %v2992_v58, 16  ;;  %v6820_v5 = vrot.slane %v5671_v47, 9 }
 0x153   : > { %7271 = vmatprep.mubr.bf16.mxu1 %v7980_v3  ;;  %v8893_v3 = vsel %vm8293_vm13, %v5793_v17, %v5794_v10  ;;  %v5798_v32 = vrot.slane %v5669_v34, 5  ;;  %v3221_v43 = vrot.slane %v3220_v8, 4  ;;  %v3243_v57 = vrot.slane %v3241_v51, 4  ;;  %v2997_v8 = vld [vmem:[#allocation2 + $0x94] sm:$0xf] }
 0x154   : > { %v6850_v31 = vcombine.low %v8887_v53, %v8893_v3  ;;  %v3216_v21 = vsel %vm8151_vm10, %v3211_v41, %v3215_v20  ;;  %v3249_v4 = vrot.slane %v3247_v7, 5  ;;  %v5805_v6 = vrot.slane %v5672_v35, 5  ;;  %v2998_v19 = vld [vmem:[#allocation2 + $0x98] sm:$0x1] }
 0x155   : > { %v8899_v42 = vsel %vm8293_vm13, %v6819_v27, %v5798_v32  ;;  %v5800_v44 = vrot.slane %v5798_v32, 4  ;;  %v5808_v12 = vrot.slane %v5673_v37, 5  ;;  %v3252_v13 = vshrl.u32 %v2993_v61, 16 }
 0x156   : > { %7492 = vmatmul.mubr.bf16.gmra.mrb[4].mxu0 %v6846_v59  ;;  %v3226_v59 = vsel %vm8151_vm10, %v3221_v43, %v3225_v36  ;;  %v8913_v17 = vsel %vm8293_vm13, %v6820_v5, %v5805_v6  ;;  %v5807_v1 = vrot.slane %v5805_v6, 4  ;;  %v3255_v14 = vshll.u32 %v2993_v61, 16  ;;  %v3000_v6 = vld [vmem:[#allocation2 + $0xa0] sm:$0xf] }
 0x157   : > { %7495 = vmatprep.mubr.bf16.mxu0 %v6847_v60  ;;  %v8905_v24 = vsel %vm8293_vm13, %v5800_v44, %v5801_v46  ;;  %v6659_v2 = vcombine.low %v3216_v21, %v3226_v59  ;;  %v3261_v34 = vshll.u32 %v2994_v62, 16  ;;  %v3254_v22 = vrot.slane %v3252_v13, 4  ;;  %v3001_v13 = vld [vmem:[#allocation2 + $0xa4] sm:$0x1] }
 0x158   : > { %v6851_v60 = vcombine.low %v8899_v42, %v8905_v24  ;;  %v3265_v23 = vshrl.u32 %v2994_v62, 16  ;;  %v8925_v27 = vsel %vm8293_vm13, %v5807_v1, %v5808_v12  ;;  %v3257_v29 = vrot.slane %v3255_v14, 5  ;;  %v5680_v1 = vld [vmem:[#allocation2 + $0xa8] sm:$0xe]  ;;  %v5681_v42 = vld [vmem:[#allocation2 + $0xac] sm:$0xf] }
 0x159   : > { %v3263_v26 = vrot.slane %v3261_v34, 5  ;;  %v3271_v32 = vshll.u32 %v2995_v9, 16  ;;  %v6821_v38 = vrot.slane %v5674_v15, 9  ;;  %v5815_v39 = vrot.slane %v5676_v25, 5 }
 0x15a   : > { %7272 = vmatmul.mubr.bf16.gmra.mrb[24].mxu1 %v7981_v54  ;;  %v3239_v54 = vrot.slane %v3237_v45, 5  ;;  %v3267_v46 = vrot.slane %v3265_v23, 4  ;;  %v3258_v0 = vor.u32 %v3257_v29, %v3254_v22  ;;  %v3279_v41 = vshll.u32 %v2996_v56, 16  ;;  %v5682_v23 = vld [vmem:[#allocation2 + $0xb0] sm:$0x1] }
 0x15b   : > { %7275 = vmatprep.mubr.bf16.mxu1 %v7982_v63  ;;  %v3234_v63 = vor.u32 %v3233_v49, %v3230_v48  ;;  %v3273_v16 = vrot.slane %v3271_v32, 5  ;;  %v3285_v43 = vshll.u32 %v2997_v8, 16  ;;  %v5677_v48 = vld [vmem:[#allocation2 + $0x9c] sm:$0xe]  ;;  %v3289_v21 = vshrl.u32 %v2997_v8, 16 }
 0x15c   : > { %v3244_v11 = vor.u32 %v3243_v57, %v3239_v54  ;;  %v3268_v58 = vor.u32 %v3267_v46, %v3263_v26  ;;  %v3259_v44 = vrot.slane %v3258_v0, 4  ;;  %v3281_v35 = vrot.slane %v3279_v41, 5  ;;  %v2999_v57 = vld [vmem:[#allocation2 + $0x9c] sm:$0xf] }
 0x15d   : > { %v3235_v10 = vrot.slane %v3234_v63, 4  ;;  %v3287_v61 = vrot.slane %v3285_v43, 5  ;;  %v3295_v59 = vshll.u32 %v2998_v19, 16  ;;  %v5679_v63 = vld [vmem:[#allocation2 + $0xa4] sm:$0x1]  ;;  %v3291_v5 = vrot.slane %v3289_v21, 4 }
 0x15e   : > { %7496 = vmatmul.mubr.bf16.gmra.mrb[8].mxu0 %v6848_v50  ;;  %v3245_v20 = vrot.slane %v3244_v11, 4  ;;  %v6852_v50 = vcombine.low %v8913_v17, %v8925_v27  ;;  %v3269_v49 = vrot.slane %v3268_v58, 4  ;;  %v3264_v7 = vsel %vm8151_vm10, %v3259_v44, %v3263_v26  ;;  %v5684_v17 = vld [vmem:[#allocation2 + $0xb8] sm:$0xf] }
 0x15f   : > { %v3240_v33 = vsel %vm8151_vm10, %v3235_v10, %v3239_v54  ;;  %7499 = vmatprep.mubr.bf16.mxu0 %v6849_v52  ;;  %v5812_v52 = vrot.slane %v5675_v18, 5  ;;  %v5678_v54 = vld [vmem:[#allocation2 + $0xa0] sm:$0xf]  ;;  %v3297_v10 = vrot.slane %v3295_v59, 5  ;;  %v6822_v11 = vrot.slane %v5677_v48, 9 }
 0x160   : > { %v3250_v55 = vsel %vm8151_vm10, %v3245_v20, %v3249_v4  ;;  %v3274_v62 = vsel %vm8151_vm10, %v3269_v49, %v3273_v16  ;;  %v5819_v12 = vrot.slane %v5678_v54, 5  ;;  %v3292_v53 = vor.u32 %v3291_v5, %v3287_v61  ;;  %v5683_v49 = vld [vmem:[#allocation2 + $0xb4] sm:$0xe] }
 0x161   : > { %v6660_v36 = vcombine.low %v3240_v33, %v3250_v55  ;;  %v8933_v45 = vsel %vm8293_vm13, %v6821_v38, %v5812_v52  ;;  %v5814_v47 = vrot.slane %v5812_v52, 4  ;;  %v6661_v9 = vcombine.low %v3264_v7, %v3274_v62  ;;  %v3005_v59 = vld [vmem:[#allocation2 + $0xb4] sm:$0xf] }
 0x162   : > { %7276 = vmatmul.mubr.bf16.gmra.mrb[28].mxu1 %v7983_v30  ;;  %v3276_v30 = vshrl.u32 %v2996_v56, 16  ;;  %v5822_v3 = vrot.slane %v5679_v63, 5  ;;  %v8950_v14 = vsel %vm8293_vm13, %v6822_v11, %v5819_v12  ;;  %v5821_v34 = vrot.slane %v5819_v12, 4  ;;  %v3002_v56 = vld [vmem:[#allocation2 + $0xa8] sm:$0xf] }
 0x163   : > { %7311 = vmatprep.mubr.bf16.mxu1 %v6659_v2  ;;  %v5816_v37 = vsel %vm8293_vm13, %v5814_v47, %v5815_v39  ;;  %v3303_v18 = vshll.u32 %v2999_v57, 16  ;;  %v3309_v33 = vshll.u32 %v3000_v6, 16  ;;  %v3313_v22 = vshrl.u32 %v3000_v6, 16  ;;  %v3007_v11 = vld [vmem:[#allocation2 + $0xbc] sm:$0x1] }
 0x164   : > { %v3278_v51 = vrot.slane %v3276_v30, 4  ;;  %v6853_v2 = vcombine.low %v8933_v45, %v5816_v37  ;;  %v5823_v25 = vsel %vm8293_vm13, %v5821_v34, %v5822_v3  ;;  %v3319_v32 = vshll.u32 %v3001_v13, 16  ;;  %v3004_v30 = vld [vmem:[#allocation2 + $0xb0] sm:$0x1]  ;;  %v5686_v3 = vld [vmem:[#allocation2 + $0xc0] sm:$0xe] }
 0x165   : > { %v3305_v29 = vrot.slane %v3303_v18, 5  ;;  %v3311_v26 = vrot.slane %v3309_v33, 5  ;;  %v6854_v46 = vcombine.low %v8950_v14, %v5823_v25  ;;  %v3315_v38 = vrot.slane %v3313_v22, 4  ;;  %v5687_v18 = vld [vmem:[#allocation2 + $0xc4] sm:$0xf] }
 0x166   : > { %7500 = vmatmul.mubr.bf16.gmra.mrb[12].mxu0 %v6850_v31  ;;  %v3282_v4 = vor.u32 %v3281_v35, %v3278_v51  ;;  %v3300_v31 = vshrl.u32 %v2999_v57, 16  ;;  %v6823_v8 = vrot.slane %v5680_v1, 9  ;;  %v3321_v52 = vrot.slane %v3319_v32, 5 }
 0x167   : > { %7503 = vmatprep.mubr.bf16.mxu0 %v6851_v60  ;;  %v3293_v60 = vrot.slane %v3292_v53, 4  ;;  %v5826_v58 = vrot.slane %v5681_v42, 5  ;;  %v3316_v39 = vor.u32 %v3315_v38, %v3311_v26  ;;  %v5829_v19 = vrot.slane %v5682_v23, 5  ;;  %v3009_v38 = vld [vmem:[#allocation2 + $0xc4] sm:$0xf] }
 0x168   : > { %v3283_v15 = vrot.slane %v3282_v4, 4  ;;  %v3302_v20 = vrot.slane %v3300_v31, 4  ;;  %v3324_v41 = vshrl.u32 %v3002_v56, 16  ;;  %v3327_v44 = vshll.u32 %v3002_v56, 16  ;;  %v3006_v4 = vld [vmem:[#allocation2 + $0xb8] sm:$0xf] }
 0x169   : > { %v3298_v55 = vsel %vm8151_vm10, %v3293_v60, %v3297_v10  ;;  %v5827_v47 = vsel %vm8293_vm13, %v6823_v8, %v5826_v58  ;;  %v5828_v43 = vrot.slane %v5826_v58, 4  ;;  %v3317_v51 = vrot.slane %v3316_v39, 4  ;;  %v3010_v39 = vld [vmem:[#allocation2 + $0xc8] sm:$0x1] }
 0x16a   : > { %7312 = vmatmul.mubr.bf16.vlgmr.msra.gmra.mrb[16].mxu1 %v6660_v36  ;;  %v3288_v24 = vsel %vm8151_vm10, %v3283_v15, %v3287_v61  ;;  %v3003_v36 = vld [vmem:[#allocation2 + $0xac] sm:$0xf]  ;;  %v3306_v16 = vor.u32 %v3305_v29, %v3302_v20  ;;  %v3326_v35 = vrot.slane %v3324_v41, 4  ;;  %v3329_v21 = vrot.slane %v3327_v44, 5  ;;  %v5685_v61 = vld [vmem:[#allocation2 + $0xbc] sm:$0x1] }
 0x16b   : > { %7315 = vmatprep.mubr.bf16.mxu1 %v6661_v9  ;;  %v6662_v0 = vcombine.low %v3288_v24, %v3298_v55  ;;  %v3333_v48 = vshll.u32 %v3003_v36, 16  ;;  %v3337_v54 = vshrl.u32 %v3003_v36, 16  ;;  %v3343_v37 = vshll.u32 %v3004_v30, 16  ;;  %v5688_v20 = vld [vmem:[#allocation2 + $0xc8] sm:$0x1] }
 0x16c   : > { %v3307_v45 = vrot.slane %v3306_v16, 4  ;;  %v3322_v63 = vsel %vm8151_vm10, %v3317_v51, %v3321_v52  ;;  %v3330_v62 = vor.u32 %v3329_v21, %v3326_v35  ;;  %v6824_v9 = vrot.slane %v5683_v49, 9  ;;  %v5690_v21 = vld [vmem:[#allocation2 + $0xd0] sm:$0xf] }
 0x16d   : > { %v3335_v7 = vrot.slane %v3333_v48, 5  ;;  %v3345_v6 = vrot.slane %v3343_v37, 5  ;;  %v5833_v10 = vrot.slane %v5684_v17, 5  ;;  %v5836_v15 = vrot.slane %v5685_v61, 5 }
 0x16e   : > { %7504 = vmatmul.mubr.bf16.gmra.mrb[16].mxu0 %v6852_v50  ;;  %v3312_v27 = vsel %vm8151_vm10, %v3307_v45, %v3311_v26  ;;  %v5830_v50 = vsel %vm8293_vm13, %v5828_v43, %v5829_v19  ;;  %v3331_v12 = vrot.slane %v3330_v62, 4  ;;  %v3348_v53 = vshrl.u32 %v3005_v59, 16  ;;  %v3008_v26 = vld [vmem:[#allocation2 + $0xc0] sm:$0xf]  ;;  %v5689_v43 = vld [vmem:[#allocation2 + $0xcc] sm:$0xe] }
 0x16f   : > { %7507 = vmatprep.mubr.bf16.mxu0 %v6853_v2  ;;  %v6855_v57 = vcombine.low %v5827_v47, %v5830_v50  ;;  %v3339_v2 = vrot.slane %v3337_v54, 4  ;;  %v6663_v5 = vcombine.low %v3312_v27, %v3322_v63  ;;  %v5834_v31 = vsel %vm8293_vm13, %v6824_v9, %v5833_v10 }
 0x170   : > { %v5835_v1 = vrot.slane %v5833_v10, 4  ;;  %v3351_v14 = vshll.u32 %v3005_v59, 16  ;;  %v3357_v34 = vshll.u32 %v3006_v4, 16  ;;  %v3336_v33 = vsel %vm8151_vm10, %v3331_v12, %v3335_v7 }
 0x171   : > { %v3340_v13 = vor.u32 %v3339_v2, %v3335_v7  ;;  %v3350_v24 = vrot.slane %v3348_v53, 4  ;;  %v3361_v60 = vshrl.u32 %v3006_v4, 16  ;;  %v3367_v29 = vshll.u32 %v3007_v11, 16  ;;  %v5691_v7 = vld [vmem:[#allocation2 + $0xd4] sm:$0x1] }
 0x172   : > { %7316 = vmatmul.mubr.bf16.gmra.mrb[20].mxu1 %v6662_v0  ;;  %v5837_v22 = vsel %vm8293_vm13, %v5835_v1, %v5836_v15  ;;  %v3353_v23 = vrot.slane %v3351_v14, 5  ;;  %v3359_v25 = vrot.slane %v3357_v34, 5  ;;  %v5840_v16 = vrot.slane %v5687_v18, 5 }
 0x173   : > { %7319 = vmatprep.mubr.bf16.mxu1 %v6663_v5  ;;  %v3341_v42 = vrot.slane %v3340_v13, 4  ;;  %v6856_v56 = vcombine.low %v5834_v31, %v5837_v22  ;;  %v3363_v55 = vrot.slane %v3361_v60, 4  ;;  %v3369_v0 = vrot.slane %v3367_v29, 5 }
 0x174   : > { %v3354_v36 = vor.u32 %v3353_v23, %v3350_v24  ;;  %v5843_v58 = vrot.slane %v5688_v20, 5  ;;  %v3372_v19 = vshrl.u32 %v3008_v26, 16  ;;  %v3375_v30 = vshll.u32 %v3008_v26, 16 }
 0x175   : > { %v3346_v32 = vsel %vm8151_vm10, %v3341_v42, %v3345_v6  ;;  %v3364_v52 = vor.u32 %v3363_v55, %v3359_v25  ;;  %v5842_v45 = vrot.slane %v5840_v16, 4  ;;  %v3381_v47 = vshll.u32 %v3009_v38, 16 }
 0x176   : > { %7508 = vmatmul.mubr.bf16.gmra.mrb[20].mxu0 %v6854_v46  ;;  %v6825_v46 = vrot.slane %v5686_v3, 9  ;;  %v6664_v8 = vcombine.low %v3336_v33, %v3346_v32  ;;  %v3355_v41 = vrot.slane %v3354_v36, 4  ;;  %v3374_v49 = vrot.slane %v3372_v19, 4 }
 0x177   : > { %7511 = vmatprep.mubr.bf16.mxu0 %v6855_v57  ;;  %v3365_v48 = vrot.slane %v3364_v52, 4  ;;  %v3377_v51 = vrot.slane %v3375_v30, 5  ;;  %v3385_v35 = vshrl.u32 %v3009_v38, 16  ;;  %v5844_v17 = vsel %vm8293_vm13, %v5842_v45, %v5843_v58 }
 0x178   : > { %v5841_v44 = vsel %vm8293_vm13, %v6825_v46, %v5840_v16  ;;  %v3360_v54 = vsel %vm8151_vm10, %v3355_v41, %v3359_v25  ;;  %v3383_v27 = vrot.slane %v3381_v47, 5  ;;  %v3391_v50 = vshll.u32 %v3010_v39, 16 }
 0x179   : > { %v3370_v37 = vsel %vm8151_vm10, %v3365_v48, %v3369_v0  ;;  %v6857_v61 = vcombine.low %v5841_v44, %v5844_v17  ;;  %v3378_v59 = vor.u32 %v3377_v51, %v3374_v49  ;;  %v3387_v63 = vrot.slane %v3385_v35, 4 }
 0x17a   : > { %7320 = vmatmul.mubr.bf16.gmra.mrb[24].mxu1 %v6664_v8  ;;  %v6665_v57 = vcombine.low %v3360_v54, %v3370_v37  ;;  %v6826_v62 = vrot.slane %v5689_v43, 9  ;;  %v5847_v2 = vrot.slane %v5690_v21, 5  ;;  %v3393_v6 = vrot.slane %v3391_v50, 5 }
 0x17b   : > { %v3379_v4 = vrot.slane %v3378_v59, 4  ;;  %v3388_v5 = vor.u32 %v3387_v63, %v3383_v27  ;;  %v5850_v9 = vrot.slane %v5691_v7, 5 }
 0x17c   : > { %7323 = vmatprep.mubr.bf16.mxu1 %v6665_v57  ;;  %v5848_v10 = vsel %vm8293_vm13, %v6826_v62, %v5847_v2  ;;  %v5849_v11 = vrot.slane %v5847_v2, 4 }
 0x17d   : > { %v3384_v12 = vsel %vm8151_vm10, %v3379_v4, %v3383_v27  ;;  %v3389_v13 = vrot.slane %v3388_v5, 4 }
 0x17e   : > { %7512 = vmatmul.mubr.bf16.gmra.mrb[24].mxu0 %v6856_v56  ;;  %v5851_v15 = vsel %vm8293_vm13, %v5849_v11, %v5850_v9 }
 0x17f   : > { %7515 = vmatprep.mubr.bf16.mxu0 %v6857_v61  ;;  %v3394_v53 = vsel %vm8151_vm10, %v3389_v13, %v3393_v6  ;;  %v6858_v3 = vcombine.low %v5848_v10, %v5851_v15 }
 0x180   : > { %v6666_v31 = vcombine.low %v3384_v12, %v3394_v53 }
 0x182   : > { %7324 = vmatmul.mubr.bf16.gmra.mrb[28].mxu1 %v6666_v31 }
 0x186   : > { %7516 = vmatmul.mubr.bf16.gmra.mrb[28].mxu0 %v6858_v3 }
 0x1fd   : > { %v7249_v1 = vpop.f32.mrb[0].mxu1 }
 0x1fe   : > { %v2740_v14 = vpop.f32.mrb[1].mxu1 }
 0x1ff   : > { %v7250_v34 = vpop.f32.mrb[2].mxu1 }
 0x200   : > { %v2743_v18 = vpop.f32.mrb[3].mxu1 }
 0x205   : > { %v7253_v33 = vpop.f32.mrb[4].mxu1 }
 0x206   : > { %v2756_v42 = vpop.f32.mrb[5].mxu1 }
 0x207   : > { %v7254_v24 = vpop.f32.mrb[6].mxu1 }
 0x208   : > { %v2759_v60 = vpop.f32.mrb[7].mxu1 }
 0x20d   : > { %v7257_v20 = vpop.f32.mrb[8].mxu1 }
 0x20e   : > { %v2772_v22 = vpop.f32.mrb[9].mxu1 }
 0x20f   : > { %v7258_v28 = vpop.f32.mrb[10].mxu1 }
 0x210   : > { %v8994_v23 = vpop.f32.mrb[11].mxu1 }
 0x215   : > { %v8996_v40 = vpop.f32.mrb[12].mxu1 }
 0x216   : > { %v8998_v25 = vpop.f32.mrb[13].mxu1 }
 0x217   : > { %v9000_v29 = vpop.f32.mrb[14].mxu1 }
 0x218   : > { %v9002_v26 = vpop.f32.mrb[15].mxu1 }
 0x221   : > { %v7489_v32 = vpop.f32.mrb[0].mxu0 }
 0x222   : > { %v7537_v56 = vadd.f32 %v7489_v32, %v7249_v1  ;;  %v6015_v55 = vpop.f32.mrb[1].mxu0 }
 0x223   : > { %v7540_v46 = vadd.f32 %v6015_v55, %v2740_v14  ;;  %v7490_v38 = vpop.f32.mrb[2].mxu0 }
 0x224   : > { %6208 = vst [vmem:[%s9008_s6 + $0x10] sm:$0xff] %v7537_v56  ;;  %v7543_v8 = vadd.f32 %v7490_v38, %v7250_v34  ;;  %v6018_v36 = vpop.f32.mrb[3].mxu0  ;;  %v6309_v39 = vmul.f32 %v7537_v56, %v7537_v56 }
 0x225   : > { %6206 = vst [vmem:[%s9008_s6] sm:$0xff] %v7540_v46  ;;  %v7546_v0 = vadd.f32 %v6018_v36, %v2743_v18  ;;  %v6307_v16 = vmul.f32 %v7540_v46, %v7540_v46 }
 0x226   : > { %6209 = vst [vmem:[%s9008_s6 + $0x18] sm:$0xff] %v7543_v8  ;;  %v6310_v47 = vmul.f32 %v7543_v8, %v7543_v8 }
 0x227   : > { %6207 = vst [vmem:[%s9008_s6 + $0x8] sm:$0xff] %v7546_v0  ;;  %v6270_v52 = vadd.f32 %v7546_v0, %v7540_v46  ;;  %v6308_v58 = vmul.f32 %v7546_v0, %v7546_v0 }
 0x229   : > { %v6271_v19 = vadd.f32 %v7537_v56, %v6270_v52  ;;  %v6339_v30 = vadd.f32 %v6308_v58, %v6307_v16  ;;  %v7493_v41 = vpop.f32.mrb[4].mxu0 }
 0x22a   : > { %v7549_v44 = vadd.f32 %v7493_v41, %v7253_v33  ;;  %v6031_v45 = vpop.f32.mrb[5].mxu0 }
 0x22b   : > { %v6340_v43 = vadd.f32 %v6339_v30, %v6309_v39  ;;  %v7552_v48 = vadd.f32 %v6031_v45, %v2756_v42  ;;  %v6272_v49 = vadd.f32 %v7543_v8, %v6271_v19  ;;  %v7494_v51 = vpop.f32.mrb[6].mxu0 }
 0x22c   : > { %6212 = vst [vmem:[%s9008_s6 + $0x30] sm:$0xff] %v7549_v44  ;;  %v7555_v35 = vadd.f32 %v7494_v51, %v7254_v24  ;;  %v6034_v21 = vpop.f32.mrb[7].mxu0  ;;  %v6313_v59 = vmul.f32 %v7549_v44, %v7549_v44 }
 0x22d   : > { %6210 = vst [vmem:[%s9008_s6 + $0x20] sm:$0xff] %v7552_v48  ;;  %v6273_v54 = vadd.f32 %v7552_v48, %v6272_v49  ;;  %v6311_v17 = vmul.f32 %v7552_v48, %v7552_v48  ;;  %v6341_v27 = vadd.f32 %v6340_v43, %v6310_v47  ;;  %v7558_v50 = vadd.f32 %v6034_v21, %v2759_v60 }
 0x22e   : > { %6213 = vst [vmem:[%s9008_s6 + $0x38] sm:$0xff] %v7555_v35  ;;  %v6314_v5 = vmul.f32 %v7555_v35, %v7555_v35 }
 0x22f   : > { %v6342_v7 = vadd.f32 %v6341_v27, %v6311_v17  ;;  %6211 = vst [vmem:[%s9008_s6 + $0x28] sm:$0xff] %v7558_v50  ;;  %v6274_v37 = vadd.f32 %v7558_v50, %v6273_v54  ;;  %v6312_v61 = vmul.f32 %v7558_v50, %v7558_v50 }
 0x231   : > { %v6275_v63 = vadd.f32 %v7549_v44, %v6274_v37  ;;  %v6343_v57 = vadd.f32 %v6342_v7, %v6312_v61  ;;  %v7497_v62 = vpop.f32.mrb[8].mxu0 }
 0x232   : > { %v7561_v2 = vadd.f32 %v7497_v62, %v7257_v20  ;;  %v6047_v4 = vpop.f32.mrb[9].mxu0 }
 0x233   : > { %v6344_v6 = vadd.f32 %v6343_v57, %v6313_v59  ;;  %v7564_v9 = vadd.f32 %v6047_v4, %v2772_v22  ;;  %v6276_v10 = vadd.f32 %v7555_v35, %v6275_v63  ;;  %v7498_v11 = vpop.f32.mrb[10].mxu0 }
 0x234   : > { %6216 = vst [vmem:[%s9008_s6 + $0x50] sm:$0xff] %v7561_v2  ;;  %v7567_v12 = vadd.f32 %v7498_v11, %v7258_v28  ;;  %v6050_v13 = vpop.f32.mrb[11].mxu0  ;;  %v6317_v42 = vmul.f32 %v7561_v2, %v7561_v2 }
 0x235   : > { %6214 = vst [vmem:[%s9008_s6 + $0x40] sm:$0xff] %v7564_v9  ;;  %v6277_v15 = vadd.f32 %v7564_v9, %v6276_v10  ;;  %v6315_v53 = vmul.f32 %v7564_v9, %v7564_v9  ;;  %v6345_v3 = vadd.f32 %v6344_v6, %v6314_v5  ;;  %v7570_v31 = vadd.f32 %v6050_v13, %v8994_v23 }
 0x236   : > { %6217 = vst [vmem:[%s9008_s6 + $0x58] sm:$0xff] %v7567_v12  ;;  %v6318_v23 = vmul.f32 %v7567_v12, %v7567_v12 }
 0x237   : > { %v6346_v1 = vadd.f32 %v6345_v3, %v6315_v53  ;;  %6215 = vst [vmem:[%s9008_s6 + $0x48] sm:$0xff] %v7570_v31  ;;  %v6278_v14 = vadd.f32 %v7570_v31, %v6277_v15  ;;  %v6316_v34 = vmul.f32 %v7570_v31, %v7570_v31 }
 0x239   : > { %v6279_v24 = vadd.f32 %v7561_v2, %v6278_v14  ;;  %v6347_v60 = vadd.f32 %v6346_v1, %v6316_v34  ;;  %v7501_v20 = vpop.f32.mrb[12].mxu0 }
 0x23a   : > { %v7573_v28 = vadd.f32 %v7501_v20, %v8996_v40  ;;  %v6063_v32 = vpop.f32.mrb[13].mxu0 }
 0x23b   : > { %v6348_v55 = vadd.f32 %v6347_v60, %v6317_v42  ;;  %v7576_v46 = vadd.f32 %v6063_v32, %v8998_v25  ;;  %v6280_v38 = vadd.f32 %v7567_v12, %v6279_v24  ;;  %v7502_v8 = vpop.f32.mrb[14].mxu0 }
 0x23c   : > { %6220 = vst [vmem:[%s9008_s6 + $0x70] sm:$0xff] %v7573_v28  ;;  %v7579_v36 = vadd.f32 %v7502_v8, %v9000_v29  ;;  %v6066_v0 = vpop.f32.mrb[15].mxu0  ;;  %v6321_v41 = vmul.f32 %v7573_v28, %v7573_v28 }
 0x23d   : > { %v7313_v18 = vpop.f32.mrb[16].mxu1  ;;  %6218 = vst [vmem:[%s9008_s6 + $0x60] sm:$0xff] %v7576_v46  ;;  %v6281_v16 = vadd.f32 %v7576_v46, %v6280_v38  ;;  %v6319_v52 = vmul.f32 %v7576_v46, %v7576_v46  ;;  %v6349_v58 = vadd.f32 %v6348_v55, %v6318_v23  ;;  %v7582_v40 = vadd.f32 %v6066_v0, %v9002_v26 }
 0x23e   : > { %v3622_v33 = vpop.f32.mrb[17].mxu1  ;;  %6221 = vst [vmem:[%s9008_s6 + $0x78] sm:$0xff] %v7579_v36  ;;  %v6322_v48 = vmul.f32 %v7579_v36, %v7579_v36 }
 0x23f   : > { %v7314_v22 = vpop.f32.mrb[18].mxu1  ;;  %v6350_v39 = vadd.f32 %v6349_v58, %v6319_v52  ;;  %6219 = vst [vmem:[%s9008_s6 + $0x68] sm:$0xff] %v7582_v40  ;;  %v6282_v19 = vadd.f32 %v7582_v40, %v6281_v16  ;;  %v6320_v30 = vmul.f32 %v7582_v40, %v7582_v40 }
 0x240   : > { %v3625_v56 = vpop.f32.mrb[19].mxu1 }
 0x241   : > { %v6283_v25 = vadd.f32 %v7573_v28, %v6282_v19  ;;  %v6351_v44 = vadd.f32 %v6350_v39, %v6320_v30  ;;  %v7505_v45 = vpop.f32.mrb[16].mxu0 }
 0x242   : > { %v7585_v47 = vadd.f32 %v7505_v45, %v7313_v18  ;;  %v6079_v29 = vpop.f32.mrb[17].mxu0 }
 0x243   : > { %v6352_v49 = vadd.f32 %v6351_v44, %v6321_v41  ;;  %v7588_v51 = vadd.f32 %v6079_v29, %v3622_v33  ;;  %v6284_v26 = vadd.f32 %v7579_v36, %v6283_v25  ;;  %v7506_v35 = vpop.f32.mrb[18].mxu0 }
 0x244   : > { %6224 = vst [vmem:[%s9008_s6 + $0x90] sm:$0xff] %v7585_v47  ;;  %v7591_v54 = vadd.f32 %v7506_v35, %v7314_v22  ;;  %v6082_v17 = vpop.f32.mrb[19].mxu0  ;;  %v6325_v2 = vmul.f32 %v7585_v47, %v7585_v47 }
 0x245   : > { %v7317_v43 = vpop.f32.mrb[20].mxu1  ;;  %6222 = vst [vmem:[%s9008_s6 + $0x80] sm:$0xff] %v7588_v51  ;;  %v6285_v50 = vadd.f32 %v7588_v51, %v6284_v26  ;;  %v6323_v7 = vmul.f32 %v7588_v51, %v7588_v51  ;;  %v6353_v37 = vadd.f32 %v6352_v49, %v6322_v48  ;;  %v7594_v61 = vadd.f32 %v6082_v17, %v3625_v56 }
 0x246   : > { %v3638_v21 = vpop.f32.mrb[21].mxu1  ;;  %6225 = vst [vmem:[%s9008_s6 + $0x98] sm:$0xff] %v7591_v54  ;;  %v6326_v11 = vmul.f32 %v7591_v54, %v7591_v54 }
 0x247   : > { %v7318_v27 = vpop.f32.mrb[22].mxu1  ;;  %v6354_v63 = vadd.f32 %v6353_v37, %v6323_v7  ;;  %6223 = vst [vmem:[%s9008_s6 + $0x88] sm:$0xff] %v7594_v61  ;;  %v6286_v57 = vadd.f32 %v7594_v61, %v6285_v50  ;;  %v6324_v62 = vmul.f32 %v7594_v61, %v7594_v61 }
 0x248   : > { %v3641_v59 = vpop.f32.mrb[23].mxu1 }
 0x249   : > { %v6287_v4 = vadd.f32 %v7585_v47, %v6286_v57  ;;  %v6355_v5 = vadd.f32 %v6354_v63, %v6324_v62  ;;  %v7509_v6 = vpop.f32.mrb[20].mxu0 }
 0x24a   : > { %v7597_v9 = vadd.f32 %v7509_v6, %v7317_v43  ;;  %v6095_v10 = vpop.f32.mrb[21].mxu0 }
 0x24b   : > { %v6356_v12 = vadd.f32 %v6355_v5, %v6325_v2  ;;  %v7600_v13 = vadd.f32 %v6095_v10, %v3638_v21  ;;  %v6288_v15 = vadd.f32 %v7591_v54, %v6287_v4  ;;  %v7510_v53 = vpop.f32.mrb[22].mxu0 }
 0x24c   : > { %6228 = vst [vmem:[%s9008_s6 + $0xb0] sm:$0xff] %v7597_v9  ;;  %v7603_v3 = vadd.f32 %v7510_v53, %v7318_v27  ;;  %v6098_v31 = vpop.f32.mrb[23].mxu0  ;;  %v6329_v28 = vmul.f32 %v7597_v9, %v7597_v9 }
 0x24d   : > { %6226 = vst [vmem:[%s9008_s6 + $0xa0] sm:$0xff] %v7600_v13  ;;  %v6289_v1 = vadd.f32 %v7600_v13, %v6288_v15  ;;  %v6327_v14 = vmul.f32 %v7600_v13, %v7600_v13  ;;  %v6357_v34 = vadd.f32 %v6356_v12, %v6326_v11  ;;  %v7606_v18 = vadd.f32 %v6098_v31, %v3641_v59  ;;  %v7321_v33 = vpop.f32.mrb[24].mxu1 }
 0x24e   : > { %6229 = vst [vmem:[%s9008_s6 + $0xb8] sm:$0xff] %v7603_v3  ;;  %v3654_v20 = vpop.f32.mrb[25].mxu1  ;;  %v6330_v8 = vmul.f32 %v7603_v3, %v7603_v3 }
 0x24f   : > { %v6358_v42 = vadd.f32 %v6357_v34, %v6327_v14  ;;  %6227 = vst [vmem:[%s9008_s6 + $0xa8] sm:$0xff] %v7606_v18  ;;  %v6290_v24 = vadd.f32 %v7606_v18, %v6289_v1  ;;  %v6328_v60 = vmul.f32 %v7606_v18, %v7606_v18  ;;  %v7322_v22 = vpop.f32.mrb[26].mxu1 }
 0x250   : > { %v3657_v55 = vpop.f32.mrb[27].mxu1 }
 0x251   : > { %v6291_v32 = vadd.f32 %v7597_v9, %v6290_v24  ;;  %v6359_v56 = vadd.f32 %v6358_v42, %v6328_v60  ;;  %v7513_v23 = vpop.f32.mrb[24].mxu0 }
 0x252   : > { %v7609_v46 = vadd.f32 %v7513_v23, %v7321_v33  ;;  %v6111_v38 = vpop.f32.mrb[25].mxu0 }
 0x253   : > { %v6360_v36 = vadd.f32 %v6359_v56, %v6329_v28  ;;  %v7612_v0 = vadd.f32 %v6111_v38, %v3654_v20  ;;  %v6292_v16 = vadd.f32 %v7603_v3, %v6291_v32  ;;  %v7514_v52 = vpop.f32.mrb[26].mxu0 }
 0x254   : > { %6232 = vst [vmem:[%s9008_s6 + $0xd0] sm:$0xff] %v7609_v46  ;;  %v7615_v58 = vadd.f32 %v7514_v52, %v7322_v22  ;;  %v6114_v40 = vpop.f32.mrb[27].mxu0  ;;  %v6333_v47 = vmul.f32 %v7609_v46, %v7609_v46 }
 0x255   : > { %6230 = vst [vmem:[%s9008_s6 + $0xc0] sm:$0xff] %v7612_v0  ;;  %v6293_v39 = vadd.f32 %v7612_v0, %v6292_v16  ;;  %v6331_v19 = vmul.f32 %v7612_v0, %v7612_v0  ;;  %v6361_v30 = vadd.f32 %v6360_v36, %v6330_v8  ;;  %v7618_v41 = vadd.f32 %v6114_v40, %v3657_v55  ;;  %v7325_v49 = vpop.f32.mrb[28].mxu1 }
 0x256   : > { %6233 = vst [vmem:[%s9008_s6 + $0xd8] sm:$0xff] %v7615_v58  ;;  %v6334_v26 = vmul.f32 %v7615_v58, %v7615_v58  ;;  %v3670_v54 = vpop.f32.mrb[29].mxu1 }
 0x257   : > { %v6362_v25 = vadd.f32 %v6361_v30, %v6331_v19  ;;  %6231 = vst [vmem:[%s9008_s6 + $0xc8] sm:$0xff] %v7618_v41  ;;  %v6294_v44 = vadd.f32 %v7618_v41, %v6293_v39  ;;  %v6332_v45 = vmul.f32 %v7618_v41, %v7618_v41  ;;  %v7326_v7 = vpop.f32.mrb[30].mxu1 }
 0x258   : > { %v3673_v63 = vpop.f32.mrb[31].mxu1 }
 0x259   : > { %v6295_v29 = vadd.f32 %v7609_v46, %v6294_v44  ;;  %v6363_v43 = vadd.f32 %v6362_v25, %v6332_v45  ;;  %v7517_v48 = vpop.f32.mrb[28].mxu0 }
 0x25a   : > { %v6127_v51 = vpop.f32.mrb[29].mxu0  ;;  %v7621_v21 = vadd.f32 %v7517_v48, %v7325_v49 }
 0x25b   : > { %v6364_v35 = vadd.f32 %v6363_v43, %v6333_v47  ;;  %v6296_v17 = vadd.f32 %v7615_v58, %v6295_v29  ;;  %v7518_v27 = vpop.f32.mrb[30].mxu0  ;;  %v7624_v50 = vadd.f32 %v6127_v51, %v3670_v54 }
 0x25c   : > { %v6130_v37 = vpop.f32.mrb[31].mxu0  ;;  %6236 = vst [vmem:[%s9008_s6 + $0xf0] sm:$0xff] %v7621_v21  ;;  %v7627_v59 = vadd.f32 %v7518_v27, %v7326_v7  ;;  %v6337_v9 = vmul.f32 %v7621_v21, %v7621_v21 }
 0x25d   : > { %v6365_v61 = vadd.f32 %v6364_v35, %v6334_v26  ;;  %6234 = vst [vmem:[%s9008_s6 + $0xe0] sm:$0xff] %v7624_v50  ;;  %v6297_v57 = vadd.f32 %v7624_v50, %v6296_v17  ;;  %v6335_v62 = vmul.f32 %v7624_v50, %v7624_v50  ;;  %v7630_v2 = vadd.f32 %v6130_v37, %v3673_v63 }
 0x25e   : > { %6237 = vst [vmem:[%s9008_s6 + $0xf8] sm:$0xff] %v7627_v59  ;;  %v6338_v12 = vmul.f32 %v7627_v59, %v7627_v59 }
 0x25f   : > { %v6366_v4 = vadd.f32 %v6365_v61, %v6335_v62  ;;  %6235 = vst [vmem:[%s9008_s6 + $0xe8] sm:$0xff] %v7630_v2  ;;  %v6298_v5 = vadd.f32 %v7630_v2, %v6297_v57  ;;  %v6336_v6 = vmul.f32 %v7630_v2, %v7630_v2 }
 0x261   : > { %v6299_v10 = vadd.f32 %v7621_v21, %v6298_v5  ;;  %v6367_v11 = vadd.f32 %v6366_v4, %v6336_v6 }
 0x263   : > { %v6300_v13 = vadd.f32 %v7627_v59, %v6299_v10  ;;  %v6368_v15 = vadd.f32 %v6367_v11, %v6337_v9 }
 0x265   : > { %v6301_v53 = vrot.slane %v6300_v13, 4  ;;  %v6369_v3 = vadd.f32 %v6368_v15, %v6338_v12 }
 0x267   : > { %v6302_v31 = vadd.f32 %v6301_v53, %v6300_v13  ;;  %v6370_v1 = vrot.slane %v6369_v3, 4 }
 0x269   : > { %v6303_v14 = vrot.slane %v6302_v31, 2  ;;  %v6371_v34 = vadd.f32 %v6370_v1, %v6369_v3 }
 0x26b   : > { %v6304_v18 = vadd.f32 %v6303_v14, %v6302_v31  ;;  %v6372_v33 = vrot.slane %v6371_v34, 2 }
 0x26d   : > { %v6305_v42 = vrot.slane %v6304_v18, 1  ;;  %v6373_v24 = vadd.f32 %v6372_v33, %v6371_v34 }
 0x26f   : > { %v6374_v60 = vrot.slane %v6373_v24, 1  ;;  %v6306_v20 = vadd.f32 %v6305_v42, %v6304_v18 }
 0x271   : > { %v6375_v22 = vadd.f32 %v6374_v60, %v6373_v24 }
 0x273   : > { %v6377_v28 = vsel %vm600_vm0, %v6306_v20, %v6375_v22 }
 0x274   : > { %6378 = vst [vmem:[%s181_s10] sm:$0x3] %v6377_v28 }
 0x275 PF: > { %s14_s12 = sadd.s32 1, %s7998_s12  }
 0x276   : > { %p11_p4 = scmp.ge.s32.totalorder %s14_s12, 4  }
 0x278   :  { %13 = sbr.rel (!%p11_p4) target bundleno = 1 (0x1), region = 80 }

</bundles_post_ra>
